<compile_context>
chip_gen: v7x
topology: tpu7x:2x2x1
jax: 0.10.0
libtpu: 0.0.40
codegen_flags: <defaults>
</compile_context>

<pallas_src>
import math

import jax
import jax.numpy as jnp
from jax.experimental import pallas as pl
from jax.experimental.pallas import tpu as pltpu

SELU_ALPHA = 1.6732632423543772848170429916717
SELU_SCALE = 1.0507009873554804934193349852946

ENC_FEATURES = 1280   # surrogate encoder output width (matches fc1 in-features)
FC1_OUT = 2048
FC2_OUT = 2048
EMB_DIM = 1024

TN_ENC = 640          # encoder weight tile width  (2 tiles of 1280)
TN_FC = 512           # fc1/fc2/fc3 weight tile width (multiple of 128)


def _round_up(x, m):
    return ((x + m - 1) // m) * m


# ---------------------------------------------------------------------------
# Kernel: 1-D grid over weight tiles; each step does (act @ w_tile + b_tile)
# for whichever layer owns that step, selected with pl.when.
# ---------------------------------------------------------------------------
def _make_kernel(schedule):
    s_enc, s_fc1, s_fc2, s_fc3, s_cls = schedule
    bf16, f32 = jnp.bfloat16, jnp.float32

    def kernel(x_ref, ew_ref, eb_ref, w1_ref, b1_ref, w2_ref, b2_ref,
               w3_ref, b3_ref, wc_ref, bc_ref, emb_ref, probs_ref,
               act_a, act_b):
        i = pl.program_id(0)

        def col(start, tn):
            return pl.multiple_of((i - start) * tn, 128)

        # ---- layer 0: surrogate encoder (linear) -> act_a[:, :1280] ----
        @pl.when(i < s_fc1)
        def _():
            h = jnp.dot(x_ref[...].astype(bf16), ew_ref[...],
                        preferred_element_type=f32) + eb_ref[...]
            act_a[:, pl.ds(col(s_enc, TN_ENC), TN_ENC)] = h

        # ---- layer 1: fc1 + relu -> act_b[:, :2048] --------------------
        @pl.when(jnp.logical_and(i >= s_fc1, i < s_fc2))
        def _():
            a = act_a[:, :ENC_FEATURES].astype(bf16)
            h = jnp.dot(a, w1_ref[...], preferred_element_type=f32) + b1_ref[...]
            act_b[:, pl.ds(col(s_fc1, TN_FC), TN_FC)] = jnp.maximum(h, 0.0)

        # ---- layer 2: fc2 + relu -> act_a[:, :2048] --------------------
        @pl.when(jnp.logical_and(i >= s_fc2, i < s_fc3))
        def _():
            a = act_b[...].astype(bf16)
            h = jnp.dot(a, w2_ref[...], preferred_element_type=f32) + b2_ref[...]
            act_a[:, pl.ds(col(s_fc2, TN_FC), TN_FC)] = jnp.maximum(h, 0.0)

        # ---- layer 3: fc3 + selu -> embeddings output (resident) -------
        @pl.when(jnp.logical_and(i >= s_fc3, i < s_cls))
        def _():
            a = act_a[...].astype(bf16)
            z = jnp.dot(a, w3_ref[...], preferred_element_type=f32) + b3_ref[...]
            e = SELU_SCALE * jnp.where(z > 0.0, z, SELU_ALPHA * (jnp.exp(z) - 1.0))
            emb_ref[:, pl.ds(col(s_fc3, TN_FC), TN_FC)] = e

        # ---- layer 4: classifier + softmax (single padded-class tile) --
        @pl.when(i == s_cls)
        def _():
            logits = jnp.dot(emb_ref[...].astype(bf16), wc_ref[...],
                             preferred_element_type=f32) + bc_ref[...]
            m = jnp.max(logits, axis=-1, keepdims=True)
            e = jnp.exp(logits - m)
            # Exact normalisation: rows sum to 1 within f32 rounding.
            probs_ref[...] = e / jnp.sum(e, axis=-1, keepdims=True)

    return kernel


# ---------------------------------------------------------------------------
# pallas_call wrapper: builds the tile schedule, streaming BlockSpecs,
# VMEM budget and cost estimate.
# ---------------------------------------------------------------------------
def fused_mlp_pallas(feat, params, cls_w_pad, cls_b_pad):
    Bp, K = feat.shape
    C_pad = cls_b_pad.shape[-1]
    assert Bp % 8 == 0 and K % 128 == 0 and C_pad % 128 == 0

    nt_enc = ENC_FEATURES // TN_ENC
    nt_fc1 = FC1_OUT // TN_FC
    nt_fc2 = FC2_OUT // TN_FC
    nt_fc3 = EMB_DIM // TN_FC
    s_enc = 0
    s_fc1 = s_enc + nt_enc
    s_fc2 = s_fc1 + nt_fc1
    s_fc3 = s_fc2 + nt_fc2
    s_cls = s_fc3 + nt_fc3
    n_steps = s_cls + 1                     # 13 steps for the default sizes

    def stream_map(start, ntiles):
        # Walk this array's N-tiles only during its own layer's steps;
        # clamp elsewhere so the block index doesn't change -> no extra DMA.
        def index_map(i):
            return (0, jnp.clip(i - start, 0, ntiles - 1))
        return index_map

    const_map = lambda i: (0, 0)

    in_specs = [
        pl.BlockSpec((Bp, K), const_map),                                # feat
        pl.BlockSpec((K, TN_ENC), stream_map(s_enc, nt_enc)),            # enc_w
        pl.BlockSpec((1, TN_ENC), stream_map(s_enc, nt_enc)),            # enc_b
        pl.BlockSpec((ENC_FEATURES, TN_FC), stream_map(s_fc1, nt_fc1)),  # fc1_w
        pl.BlockSpec((1, TN_FC), stream_map(s_fc1, nt_fc1)),             # fc1_b
        pl.BlockSpec((FC1_OUT, TN_FC), stream_map(s_fc2, nt_fc2)),       # fc2_w
        pl.BlockSpec((1, TN_FC), stream_map(s_fc2, nt_fc2)),             # fc2_b
        pl.BlockSpec((FC2_OUT, TN_FC), stream_map(s_fc3, nt_fc3)),       # fc3_w
        pl.BlockSpec((1, TN_FC), stream_map(s_fc3, nt_fc3)),             # fc3_b
        pl.BlockSpec((EMB_DIM, C_pad), const_map),                       # cls_w
        pl.BlockSpec((1, C_pad), const_map),                             # cls_b
    ]
    out_specs = (
        pl.BlockSpec((Bp, EMB_DIM), const_map),      # embeddings (resident)
        pl.BlockSpec((Bp, C_pad), const_map),        # probs (resident)
    )
    out_shape = (
        jax.ShapeDtypeStruct((Bp, EMB_DIM), jnp.float32),
        jax.ShapeDtypeStruct((Bp, C_pad), jnp.float32),
    )
    scratch_shapes = [
        pltpu.VMEM((Bp, FC2_OUT), jnp.float32),      # act_a: enc out / fc2 out
        pltpu.VMEM((Bp, FC1_OUT), jnp.float32),      # act_b: fc1 out
    ]

    args = (feat,
            params["enc_w"], params["enc_b"],
            params["fc1_w"], params["fc1_b"],
            params["fc2_w"], params["fc2_b"],
            params["fc3_w"], params["fc3_b"],
            cls_w_pad, cls_b_pad)

    # VMEM budget: double-buffered streamed tiles + resident blocks + scratch.
    def _nbytes(shape, dt):
        return math.prod(shape) * jnp.dtype(dt).itemsize
    streamed = 2 * (
        _nbytes((K, TN_ENC), jnp.bfloat16) + _nbytes((1, TN_ENC), jnp.float32)
        + _nbytes((ENC_FEATURES, TN_FC), jnp.bfloat16) + _nbytes((1, TN_FC), jnp.float32)
        + _nbytes((FC1_OUT, TN_FC), jnp.bfloat16) + _nbytes((1, TN_FC), jnp.float32)
        + _nbytes((FC2_OUT, TN_FC), jnp.bfloat16) + _nbytes((1, TN_FC), jnp.float32)
        + _nbytes((EMB_DIM, C_pad), jnp.bfloat16) + _nbytes((1, C_pad), jnp.float32))
    resident = (_nbytes((Bp, K), jnp.float32)
                + _nbytes((Bp, EMB_DIM), jnp.float32)
                + _nbytes((Bp, C_pad), jnp.float32)
                + _nbytes((Bp, FC1_OUT), jnp.float32)
                + _nbytes((Bp, FC2_OUT), jnp.float32))
    vmem_limit = int((streamed + resident) * 1.3) + (4 << 20)   # ~20 MB << 64 MiB (v7x)

    flops = 2 * Bp * (K * ENC_FEATURES + ENC_FEATURES * FC1_OUT
                      + FC1_OUT * FC2_OUT + FC2_OUT * EMB_DIM + EMB_DIM * C_pad)
    bytes_accessed = (sum(int(a.size) * a.dtype.itemsize for a in args)
                      + sum(math.prod(s.shape) * 4 for s in out_shape))
    cost = pl.CostEstimate(flops=flops,
                           transcendentals=Bp * (EMB_DIM + C_pad),
                           bytes_accessed=bytes_accessed)

    kernel = _make_kernel((s_enc, s_fc1, s_fc2, s_fc3, s_cls))

    return pl.pallas_call(
        kernel,
        out_shape=out_shape,
        grid_spec=pltpu.PrefetchScalarGridSpec(
            num_scalar_prefetch=0,
            grid=(n_steps,),
            in_specs=in_specs,
            out_specs=out_specs,
            scratch_shapes=scratch_shapes),
        compiler_params=pltpu.CompilerParams(
            dimension_semantics=("arbitrary",),      # sequential layer chain
            vmem_limit_bytes=vmem_limit),
        cost_estimate=cost,
    )(*args)


# ---------------------------------------------------------------------------
# Parameter init (matches nn.init.xavier_uniform_ + zero bias).
# Weights stored [in, out] (transposed vs. PyTorch) in bfloat16; biases f32.
# ---------------------------------------------------------------------------
def xavier_uniform(key, fan_in, fan_out):
    bound = math.sqrt(6.0 / (fan_in + fan_out))
    w = jax.random.uniform(key, (fan_in, fan_out), jnp.float32, -bound, bound)
    return w.astype(jnp.bfloat16)


def make_params(key, in_feat, classes_num):
    Kp = _round_up(max(in_feat, 128), 128)     # lane-aligned flattened input
    ks = jax.random.split(key, 5)
    p = {}
    p["enc_w"] = xavier_uniform(ks[0], Kp, ENC_FEATURES)
    p["enc_b"] = jnp.zeros((1, ENC_FEATURES), jnp.float32)
    p["fc1_w"] = xavier_uniform(ks[1], ENC_FEATURES, FC1_OUT)
    p["fc1_b"] = jnp.zeros((1, FC1_OUT), jnp.float32)
    p["fc2_w"] = xavier_uniform(ks[2], FC1_OUT, FC2_OUT)
    p["fc2_b"] = jnp.zeros((1, FC2_OUT), jnp.float32)
    p["fc3_w"] = xavier_uniform(ks[3], FC2_OUT, EMB_DIM)
    p["fc3_b"] = jnp.zeros((1, EMB_DIM), jnp.float32)
    p["cls_w"] = xavier_uniform(ks[4], EMB_DIM, classes_num)
    p["cls_b"] = jnp.zeros((1, classes_num), jnp.float32)
    return p


# ---------------------------------------------------------------------------
# Forward pass wrappers
# ---------------------------------------------------------------------------
def _flatten_pad_input(x_nchw, Kp):
    B = x_nchw.shape[0]
    feat = x_nchw.reshape(B, -1).astype(jnp.float32)
    if feat.shape[1] != Kp:
        feat = jnp.pad(feat, ((0, 0), (0, Kp - feat.shape[1])))
    return feat


def _pad_classifier(cls_w, cls_b):
    C = cls_b.shape[-1]
    C_pad = _round_up(max(C, 128), 128)
    dc = C_pad - C
    if dc:
        cls_w = jnp.pad(cls_w, ((0, 0), (0, dc)))
        # Very negative bias -> padded classes carry ~0 softmax mass.
        cls_b = jnp.pad(cls_b, ((0, 0), (0, dc)), constant_values=-1e30)
    return cls_w, cls_b


def multilingual_kws_forward(params, x_nchw):
    B = x_nchw.shape[0]
    Kp = params["enc_w"].shape[0]
    C = params["cls_b"].shape[-1]

    feat = _flatten_pad_input(x_nchw, Kp)
    # Pad batch to a full sublane block; larger batches amortize the weight
    # stream essentially for free (kernel time is weight-bound).
    Bp = _round_up(max(B, 8), 8)
    if Bp != B:
        feat = jnp.pad(feat, ((0, Bp - B), (0, 0)))

    cls_w_p, cls_b_p = _pad_classifier(params["cls_w"], params["cls_b"])
    emb, probs = fused_mlp_pallas(feat, params, cls_w_p, cls_b_p)
    return {
        "embeddings": emb[:B],
        "pre_training_output": probs[:B, :C],
    }


def reference_forward(params, x_nchw):
    """Pure-JAX f32 reference (bf16 weights upcast to f32)."""
    f32 = lambda a: a.astype(jnp.float32)
    Kp = params["enc_w"].shape[0]
    x = _flatten_pad_input(x_nchw, Kp)
    x = x @ f32(params["enc_w"]) + params["enc_b"]
    x = jax.nn.relu(x @ f32(params["fc1_w"]) + params["fc1_b"])
    x = jax.nn.relu(x @ f32(params["fc2_w"]) + params["fc2_b"])
    emb = jax.nn.selu(x @ f32(params["fc3_w"]) + params["fc3_b"])
    out = jax.nn.softmax(emb @ f32(params["cls_w"]) + params["cls_b"], axis=-1)
    return {"embeddings": emb, "pre_training_output": out}


if __name__ == "__main__":
    key = jax.random.PRNGKey(0)
    k_x, k_p = jax.random.split(key)

    B, C_in, H, W = 2, 1, 16, 16          # in_chans=1 as in the PyTorch module
    classes_num = 128

    x = jax.random.normal(k_x, (B, C_in, H, W), jnp.float32)
    params = make_params(k_p, C_in * H * W, classes_num)

    out = multilingual_kws_forward(params, x)
    jax.block_until_ready(out)

    ref = reference_forward(params, x)
    # bf16 weights/activations inside the kernel vs f32 reference -> relaxed tol
    assert out["embeddings"].shape == (B, EMB_DIM)
    assert out["pre_training_output"].shape == (B, classes_num)
    assert jnp.allclose(out["embeddings"], ref["embeddings"], atol=5e-2, rtol=5e-2)
    assert jnp.allclose(out["pre_training_output"], ref["pre_training_output"],
                        atol=2e-3, rtol=5e-2)
    # softmax rows sum to 1 (exact normalisation in-kernel)
    assert jnp.allclose(jnp.sum(out["pre_training_output"], axis=-1), 1.0, atol=1e-3)

    print("KERNEL_OK")
</pallas_src>

<mosaic_0001>
module attributes {stable_mosaic.version = 11 : i64} {
  func.func @kernel(%arg0: i32, %arg1: memref<8x256xf32, #tpu.memory_space<vmem>>, %arg2: memref<256x640xbf16, #tpu.memory_space<vmem>>, %arg3: memref<1x640xf32, #tpu.memory_space<vmem>>, %arg4: memref<1280x512xbf16, #tpu.memory_space<vmem>>, %arg5: memref<1x512xf32, #tpu.memory_space<vmem>>, %arg6: memref<2048x512xbf16, #tpu.memory_space<vmem>>, %arg7: memref<1x512xf32, #tpu.memory_space<vmem>>, %arg8: memref<2048x512xbf16, #tpu.memory_space<vmem>>, %arg9: memref<1x512xf32, #tpu.memory_space<vmem>>, %arg10: memref<1024x128xbf16, #tpu.memory_space<vmem>>, %arg11: memref<1x128xf32, #tpu.memory_space<vmem>>, %arg12: memref<8x1024xf32, #tpu.memory_space<vmem>>, %arg13: memref<8x128xf32, #tpu.memory_space<vmem>>, %arg14: memref<8x2048xf32, #tpu.memory_space<vmem>>, %arg15: memref<8x2048xf32, #tpu.memory_space<vmem>>) attributes {dimension_semantics = [#tpu.dimension_semantics<arbitrary>], iteration_bounds = array<i64: 13>, scalar_prefetch = 0 : i64, scratch_operands = 2 : i64, tpu.core_type = #tpu.core_type<tc>, window_params = [{pipeline_mode = #tpu.pipeline_mode<synchronous>, transform_indices = @transform_0, window_bounds = array<i64: 8, 256>}, {transform_indices = @transform_1, window_bounds = array<i64: 256, 640>}, {transform_indices = @transform_2, window_bounds = array<i64: 1, 640>}, {transform_indices = @transform_3, window_bounds = array<i64: 1280, 512>}, {transform_indices = @transform_4, window_bounds = array<i64: 1, 512>}, {transform_indices = @transform_5, window_bounds = array<i64: 2048, 512>}, {transform_indices = @transform_6, window_bounds = array<i64: 1, 512>}, {transform_indices = @transform_7, window_bounds = array<i64: 2048, 512>}, {transform_indices = @transform_8, window_bounds = array<i64: 1, 512>}, {pipeline_mode = #tpu.pipeline_mode<synchronous>, transform_indices = @transform_9, window_bounds = array<i64: 1024, 128>}, {pipeline_mode = #tpu.pipeline_mode<synchronous>, transform_indices = @transform_10, window_bounds = array<i64: 1, 128>}, {pipeline_mode = #tpu.pipeline_mode<synchronous>, transform_indices = @transform_11, window_bounds = array<i64: 8, 1024>}, {pipeline_mode = #tpu.pipeline_mode<synchronous>, transform_indices = @transform_12, window_bounds = array<i64: 8, 128>}]} {
    %c2_i32 = arith.constant 2 : i32
    %0 = arith.cmpi slt, %arg0, %c2_i32 : i32
    %1 = arith.extui %0 : i1 to i32
    %c0_i32 = arith.constant 0 : i32
    %2 = arith.cmpi ne, %1, %c0_i32 : i32
    scf.if %2 {
      %c0 = arith.constant 0 : index
      %c0_8 = arith.constant 0 : index
      %21 = vector.load %arg1[%c0, %c0_8] : memref<8x256xf32, #tpu.memory_space<vmem>>, vector<8x256xf32>
      %22 = arith.truncf %21 : vector<8x256xf32> to vector<8x256xbf16>
      %c0_9 = arith.constant 0 : index
      %c0_10 = arith.constant 0 : index
      %23 = vector.load %arg2[%c0_9, %c0_10] : memref<256x640xbf16, #tpu.memory_space<vmem>>, vector<256x640xbf16>
      %cst = arith.constant dense<0.000000e+00> : vector<8x640xf32>
      %24 = tpu.matmul %22, %23, %cst {dimension_numbers = #tpu.dot_dimension_numbers<[1], [0], [0], [1], [0, 0, 1, 1], [], []>} : vector<8x256xbf16>, vector<256x640xbf16>, vector<8x640xf32> -> vector<8x640xf32>
      %c0_11 = arith.constant 0 : index
      %c0_12 = arith.constant 0 : index
      %25 = vector.load %arg3[%c0_11, %c0_12] : memref<1x640xf32, #tpu.memory_space<vmem>>, vector<1x640xf32>
      %26 = vector.broadcast %25 : vector<1x640xf32> to vector<8x640xf32>
      %27 = arith.addf %24, %26 : vector<8x640xf32>
      %c0_i32_13 = arith.constant 0 : i32
      %28 = arith.subi %arg0, %c0_i32_13 : i32
      %c640_i32 = arith.constant 640 : i32
      %29 = arith.muli %28, %c640_i32 : i32
      %30 = tpu.assume_multiple %29, 128 : i32
      %c0_14 = arith.constant 0 : index
      %31 = arith.index_cast %30 : i32 to index
      %32 = vector.load %arg14[%c0_14, %31] : memref<8x2048xf32, #tpu.memory_space<vmem>>, vector<8x640xf32>
      tpu.vector_store %arg14[%c0_14, %31], %27 {strides = array<i32>} : memref<8x2048xf32, #tpu.memory_space<vmem>>, vector<8x640xf32>,
    } else {
    }
    %c2_i32_0 = arith.constant 2 : i32
    %3 = arith.cmpi sge, %arg0, %c2_i32_0 : i32
    %c6_i32 = arith.constant 6 : i32
    %4 = arith.cmpi slt, %arg0, %c6_i32 : i32
    %5 = arith.andi %3, %4 : i1
    %6 = arith.extui %5 : i1 to i32
    %c0_i32_1 = arith.constant 0 : i32
    %7 = arith.cmpi ne, %6, %c0_i32_1 : i32
    scf.if %7 {
      %c0 = arith.constant 0 : index
      %c0_8 = arith.constant 0 : index
      %21 = vector.load %arg14[%c0, %c0_8] : memref<8x2048xf32, #tpu.memory_space<vmem>>, vector<8x1280xf32>
      %22 = arith.truncf %21 : vector<8x1280xf32> to vector<8x1280xbf16>
      %c0_9 = arith.constant 0 : index
      %c0_10 = arith.constant 0 : index
      %23 = vector.load %arg4[%c0_9, %c0_10] : memref<1280x512xbf16, #tpu.memory_space<vmem>>, vector<1280x512xbf16>
      %cst = arith.constant dense<0.000000e+00> : vector<8x512xf32>
      %24 = tpu.matmul %22, %23, %cst {dimension_numbers = #tpu.dot_dimension_numbers<[1], [0], [0], [1], [0, 0, 1, 1], [], []>} : vector<8x1280xbf16>, vector<1280x512xbf16>, vector<8x512xf32> -> vector<8x512xf32>
      %c0_11 = arith.constant 0 : index
      %c0_12 = arith.constant 0 : index
      %25 = vector.load %arg5[%c0_11, %c0_12] : memref<1x512xf32, #tpu.memory_space<vmem>>, vector<1x512xf32>
      %26 = vector.broadcast %25 : vector<1x512xf32> to vector<8x512xf32>
      %27 = arith.addf %24, %26 : vector<8x512xf32>
      %cst_13 = arith.constant 0.000000e+00 : f32
      %28 = vector.broadcast %cst_13 : f32 to vector<8x512xf32>
      %29 = arith.maximumf %27, %28 : vector<8x512xf32>
      %c2_i32_14 = arith.constant 2 : i32
      %30 = arith.subi %arg0, %c2_i32_14 : i32
      %c512_i32 = arith.constant 512 : i32
      %31 = arith.muli %30, %c512_i32 : i32
      %32 = tpu.assume_multiple %31, 128 : i32
      %c0_15 = arith.constant 0 : index
      %33 = arith.index_cast %32 : i32 to index
      %34 = vector.load %arg15[%c0_15, %33] : memref<8x2048xf32, #tpu.memory_space<vmem>>, vector<8x512xf32>
      tpu.vector_store %arg15[%c0_15, %33], %29 {strides = array<i32>} : memref<8x2048xf32, #tpu.memory_space<vmem>>, vector<8x512xf32>,
    } else {
    }
    %c6_i32_2 = arith.constant 6 : i32
    %8 = arith.cmpi sge, %arg0, %c6_i32_2 : i32
    %c10_i32 = arith.constant 10 : i32
    %9 = arith.cmpi slt, %arg0, %c10_i32 : i32
    %10 = arith.andi %8, %9 : i1
    %11 = arith.extui %10 : i1 to i32
    %c0_i32_3 = arith.constant 0 : i32
    %12 = arith.cmpi ne, %11, %c0_i32_3 : i32
    scf.if %12 {
      %c0 = arith.constant 0 : index
      %c0_8 = arith.constant 0 : index
      %21 = vector.load %arg15[%c0, %c0_8] : memref<8x2048xf32, #tpu.memory_space<vmem>>, vector<8x2048xf32>
      %22 = arith.truncf %21 : vector<8x2048xf32> to vector<8x2048xbf16>
      %c0_9 = arith.constant 0 : index
      %c0_10 = arith.constant 0 : index
      %23 = vector.load %arg6[%c0_9, %c0_10] : memref<2048x512xbf16, #tpu.memory_space<vmem>>, vector<2048x512xbf16>
      %cst = arith.constant dense<0.000000e+00> : vector<8x512xf32>
      %24 = tpu.matmul %22, %23, %cst {dimension_numbers = #tpu.dot_dimension_numbers<[1], [0], [0], [1], [0, 0, 1, 1], [], []>} : vector<8x2048xbf16>, vector<2048x512xbf16>, vector<8x512xf32> -> vector<8x512xf32>
      %c0_11 = arith.constant 0 : index
      %c0_12 = arith.constant 0 : index
      %25 = vector.load %arg7[%c0_11, %c0_12] : memref<1x512xf32, #tpu.memory_space<vmem>>, vector<1x512xf32>
      %26 = vector.broadcast %25 : vector<1x512xf32> to vector<8x512xf32>
      %27 = arith.addf %24, %26 : vector<8x512xf32>
      %cst_13 = arith.constant 0.000000e+00 : f32
      %28 = vector.broadcast %cst_13 : f32 to vector<8x512xf32>
      %29 = arith.maximumf %27, %28 : vector<8x512xf32>
      %c6_i32_14 = arith.constant 6 : i32
      %30 = arith.subi %arg0, %c6_i32_14 : i32
      %c512_i32 = arith.constant 512 : i32
      %31 = arith.muli %30, %c512_i32 : i32
      %32 = tpu.assume_multiple %31, 128 : i32
      %c0_15 = arith.constant 0 : index
      %33 = arith.index_cast %32 : i32 to index
      %34 = vector.load %arg14[%c0_15, %33] : memref<8x2048xf32, #tpu.memory_space<vmem>>, vector<8x512xf32>
      tpu.vector_store %arg14[%c0_15, %33], %29 {strides = array<i32>} : memref<8x2048xf32, #tpu.memory_space<vmem>>, vector<8x512xf32>,
    } else {
    }
    %c10_i32_4 = arith.constant 10 : i32
    %13 = arith.cmpi sge, %arg0, %c10_i32_4 : i32
    %c12_i32 = arith.constant 12 : i32
    %14 = arith.cmpi slt, %arg0, %c12_i32 : i32
    %15 = arith.andi %13, %14 : i1
    %16 = arith.extui %15 : i1 to i32
    %c0_i32_5 = arith.constant 0 : i32
    %17 = arith.cmpi ne, %16, %c0_i32_5 : i32
    scf.if %17 {
      %c0 = arith.constant 0 : index
      %c0_8 = arith.constant 0 : index
      %21 = vector.load %arg14[%c0, %c0_8] : memref<8x2048xf32, #tpu.memory_space<vmem>>, vector<8x2048xf32>
      %22 = arith.truncf %21 : vector<8x2048xf32> to vector<8x2048xbf16>
      %c0_9 = arith.constant 0 : index
      %c0_10 = arith.constant 0 : index
      %23 = vector.load %arg8[%c0_9, %c0_10] : memref<2048x512xbf16, #tpu.memory_space<vmem>>, vector<2048x512xbf16>
      %cst = arith.constant dense<0.000000e+00> : vector<8x512xf32>
      %24 = tpu.matmul %22, %23, %cst {dimension_numbers = #tpu.dot_dimension_numbers<[1], [0], [0], [1], [0, 0, 1, 1], [], []>} : vector<8x2048xbf16>, vector<2048x512xbf16>, vector<8x512xf32> -> vector<8x512xf32>
      %c0_11 = arith.constant 0 : index
      %c0_12 = arith.constant 0 : index
      %25 = vector.load %arg9[%c0_11, %c0_12] : memref<1x512xf32, #tpu.memory_space<vmem>>, vector<1x512xf32>
      %26 = vector.broadcast %25 : vector<1x512xf32> to vector<8x512xf32>
      %27 = arith.addf %24, %26 : vector<8x512xf32>
      %cst_13 = arith.constant 0.000000e+00 : f32
      %28 = vector.broadcast %cst_13 : f32 to vector<8x512xf32>
      %29 = arith.cmpf ogt, %27, %28 : vector<8x512xf32>
      %30 = math.exp %27 : vector<8x512xf32>
      %cst_14 = arith.constant 1.000000e+00 : f32
      %31 = vector.broadcast %cst_14 : f32 to vector<8x512xf32>
      %32 = arith.subf %30, %31 : vector<8x512xf32>
      %cst_15 = arith.constant 1.67326319 : f32
      %33 = vector.broadcast %cst_15 : f32 to vector<8x512xf32>
      %34 = arith.mulf %33, %32 : vector<8x512xf32>
      %35 = arith.select %29, %27, %34 : vector<8x512xi1>, vector<8x512xf32>
      %cst_16 = arith.constant 1.05070102 : f32
      %36 = vector.broadcast %cst_16 : f32 to vector<8x512xf32>
      %37 = arith.mulf %36, %35 : vector<8x512xf32>
      %c10_i32_17 = arith.constant 10 : i32
      %38 = arith.subi %arg0, %c10_i32_17 : i32
      %c512_i32 = arith.constant 512 : i32
      %39 = arith.muli %38, %c512_i32 : i32
      %40 = tpu.assume_multiple %39, 128 : i32
      %c0_18 = arith.constant 0 : index
      %41 = arith.index_cast %40 : i32 to index
      %42 = vector.load %arg12[%c0_18, %41] : memref<8x1024xf32, #tpu.memory_space<vmem>>, vector<8x512xf32>
      tpu.vector_store %arg12[%c0_18, %41], %37 {strides = array<i32>} : memref<8x1024xf32, #tpu.memory_space<vmem>>, vector<8x512xf32>,
    } else {
    }
    %c12_i32_6 = arith.constant 12 : i32
    %18 = arith.cmpi eq, %arg0, %c12_i32_6 : i32
    %19 = arith.extui %18 : i1 to i32
    %c0_i32_7 = arith.constant 0 : i32
    %20 = arith.cmpi ne, %19, %c0_i32_7 : i32
    scf.if %20 {
      %c0 = arith.constant 0 : index
      %c0_8 = arith.constant 0 : index
      %21 = vector.load %arg12[%c0, %c0_8] : memref<8x1024xf32, #tpu.memory_space<vmem>>, vector<8x1024xf32>
      %22 = arith.truncf %21 : vector<8x1024xf32> to vector<8x1024xbf16>
      %c0_9 = arith.constant 0 : index
      %c0_10 = arith.constant 0 : index
      %23 = vector.load %arg10[%c0_9, %c0_10] : memref<1024x128xbf16, #tpu.memory_space<vmem>>, vector<1024x128xbf16>
      %cst = arith.constant dense<0.000000e+00> : vector<8x128xf32>
      %24 = tpu.matmul %22, %23, %cst {dimension_numbers = #tpu.dot_dimension_numbers<[1], [0], [0], [1], [0, 0, 1, 1], [], []>} : vector<8x1024xbf16>, vector<1024x128xbf16>, vector<8x128xf32> -> vector<8x128xf32>
      %c0_11 = arith.constant 0 : index
      %c0_12 = arith.constant 0 : index
      %25 = vector.load %arg11[%c0_11, %c0_12] : memref<1x128xf32, #tpu.memory_space<vmem>>, vector<1x128xf32>
      %26 = vector.broadcast %25 : vector<1x128xf32> to vector<8x128xf32>
      %27 = arith.addf %24, %26 : vector<8x128xf32>
      %cst_13 = arith.constant dense<0xFF800000> : vector<8xf32>
      %28 = vector.multi_reduction <maximumf>, %27, %cst_13 [1] : vector<8x128xf32> to vector<8xf32>
      %29 = vector.shape_cast %28 : vector<8xf32> to vector<8x1xf32>
      %30 = vector.broadcast %29 : vector<8x1xf32> to vector<8x128xf32>
      %31 = arith.subf %27, %30 : vector<8x128xf32>
      %32 = math.exp %31 : vector<8x128xf32>
      %cst_14 = arith.constant dense<0.000000e+00> : vector<8xf32>
      %33 = vector.multi_reduction <add>, %32, %cst_14 [1] : vector<8x128xf32> to vector<8xf32>
      %34 = vector.shape_cast %33 : vector<8xf32> to vector<8x1xf32>
      %35 = vector.broadcast %34 : vector<8x1xf32> to vector<8x128xf32>
      %36 = arith.divf %32, %35 : vector<8x128xf32>
      %c0_15 = arith.constant 0 : index
      %c0_16 = arith.constant 0 : index
      %37 = vector.load %arg13[%c0_15, %c0_16] : memref<8x128xf32, #tpu.memory_space<vmem>>, vector<8x128xf32>
      tpu.vector_store %arg13[%c0_15, %c0_16], %36 {strides = array<i32>} : memref<8x128xf32, #tpu.memory_space<vmem>>, vector<8x128xf32>,
    } else {
    }
    return
  }
  func.func @transform_0(%arg0: i32) -> (i32, i32) {
    %c0_i32 = arith.constant 0 : i32
    %c0_i32_0 = arith.constant 0 : i32
    %c0_i32_1 = arith.constant 0 : i32
    return %c0_i32, %c0_i32_0 : i32, i32
  }
  func.func @transform_1(%arg0: i32) -> (i32, i32) {
    %c0_i32 = arith.constant 0 : i32
    %0 = arith.subi %arg0, %c0_i32 : i32
    %c0_i32_0 = arith.constant 0 : i32
    %c1_i32 = arith.constant 1 : i32
    %1 = arith.maxsi %c0_i32_0, %0 : i32
    %2 = arith.minsi %c1_i32, %1 : i32
    %c0_i32_1 = arith.constant 0 : i32
    %c0_i32_2 = arith.constant 0 : i32
    return %c0_i32_1, %2 : i32, i32
  }
  func.func @transform_2(%arg0: i32) -> (i32, i32) {
    %c0_i32 = arith.constant 0 : i32
    %0 = arith.subi %arg0, %c0_i32 : i32
    %c0_i32_0 = arith.constant 0 : i32
    %c1_i32 = arith.constant 1 : i32
    %1 = arith.maxsi %c0_i32_0, %0 : i32
    %2 = arith.minsi %c1_i32, %1 : i32
    %c0_i32_1 = arith.constant 0 : i32
    %c0_i32_2 = arith.constant 0 : i32
    return %c0_i32_1, %2 : i32, i32
  }
  func.func @transform_3(%arg0: i32) -> (i32, i32) {
    %c2_i32 = arith.constant 2 : i32
    %0 = arith.subi %arg0, %c2_i32 : i32
    %c0_i32 = arith.constant 0 : i32
    %c3_i32 = arith.constant 3 : i32
    %1 = arith.maxsi %c0_i32, %0 : i32
    %2 = arith.minsi %c3_i32, %1 : i32
    %c0_i32_0 = arith.constant 0 : i32
    %c0_i32_1 = arith.constant 0 : i32
    return %c0_i32_0, %2 : i32, i32
  }
  func.func @transform_4(%arg0: i32) -> (i32, i32) {
    %c2_i32 = arith.constant 2 : i32
    %0 = arith.subi %arg0, %c2_i32 : i32
    %c0_i32 = arith.constant 0 : i32
    %c3_i32 = arith.constant 3 : i32
    %1 = arith.maxsi %c0_i32, %0 : i32
    %2 = arith.minsi %c3_i32, %1 : i32
    %c0_i32_0 = arith.constant 0 : i32
    %c0_i32_1 = arith.constant 0 : i32
    return %c0_i32_0, %2 : i32, i32
  }
  func.func @transform_5(%arg0: i32) -> (i32, i32) {
    %c6_i32 = arith.constant 6 : i32
    %0 = arith.subi %arg0, %c6_i32 : i32
    %c0_i32 = arith.constant 0 : i32
    %c3_i32 = arith.constant 3 : i32
    %1 = arith.maxsi %c0_i32, %0 : i32
    %2 = arith.minsi %c3_i32, %1 : i32
    %c0_i32_0 = arith.constant 0 : i32
    %c0_i32_1 = arith.constant 0 : i32
    return %c0_i32_0, %2 : i32, i32
  }
  func.func @transform_6(%arg0: i32) -> (i32, i32) {
    %c6_i32 = arith.constant 6 : i32
    %0 = arith.subi %arg0, %c6_i32 : i32
    %c0_i32 = arith.constant 0 : i32
    %c3_i32 = arith.constant 3 : i32
    %1 = arith.maxsi %c0_i32, %0 : i32
    %2 = arith.minsi %c3_i32, %1 : i32
    %c0_i32_0 = arith.constant 0 : i32
    %c0_i32_1 = arith.constant 0 : i32
    return %c0_i32_0, %2 : i32, i32
  }
  func.func @transform_7(%arg0: i32) -> (i32, i32) {
    %c10_i32 = arith.constant 10 : i32
    %0 = arith.subi %arg0, %c10_i32 : i32
    %c0_i32 = arith.constant 0 : i32
    %c1_i32 = arith.constant 1 : i32
    %1 = arith.maxsi %c0_i32, %0 : i32
    %2 = arith.minsi %c1_i32, %1 : i32
    %c0_i32_0 = arith.constant 0 : i32
    %c0_i32_1 = arith.constant 0 : i32
    return %c0_i32_0, %2 : i32, i32
  }
  func.func @transform_8(%arg0: i32) -> (i32, i32) {
    %c10_i32 = arith.constant 10 : i32
    %0 = arith.subi %arg0, %c10_i32 : i32
    %c0_i32 = arith.constant 0 : i32
    %c1_i32 = arith.constant 1 : i32
    %1 = arith.maxsi %c0_i32, %0 : i32
    %2 = arith.minsi %c1_i32, %1 : i32
    %c0_i32_0 = arith.constant 0 : i32
    %c0_i32_1 = arith.constant 0 : i32
    return %c0_i32_0, %2 : i32, i32
  }
  func.func @transform_9(%arg0: i32) -> (i32, i32) {
    %c0_i32 = arith.constant 0 : i32
    %c0_i32_0 = arith.constant 0 : i32
    %c0_i32_1 = arith.constant 0 : i32
    return %c0_i32, %c0_i32_0 : i32, i32
  }
  func.func @transform_10(%arg0: i32) -> (i32, i32) {
    %c0_i32 = arith.constant 0 : i32
    %c0_i32_0 = arith.constant 0 : i32
    %c0_i32_1 = arith.constant 0 : i32
    return %c0_i32, %c0_i32_0 : i32, i32
  }
  func.func @transform_11(%arg0: i32) -> (i32, i32) {
    %c0_i32 = arith.constant 0 : i32
    %c0_i32_0 = arith.constant 0 : i32
    %c0_i32_1 = arith.constant 0 : i32
    return %c0_i32, %c0_i32_0 : i32, i32
  }
  func.func @transform_12(%arg0: i32) -> (i32, i32) {
    %c0_i32 = arith.constant 0 : i32
    %c0_i32_0 = arith.constant 0 : i32
    %c0_i32_1 = arith.constant 0 : i32
    return %c0_i32, %c0_i32_0 : i32, i32
  }
}

</mosaic_0001>

<bundles_post_ra>
// kernel: tpu_custom_call.1
= control target key start
LH: loop header
LB: loop body
LE: loop exit
PB: predicated region body
PF: predicated region fallthrough
CT: control target
= control target key end

     0   :  { %s19715_s0 = inlined_call_operand.hbm [shape: f32[8,256], index: 0, kind: input, shape index: {}]   ;;  %s19716_s1 = inlined_call_operand.hbm [shape: bf16[256,1280], index: 1, kind: input, shape index: {}]   ;;  %s19717_s2 = inlined_call_operand.hbm [shape: f32[1,1280], index: 2, kind: input, shape index: {}]   ;;  %s19718_s3 = inlined_call_operand.hbm [shape: bf16[1280,2048], index: 3, kind: input, shape index: {}]   ;;  %s19719_s4 = inlined_call_operand.hbm [shape: f32[1,2048], index: 4, kind: input, shape index: {}]   ;;  %s19720_s5 = inlined_call_operand.hbm [shape: bf16[2048,2048], index: 5, kind: input, shape index: {}]   ;;  %s19721_s6 = inlined_call_operand.hbm [shape: f32[1,2048], index: 6, kind: input, shape index: {}]   ;;  %s19722_s7 = inlined_call_operand.hbm [shape: bf16[2048,1024], index: 7, kind: input, shape index: {}]   ;;  %s19723_s8 = inlined_call_operand.hbm [shape: f32[1,1024], index: 8, kind: input, shape index: {}]   ;;  %s19724_s9 = inlined_call_operand.hbm [shape: bf16[1024,128], index: 9, kind: input, shape index: {}]   ;;  %s19725_s10 = inlined_call_operand.hbm [shape: f32[1,128], index: 10, kind: input, shape index: {}]   ;;  %s19726_s11 = inlined_call_operand.hbm [shape: f32[8,1024], index: 11, kind: output, shape index: {0}]   ;;  %s19727_s12 = inlined_call_operand.hbm [shape: f32[8,128], index: 12, kind: output, shape index: {1}]  }
   0x1   :  { %19787 = sst [smem:[#allocation49_spill]] %s19716_s1 }
   0x2   :  { %19788 = sst [smem:[#allocation50_spill]] %s19717_s2 }
   0x3   :  { %19789 = sst [smem:[#allocation51_spill]] %s19718_s3 }
   0x4   :  { %19790 = sst [smem:[#allocation52_spill]] %s19719_s4 }
   0x5   :  { %19791 = sst [smem:[#allocation53_spill]] %s19720_s5 }
   0x6   :  { %19792 = sst [smem:[#allocation54_spill]] %s19721_s6 }
   0x7   :  { %19793 = sst [smem:[#allocation55_spill]] %s19722_s7 }
   0x8   :  { %19794 = sst [smem:[#allocation56_spill]] %s19723_s8 }
   0x9   :  { %19795 = sst [smem:[#allocation57_spill]] %s19724_s9 }
   0xa   :  { %19796 = sst [smem:[#allocation58_spill]] %s19725_s10 }
   0xb   :  { %19797 = sst [smem:[#allocation59_spill]] %s19726_s11 }
   0xc   :  { %19798 = sst [smem:[#allocation60_spill]] %s19727_s12 }
   0xd   :  { %18 = vsyncpa [#allocation5], 0 }
   0xe   :  { %19 = vsyncpa [#allocation8], 0 }
   0xf   :  { %21 = vsyncpa [#allocation8 + $0x1], 0 }
  0x10   :  { %22 = vsyncpa [#allocation11], 0 }
  0x11   :  { %24 = vsyncpa [#allocation11 + $0x1], 0 }
  0x12   :  { %25 = vsyncpa [#allocation14], 0 }
  0x13   :  { %27 = vsyncpa [#allocation14 + $0x1], 0 }
  0x14   :  { %28 = vsyncpa [#allocation17], 0 }
  0x15   :  { %30 = vsyncpa [#allocation17 + $0x1], 0 }
  0x16   :  { %31 = vsyncpa [#allocation20], 0 }
  0x17   :  { %32 = vsyncpa [#allocation6], 0 }
  0x18   :  { %33 = vsyncpa [#allocation24], 0  ;;  %s17569_s21 = smov 0   ;;  %s17571_s22 = smov 0  }
  0x19   :  { %s17573_s23 = smov 0   ;;  %s17575_s24 = smov 0  }
  0x1a   :  { %s17577_s25 = smov 0   ;;  %s17579_s26 = smov 0  }
  0x1b   :  { %s17581_s27 = smov 0   ;;  %s17583_s28 = smov 0  }
  0x1c   :  { %s17585_s29 = smov 0   ;;  %s17587_s30 = smov 0  }
  0x1d   :  { %s17589_s13 = smov 0   ;;  %s17591_s14 = smov 0  }
  0x1e   :  { %s17593_s15 = smov 0  }
  0x1f LB: > { %19799 = sst [smem:[#allocation33_spill]] %s17436_s22  ;;  %s17482_s16 = smov [#allocation19]   ;;  %s17480_s15 = sphi %s17593_s15, %s19895_s15   ;;  %s17476_s14 = sphi %s17591_s14, %s19904_s14   ;;  %s17472_s13 = sphi %s17589_s13, %s19903_s13   ;;  %s17468_s30 = sphi %s17587_s30, %s19902_s30   ;;  %s17464_s29 = sphi %s17585_s29, %s19911_s29   ;;  %s17460_s28 = sphi %s17583_s28, %s19910_s28   ;;  %s17456_s27 = sphi %s17581_s27, %s19900_s27   ;;  %s17452_s26 = sphi %s17579_s26, %s19909_s26   ;;  %s17448_s25 = sphi %s17577_s25, %s19908_s25   ;;  %s17444_s24 = sphi %s17575_s24, %s19898_s24   ;;  %s17440_s23 = sphi %s17573_s23, %s19907_s23   ;;  %s17436_s22 = sphi %s17571_s22, %s19906_s22   ;;  %s17432_s21 = sphi %s17569_s21, %s19896_s21  }
  0x20   : > { %19800 = sst [smem:[#allocation34_spill]] %s17448_s25  ;;  %s456_s17 = sshll.u32 %s17482_s16, 4  ;;  %s457_s17 = int_to_ptr.vmem [resolvable:$true] %s456_s17 }
  0x21   : > { %19801 = sst [smem:[#allocation35_spill]] %s17460_s28  ;;  %s17635_s18 = sadd.s32 4294967295, %s17480_s15  }
  0x22   : > { %19802 = sst [smem:[#allocation36_spill]] %s17472_s13  ;;  %p12648_p0 = scmp.ge.s32.totalorder %s17480_s15, 1 }
  0x23   : > { %19803 = sst [smem:[#allocation37_spill]] %s17476_s14  ;;  %p19736_p1 = scmp.eq.s32.totalorder %s17635_s18, 0 }
  0x24   : > { %p433_p2 = scmp.lt.s32.totalorder %s17480_s15, 14  ;;  %s17653_s16 = sadd.s32 1, %s17480_s15  }
  0x25   : > { %19808 = sst [smem:[#allocation40_spill]] %s17653_s16  ;;  %s19809_s9 = sld [smem:[#allocation57_spill]] }
  0x26   : > { %p17640_p3 = pnand %p12648_p0, %p433_p2 }
  0x28   : > { %s19804_s19 = scalar_select %p17640_p3, 1, 0 }
  0x29   : > { %p14602_p4 = pneg %p17640_p3 }
  0x2a   : > { %19805 = sst [smem:[#allocation38_spill]] %s19804_s19 }
  0x2b   : > { %p17648_p5 = pnand %p14602_p4, %p19736_p1  ;;  %s16970_s8 = scalar_lea.hbm %s19809_s9, 8192 }
  0x2c   : > { %p16971_p6 = scmp.ne.s32.totalorder %s19809_s9, %s16970_s8  ;;  %p16977_p10 = scmp.lt.u32.totalorder %s16970_s8, %s19809_s9 }
  0x2d   : > { %s19806_s20 = scalar_select %p17648_p5, 1, 0 }
  0x2e   : > { %p17663_p7 = pneg %p17648_p5 }
  0x2f   : > { %19807 = sst [smem:[#allocation39_spill]] %s19806_s20 }
  0x30   : > { %p16973_p8 = pnand %p17663_p7, %p16971_p6 }
  0x32   : > { %p16974_p9 = pneg %p16973_p8 }
  0x34   : > { %p16979_p11 = pnand %p16977_p10, %p16974_p9 }
  0x36   : > { %16982 = shalt.err (!%p16979_p11)
}
  0x37   : > { %s16983_s11 = scalar_lea.vmem %s457_s17, 8192  ;;  %p16991_p2 = scmp.lt.s32.totalorder %s457_s17, %s457_s17 }
  0x38   : > { %p16984_p12 = scmp.ne.s32.totalorder %s457_s17, %s16983_s11  ;;  %p16992_p4 = scmp.lt.s32.totalorder %s16983_s11, %s16983_s11 }
  0x3a   : > { %p16986_p13 = pnand %p16984_p12, %p17663_p7  ;;  %p16993_p1 = por %p16992_p4, %p16991_p2 }
  0x3c   : > { %p16987_p0 = pneg %p16986_p13 }
  0x3e   : > { %p16994_p3 = pnand %p16993_p1, %p16987_p0 }
  0x40   : > { %16997 = shalt.err (!%p16994_p3)
}
  0x41   : > { %s17483_s4 = smov 64   ;;  %s17484_s2 = smov 4  }
  0x42   : > { %14608 = dma.hbm_to_vmem [thread:$0]  (!%p17648_p5), %s19809_s9, 8192, %s457_s17, [#allocation20], %s17483_s4, %s17483_s4, %s17484_s2  }
  0x43   : > { %p64_p1 = scmp.gt.s32.totalorder %s17480_s15, 0  ;;  %p12556_p3 = scmp.lt.s32.totalorder %s17480_s15, 1 }
  0x44   : > { %p68_p6 = scmp.gt.s32.totalorder %s17653_s16, 0  ;;  %p12561_p8 = scmp.lt.s32.totalorder %s17653_s16, 1 }
  0x45   : > { %s65_s10 = scalar_select %p64_p1, %s17480_s15, 0 }
  0x46   : > { %s69_s12 = scalar_select %p68_p6, %s17653_s16, 0 }
  0x47   : > { %s19913_s10 = smov (!%p12556_p3, %s65_s10), 1  ;;  %s75_s11 = sadd.s32 1, %s17476_s14 }
  0x48   : > { %19811 = sst [smem:[#allocation41_spill]] %s19913_s10  ;;  %s19915_s12 = smov (!%p12561_p8, %s69_s12), 1 }
  0x49   : > { %p82_p9 = scmp.ne.s32.totalorder %s17476_s14, %s17472_s13  ;;  %s72_s17 = ssub.s32 %s19913_s10, %s19915_s12 }
  0x4a   : > { %p19747_p10 = scmp.eq.s32.totalorder %s17480_s15, 0  ;;  %p73_p11 = scmp.eq.s32.totalorder %s72_s17, 0 }
  0x4b   : > { %p88_p12 = scmp.ne.s32.totalorder %s17472_s13, %s17468_s30  ;;  %p19746_p0 = scmp.lt.s32.totalorder %s17480_s15, 13 }
  0x4c   : > { %p84_p13 = por %p19747_p10, %p82_p9  ;;  %p19813_p2 = scmp.eq.s32.totalorder %s17635_s18, 0 }
  0x4d   : > { %s17698_s4 = scalar_select %p73_p11, %s17476_s14, %s75_s11  }
  0x4e   : > { %p17702_p4 = por %p19813_p2, %p88_p12  ;;  %s17707_s6 = sand.u32 1, %s17480_s15  }
  0x4f   : > { %19812 = sst [smem:[#allocation42_spill]] %s17698_s4  ;;  %s19741_s8 = sand.u32 1, %s17476_s14  }
  0x50   : > { %s19814_s2 = scalar_select %p17702_p4, 1, 0 }
  0x51   : > { %s14560_s9 = smul.u32 640, %s19741_s8  ;;  %p17714_p1 = pnand %p19746_p0, %p84_p13 }
  0x52   : > { %19815 = sst [smem:[#allocation43_spill]] %s19814_s2  ;;  %s14272_s30 = smul.u32 320, %s19913_s10 }
  0x53   : > { %s19816_s12 = scalar_select %p17714_p1, 1, 0 }
  0x54   : > { %s19817_s1 = sld [smem:[#allocation49_spill]]  ;;  %s485_s2 = scalar_lea.vmem [#allocation7], %s14560_s9 }
  0x55   : > { %s496_s13 = sshll.u32 %s485_s2, 4  ;;  %s19751_s8 = scalar_lea.sflag [#allocation8], %s17707_s6  ;;  %s17724_s13 = int_to_ptr.vmem [resolvable:$true] %s496_s13 }
  0x56   : > { %p19753_p6 = pneg %p17714_p1 }
  0x5a   : > { %s17722_s4 = scalar_lea.hbm %s19817_s1, %s14272_s30  ;;  %s17003_s17 = scalar_lea.hbm %s19817_s1, 20480 }
  0x5b   : > { %s16998_s14 = scalar_lea.hbm %s17722_s4, 10240  ;;  %p17004_p11 = scmp.lt.u32.totalorder %s17722_s4, %s19817_s1 }
  0x5c   : > { %p16999_p3 = scmp.ne.s32.totalorder %s17722_s4, %s16998_s14  ;;  %p17005_p12 = scmp.lt.u32.totalorder %s17003_s17, %s16998_s14 }
  0x5d   : > { %p17007_p2 = scmp.lt.u32.totalorder %s16998_s14, %s17722_s4 }
  0x5e   : > { %p17001_p8 = pnand %p19753_p6, %p16999_p3  ;;  %p17006_p13 = por %p17005_p12, %p17004_p11 }
  0x60   : > { %p17002_p9 = pneg %p17001_p8  ;;  %p17008_p0 = por %p17007_p2, %p17006_p13 }
  0x62   : > { %p17009_p10 = pnand %p17008_p0, %p17002_p9 }
  0x64   : > { %17012 = shalt.err (!%p17009_p10)
}
  0x65   : > { %s17013_s9 = scalar_lea.vmem %s17724_s13, 10240  ;;  %s17485_s2 = smov [#allocation7]  }
  0x66   : > { %p17014_p3 = scmp.ne.s32.totalorder %s17724_s13, %s17013_s9  ;;  %s17018_s11 = sshll.u32 %s17485_s2, 4  ;;  %s17019_s11 = int_to_ptr.vmem [resolvable:$false] %s17018_s11 }
  0x67   : > { %s17020_s20 = scalar_lea.vmem %s17019_s11, 20480  ;;  %p17021_p5 = scmp.lt.s32.totalorder %s17724_s13, %s17019_s11 }
  0x68   : > { %p17016_p8 = pnand %p17014_p3, %p19753_p6  ;;  %p17022_p11 = scmp.lt.s32.totalorder %s17020_s20, %s17013_s9 }
  0x6a   : > { %p17017_p4 = pneg %p17016_p8  ;;  %p17023_p12 = por %p17022_p11, %p17021_p5 }
  0x6c   : > { %p17024_p13 = pnand %p17023_p12, %p17017_p4 }
  0x6e   : > { %17027 = shalt.err (!%p17024_p13)
}
  0x6f   : > { %s17486_s14 = smov 640   ;;  %s17487_s10 = smov 320  }
  0x70   : > { %s17488_s30 = smov 20   ;;  %s12576_s17 = sadd.s32 4294967294, %s17480_s15 }
  0x71   : > { %14615 = dma.hbm_to_vmem [thread:$0]  (!%p17714_p1), %s17722_s4, 10240, %s17724_s13, %s19751_s8, %s17486_s14, %s17487_s10, %s17488_s30  }
  0x72   : > { %p133_p5 = scmp.gt.s32.totalorder %s12576_s17, 0  ;;  %p12577_p10 = scmp.lt.s32.totalorder %s12576_s17, 3 }
  0x73   : > { %s12582_s9 = sadd.s32 4294967294, %s17653_s16  ;;  %s145_s2 = sadd.s32 1, %s17464_s29 }
  0x74   : > { %s19917_s17 = smov (!%p133_p5, %s12576_s17), 0  ;;  %p138_p0 = scmp.gt.s32.totalorder %s12582_s9, 0 }
  0x75   : > { %p12583_p4 = scmp.lt.s32.totalorder %s12582_s9, 3  ;;  %s19919_s17 = smov (!%p12577_p10, %s19917_s17), 3 }
  0x76   : > { %s19921_s9 = smov (!%p138_p0, %s12582_s9), 0  ;;  %p152_p9 = scmp.ne.s32.totalorder %s17464_s29, %s17460_s28 }
  0x77   : > { %p158_p2 = scmp.ne.s32.totalorder %s17460_s28, %s17456_s27  ;;  %s19923_s9 = smov (!%p12583_p4, %s19921_s9), 3 }
  0x78   : > { %p19818_p3 = scmp.eq.s32.totalorder %s17480_s15, 0  ;;  %p19819_p11 = scmp.eq.s32.totalorder %s17635_s18, 0 }
  0x79   : > { %s142_s4 = ssub.s32 %s19919_s17, %s19923_s9  ;;  %s19754_s11 = sand.u32 1, %s17464_s29  }
  0x7a   : > { %p154_p8 = por %p152_p9, %p19818_p3  ;;  %p17767_p12 = por %p158_p2, %p19819_p11 }
  0x7b   : > { %p143_p13 = scmp.eq.s32.totalorder %s142_s4, 0  ;;  %s14562_s20 = smul.u32 2560, %s19754_s11 }
  0x7c   : > { %s19820_s13 = scalar_select %p17767_p12, 1, 0 }
  0x7d   : > { %s14278_s14 = sshll.u32 %s19919_s17, 8  ;;  %s19822_s3 = sld [smem:[#allocation51_spill]] }
  0x7e   : > { %s17777_s10 = scalar_select %p143_p13, %s17464_s29, %s145_s2  }
  0x7f   : > { %s533_s1 = scalar_lea.vmem [#allocation10], %s14562_s20  ;;  %p19823_p5 = scmp.lt.s32.totalorder %s17480_s15, 13 }
  0x80   : > { %19821 = sst [smem:[#allocation44_spill]] %s17777_s10  ;;  %s545_s28 = sshll.u32 %s533_s1, 4  ;;  %s17790_s28 = int_to_ptr.vmem [resolvable:$true] %s545_s28 }
  0x81   : > { %p17786_p10 = pnand %p19823_p5, %p154_p8  ;;  %s19758_s2 = scalar_lea.sflag [#allocation11], %s17707_s6 }
  0x83   : > { %s17782_s27 = scalar_lea.hbm %s19822_s3, %s14278_s14  ;;  %p19765_p4 = pneg %p17786_p10 }
  0x84   : > { %s19824_s9 = scalar_select %p17786_p10, 1, 0 }
  0x85   : > { %s17028_s4 = scalar_lea.hbm %s17782_s27, 40960  ;;  %s17033_s20 = scalar_lea.hbm %s19822_s3, 163840 }
  0x86   : > { %p17029_p0 = scmp.ne.s32.totalorder %s17782_s27, %s17028_s4  ;;  %p17034_p3 = scmp.lt.u32.totalorder %s17782_s27, %s19822_s3 }
  0x87   : > { %p17035_p8 = scmp.lt.u32.totalorder %s17033_s20, %s17028_s4  ;;  %p17037_p13 = scmp.lt.u32.totalorder %s17028_s4, %s17782_s27 }
  0x88   : > { %p17031_p9 = pnand %p19765_p4, %p17029_p0 }
  0x89   : > { %p17036_p11 = por %p17035_p8, %p17034_p3 }
  0x8a   : > { %p17032_p2 = pneg %p17031_p9 }
  0x8b   : > { %p17038_p5 = por %p17037_p13, %p17036_p11 }
  0x8d   : > { %p17039_p6 = pnand %p17038_p5, %p17032_p2 }
  0x8f   : > { %17042 = shalt.err (!%p17039_p6)
}
  0x90   : > { %s17043_s11 = scalar_lea.vmem %s17790_s28, 40960  ;;  %s17489_s8 = smov [#allocation10]  }
  0x91   : > { %p17044_p0 = scmp.ne.s32.totalorder %s17790_s28, %s17043_s11  ;;  %s17048_s1 = sshll.u32 %s17489_s8, 4  ;;  %s17049_s1 = int_to_ptr.vmem [resolvable:$false] %s17048_s1 }
  0x92   : > { %s17050_s14 = scalar_lea.vmem %s17049_s1, 81920  ;;  %p17051_p1 = scmp.lt.s32.totalorder %s17790_s28, %s17049_s1 }
  0x93   : > { %p17046_p9 = pnand %p17044_p0, %p19765_p4  ;;  %p17052_p3 = scmp.lt.s32.totalorder %s17050_s14, %s17043_s11 }
  0x95   : > { %p17047_p12 = pneg %p17046_p9  ;;  %p17053_p8 = por %p17052_p3, %p17051_p1 }
  0x97   : > { %p17054_p11 = pnand %p17053_p8, %p17047_p12 }
  0x99   : > { %17057 = shalt.err (!%p17054_p11)
}
  0x9a   : > { %s19759_s4 = smov 1024   ;;  %s19760_s20 = smov 256  }
  0x9b   : > { %s19762_s30 = smov 16   ;;  %s12600_s11 = sadd.s32 4294967290, %s17480_s15 }
  0x9c   : > { %14621 = dma.hbm_to_vmem [thread:$0]  (!%p17786_p10), %s17782_s27, 40960, %s17790_s28, %s19758_s2, %s19759_s4, %s19760_s20, %s19762_s30  }
  0x9d   : > { %p205_p1 = scmp.gt.s32.totalorder %s12600_s11, 0  ;;  %p12601_p6 = scmp.lt.s32.totalorder %s12600_s11, 3 }
  0x9e   : > { %s12606_s8 = sadd.s32 4294967290, %s17653_s16  ;;  %s217_s1 = sadd.s32 1, %s17452_s26 }
  0x9f   : > { %s19925_s11 = smov (!%p205_p1, %s12600_s11), 0  ;;  %p210_p12 = scmp.gt.s32.totalorder %s12606_s8, 0 }
  0xa0   : > { %p12607_p2 = scmp.lt.s32.totalorder %s12606_s8, 3  ;;  %s19927_s11 = smov (!%p12601_p6, %s19925_s11), 3 }
  0xa1   : > { %s19929_s8 = smov (!%p210_p12, %s12606_s8), 0  ;;  %p224_p13 = scmp.ne.s32.totalorder %s17452_s26, %s17448_s25 }
  0xa2   : > { %p230_p5 = scmp.ne.s32.totalorder %s17448_s25, %s17444_s24  ;;  %s19931_s8 = smov (!%p12607_p2, %s19929_s8), 3 }
  0xa3   : > { %p19825_p0 = scmp.eq.s32.totalorder %s17480_s15, 0  ;;  %p19826_p3 = scmp.eq.s32.totalorder %s17635_s18, 0 }
  0xa4   : > { %s214_s27 = ssub.s32 %s19927_s11, %s19931_s8  ;;  %s19766_s14 = sand.u32 1, %s17452_s26  }
  0xa5   : > { %p226_p9 = por %p224_p13, %p19825_p0  ;;  %p17836_p8 = por %p230_p5, %p19826_p3 }
  0xa6   : > { %p215_p11 = scmp.eq.s32.totalorder %s214_s27, 0  ;;  %s12682_s2 = sshll.u32 %s19766_s14, 12 }
  0xa7   : > { %s19827_s28 = scalar_select %p17836_p8, 1, 0 }
  0xa8   : > { %s14284_s4 = sshll.u32 %s19927_s11, 8  ;;  %s19830_s5 = sld [smem:[#allocation53_spill]] }
  0xa9   : > { %19828 = sst [smem:[#allocation45_spill]] %s19827_s28  ;;  %s583_s10 = scalar_lea.vmem [#allocation13], %s12682_s2 }
  0xaa   : > { %s17846_s20 = scalar_select %p215_p11, %s17452_s26, %s217_s1  }
  0xab   : > { %s595_s25 = sshll.u32 %s583_s10, 4  ;;  %p19831_p1 = scmp.lt.s32.totalorder %s17480_s15, 13  ;;  %s17859_s25 = int_to_ptr.vmem [resolvable:$true] %s595_s25 }
  0xac   : > { %19829 = sst [smem:[#allocation46_spill]] %s17846_s20  ;;  %s19770_s1 = scalar_lea.sflag [#allocation14], %s17707_s6 }
  0xad   : > { %p17855_p6 = pnand %p19831_p1, %p226_p9 }
  0xae   : > { %s17851_s24 = scalar_lea.hbm %s19830_s5, %s14284_s4  ;;  %s17063_s2 = scalar_lea.hbm %s19830_s5, 262144 }
  0xaf   : > { %s19832_s8 = scalar_select %p17855_p6, 1, 0 }
  0xb0   : > { %s17058_s27 = scalar_lea.hbm %s17851_s24, 65536  ;;  %p19776_p2 = pneg %p17855_p6 }
  0xb1   : > { %p17059_p12 = scmp.ne.s32.totalorder %s17851_s24, %s17058_s27  ;;  %p17064_p0 = scmp.lt.u32.totalorder %s17851_s24, %s19830_s5 }
  0xb2   : > { %p17065_p9 = scmp.lt.u32.totalorder %s17063_s2, %s17058_s27  ;;  %p17067_p11 = scmp.lt.u32.totalorder %s17058_s27, %s17851_s24 }
  0xb3   : > { %p17061_p13 = pnand %p19776_p2, %p17059_p12 }
  0xb4   : > { %p17066_p3 = por %p17065_p9, %p17064_p0 }
  0xb5   : > { %p17062_p5 = pneg %p17061_p13 }
  0xb6   : > { %p17068_p1 = por %p17067_p11, %p17066_p3 }
  0xb8   : > { %p17069_p4 = pnand %p17068_p1, %p17062_p5 }
  0xba   : > { %17072 = shalt.err (!%p17069_p4)
}
  0xbb   : > { %s17073_s14 = scalar_lea.vmem %s17859_s25, 65536  ;;  %s17493_s3 = smov [#allocation13]  }
  0xbc   : > { %p17074_p12 = scmp.ne.s32.totalorder %s17859_s25, %s17073_s14  ;;  %s17078_s10 = sshll.u32 %s17493_s3, 4  ;;  %s17079_s10 = int_to_ptr.vmem [resolvable:$false] %s17078_s10 }
  0xbd   : > { %s17080_s4 = scalar_lea.vmem %s17079_s10, 131072  ;;  %p17081_p10 = scmp.lt.s32.totalorder %s17859_s25, %s17079_s10 }
  0xbe   : > { %p17076_p13 = pnand %p17074_p12, %p19776_p2  ;;  %p17082_p0 = scmp.lt.s32.totalorder %s17080_s4, %s17073_s14 }
  0xc0   : > { %p17077_p8 = pneg %p17076_p13  ;;  %p17083_p9 = por %p17082_p0, %p17081_p10 }
  0xc2   : > { %p17084_p3 = pnand %p17083_p9, %p17077_p8 }
  0xc4   : > { %17087 = shalt.err (!%p17084_p3)
}
  0xc5   : > { %s19833_s27 = smov 16   ;;  %s19834_s2 = smov 256  }
  0xc6   : > { %s19835_s30 = smov 1024   ;;  %s12624_s14 = sadd.s32 4294967286, %s17480_s15 }
  0xc7   : > { %14627 = dma.hbm_to_vmem [thread:$0]  (!%p17855_p6), %s17851_s24, 65536, %s17859_s25, %s19770_s1, %s19835_s30, %s19834_s2, %s19833_s27  }
  0xc8   : > { %s12630_s3 = sadd.s32 4294967286, %s17653_s16  ;;  %p277_p10 = scmp.gt.s32.totalorder %s12624_s14, 0 }
  0xc9   : > { %p12625_p4 = scmp.lt.s32.totalorder %s12624_s14, 1  ;;  %p282_p8 = scmp.gt.s32.totalorder %s12630_s3, 0 }
  0xca   : > { %p12631_p5 = scmp.lt.s32.totalorder %s12630_s3, 1  ;;  %s19933_s14 = smov (!%p277_p10, %s12624_s14), 0 }
  0xcb   : > { %s19935_s3 = smov (!%p282_p8, %s12630_s3), 0  ;;  %s19937_s14 = smov (!%p12625_p4, %s19933_s14), 1 }
  0xcc   : > { %s19939_s3 = smov (!%p12631_p5, %s19935_s3), 1  ;;  %s289_s25 = sadd.s32 1, %s17440_s23 }
  0xcd   : > { %p296_p11 = scmp.ne.s32.totalorder %s17440_s23, %s17436_s22  ;;  %s286_s24 = ssub.s32 %s19937_s14, %s19939_s3 }
  0xce   : > { %p302_p1 = scmp.ne.s32.totalorder %s17436_s22, %s17432_s21  ;;  %p287_p12 = scmp.eq.s32.totalorder %s286_s24, 0 }
  0xcf   : > { %p19836_p13 = scmp.eq.s32.totalorder %s17480_s15, 0  ;;  %p19837_p9 = scmp.eq.s32.totalorder %s17635_s18, 0 }
  0xd0   : > { %s17911_s4 = scalar_select %p287_p12, %s17440_s23, %s289_s25  }
  0xd1   : > { %p298_p0 = por %p296_p11, %p19836_p13  ;;  %p17906_p3 = por %p302_p1, %p19837_p9 }
  0xd2   : > { %19840 = sst [smem:[#allocation48_spill]] %s17911_s4  ;;  %s19775_s30 = sand.u32 1, %s17440_s23  }
  0xd3   : > { %s19838_s10 = scalar_select %p17906_p3, 1, 0 }
  0xd4   : > { %s14290_s1 = sshll.u32 %s19937_s14, 8  ;;  %s12700_s5 = sshll.u32 %s19775_s30, 12 }
  0xd5   : > { %19839 = sst [smem:[#allocation47_spill]] %s19838_s10  ;;  %s19841_s7 = sld [smem:[#allocation55_spill]] }
  0xd6   : > { %p19842_p10 = scmp.lt.s32.totalorder %s17480_s15, 13  ;;  %s633_s3 = scalar_lea.vmem [#allocation16], %s12700_s5 }
  0xd7   : > { %s645_s25 = sshll.u32 %s633_s3, 4  ;;  %s19784_s24 = scalar_lea.sflag [#allocation17], %s17707_s6  ;;  %s17928_s25 = int_to_ptr.vmem [resolvable:$true] %s645_s25 }
  0xd8   : > { %p17924_p4 = pnand %p19842_p10, %p298_p0 }
  0xda   : > { %s19843_s21 = scalar_select %p17924_p4, 1, 0 }
  0xdb   : > { %s17920_s28 = scalar_lea.hbm %s19841_s7, %s14290_s1  ;;  %p19783_p5 = pneg %p17924_p4 }
  0xdc   : > { %s17088_s30 = scalar_lea.hbm %s17920_s28, 65536  ;;  %s17093_s20 = scalar_lea.hbm %s19841_s7, 131072 }
  0xdd   : > { %p17089_p8 = scmp.ne.s32.totalorder %s17920_s28, %s17088_s30  ;;  %p17094_p12 = scmp.lt.u32.totalorder %s17920_s28, %s19841_s7 }
  0xde   : > { %p17095_p13 = scmp.lt.u32.totalorder %s17093_s20, %s17088_s30  ;;  %p17097_p9 = scmp.lt.u32.totalorder %s17088_s30, %s17920_s28 }
  0xdf   : > { %p17091_p11 = pnand %p19783_p5, %p17089_p8 }
  0xe0   : > { %p17096_p0 = por %p17095_p13, %p17094_p12 }
  0xe1   : > { %p17092_p1 = pneg %p17091_p11 }
  0xe2   : > { %p17098_p10 = por %p17097_p9, %p17096_p0 }
  0xe4   : > { %p17099_p2 = pnand %p17098_p10, %p17092_p1 }
  0xe6   : > { %17102 = shalt.err (!%p17099_p2)
}
  0xe7   : > { %s17103_s5 = scalar_lea.vmem %s17928_s25, 65536  ;;  %s17494_s3 = smov [#allocation16]  }
  0xe8   : > { %p17104_p8 = scmp.ne.s32.totalorder %s17928_s25, %s17103_s5  ;;  %s17108_s15 = sshll.u32 %s17494_s3, 4  ;;  %s17109_s15 = int_to_ptr.vmem [resolvable:$false] %s17108_s15 }
  0xe9   : > { %s17110_s4 = scalar_lea.vmem %s17109_s15, 131072  ;;  %p17111_p6 = scmp.lt.s32.totalorder %s17928_s25, %s17109_s15 }
  0xea   : > { %p17106_p11 = pnand %p17104_p8, %p19783_p5  ;;  %p17112_p12 = scmp.lt.s32.totalorder %s17110_s4, %s17103_s5 }
  0xec   : > { %p17107_p3 = pneg %p17106_p11  ;;  %p17113_p13 = por %p17112_p12, %p17111_p6 }
  0xee   : > { %p17114_p0 = pnand %p17113_p13, %p17107_p3 }
  0xf0   : > { %17117 = shalt.err (!%p17114_p0)
}
  0xf1   : > { %s17495_s30 = smov 512   ;;  %s17496_s16 = smov [#allocation4]  }
  0xf2   : > { %14633 = dma.hbm_to_vmem [thread:$0]  (!%p17924_p4), %s17920_s28, 65536, %s17928_s25, %s19784_s24, %s17495_s30, %s19834_s2, %s19833_s27  }
  0xf3   : > { %s446_s20 = sshll.u32 %s17496_s16, 4  ;;  %s17497_s1 = smov [#allocation21]   ;;  %s447_s20 = int_to_ptr.vmem [resolvable:$true] %s446_s20 }
  0xf4   : > { %s470_s3 = sshll.u32 %s17497_s1, 4  ;;  %s17118_s4 = scalar_lea.hbm %s19715_s0, 256  ;;  %s17960_s3 = int_to_ptr.vmem [resolvable:$true] %s470_s3 }
  0xf5   : > { %p17119_p6 = scmp.ne.s32.totalorder %s19715_s0, %s17118_s4  ;;  %p17125_p1 = scmp.lt.u32.totalorder %s17118_s4, %s19715_s0 }
  0xf7   : > { %p17121_p2 = pnand %p17119_p6, %p17663_p7 }
  0xf9   : > { %p17122_p3 = pneg %p17121_p2 }
  0xfb   : > { %p17127_p9 = pnand %p17125_p1, %p17122_p3 }
  0xfd   : > { %17130 = shalt.err (!%p17127_p9)
}
  0xfe   : > { %s17131_s27 = scalar_lea.vmem %s447_s20, 256  ;;  %p17139_p12 = scmp.lt.s32.totalorder %s447_s20, %s447_s20 }
  0xff   : > { %p17132_p10 = scmp.ne.s32.totalorder %s447_s20, %s17131_s27  ;;  %p17140_p13 = scmp.lt.s32.totalorder %s17131_s27, %s17131_s27 }
 0x101   : > { %p17134_p8 = pnand %p17132_p10, %p17663_p7  ;;  %p17141_p0 = por %p17140_p13, %p17139_p12 }
 0x103   : > { %p17135_p11 = pneg %p17134_p8 }
 0x105   : > { %p17142_p5 = pnand %p17141_p0, %p17135_p11 }
 0x107   : > { %17145 = shalt.err (!%p17142_p5)
}
 0x108   : > { %s19844_s7 = sld [smem:[#allocation39_spill]]  ;;  %s19846_s30 = sld [smem:[#allocation58_spill]] }
 0x10e   : > { %p19845_p6 = scmp.ne.s32.totalorder %s19844_s7, 0  ;;  %s19847_s16 = smov %s19846_s30 }
 0x10f   : > { %s17146_s1 = scalar_lea.hbm %s19846_s30, 16 }
 0x110   : > { %14605 = dma.hbm_to_vmem [thread:$0]  (!%p19845_p6), %s19715_s0, 256, %s447_s20, [#allocation5]  }
 0x111   : > { %p17147_p2 = scmp.ne.s32.totalorder %s19847_s16, %s17146_s1  ;;  %p17153_p5 = scmp.lt.u32.totalorder %s17146_s1, %s19847_s16 }
 0x113   : > { %p17149_p3 = pnand %p17147_p2, %p17663_p7 }
 0x115   : > { %p17150_p1 = pneg %p17149_p3 }
 0x117   : > { %p17155_p9 = pnand %p17153_p5, %p17150_p1 }
 0x119   : > { %17158 = shalt.err (!%p17155_p9)
}
 0x11a   : > { %s17159_s20 = scalar_lea.vmem %s17960_s3, 16  ;;  %s17166_s27 = scalar_lea.vmem %s17960_s3, 32 }
 0x11b   : > { %p17160_p10 = scmp.ne.s32.totalorder %s17960_s3, %s17159_s20  ;;  %p17167_p12 = scmp.lt.s32.totalorder %s17960_s3, %s17960_s3 }
 0x11c   : > { %p17168_p13 = scmp.lt.s32.totalorder %s17166_s27, %s17159_s20 }
 0x11d   : > { %p17162_p8 = pnand %p17160_p10, %p17663_p7 }
 0x11e   : > { %p17169_p0 = por %p17168_p13, %p17167_p12 }
 0x11f   : > { %p17163_p11 = pneg %p17162_p8 }
 0x121   : > { %p17170_p2 = pnand %p17169_p0, %p17163_p11 }
 0x123   : > { %17173 = shalt.err (!%p17170_p2)
}
 0x124   : > { %s19848_s22 = sld [smem:[#allocation37_spill]]  ;;  %s19851_s1 = sand.u32 1, %s17464_s29  }
 0x125   : > { %s19849_s25 = sld [smem:[#allocation41_spill]]  ;;  %s18008_s5 = sshll.u32 %s19851_s1, 2 }
 0x126   : > { %14611 = dma.hbm_to_vmem [thread:$0]  (!%p19845_p6), %s19847_s16, 16, %s17960_s3, [#allocation20]  }
 0x127   : > { %s14281_s4 = sshll.u32 %s19919_s17, 6  ;;  %s19852_s7 = sld [smem:[#allocation50_spill]] }
 0x128   : > { %p19854_p6 = scmp.ne.s32.totalorder %s19816_s12, 0 }
 0x12a   : > { %s19850_s19 = sand.u32 1, %s19848_s22   ;;  %p19855_p3 = pneg %p19854_p6 }
 0x12b   : > { %s14561_s30 = smul.u32 5, %s19850_s19  ;;  %s19853_s19 = sld [smem:[#allocation52_spill]] }
 0x12c   : > { %s14275_s15 = smul.u32 80, %s19849_s25 }
 0x12d   : > { %s510_s2 = scalar_lea.vmem [#allocation9], %s14561_s30 }
 0x12e   : > { %s18015_s27 = scalar_lea.hbm %s19852_s7, %s14275_s15  ;;  %s522_s10 = sshll.u32 %s510_s2, 4  ;;  %s523_s10 = int_to_ptr.vmem [resolvable:$true] %s522_s10 }
 0x12f   : > { %s17174_s1 = scalar_lea.hbm %s18015_s27, 80  ;;  %s17179_s15 = scalar_lea.hbm %s19852_s7, 160 }
 0x130   : > { %p17175_p7 = scmp.ne.s32.totalorder %s18015_s27, %s17174_s1  ;;  %p17180_p9 = scmp.lt.u32.totalorder %s18015_s27, %s19852_s7 }
 0x131   : > { %s18020_s24 = scalar_lea.hbm %s19853_s19, %s14281_s4  ;;  %p17181_p10 = scmp.lt.u32.totalorder %s17179_s15, %s17174_s1 }
 0x132   : > { %p17177_p1 = pnand %p17175_p7, %p19855_p3  ;;  %p17183_p11 = scmp.lt.u32.totalorder %s17174_s1, %s18015_s27 }
 0x133   : > { %p17182_p8 = por %p17181_p10, %p17180_p9 }
 0x134   : > { %p17178_p5 = pneg %p17177_p1 }
 0x135   : > { %p17184_p12 = por %p17183_p11, %p17182_p8 }
 0x137   : > { %p17185_p13 = pnand %p17184_p12, %p17178_p5 }
 0x139   : > { %17188 = shalt.err (!%p17185_p13)
}
 0x13a   : > { %s17189_s30 = scalar_lea.vmem %s523_s10, 80  ;;  %p19856_p2 = pmov %p19855_p3 }
 0x13b   : > { %p17190_p0 = scmp.ne.s32.totalorder %s523_s10, %s17189_s30  ;;  %s17498_s4 = smov [#allocation9]  }
 0x13c   : > { %s17194_s2 = sshll.u32 %s17498_s4, 4  ;;  %s17195_s2 = int_to_ptr.vmem [resolvable:$false] %s17194_s2 }
 0x13d   : > { %p17192_p7 = pnand %p17190_p0, %p19856_p2  ;;  %s17196_s3 = scalar_lea.vmem %s17195_s2, 160 }
 0x13e   : > { %p17197_p1 = scmp.lt.s32.totalorder %s523_s10, %s17195_s2  ;;  %p17198_p4 = scmp.lt.s32.totalorder %s17196_s3, %s17189_s30 }
 0x13f   : > { %p17193_p3 = pneg %p17192_p7 }
 0x140   : > { %p17199_p9 = por %p17198_p4, %p17197_p1 }
 0x142   : > { %p17200_p10 = pnand %p17199_p9, %p17193_p3 }
 0x144   : > { %17203 = shalt.err (!%p17200_p10)
}
 0x145   : > { %s19857_s22 = scalar_lea.sflag [#allocation8], %s17707_s6  ;;  %s559_s1 = scalar_lea.vmem [#allocation12], %s18008_s5 }
 0x146   : > { %14618 = dma.hbm_to_vmem [thread:$0]  (!%p19854_p6), %s18015_s27, 80, %s523_s10, %s19857_s22  }
 0x147   : > { %s572_s17 = sshll.u32 %s559_s1, 4  ;;  %s19858_s25 = sand.u32 1, %s17452_s26   ;;  %s573_s17 = int_to_ptr.vmem [resolvable:$true] %s572_s17 }
 0x148   : > { %s18046_s15 = sshll.u32 %s19858_s25, 2  ;;  %s17204_s28 = scalar_lea.hbm %s18020_s24, 64 }
 0x149   : > { %p17205_p4 = scmp.ne.s32.totalorder %s18020_s24, %s17204_s28  ;;  %p19859_p5 = scmp.ne.s32.totalorder %s19824_s9, 0 }
 0x14a   : > { %s17209_s30 = scalar_lea.hbm %s19853_s19, 256  ;;  %p17210_p6 = scmp.lt.u32.totalorder %s18020_s24, %s19853_s19 }
 0x14b   : > { %p19860_p8 = pneg %p19859_p5  ;;  %p17211_p13 = scmp.lt.u32.totalorder %s17209_s30, %s17204_s28 }
 0x14c   : > { %p17213_p2 = scmp.lt.u32.totalorder %s17204_s28, %s18020_s24 }
 0x14d   : > { %p17207_p11 = pnand %p17205_p4, %p19860_p8  ;;  %p17212_p0 = por %p17211_p13, %p17210_p6 }
 0x14f   : > { %p17208_p12 = pneg %p17207_p11  ;;  %p17214_p7 = por %p17213_p2, %p17212_p0 }
 0x151   : > { %p17215_p3 = pnand %p17214_p7, %p17208_p12 }
 0x153   : > { %17218 = shalt.err (!%p17215_p3)
}
 0x154   : > { %s17219_s5 = scalar_lea.vmem %s573_s17, 64  ;;  %p19861_p9 = pmov %p19860_p8 }
 0x155   : > { %p17220_p1 = scmp.ne.s32.totalorder %s573_s17, %s17219_s5  ;;  %s17499_s27 = smov [#allocation12]  }
 0x156   : > { %s17224_s10 = sshll.u32 %s17499_s27, 4  ;;  %s17225_s10 = int_to_ptr.vmem [resolvable:$false] %s17224_s10 }
 0x157   : > { %p17222_p10 = pnand %p17220_p1, %p19861_p9  ;;  %s17226_s3 = scalar_lea.vmem %s17225_s10, 128 }
 0x158   : > { %p17227_p8 = scmp.lt.s32.totalorder %s573_s17, %s17225_s10  ;;  %p17228_p11 = scmp.lt.s32.totalorder %s17226_s3, %s17219_s5 }
 0x159   : > { %p17223_p4 = pneg %p17222_p10 }
 0x15a   : > { %p17229_p6 = por %p17228_p11, %p17227_p8 }
 0x15c   : > { %p17230_p13 = pnand %p17229_p6, %p17223_p4 }
 0x15e   : > { %17233 = shalt.err (!%p17230_p13)
}
 0x15f   : > { %s19862_s22 = scalar_lea.sflag [#allocation11], %s17707_s6  ;;  %s14287_s1 = sshll.u32 %s19927_s11, 6 }
 0x160   : > { %14624 = dma.hbm_to_vmem [thread:$0]  (!%p19859_p5), %s18020_s24, 64, %s573_s17, %s19862_s22  }
 0x161   : > { %s609_s25 = scalar_lea.vmem [#allocation15], %s18046_s15  ;;  %s19863_s30 = sld [smem:[#allocation54_spill]] }
 0x162   : > { %s622_s28 = sshll.u32 %s609_s25, 4  ;;  %p19865_p0 = scmp.ne.s32.totalorder %s19832_s8, 0  ;;  %s623_s28 = int_to_ptr.vmem [resolvable:$true] %s622_s28 }
 0x164   : > { %p19866_p2 = pneg %p19865_p0 }
 0x167   : > { %s19864_s4 = smov %s19863_s30  ;;  %s620_s2 = scalar_lea.hbm %s19863_s30, %s14287_s1 }
 0x168   : > { %s17234_s5 = scalar_lea.hbm %s620_s2, 64  ;;  %s17239_s10 = scalar_lea.hbm %s19864_s4, 256 }
 0x169   : > { %p17235_p12 = scmp.ne.s32.totalorder %s620_s2, %s17234_s5  ;;  %p17240_p5 = scmp.lt.u32.totalorder %s620_s2, %s19864_s4 }
 0x16a   : > { %p17241_p1 = scmp.lt.u32.totalorder %s17239_s10, %s17234_s5  ;;  %p17243_p10 = scmp.lt.u32.totalorder %s17234_s5, %s620_s2 }
 0x16b   : > { %p17237_p7 = pnand %p17235_p12, %p19866_p2 }
 0x16c   : > { %p17242_p9 = por %p17241_p1, %p17240_p5 }
 0x16d   : > { %p17238_p3 = pneg %p17237_p7 }
 0x16e   : > { %p17244_p4 = por %p17243_p10, %p17242_p9 }
 0x170   : > { %p17245_p8 = pnand %p17244_p4, %p17238_p3 }
 0x172   : > { %17248 = shalt.err (!%p17245_p8)
}
 0x173   : > { %s17249_s11 = scalar_lea.vmem %s623_s28, 64  ;;  %p19867_p6 = pmov %p19866_p2 }
 0x174   : > { %p17250_p11 = scmp.ne.s32.totalorder %s623_s28, %s17249_s11  ;;  %s17500_s17 = smov [#allocation15]  }
 0x175   : > { %s17254_s15 = sshll.u32 %s17500_s17, 4  ;;  %s17255_s15 = int_to_ptr.vmem [resolvable:$false] %s17254_s15 }
 0x176   : > { %p17252_p13 = pnand %p17250_p11, %p19867_p6  ;;  %s17256_s22 = scalar_lea.vmem %s17255_s15, 128 }
 0x177   : > { %p17257_p2 = scmp.lt.s32.totalorder %s623_s28, %s17255_s15  ;;  %p17258_p7 = scmp.lt.s32.totalorder %s17256_s22, %s17249_s11 }
 0x178   : > { %p17253_p12 = pneg %p17252_p13 }
 0x179   : > { %p17259_p1 = por %p17258_p7, %p17257_p2 }
 0x17b   : > { %p17260_p5 = pnand %p17259_p1, %p17253_p12 }
 0x17d   : > { %17263 = shalt.err (!%p17260_p5)
}
 0x17e   : > { %s19868_s1 = scalar_lea.sflag [#allocation14], %s17707_s6  ;;  %s19869_s25 = sand.u32 1, %s17440_s23  }
 0x17f   : > { %14630 = dma.hbm_to_vmem [thread:$0]  (!%p19865_p0), %s620_s2, 64, %s623_s28, %s19868_s1  }
 0x180   : > { %s12709_s12 = sshll.u32 %s19869_s25, 2  ;;  %s14293_s20 = sshll.u32 %s19937_s14, 6 }
 0x181   : > { %s19870_s9 = sld [smem:[#allocation56_spill]]  ;;  %s659_s10 = scalar_lea.vmem [#allocation18], %s12709_s12 }
 0x182   : > { %s672_s8 = sshll.u32 %s659_s10, 4  ;;  %p19871_p9 = scmp.ne.s32.totalorder %s19843_s21, 0  ;;  %s673_s8 = int_to_ptr.vmem [resolvable:$true] %s672_s8 }
 0x184   : > { %p19872_p10 = pneg %p19871_p9 }
 0x187   : > { %s18096_s27 = scalar_lea.hbm %s19870_s9, %s14293_s20  ;;  %s17269_s2 = scalar_lea.hbm %s19870_s9, 128 }
 0x188   : > { %s17264_s3 = scalar_lea.hbm %s18096_s27, 64  ;;  %p17270_p8 = scmp.lt.u32.totalorder %s18096_s27, %s19870_s9 }
 0x189   : > { %p17265_p3 = scmp.ne.s32.totalorder %s18096_s27, %s17264_s3  ;;  %p17271_p11 = scmp.lt.u32.totalorder %s17269_s2, %s17264_s3 }
 0x18a   : > { %p17273_p13 = scmp.lt.u32.totalorder %s17264_s3, %s18096_s27 }
 0x18b   : > { %p17267_p0 = pnand %p17265_p3, %p19872_p10  ;;  %p17272_p6 = por %p17271_p11, %p17270_p8 }
 0x18d   : > { %p17268_p4 = pneg %p17267_p0  ;;  %p17274_p12 = por %p17273_p13, %p17272_p6 }
 0x18f   : > { %p17275_p2 = pnand %p17274_p12, %p17268_p4 }
 0x191   : > { %17278 = shalt.err (!%p17275_p2)
}
 0x192   : > { %s17279_s17 = scalar_lea.vmem %s673_s8, 64  ;;  %p19873_p1 = pmov %p19872_p10 }
 0x193   : > { %p17280_p7 = scmp.ne.s32.totalorder %s673_s8, %s17279_s17  ;;  %s17501_s15 = smov [#allocation18]  }
 0x194   : > { %s17284_s22 = sshll.u32 %s17501_s15, 4  ;;  %s17285_s22 = int_to_ptr.vmem [resolvable:$false] %s17284_s22 }
 0x195   : > { %p17282_p5 = pnand %p17280_p7, %p19873_p1  ;;  %s17286_s1 = scalar_lea.vmem %s17285_s22, 128 }
 0x196   : > { %p17287_p10 = scmp.lt.s32.totalorder %s673_s8, %s17285_s22  ;;  %p17288_p0 = scmp.lt.s32.totalorder %s17286_s1, %s17279_s17 }
 0x197   : > { %p17283_p3 = pneg %p17282_p5 }
 0x198   : > { %p17289_p8 = por %p17288_p0, %p17287_p10 }
 0x19a   : > { %p17290_p11 = pnand %p17289_p8, %p17283_p3 }
 0x19c   : > { %17293 = shalt.err (!%p17290_p11)
}
 0x19d   : > { %s19874_s25 = scalar_lea.sflag [#allocation17], %s17707_s6  ;;  %s19875_s12 = sld [smem:[#allocation38_spill]] }
 0x19e   : > { %14636 = dma.hbm_to_vmem [thread:$0]  (!%p19871_p9), %s18096_s27, 64, %s673_s8, %s19874_s25  }
 0x1a3   : > { %p19876_p4 = scmp.ne.s32.totalorder %s19875_s12, 0 }
 0x1a4   : > { %p19877_p6 = scmp.eq.s32.totalorder (!%p19876_p4), %s17635_s18, 0 }
 0x1a5   : > { %681 = sbr.rel (%p19876_p4) target bundleno = 3479 (0xd97), region = 64 }
 0x1ac   : > { %17399 = dma.done.wait (%p19877_p6), [#allocation5], 256   ;;  %p19878_p13 = pmov %p19877_p6 }
 0x1ad   : > { %s19879_s20 = sld [smem:[#allocation36_spill]]  ;;  %s19880_s30 = sld [smem:[#allocation43_spill]] }
 0x1ae   : > { %17401 = vsyncadd (%p19878_p13), [#allocation5], 4294967040  ;;  %s18126_s5 = sand.u32 1, %s17635_s18  }
 0x1af   : > { %s688_s6 = scalar_lea.sflag [#allocation8], %s18126_s5 }
 0x1b3   : > { %s689_s21 = sand.u32 1, %s19879_s20   ;;  %p19881_p9 = scmp.ne.s32.totalorder %s19880_s30, 0 }
 0x1b4   : > { %s14563_s10 = smul.u32 640, %s689_s21 }
 0x1b6   : > { %s18130_s3 = scalar_lea.vmem [#allocation7], %s14563_s10 }
 0x1b7   : > { %17403 = dma.done.wait (%p19881_p9), %s688_s6, 10320  }
 0x1b8   : > { %17405 = vsyncadd (%p19881_p9), %s688_s6, 4294956976  ;;  %s19882_s27 = sld [smem:[#allocation35_spill]]  ;;  %s18136_s8 = smul.u32 5, %s689_s21 }
 0x1b9   : > { %s706_s24 = scalar_lea.sflag [#allocation11], %s18126_s5  ;;  %p19883_p12 = scmp.ne.s32.totalorder %s19820_s13, 0 }
 0x1ba   : > { %s700_s2 = scalar_lea.vmem [#allocation9], %s18136_s8 }
 0x1be   : > { %s707_s28 = sand.u32 1, %s19882_s27  }
 0x1bf   : > { %s14565_s14 = smul.u32 2560, %s707_s28 }
 0x1c1   : > { %s18141_s11 = scalar_lea.vmem [#allocation10], %s14565_s14 }
 0x1c2   : > { %17407 = dma.done.wait (%p19883_p12), %s706_s24, 41024  }
 0x1c3   : > { %17409 = vsyncadd (%p19883_p12), %s706_s24, 4294926272  ;;  %s19884_s17 = sld [smem:[#allocation34_spill]]  ;;  %s19885_s15 = sld [smem:[#allocation45_spill]] }
 0x1c4   : > { %s18147_s22 = sshll.u32 %s707_s28, 2  ;;  %s724_s20 = scalar_lea.sflag [#allocation14], %s18126_s5 }
 0x1c5   : > { %s718_s12 = scalar_lea.vmem [#allocation12], %s18147_s22 }
 0x1c9   : > { %s725_s1 = sand.u32 1, %s19884_s17   ;;  %p19886_p2 = scmp.ne.s32.totalorder %s19885_s15, 0 }
 0x1ca   : > { %s12721_s25 = sshll.u32 %s725_s1, 12 }
 0x1cb   : > { %s18152_s30 = scalar_lea.vmem [#allocation13], %s12721_s25 }
 0x1cc   : > { %17411 = dma.done.wait (%p19886_p2), %s724_s20, 65600  }
 0x1cd   : > { %17413 = vsyncadd (%p19886_p2), %s724_s20, 4294901696  ;;  %s19887_s21 = sld [smem:[#allocation33_spill]]  ;;  %s19888_s13 = sld [smem:[#allocation47_spill]] }
 0x1ce   : > { %s18158_s10 = sshll.u32 %s725_s1, 2  ;;  %s742_s14 = scalar_lea.sflag [#allocation17], %s18126_s5 }
 0x1cf   : > { %s736_s28 = scalar_lea.vmem [#allocation15], %s18158_s10 }
 0x1d3   : > { %s743_s6 = sand.u32 1, %s19887_s21   ;;  %p19889_p7 = scmp.ne.s32.totalorder %s19888_s13, 0 }
 0x1d4   : > { %s12723_s27 = sshll.u32 %s743_s6, 12 }
 0x1d5   : > { %s18163_s24 = scalar_lea.vmem [#allocation16], %s12723_s27 }
 0x1d6   : > { %17415 = dma.done.wait (%p19889_p7), %s742_s14, 65600  }
 0x1d7   : > { %17417 = vsyncadd (%p19889_p7), %s742_s14, 4294901696  ;;  %s18169_s17 = sshll.u32 %s743_s6, 2  ;;  %p19890_p1 = pmov %p19877_p6 }
 0x1d8   : > { %s754_s15 = scalar_lea.vmem [#allocation18], %s18169_s17 }
 0x1d9   : > { %17419 = dma.done.wait (%p19890_p1), [#allocation20], 8208   ;;  %p19891_p5 = pmov %p19890_p1 }
 0x1da   : > { %p12727_p3 = scmp.ge.s32.totalorder %s17635_s18, 2 }
 0x1db   : > { %17421 = vsyncadd (%p19891_p5), [#allocation20], 4294959088  ;;  %v14766_v0 = vld [vmem:[%s18130_s3 + $0x4] ss:$20 sps:$4 sm:$0xff] (!%p12727_p3)   ;;  %v14768_v1 = vld [vmem:[%s18130_s3] ss:$20 sps:$4 sm:$0xff] (!%p12727_p3)  }
 0x1dc   : > { %883 = sbr.rel (%p12727_p3) target bundleno = 790 (0x316), region = 112  ;;  %1427 = vmatprep.subr.bf16.mxu0 (!%p12727_p3), %v14766_v0  ;;  %v14769_v2 = vld [vmem:[%s18130_s3 + $0x2c] ss:$20 sps:$4 sm:$0xff] (!%p12727_p3)   ;;  %v14771_v3 = vld [vmem:[%s18130_s3 + $0x28] ss:$20 sps:$4 sm:$0xff] (!%p12727_p3)   ;;  %v884_v60 = vld [vmem:[#allocation4] sm:$0xff] (!%p12727_p3) }
 0x1dd   : > { %1428 = vmatpush1.bf16.msra.mxu0 (!%p12727_p3), %v14768_v1  ;;  %v14772_v4 = vld [vmem:[%s18130_s3 + $0x54] ss:$20 sps:$4 sm:$0xff] (!%p12727_p3)   ;;  %v14774_v5 = vld [vmem:[%s18130_s3 + $0x50] ss:$20 sps:$4 sm:$0xff] (!%p12727_p3)   ;;  %v14777_v7 = vld [vmem:[%s18130_s3 + $0x78] ss:$20 sps:$4 sm:$0xff] (!%p12727_p3)   ;;  %v886_v63 = vpack.c.bf16 (!%p12727_p3), %v884_v60, %v884_v60 }
 0x1de   : > { %1429 = vmatprep.subr.bf16.mxu0 (!%p12727_p3), %v14769_v2  ;;  %v14775_v6 = vld [vmem:[%s18130_s3 + $0x7c] ss:$20 sps:$4 sm:$0xff] (!%p12727_p3)   ;;  %v14790_v8 = vld [vmem:[%s18130_s3 + $0xc] ss:$20 sps:$4 sm:$0xff] (!%p12727_p3)   ;;  %v14778_v9 = vld [vmem:[%s18130_s3 + $0xa4] ss:$20 sps:$4 sm:$0xff] (!%p12727_p3)  }
 0x1df   : > { %v14794_v10 = vld [vmem:[%s18130_s3 + $0x8] ss:$20 sps:$4 sm:$0xff] (!%p12727_p3)   ;;  %1468 = vmatprep.subr.bf16.mxu1 (!%p12727_p3), %v14790_v8  ;;  %v14780_v12 = vld [vmem:[%s18130_s3 + $0xa0] ss:$20 sps:$4 sm:$0xff] (!%p12727_p3)   ;;  %v14800_v14 = vld [vmem:[%s18130_s3 + $0x30] ss:$20 sps:$4 sm:$0xff] (!%p12727_p3)  }
 0x1e0   : > { %1469 = vmatpush1.bf16.msra.mxu1 (!%p12727_p3), %v14794_v10  ;;  %v14796_v11 = vld [vmem:[%s18130_s3 + $0x34] ss:$20 sps:$4 sm:$0xff] (!%p12727_p3)   ;;  %v14781_v13 = vld [vmem:[%s18130_s3 + $0xcc] ss:$20 sps:$4 sm:$0xff] (!%p12727_p3)   ;;  %v14802_v15 = vld [vmem:[%s18130_s3 + $0x5c] ss:$20 sps:$4 sm:$0xff] (!%p12727_p3)  }
 0x1e1   : > { %1430 = vmatpush1.bf16.msra.mxu0 (!%p12727_p3), %v14771_v3  ;;  %1470 = vmatprep.subr.bf16.mxu1 (!%p12727_p3), %v14796_v11  ;;  %v14783_v16 = vld [vmem:[%s18130_s3 + $0xc8] ss:$20 sps:$4 sm:$0xff] (!%p12727_p3)   ;;  %v14806_v17 = vld [vmem:[%s18130_s3 + $0x58] ss:$20 sps:$4 sm:$0xff] (!%p12727_p3)   ;;  %v14812_v20 = vld [vmem:[%s18130_s3 + $0x80] ss:$20 sps:$4 sm:$0xff] (!%p12727_p3)  }
 0x1e2   : > { %1431 = vmatprep.subr.bf16.mxu0 (!%p12727_p3), %v14772_v4  ;;  %v14808_v18 = vld [vmem:[%s18130_s3 + $0x84] ss:$20 sps:$4 sm:$0xff] (!%p12727_p3)   ;;  %v14784_v19 = vld [vmem:[%s18130_s3 + $0xf4] ss:$20 sps:$4 sm:$0xff] (!%p12727_p3)   ;;  %v14814_v22 = vld [vmem:[%s18130_s3 + $0xac] ss:$20 sps:$4 sm:$0xff] (!%p12727_p3)  }
 0x1e3   : > { %v14786_v21 = vld [vmem:[%s18130_s3 + $0xf0] ss:$20 sps:$4 sm:$0xff]   ;;  %v14789_v24 = vld [vmem:[%s18130_s3 + $0x118] ss:$20 sps:$4 sm:$0xff]   ;;  %v14818_v25 = vld [vmem:[%s18130_s3 + $0xa8] ss:$20 sps:$4 sm:$0xff]  }
 0x1e4   : > { %1471 = vmatpush1.bf16.msra.mxu1 %v14800_v14  ;;  %v14787_v23 = vld [vmem:[%s18130_s3 + $0x11c] ss:$20 sps:$4 sm:$0xff]   ;;  %v14820_v26 = vld [vmem:[%s18130_s3 + $0xd4] ss:$20 sps:$4 sm:$0xff]   ;;  %v14792_v27 = vld [vmem:[%s18130_s3 + $0x144] ss:$20 sps:$4 sm:$0xff]  }
 0x1e5   : > { %1432 = vmatpush1.bf16.msra.mxu0 %v14774_v5  ;;  %1472 = vmatprep.subr.bf16.mxu1 %v14802_v15  ;;  %v14824_v28 = vld [vmem:[%s18130_s3 + $0xd0] ss:$20 sps:$4 sm:$0xff]   ;;  %v14795_v29 = vld [vmem:[%s18130_s3 + $0x140] ss:$20 sps:$4 sm:$0xff]   ;;  %v885_v32 = vld [vmem:[#allocation4 + $0x8] sm:$0xff]  ;;  %s1549_s5 = smul.u32 640, %s17635_s18 }
 0x1e6   : > { %1433 = vmatprep.subr.bf16.mxu0 %v14775_v6  ;;  %v14798_v30 = vld [vmem:[%s18130_s3 + $0x16c] ss:$20 sps:$4 sm:$0xff]   ;;  %v14826_v31 = vld [vmem:[%s18130_s3 + $0xfc] ss:$20 sps:$4 sm:$0xff]   ;;  %v18212_v34 = vpack.c.bf16 %v885_v32, %v885_v32  ;;  %v14832_v36 = vld [vmem:[%s18130_s3 + $0x124] ss:$20 sps:$4 sm:$0xff]  }
 0x1e7   : > { %v14801_v33 = vld [vmem:[%s18130_s3 + $0x168] ss:$20 sps:$4 sm:$0xff]   ;;  %v14830_v35 = vld [vmem:[%s18130_s3 + $0xf8] ss:$20 sps:$4 sm:$0xff]   ;;  %v14807_v38 = vld [vmem:[%s18130_s3 + $0x190] ss:$20 sps:$4 sm:$0xff]  }
 0x1e8   : > { %1473 = vmatpush1.bf16.msra.mxu1 %v14806_v17  ;;  %v14804_v37 = vld [vmem:[%s18130_s3 + $0x194] ss:$20 sps:$4 sm:$0xff]   ;;  %1459 = vmatprep.mubr.bf16.mxu0 %v18212_v34  ;;  %v14838_v40 = vld [vmem:[%s18130_s3 + $0x14c] ss:$20 sps:$4 sm:$0xff]   ;;  %v14810_v41 = vld [vmem:[%s18130_s3 + $0x1bc] ss:$20 sps:$4 sm:$0xff]  }
 0x1e9   : > { %1434 = vmatpush1.bf16.msra.mxu0 %v14777_v7  ;;  %1474 = vmatprep.subr.bf16.mxu1 %v14808_v18  ;;  %v14836_v39 = vld [vmem:[%s18130_s3 + $0x120] ss:$20 sps:$4 sm:$0xff]   ;;  %v14840_v42 = vld [vmem:[%s18130_s3 + $0x148] ss:$20 sps:$4 sm:$0xff]   ;;  %v14813_v43 = vld [vmem:[%s18130_s3 + $0x1b8] ss:$20 sps:$4 sm:$0xff]  }
 0x1ea   : > { %1435 = vmatprep.subr.bf16.mxu0 %v14778_v9  ;;  %1500 = vmatprep.mubr.bf16.mxu1 %v18212_v34  ;;  %v14843_v44 = vld [vmem:[%s18130_s3 + $0x174] ss:$20 sps:$4 sm:$0xff]   ;;  %v14816_v45 = vld [vmem:[%s18130_s3 + $0x1e4] ss:$20 sps:$4 sm:$0xff]   ;;  %v14848_v48 = vld [vmem:[%s18130_s3 + $0x19c] ss:$20 sps:$4 sm:$0xff]  }
 0x1eb   : > { %v14819_v46 = vld [vmem:[%s18130_s3 + $0x1e0] ss:$20 sps:$4 sm:$0xff]   ;;  %v14845_v47 = vld [vmem:[%s18130_s3 + $0x170] ss:$20 sps:$4 sm:$0xff]   ;;  %v14825_v50 = vld [vmem:[%s18130_s3 + $0x208] ss:$20 sps:$4 sm:$0xff]  }
 0x1ec   : > { %1475 = vmatpush1.bf16.msra.mxu1 %v14812_v20  ;;  %v14822_v49 = vld [vmem:[%s18130_s3 + $0x20c] ss:$20 sps:$4 sm:$0xff]   ;;  %v14853_v52 = vld [vmem:[%s18130_s3 + $0x1c4] ss:$20 sps:$4 sm:$0xff]   ;;  %v14828_v53 = vld [vmem:[%s18130_s3 + $0x234] ss:$20 sps:$4 sm:$0xff]   ;;  %v986_v20 = vlaneseq }
 0x1ed   : > { %1436 = vmatpush1.bf16.msra.mxu0 %v14780_v12  ;;  %1476 = vmatprep.subr.bf16.mxu1 %v14814_v22  ;;  %v14850_v51 = vld [vmem:[%s18130_s3 + $0x198] ss:$20 sps:$4 sm:$0xff]   ;;  %v14831_v54 = vld [vmem:[%s18130_s3 + $0x230] ss:$20 sps:$4 sm:$0xff]   ;;  %v14855_v55 = vld [vmem:[%s18130_s3 + $0x1c0] ss:$20 sps:$4 sm:$0xff]  }
 0x1ee   : > { %1437 = vmatprep.subr.bf16.mxu0 %v14781_v13  ;;  %v14858_v56 = vld [vmem:[%s18130_s3 + $0x1ec] ss:$20 sps:$4 sm:$0xff]   ;;  %v14834_v57 = vld [vmem:[%s18130_s3 + $0x25c] ss:$20 sps:$4 sm:$0xff]   ;;  %v14863_v61 = vld [vmem:[%s18130_s3 + $0x214] ss:$20 sps:$4 sm:$0xff]  }
 0x1ef   : > { %v14860_v58 = vld [vmem:[%s18130_s3 + $0x1e8] ss:$20 sps:$4 sm:$0xff]   ;;  %v14837_v59 = vld [vmem:[%s18130_s3 + $0x258] ss:$20 sps:$4 sm:$0xff]   ;;  %v14841_v62 = vld [vmem:[%s18130_s3 + $0x150] ss:$20 sps:$4 sm:$0xff]  }
 0x1f0   : > { %1477 = vmatpush1.bf16.msra.mxu1 %v14818_v25  ;;  %v14865_v0 = vld [vmem:[%s18130_s3 + $0x210] ss:$20 sps:$4 sm:$0xff]   ;;  %v14846_v3 = vld [vmem:[%s18130_s3 + $0x178] ss:$20 sps:$4 sm:$0xff]   ;;  %v14851_v7 = vld [vmem:[%s18130_s3 + $0x1a0] ss:$20 sps:$4 sm:$0xff]  }
 0x1f1   : > { %1438 = vmatpush1.bf16.msra.mxu0 %v14783_v16  ;;  %1478 = vmatprep.subr.bf16.mxu1 %v14820_v26  ;;  %v14842_v1 = vld [vmem:[%s18130_s3 + $0x10] ss:$20 sps:$4 sm:$0xff]   ;;  %v14870_v4 = vld [vmem:[%s18130_s3 + $0x238] ss:$20 sps:$4 sm:$0xff]   ;;  %v14875_v8 = vld [vmem:[%s18130_s3 + $0x260] ss:$20 sps:$4 sm:$0xff]  }
 0x1f2   : > { %1439 = vmatprep.subr.bf16.mxu0 %v14784_v19  ;;  %v14868_v2 = vld [vmem:[%s18130_s3 + $0x23c] ss:$20 sps:$4 sm:$0xff]   ;;  %v14847_v5 = vld [vmem:[%s18130_s3 + $0x38] ss:$20 sps:$4 sm:$0xff]   ;;  %v14852_v9 = vld [vmem:[%s18130_s3 + $0x60] ss:$20 sps:$4 sm:$0xff]  }
 0x1f3   : > { %v14873_v6 = vld [vmem:[%s18130_s3 + $0x264] ss:$20 sps:$4 sm:$0xff]   ;;  %v14856_v10 = vld [vmem:[%s18130_s3 + $0x1c8] ss:$20 sps:$4 sm:$0xff]   ;;  %v14871_v16 = vld [vmem:[%s18130_s3 + $0x240] ss:$20 sps:$4 sm:$0xff]  }
 0x1f4   : > { %1479 = vmatpush1.bf16.msra.mxu1 %v14824_v28  ;;  %v14857_v11 = vld [vmem:[%s18130_s3 + $0x88] ss:$20 sps:$4 sm:$0xff]   ;;  %v14861_v12 = vld [vmem:[%s18130_s3 + $0x1f0] ss:$20 sps:$4 sm:$0xff]   ;;  %v14866_v14 = vld [vmem:[%s18130_s3 + $0x218] ss:$20 sps:$4 sm:$0xff]  }
 0x1f5   : > { %1440 = vmatpush1.bf16.msra.mxu0 %v14786_v21  ;;  %1480 = vmatprep.subr.bf16.mxu1 %v14826_v31  ;;  %v14862_v13 = vld [vmem:[%s18130_s3 + $0xb0] ss:$20 sps:$4 sm:$0xff]   ;;  %v14867_v15 = vld [vmem:[%s18130_s3 + $0xd8] ss:$20 sps:$4 sm:$0xff]   ;;  %v14872_v17 = vld [vmem:[%s18130_s3 + $0x100] ss:$20 sps:$4 sm:$0xff]  }
 0x1f6   : > { %1441 = vmatprep.subr.bf16.mxu0 %v14787_v23  ;;  %v14876_v18 = vld [vmem:[%s18130_s3 + $0x268] ss:$20 sps:$4 sm:$0xff]   ;;  %v987_v21 = vshrl.u32 %v986_v20, 7  ;;  %s1550_s1 = sshra.s32 %s1549_s5, 7 }
 0x1f7   : > { %v14877_v19 = vld [vmem:[%s18130_s3 + $0x128] ss:$20 sps:$4 sm:$0xff]   ;;  %s12808_s25 = sshll.u32 %s1550_s1, 3 }
 0x1f8   : > { %1481 = vmatpush1.bf16.msra.mxu1 %v14830_v35  ;;  %v988_v22 = vsub.s32 0, %v987_v21  ;;  %v984_v23 = vld [vmem:[%s700_s2] sm:$0x1f]  ;;  %s1553_s3 = scalar_lea.vmem [#allocation2], %s12808_s25 }
 0x1f9   : > { %1442 = vmatpush1.bf16.msra.mxu0 %v14789_v24  ;;  %1482 = vmatprep.subr.bf16.mxu1 %v14832_v36  ;;  %v992_v24 = vsub.s32 1, %v987_v21 }
 0x1fa   : > { %1443 = vmatprep.subr.bf16.mxu0 %v14792_v27  ;;  %v989_v25 = vrot.slane %v984_v23, %v988_v22 }
 0x1fb   : > { %v993_v26 = vrot.slane %v984_v23, %v992_v24 }
 0x1fc   : > { %1483 = vmatpush1.bf16.msra.mxu1 %v14836_v39 }
 0x1fd   : > { %1444 = vmatpush1.bf16.msra.mxu0 %v14795_v29  ;;  %1484 = vmatprep.subr.bf16.mxu1 %v14838_v40 }
 0x1fe   : > { %1445 = vmatprep.subr.bf16.mxu0 %v14798_v30 }
 0x200   : > { %1485 = vmatpush1.bf16.msra.mxu1 %v14840_v42 }
 0x201   : > { %1446 = vmatpush1.bf16.msra.mxu0 %v14801_v33  ;;  %1486 = vmatprep.subr.bf16.mxu1 %v14843_v44  ;;  %v996_v33 = vsub.s32 2, %v987_v21 }
 0x202   : > { %1447 = vmatprep.subr.bf16.mxu0 %v14804_v37 }
 0x203   : > { %v997_v35 = vrot.slane %v984_v23, %v996_v33 }
 0x204   : > { %1487 = vmatpush1.bf16.msra.mxu1 %v14845_v47 }
 0x205   : > { %1448 = vmatpush1.bf16.msra.mxu0 %v14807_v38  ;;  %1488 = vmatprep.subr.bf16.mxu1 %v14848_v48 }
 0x206   : > { %1449 = vmatprep.subr.bf16.mxu0 %v14810_v41 }
 0x208   : > { %1489 = vmatpush1.bf16.msra.mxu1 %v14850_v51 }
 0x209   : > { %1450 = vmatpush1.bf16.msra.mxu0 %v14813_v43  ;;  %1490 = vmatprep.subr.bf16.mxu1 %v14853_v52  ;;  %v1004_v43 = vsub.s32 4, %v987_v21 }
 0x20a   : > { %1451 = vmatprep.subr.bf16.mxu0 %v14816_v45 }
 0x20b   : > { %v1005_v45 = vrot.slane %v984_v23, %v1004_v43 }
 0x20c   : > { %1491 = vmatpush1.bf16.msra.mxu1 %v14855_v55 }
 0x20d   : > { %1452 = vmatpush1.bf16.msra.mxu0 %v14819_v46  ;;  %1492 = vmatprep.subr.bf16.mxu1 %v14858_v56 }
 0x20e   : > { %1453 = vmatprep.subr.bf16.mxu0 %v14822_v49 }
 0x210   : > { %1493 = vmatpush1.bf16.msra.mxu1 %v14860_v58 }
 0x211   : > { %1454 = vmatpush1.bf16.msra.mxu0 %v14825_v50  ;;  %1494 = vmatprep.subr.bf16.mxu1 %v14863_v61 }
 0x212   : > { %1455 = vmatprep.subr.bf16.mxu0 %v14828_v53 }
 0x214   : > { %1495 = vmatpush1.bf16.msra.mxu1 %v14865_v0 }
 0x215   : > { %1456 = vmatpush1.bf16.msra.mxu0 %v14831_v54  ;;  %1496 = vmatprep.subr.bf16.mxu1 %v14868_v2 }
 0x216   : > { %1457 = vmatprep.subr.bf16.mxu0 %v14834_v57 }
 0x218   : > { %1497 = vmatpush1.bf16.msra.mxu1 %v14870_v4 }
 0x219   : > { %1458 = vmatpush1.bf16.msra.mxu0 %v14837_v59  ;;  %1498 = vmatprep.subr.bf16.mxu1 %v14873_v6 }
 0x21a   : > { %14294 = vmatprep.subr.bf16.mxu0 %v14841_v62 }
 0x21c   : > { %1460 = vmatmul.mubr.bf16.vlgmr.msra.gmra.mrb[0].mxu0 %v886_v63  ;;  %1499 = vmatpush1.bf16.msra.mxu1 %v14875_v8 }
 0x21d   : > { %14295 = vmatpush3.bf16.msra.mxu0 %v14842_v1  ;;  %1541 = vmatprep.mubr.bf16.mxu0 %v18212_v34  ;;  %v1000_v34 = vsub.s32 3, %v987_v21 }
 0x21e   : > { %14296 = vmatprep.subr.bf16.mxu0 %v14846_v3 }
 0x21f   : > { %1501 = vmatmul.mubr.bf16.vlgmr.msra.gmra.mrb[0].mxu1 %v886_v63  ;;  %v1001_v36 = vrot.slane %v984_v23, %v1000_v34 }
 0x221   : > { %14297 = vmatpush3.bf16.msra.mxu0 %v14847_v5 }
 0x222   : > { %14298 = vmatprep.subr.bf16.mxu0 %v14851_v7 }
 0x225   : > { %14299 = vmatpush3.bf16.msra.mxu0 %v14852_v9 }
 0x226   : > { %14300 = vmatprep.subr.bf16.mxu0 %v14856_v10 }
 0x229   : > { %14301 = vmatpush3.bf16.msra.mxu0 %v14857_v11 }
 0x22a   : > { %14302 = vmatprep.subr.bf16.mxu0 %v14861_v12 }
 0x22d   : > { %14303 = vmatpush3.bf16.msra.mxu0 %v14862_v13 }
 0x22e   : > { %14304 = vmatprep.subr.bf16.mxu0 %v14866_v14 }
 0x231   : > { %14305 = vmatpush3.bf16.msra.mxu0 %v14867_v15 }
 0x232   : > { %14306 = vmatprep.subr.bf16.mxu0 %v14871_v16 }
 0x235   : > { %14307 = vmatpush3.bf16.msra.mxu0 %v14872_v17 }
 0x236   : > { %14308 = vmatprep.subr.bf16.mxu0 %v14876_v18 }
 0x239   : > { %14309 = vmatpush3.bf16.msra.mxu0 %v14877_v19 }
 0x23c   : > { %1542 = vmatmul.mubr.bf16.vlgmr.msra.gmra.mrb[4].mxu0 %v886_v63 }
 0x2ef   : > { %v1461_v27 = vpop.f32.mrb[0].mxu0 }
 0x2f0   : > { %v1462_v28 = vadd.f32 %v1461_v27, %v989_v25  ;;  %v1463_v29 = vpop.f32.mrb[1].mxu0 }
 0x2f1   : > { %v1464_v30 = vadd.f32 %v1463_v29, %v993_v26  ;;  %v1465_v31 = vpop.f32.mrb[2].mxu0 }
 0x2f2   : > { %1554 = vst [vmem:[%s1553_s3] sm:$0xff] %v1462_v28  ;;  %v1466_v32 = vpop.f32.mrb[3].mxu0  ;;  %v1502_v37 = vpop.f32.mrb[0].mxu1 }
 0x2f3   : > { %1555 = vst [vmem:[%s1553_s3 + $0x8] sm:$0xff] %v1464_v30  ;;  %v1503_v38 = vadd.f32 %v1502_v37, %v997_v35  ;;  %v1504_v39 = vpop.f32.mrb[1].mxu1 }
 0x2f4   : > { %v1505_v40 = vadd.f32 %v1504_v39, %v1001_v36  ;;  %v1506_v41 = vpop.f32.mrb[2].mxu1 }
 0x2f5   : > { %1556 = vst [vmem:[%s1553_s3 + $0x10] sm:$0xff] %v1503_v38  ;;  %v1507_v42 = vpop.f32.mrb[3].mxu1 }
 0x2f6   : > { %1557 = vst [vmem:[%s1553_s3 + $0x18] sm:$0xff] %v1505_v40 }
 0x30f   : > { %v14310_v44 = vpop.f32.mrb[4].mxu0 }
 0x310   : > { %v14311_v46 = vpop.f32.mrb[5].mxu0 }
 0x311   : > { %v14312_v47 = vadd.f32 %v14311_v46, %v14310_v44  ;;  %v14313_v48 = vpop.f32.mrb[6].mxu0 }
 0x312   : > { %v14314_v49 = vpop.f32.mrb[7].mxu0 }
 0x313   : > { %v1544_v50 = vadd.f32 %v14312_v47, %v1005_v45 }
 0x315   : > { %1558 = vst [vmem:[%s1553_s3 + $0x20] sm:$0xff] %v1544_v50 }
 0x316 PF: > { %p1560_p10 = scmp.lt.s32.totalorder %s17635_s18, 6 }
 0x318   : > { %p1561_p0 = pnand %p12727_p3, %p1560_p10 }
 0x319   : > { %v14878_v51 = vld [vmem:[%s18141_s11 + $0x4] ss:$16 sps:$4 sm:$0xff] (!%p1561_p0)   ;;  %v14880_v52 = vld [vmem:[%s18141_s11 + $0xc] ss:$16 sps:$4 sm:$0xff] (!%p1561_p0)   ;;  %v14882_v53 = vld [vmem:[%s18141_s11] ss:$16 sps:$4 sm:$0xff] (!%p1561_p0)  }
 0x31a   : > { %1564 = sbr.rel (%p1561_p0) target bundleno = 1332 (0x534), region = 116  ;;  %3527 = vmatprep.subr.bf16.mxu0 (!%p1561_p0), %v14878_v51  ;;  %v14883_v54 = vld [vmem:[%s18141_s11 + $0x8] ss:$16 sps:$4 sm:$0xff] (!%p1561_p0)   ;;  %3732 = vmatprep.subr.bf16.mxu1 (!%p1561_p0), %v14880_v52  ;;  %v14884_v55 = vld [vmem:[%s18141_s11 + $0x24] ss:$16 sps:$4 sm:$0xff] (!%p1561_p0)   ;;  %s13129_s8 = sadd.s32 (!%p1561_p0), 4294967294, %s17635_s18 }
 0x31b   : > { %3528 = vmatpush1.bf16.msra.mxu0 (!%p1561_p0), %v14882_v53  ;;  %3733 = vmatpush1.bf16.msra.mxu1 (!%p1561_p0), %v14883_v54  ;;  %v14886_v56 = vld [vmem:[%s18141_s11 + $0x2c] ss:$16 sps:$4 sm:$0xff] (!%p1561_p0)   ;;  %v14888_v57 = vld [vmem:[%s18141_s11 + $0x20] ss:$16 sps:$4 sm:$0xff] (!%p1561_p0)   ;;  %v14889_v58 = vld [vmem:[%s18141_s11 + $0x28] ss:$16 sps:$4 sm:$0xff] (!%p1561_p0)  }
 0x31c   : > { %3529 = vmatprep.subr.bf16.mxu0 (!%p1561_p0), %v14884_v55  ;;  %3734 = vmatprep.subr.bf16.mxu1 (!%p1561_p0), %v14886_v56  ;;  %v14890_v59 = vld [vmem:[%s18141_s11 + $0x44] ss:$16 sps:$4 sm:$0xff] (!%p1561_p0)   ;;  %v14892_v60 = vld [vmem:[%s18141_s11 + $0x4c] ss:$16 sps:$4 sm:$0xff] (!%p1561_p0)   ;;  %v14894_v61 = vld [vmem:[%s18141_s11 + $0x40] ss:$16 sps:$4 sm:$0xff] (!%p1561_p0)  }
 0x31d   : > { %v14895_v62 = vld [vmem:[%s18141_s11 + $0x48] ss:$16 sps:$4 sm:$0xff] (!%p1561_p0)   ;;  %v14896_v63 = vld [vmem:[%s18141_s11 + $0x64] ss:$16 sps:$4 sm:$0xff] (!%p1561_p0)   ;;  %v14898_v0 = vld [vmem:[%s18141_s11 + $0x6c] ss:$16 sps:$4 sm:$0xff] (!%p1561_p0)  }
 0x31e   : > { %v14900_v1 = vld [vmem:[%s18141_s11 + $0x60] ss:$16 sps:$4 sm:$0xff] (!%p1561_p0)   ;;  %v14901_v2 = vld [vmem:[%s18141_s11 + $0x68] ss:$16 sps:$4 sm:$0xff] (!%p1561_p0)   ;;  %v14902_v3 = vld [vmem:[%s18141_s11 + $0x84] ss:$16 sps:$4 sm:$0xff] (!%p1561_p0)  }
 0x31f   : > { %3530 = vmatpush1.bf16.msra.mxu0 (!%p1561_p0), %v14888_v57  ;;  %3735 = vmatpush1.bf16.msra.mxu1 (!%p1561_p0), %v14889_v58  ;;  %v14904_v4 = vld [vmem:[%s18141_s11 + $0x8c] ss:$16 sps:$4 sm:$0xff] (!%p1561_p0)   ;;  %v14906_v5 = vld [vmem:[%s18141_s11 + $0x80] ss:$16 sps:$4 sm:$0xff] (!%p1561_p0)   ;;  %v14907_v6 = vld [vmem:[%s18141_s11 + $0x88] ss:$16 sps:$4 sm:$0xff] (!%p1561_p0)  }
 0x320   : > { %3531 = vmatprep.subr.bf16.mxu0 (!%p1561_p0), %v14890_v59  ;;  %3736 = vmatprep.subr.bf16.mxu1 (!%p1561_p0), %v14892_v60  ;;  %v14908_v7 = vld [vmem:[%s18141_s11 + $0xa4] ss:$16 sps:$4 sm:$0xff] (!%p1561_p0)   ;;  %v14910_v8 = vld [vmem:[%s18141_s11 + $0xac] ss:$16 sps:$4 sm:$0xff] (!%p1561_p0)   ;;  %v14912_v9 = vld [vmem:[%s18141_s11 + $0xa0] ss:$16 sps:$4 sm:$0xff] (!%p1561_p0)  }
 0x321   : > { %v14913_v10 = vld [vmem:[%s18141_s11 + $0xa8] ss:$16 sps:$4 sm:$0xff]   ;;  %v14914_v11 = vld [vmem:[%s18141_s11 + $0xc4] ss:$16 sps:$4 sm:$0xff]   ;;  %v14916_v12 = vld [vmem:[%s18141_s11 + $0xcc] ss:$16 sps:$4 sm:$0xff]  }
 0x322   : > { %v14918_v13 = vld [vmem:[%s18141_s11 + $0xc0] ss:$16 sps:$4 sm:$0xff]   ;;  %v14919_v14 = vld [vmem:[%s18141_s11 + $0xc8] ss:$16 sps:$4 sm:$0xff]   ;;  %v14920_v15 = vld [vmem:[%s18141_s11 + $0xe4] ss:$16 sps:$4 sm:$0xff]  }
 0x323   : > { %3532 = vmatpush1.bf16.msra.mxu0 %v14894_v61  ;;  %3737 = vmatpush1.bf16.msra.mxu1 %v14895_v62  ;;  %v14922_v16 = vld [vmem:[%s18141_s11 + $0xec] ss:$16 sps:$4 sm:$0xff]   ;;  %v14924_v17 = vld [vmem:[%s18141_s11 + $0xe0] ss:$16 sps:$4 sm:$0xff]   ;;  %v14925_v18 = vld [vmem:[%s18141_s11 + $0xe8] ss:$16 sps:$4 sm:$0xff]  }
 0x324   : > { %3533 = vmatprep.subr.bf16.mxu0 %v14896_v63  ;;  %3738 = vmatprep.subr.bf16.mxu1 %v14898_v0  ;;  %v14926_v19 = vld [vmem:[%s18141_s11 + $0x104] ss:$16 sps:$4 sm:$0xff]   ;;  %v14928_v20 = vld [vmem:[%s18141_s11 + $0x10c] ss:$16 sps:$4 sm:$0xff]   ;;  %v14930_v21 = vld [vmem:[%s18141_s11 + $0x100] ss:$16 sps:$4 sm:$0xff]  }
 0x325   : > { %v14931_v22 = vld [vmem:[%s18141_s11 + $0x108] ss:$16 sps:$4 sm:$0xff]   ;;  %v14932_v23 = vld [vmem:[%s18141_s11 + $0x124] ss:$16 sps:$4 sm:$0xff]   ;;  %v14934_v24 = vld [vmem:[%s18141_s11 + $0x12c] ss:$16 sps:$4 sm:$0xff]  }
 0x326   : > { %v14936_v25 = vld [vmem:[%s18141_s11 + $0x120] ss:$16 sps:$4 sm:$0xff]   ;;  %v14937_v26 = vld [vmem:[%s18141_s11 + $0x128] ss:$16 sps:$4 sm:$0xff]   ;;  %v14938_v27 = vld [vmem:[%s18141_s11 + $0x144] ss:$16 sps:$4 sm:$0xff]  }
 0x327   : > { %3534 = vmatpush1.bf16.msra.mxu0 %v14900_v1  ;;  %3739 = vmatpush1.bf16.msra.mxu1 %v14901_v2  ;;  %v14940_v28 = vld [vmem:[%s18141_s11 + $0x14c] ss:$16 sps:$4 sm:$0xff]   ;;  %v14942_v29 = vld [vmem:[%s18141_s11 + $0x140] ss:$16 sps:$4 sm:$0xff]   ;;  %v14943_v30 = vld [vmem:[%s18141_s11 + $0x148] ss:$16 sps:$4 sm:$0xff]  }
 0x328   : > { %3535 = vmatprep.subr.bf16.mxu0 %v14902_v3  ;;  %3740 = vmatprep.subr.bf16.mxu1 %v14904_v4  ;;  %v14944_v31 = vld [vmem:[%s18141_s11 + $0x164] ss:$16 sps:$4 sm:$0xff]   ;;  %v14946_v32 = vld [vmem:[%s18141_s11 + $0x16c] ss:$16 sps:$4 sm:$0xff]   ;;  %v14948_v34 = vld [vmem:[%s18141_s11 + $0x160] ss:$16 sps:$4 sm:$0xff]  }
 0x329   : > { %v1566_v33 = vld [vmem:[#allocation2 + $0x8] sm:$0xff]  ;;  %v14949_v36 = vld [vmem:[%s18141_s11 + $0x168] ss:$16 sps:$4 sm:$0xff]   ;;  %s13130_s2 = sshll.u32 %s13129_s8, 9 }
 0x32a   : > { %v1576_v35 = vpack.c.bf16 %v1566_v33, %v1566_v33  ;;  %v14950_v37 = vld [vmem:[%s18141_s11 + $0x184] ss:$16 sps:$4 sm:$0xff]   ;;  %v14952_v38 = vld [vmem:[%s18141_s11 + $0x18c] ss:$16 sps:$4 sm:$0xff]   ;;  %v14954_v39 = vld [vmem:[%s18141_s11 + $0x180] ss:$16 sps:$4 sm:$0xff]  }
 0x32b   : > { %3536 = vmatpush1.bf16.msra.mxu0 %v14906_v5  ;;  %3741 = vmatpush1.bf16.msra.mxu1 %v14907_v6  ;;  %v14955_v40 = vld [vmem:[%s18141_s11 + $0x188] ss:$16 sps:$4 sm:$0xff]   ;;  %v14956_v41 = vld [vmem:[%s18141_s11 + $0x1a4] ss:$16 sps:$4 sm:$0xff]   ;;  %v14958_v42 = vld [vmem:[%s18141_s11 + $0x1ac] ss:$16 sps:$4 sm:$0xff]  }
 0x32c   : > { %3537 = vmatprep.subr.bf16.mxu0 %v14908_v7  ;;  %3742 = vmatprep.subr.bf16.mxu1 %v14910_v8  ;;  %v14960_v43 = vld [vmem:[%s18141_s11 + $0x1a0] ss:$16 sps:$4 sm:$0xff]   ;;  %v14961_v44 = vld [vmem:[%s18141_s11 + $0x1a8] ss:$16 sps:$4 sm:$0xff]   ;;  %v14962_v45 = vld [vmem:[%s18141_s11 + $0x1c4] ss:$16 sps:$4 sm:$0xff]  }
 0x32d   : > { %3559 = vmatprep.mubr.bf16.mxu0 %v1576_v35  ;;  %3764 = vmatprep.mubr.bf16.mxu1 %v1576_v35  ;;  %v14964_v46 = vld [vmem:[%s18141_s11 + $0x1cc] ss:$16 sps:$4 sm:$0xff]   ;;  %v14966_v47 = vld [vmem:[%s18141_s11 + $0x1c0] ss:$16 sps:$4 sm:$0xff]   ;;  %v14967_v48 = vld [vmem:[%s18141_s11 + $0x1c8] ss:$16 sps:$4 sm:$0xff]  }
 0x32e   : > { %v14968_v49 = vld [vmem:[%s18141_s11 + $0x1e4] ss:$16 sps:$4 sm:$0xff]   ;;  %v14970_v50 = vld [vmem:[%s18141_s11 + $0x1ec] ss:$16 sps:$4 sm:$0xff]   ;;  %v14972_v51 = vld [vmem:[%s18141_s11 + $0x1e0] ss:$16 sps:$4 sm:$0xff]  }
 0x32f   : > { %3538 = vmatpush1.bf16.msra.mxu0 %v14912_v9  ;;  %3743 = vmatpush1.bf16.msra.mxu1 %v14913_v10  ;;  %v14973_v52 = vld [vmem:[%s18141_s11 + $0x1e8] ss:$16 sps:$4 sm:$0xff]   ;;  %v14976_v54 = vld [vmem:[%s18141_s11 + $0x204] ss:$16 sps:$4 sm:$0xff]   ;;  %v14979_v55 = vld [vmem:[%s18141_s11 + $0x20c] ss:$16 sps:$4 sm:$0xff]  }
 0x330   : > { %3539 = vmatprep.subr.bf16.mxu0 %v14914_v11  ;;  %3744 = vmatprep.subr.bf16.mxu1 %v14916_v12  ;;  %v1565_v53 = vld [vmem:[#allocation2] sm:$0xff]  ;;  %v14974_v57 = vld [vmem:[%s18141_s11 + $0x200] ss:$16 sps:$4 sm:$0xff]   ;;  %s3943_s20 = sshra.s32 %s13130_s2, 7 }
 0x331   : > { %v1575_v56 = vpack.c.bf16 %v1565_v53, %v1565_v53  ;;  %v14977_v58 = vld [vmem:[%s18141_s11 + $0x208] ss:$16 sps:$4 sm:$0xff]   ;;  %v14982_v59 = vld [vmem:[%s18141_s11 + $0x224] ss:$16 sps:$4 sm:$0xff]   ;;  %v14985_v60 = vld [vmem:[%s18141_s11 + $0x22c] ss:$16 sps:$4 sm:$0xff]  }
 0x332   : > { %v14980_v61 = vld [vmem:[%s18141_s11 + $0x220] ss:$16 sps:$4 sm:$0xff]   ;;  %v14983_v62 = vld [vmem:[%s18141_s11 + $0x228] ss:$16 sps:$4 sm:$0xff]   ;;  %v14988_v63 = vld [vmem:[%s18141_s11 + $0x244] ss:$16 sps:$4 sm:$0xff]  }
 0x333   : > { %3540 = vmatpush1.bf16.msra.mxu0 %v14918_v13  ;;  %3745 = vmatpush1.bf16.msra.mxu1 %v14919_v14  ;;  %v14991_v0 = vld [vmem:[%s18141_s11 + $0x24c] ss:$16 sps:$4 sm:$0xff]   ;;  %v14986_v1 = vld [vmem:[%s18141_s11 + $0x240] ss:$16 sps:$4 sm:$0xff]   ;;  %v14989_v2 = vld [vmem:[%s18141_s11 + $0x248] ss:$16 sps:$4 sm:$0xff]  }
 0x334   : > { %3541 = vmatprep.subr.bf16.mxu0 %v14920_v15  ;;  %3746 = vmatprep.subr.bf16.mxu1 %v14922_v16  ;;  %v14994_v3 = vld [vmem:[%s18141_s11 + $0x264] ss:$16 sps:$4 sm:$0xff]   ;;  %v14997_v4 = vld [vmem:[%s18141_s11 + $0x26c] ss:$16 sps:$4 sm:$0xff]   ;;  %v14992_v5 = vld [vmem:[%s18141_s11 + $0x260] ss:$16 sps:$4 sm:$0xff]  }
 0x335   : > { %v14995_v6 = vld [vmem:[%s18141_s11 + $0x268] ss:$16 sps:$4 sm:$0xff]   ;;  %v15000_v7 = vld [vmem:[%s18141_s11 + $0x284] ss:$16 sps:$4 sm:$0xff]   ;;  %v15003_v8 = vld [vmem:[%s18141_s11 + $0x28c] ss:$16 sps:$4 sm:$0xff]  }
 0x336   : > { %v14998_v9 = vld [vmem:[%s18141_s11 + $0x280] ss:$16 sps:$4 sm:$0xff]   ;;  %v15001_v10 = vld [vmem:[%s18141_s11 + $0x288] ss:$16 sps:$4 sm:$0xff]   ;;  %v15006_v11 = vld [vmem:[%s18141_s11 + $0x2a4] ss:$16 sps:$4 sm:$0xff]  }
 0x337   : > { %3542 = vmatpush1.bf16.msra.mxu0 %v14924_v17  ;;  %3747 = vmatpush1.bf16.msra.mxu1 %v14925_v18  ;;  %v15009_v12 = vld [vmem:[%s18141_s11 + $0x2ac] ss:$16 sps:$4 sm:$0xff]   ;;  %v15004_v13 = vld [vmem:[%s18141_s11 + $0x2a0] ss:$16 sps:$4 sm:$0xff]   ;;  %v15007_v14 = vld [vmem:[%s18141_s11 + $0x2a8] ss:$16 sps:$4 sm:$0xff]  }
 0x338   : > { %3543 = vmatprep.subr.bf16.mxu0 %v14926_v19  ;;  %3748 = vmatprep.subr.bf16.mxu1 %v14928_v20  ;;  %v15012_v15 = vld [vmem:[%s18141_s11 + $0x2c4] ss:$16 sps:$4 sm:$0xff]   ;;  %v15015_v16 = vld [vmem:[%s18141_s11 + $0x2cc] ss:$16 sps:$4 sm:$0xff]   ;;  %v15010_v18 = vld [vmem:[%s18141_s11 + $0x2c0] ss:$16 sps:$4 sm:$0xff]  }
 0x339   : > { %v1568_v17 = vld [vmem:[#allocation2 + $0x18] sm:$0xff]  ;;  %v15013_v20 = vld [vmem:[%s18141_s11 + $0x2c8] ss:$16 sps:$4 sm:$0xff]  }
 0x33a   : > { %v1578_v19 = vpack.c.bf16 %v1568_v17, %v1568_v17  ;;  %v15036_v33 = vld [vmem:[%s18141_s11 + $0x344] ss:$16 sps:$4 sm:$0xff]   ;;  %v15034_v35 = vld [vmem:[%s18141_s11 + $0x340] ss:$16 sps:$4 sm:$0xff]  }
 0x33b   : > { %3544 = vmatpush1.bf16.msra.mxu0 %v14930_v21  ;;  %3749 = vmatpush1.bf16.msra.mxu1 %v14931_v22  ;;  %v15018_v21 = vld [vmem:[%s18141_s11 + $0x2e4] ss:$16 sps:$4 sm:$0xff]   ;;  %v15021_v22 = vld [vmem:[%s18141_s11 + $0x2ec] ss:$16 sps:$4 sm:$0xff]  }
 0x33c   : > { %3545 = vmatprep.subr.bf16.mxu0 %v14932_v23  ;;  %3750 = vmatprep.subr.bf16.mxu1 %v14934_v24  ;;  %v15016_v23 = vld [vmem:[%s18141_s11 + $0x2e0] ss:$16 sps:$4 sm:$0xff]   ;;  %v15019_v24 = vld [vmem:[%s18141_s11 + $0x2e8] ss:$16 sps:$4 sm:$0xff]   ;;  %v15066_v53 = vld [vmem:[%s18141_s11 + $0x3e4] ss:$16 sps:$4 sm:$0xff]  }
 0x33d   : > { %v15102_v17 = vld [vmem:[%s18141_s11 + $0x4a4] ss:$16 sps:$4 sm:$0xff]  }
 0x33f   : > { %3546 = vmatpush1.bf16.msra.mxu0 %v14936_v25  ;;  %3751 = vmatpush1.bf16.msra.mxu1 %v14937_v26  ;;  %v15024_v25 = vld [vmem:[%s18141_s11 + $0x304] ss:$16 sps:$4 sm:$0xff]   ;;  %v15027_v26 = vld [vmem:[%s18141_s11 + $0x30c] ss:$16 sps:$4 sm:$0xff]  }
 0x340   : > { %3547 = vmatprep.subr.bf16.mxu0 %v14938_v27  ;;  %3752 = vmatprep.subr.bf16.mxu1 %v14940_v28  ;;  %v15022_v27 = vld [vmem:[%s18141_s11 + $0x300] ss:$16 sps:$4 sm:$0xff]   ;;  %v15025_v28 = vld [vmem:[%s18141_s11 + $0x308] ss:$16 sps:$4 sm:$0xff]  }
 0x343   : > { %3548 = vmatpush1.bf16.msra.mxu0 %v14942_v29  ;;  %3753 = vmatpush1.bf16.msra.mxu1 %v14943_v30  ;;  %v15030_v29 = vld [vmem:[%s18141_s11 + $0x324] ss:$16 sps:$4 sm:$0xff]   ;;  %v15033_v30 = vld [vmem:[%s18141_s11 + $0x32c] ss:$16 sps:$4 sm:$0xff]  }
 0x344   : > { %3549 = vmatprep.subr.bf16.mxu0 %v14944_v31  ;;  %3754 = vmatprep.subr.bf16.mxu1 %v14946_v32  ;;  %v15028_v31 = vld [vmem:[%s18141_s11 + $0x320] ss:$16 sps:$4 sm:$0xff]   ;;  %v15031_v32 = vld [vmem:[%s18141_s11 + $0x328] ss:$16 sps:$4 sm:$0xff]  }
 0x347   : > { %3550 = vmatpush1.bf16.msra.mxu0 %v14948_v34  ;;  %3755 = vmatpush1.bf16.msra.mxu1 %v14949_v36  ;;  %v15039_v34 = vld [vmem:[%s18141_s11 + $0x34c] ss:$16 sps:$4 sm:$0xff]   ;;  %v15037_v36 = vld [vmem:[%s18141_s11 + $0x348] ss:$16 sps:$4 sm:$0xff]  }
 0x348   : > { %3551 = vmatprep.subr.bf16.mxu0 %v14950_v37  ;;  %3756 = vmatprep.subr.bf16.mxu1 %v14952_v38  ;;  %v15042_v37 = vld [vmem:[%s18141_s11 + $0x364] ss:$16 sps:$4 sm:$0xff]   ;;  %v15045_v38 = vld [vmem:[%s18141_s11 + $0x36c] ss:$16 sps:$4 sm:$0xff]  }
 0x34b   : > { %3552 = vmatpush1.bf16.msra.mxu0 %v14954_v39  ;;  %3757 = vmatpush1.bf16.msra.mxu1 %v14955_v40  ;;  %v15040_v39 = vld [vmem:[%s18141_s11 + $0x360] ss:$16 sps:$4 sm:$0xff]   ;;  %v15043_v40 = vld [vmem:[%s18141_s11 + $0x368] ss:$16 sps:$4 sm:$0xff]  }
 0x34c   : > { %3553 = vmatprep.subr.bf16.mxu0 %v14956_v41  ;;  %3758 = vmatprep.subr.bf16.mxu1 %v14958_v42  ;;  %v15048_v41 = vld [vmem:[%s18141_s11 + $0x384] ss:$16 sps:$4 sm:$0xff]   ;;  %v15051_v42 = vld [vmem:[%s18141_s11 + $0x38c] ss:$16 sps:$4 sm:$0xff]  }
 0x34f   : > { %3554 = vmatpush1.bf16.msra.mxu0 %v14960_v43  ;;  %3759 = vmatpush1.bf16.msra.mxu1 %v14961_v44  ;;  %v15046_v43 = vld [vmem:[%s18141_s11 + $0x380] ss:$16 sps:$4 sm:$0xff]   ;;  %v15049_v44 = vld [vmem:[%s18141_s11 + $0x388] ss:$16 sps:$4 sm:$0xff]  }
 0x350   : > { %3555 = vmatprep.subr.bf16.mxu0 %v14962_v45  ;;  %3760 = vmatprep.subr.bf16.mxu1 %v14964_v46  ;;  %v15054_v45 = vld [vmem:[%s18141_s11 + $0x3a4] ss:$16 sps:$4 sm:$0xff]   ;;  %v15057_v46 = vld [vmem:[%s18141_s11 + $0x3ac] ss:$16 sps:$4 sm:$0xff]  }
 0x353   : > { %3556 = vmatpush1.bf16.msra.mxu0 %v14966_v47  ;;  %3761 = vmatpush1.bf16.msra.mxu1 %v14967_v48  ;;  %v15052_v47 = vld [vmem:[%s18141_s11 + $0x3a0] ss:$16 sps:$4 sm:$0xff]   ;;  %v15055_v48 = vld [vmem:[%s18141_s11 + $0x3a8] ss:$16 sps:$4 sm:$0xff]  }
 0x354   : > { %3557 = vmatprep.subr.bf16.mxu0 %v14968_v49  ;;  %3762 = vmatprep.subr.bf16.mxu1 %v14970_v50  ;;  %v15060_v49 = vld [vmem:[%s18141_s11 + $0x3c4] ss:$16 sps:$4 sm:$0xff]   ;;  %v15063_v50 = vld [vmem:[%s18141_s11 + $0x3cc] ss:$16 sps:$4 sm:$0xff]  }
 0x357   : > { %3558 = vmatpush1.bf16.msra.mxu0 %v14972_v51  ;;  %3763 = vmatpush1.bf16.msra.mxu1 %v14973_v52  ;;  %v15058_v51 = vld [vmem:[%s18141_s11 + $0x3c0] ss:$16 sps:$4 sm:$0xff]   ;;  %v15061_v52 = vld [vmem:[%s18141_s11 + $0x3c8] ss:$16 sps:$4 sm:$0xff]  }
 0x358   : > { %3568 = vmatprep.subr.bf16.mxu0 %v14976_v54  ;;  %3773 = vmatprep.subr.bf16.mxu1 %v14979_v55  ;;  %v15069_v54 = vld [vmem:[%s18141_s11 + $0x3ec] ss:$16 sps:$4 sm:$0xff]   ;;  %v15064_v55 = vld [vmem:[%s18141_s11 + $0x3e0] ss:$16 sps:$4 sm:$0xff]  }
 0x35a   : > { %3560 = vmatmul.mubr.bf16.vlgmr.msra.gmra.mrb[0].mxu0 %v1575_v56  ;;  %3765 = vmatmul.mubr.bf16.vlgmr.msra.gmra.mrb[0].mxu1 %v1575_v56  ;;  %v15067_v56 = vld [vmem:[%s18141_s11 + $0x3e8] ss:$16 sps:$4 sm:$0xff]  }
 0x35b   : > { %3569 = vmatpush1.bf16.msra.mxu0 %v14974_v57  ;;  %3774 = vmatpush1.bf16.msra.mxu1 %v14977_v58  ;;  %v15072_v57 = vld [vmem:[%s18141_s11 + $0x404] ss:$16 sps:$4 sm:$0xff]  }
 0x35c   : > { %3570 = vmatprep.subr.bf16.mxu0 %v14982_v59  ;;  %3775 = vmatprep.subr.bf16.mxu1 %v14985_v60  ;;  %v1567_v58 = vld [vmem:[#allocation2 + $0x10] sm:$0xff]  ;;  %v15070_v60 = vld [vmem:[%s18141_s11 + $0x400] ss:$16 sps:$4 sm:$0xff]  }
 0x35d   : > { %3600 = vmatprep.mubr.bf16.mxu0 %v1578_v19  ;;  %3805 = vmatprep.mubr.bf16.mxu1 %v1578_v19  ;;  %v15075_v59 = vld [vmem:[%s18141_s11 + $0x40c] ss:$16 sps:$4 sm:$0xff]   ;;  %v15100_v19 = vld [vmem:[%s18141_s11 + $0x4a0] ss:$16 sps:$4 sm:$0xff]  }
 0x35f   : > { %3571 = vmatpush1.bf16.msra.mxu0 %v14980_v61  ;;  %3776 = vmatpush1.bf16.msra.mxu1 %v14983_v62  ;;  %v15073_v61 = vld [vmem:[%s18141_s11 + $0x408] ss:$16 sps:$4 sm:$0xff]   ;;  %v1577_v62 = vpack.c.bf16 %v1567_v58, %v1567_v58  ;;  %v15165_v58 = vld [vmem:[%s18141_s11 + $0x5ec] ss:$16 sps:$4 sm:$0xff]  }
 0x360   : > { %3572 = vmatprep.subr.bf16.mxu0 %v14988_v63  ;;  %3777 = vmatprep.subr.bf16.mxu1 %v14991_v0  ;;  %v15078_v63 = vld [vmem:[%s18141_s11 + $0x424] ss:$16 sps:$4 sm:$0xff]   ;;  %v15081_v0 = vld [vmem:[%s18141_s11 + $0x42c] ss:$16 sps:$4 sm:$0xff]  }
 0x363   : > { %3573 = vmatpush1.bf16.msra.mxu0 %v14986_v1  ;;  %3778 = vmatpush1.bf16.msra.mxu1 %v14989_v2  ;;  %v1570_v1 = vld [vmem:[#allocation2 + $0x28] sm:$0xff] }
 0x364   : > { %3574 = vmatprep.subr.bf16.mxu0 %v14994_v3  ;;  %3779 = vmatprep.subr.bf16.mxu1 %v14997_v4  ;;  %v1580_v2 = vpack.c.bf16 %v1570_v1, %v1570_v1  ;;  %v15076_v3 = vld [vmem:[%s18141_s11 + $0x420] ss:$16 sps:$4 sm:$0xff]   ;;  %v15079_v4 = vld [vmem:[%s18141_s11 + $0x428] ss:$16 sps:$4 sm:$0xff]  }
 0x365   : > { %v15169_v1 = vld [vmem:[%s18141_s11 + $0x608] ss:$16 sps:$4 sm:$0xff]  }
 0x367   : > { %3575 = vmatpush1.bf16.msra.mxu0 %v14992_v5  ;;  %3780 = vmatpush1.bf16.msra.mxu1 %v14995_v6  ;;  %v15084_v5 = vld [vmem:[%s18141_s11 + $0x444] ss:$16 sps:$4 sm:$0xff]   ;;  %v15087_v6 = vld [vmem:[%s18141_s11 + $0x44c] ss:$16 sps:$4 sm:$0xff]  }
 0x368   : > { %3576 = vmatprep.subr.bf16.mxu0 %v15000_v7  ;;  %3781 = vmatprep.subr.bf16.mxu1 %v15003_v8  ;;  %v15082_v7 = vld [vmem:[%s18141_s11 + $0x440] ss:$16 sps:$4 sm:$0xff]   ;;  %v15085_v8 = vld [vmem:[%s18141_s11 + $0x448] ss:$16 sps:$4 sm:$0xff]  }
 0x36b   : > { %3577 = vmatpush1.bf16.msra.mxu0 %v14998_v9  ;;  %3782 = vmatpush1.bf16.msra.mxu1 %v15001_v10  ;;  %v15090_v9 = vld [vmem:[%s18141_s11 + $0x464] ss:$16 sps:$4 sm:$0xff]   ;;  %v15093_v10 = vld [vmem:[%s18141_s11 + $0x46c] ss:$16 sps:$4 sm:$0xff]  }
 0x36c   : > { %3578 = vmatprep.subr.bf16.mxu0 %v15006_v11  ;;  %3783 = vmatprep.subr.bf16.mxu1 %v15009_v12  ;;  %v15088_v11 = vld [vmem:[%s18141_s11 + $0x460] ss:$16 sps:$4 sm:$0xff]   ;;  %v15091_v12 = vld [vmem:[%s18141_s11 + $0x468] ss:$16 sps:$4 sm:$0xff]  }
 0x36f   : > { %3579 = vmatpush1.bf16.msra.mxu0 %v15004_v13  ;;  %3784 = vmatpush1.bf16.msra.mxu1 %v15007_v14  ;;  %v15096_v13 = vld [vmem:[%s18141_s11 + $0x484] ss:$16 sps:$4 sm:$0xff]   ;;  %v15099_v14 = vld [vmem:[%s18141_s11 + $0x48c] ss:$16 sps:$4 sm:$0xff]  }
 0x370   : > { %3580 = vmatprep.subr.bf16.mxu0 %v15012_v15  ;;  %3785 = vmatprep.subr.bf16.mxu1 %v15015_v16  ;;  %v15094_v15 = vld [vmem:[%s18141_s11 + $0x480] ss:$16 sps:$4 sm:$0xff]   ;;  %v15097_v16 = vld [vmem:[%s18141_s11 + $0x488] ss:$16 sps:$4 sm:$0xff]  }
 0x373   : > { %3581 = vmatpush1.bf16.msra.mxu0 %v15010_v18  ;;  %3786 = vmatpush1.bf16.msra.mxu1 %v15013_v20  ;;  %v15105_v18 = vld [vmem:[%s18141_s11 + $0x4ac] ss:$16 sps:$4 sm:$0xff]   ;;  %v15103_v20 = vld [vmem:[%s18141_s11 + $0x4a8] ss:$16 sps:$4 sm:$0xff]  }
 0x374   : > { %3582 = vmatprep.subr.bf16.mxu0 %v15018_v21  ;;  %3787 = vmatprep.subr.bf16.mxu1 %v15021_v22  ;;  %v15108_v21 = vld [vmem:[%s18141_s11 + $0x4c4] ss:$16 sps:$4 sm:$0xff]   ;;  %v15111_v22 = vld [vmem:[%s18141_s11 + $0x4cc] ss:$16 sps:$4 sm:$0xff]  }
 0x377   : > { %3583 = vmatpush1.bf16.msra.mxu0 %v15016_v23  ;;  %3788 = vmatpush1.bf16.msra.mxu1 %v15019_v24  ;;  %v15106_v23 = vld [vmem:[%s18141_s11 + $0x4c0] ss:$16 sps:$4 sm:$0xff]   ;;  %v15109_v24 = vld [vmem:[%s18141_s11 + $0x4c8] ss:$16 sps:$4 sm:$0xff]  }
 0x378   : > { %3584 = vmatprep.subr.bf16.mxu0 %v15024_v25  ;;  %3789 = vmatprep.subr.bf16.mxu1 %v15027_v26  ;;  %v15114_v25 = vld [vmem:[%s18141_s11 + $0x4e4] ss:$16 sps:$4 sm:$0xff]   ;;  %v15117_v26 = vld [vmem:[%s18141_s11 + $0x4ec] ss:$16 sps:$4 sm:$0xff]  }
 0x37b   : > { %3585 = vmatpush1.bf16.msra.mxu0 %v15022_v27  ;;  %3790 = vmatpush1.bf16.msra.mxu1 %v15025_v28  ;;  %v15112_v27 = vld [vmem:[%s18141_s11 + $0x4e0] ss:$16 sps:$4 sm:$0xff]   ;;  %v15115_v28 = vld [vmem:[%s18141_s11 + $0x4e8] ss:$16 sps:$4 sm:$0xff]  }
 0x37c   : > { %3586 = vmatprep.subr.bf16.mxu0 %v15030_v29  ;;  %3791 = vmatprep.subr.bf16.mxu1 %v15033_v30  ;;  %v15120_v29 = vld [vmem:[%s18141_s11 + $0x504] ss:$16 sps:$4 sm:$0xff]   ;;  %v15123_v30 = vld [vmem:[%s18141_s11 + $0x50c] ss:$16 sps:$4 sm:$0xff]  }
 0x37f   : > { %3587 = vmatpush1.bf16.msra.mxu0 %v15028_v31  ;;  %3792 = vmatpush1.bf16.msra.mxu1 %v15031_v32  ;;  %v15118_v31 = vld [vmem:[%s18141_s11 + $0x500] ss:$16 sps:$4 sm:$0xff]   ;;  %v15121_v32 = vld [vmem:[%s18141_s11 + $0x508] ss:$16 sps:$4 sm:$0xff]  }
 0x380   : > { %3588 = vmatprep.subr.bf16.mxu0 %v15036_v33  ;;  %3793 = vmatprep.subr.bf16.mxu1 %v15039_v34  ;;  %v15126_v33 = vld [vmem:[%s18141_s11 + $0x524] ss:$16 sps:$4 sm:$0xff]   ;;  %v15129_v34 = vld [vmem:[%s18141_s11 + $0x52c] ss:$16 sps:$4 sm:$0xff]  }
 0x383   : > { %3589 = vmatpush1.bf16.msra.mxu0 %v15034_v35  ;;  %3794 = vmatpush1.bf16.msra.mxu1 %v15037_v36  ;;  %v15124_v35 = vld [vmem:[%s18141_s11 + $0x520] ss:$16 sps:$4 sm:$0xff]   ;;  %v15127_v36 = vld [vmem:[%s18141_s11 + $0x528] ss:$16 sps:$4 sm:$0xff]  }
 0x384   : > { %3590 = vmatprep.subr.bf16.mxu0 %v15042_v37  ;;  %3795 = vmatprep.subr.bf16.mxu1 %v15045_v38  ;;  %v15132_v37 = vld [vmem:[%s18141_s11 + $0x544] ss:$16 sps:$4 sm:$0xff]   ;;  %v15135_v38 = vld [vmem:[%s18141_s11 + $0x54c] ss:$16 sps:$4 sm:$0xff]  }
 0x387   : > { %3591 = vmatpush1.bf16.msra.mxu0 %v15040_v39  ;;  %3796 = vmatpush1.bf16.msra.mxu1 %v15043_v40  ;;  %v15130_v39 = vld [vmem:[%s18141_s11 + $0x540] ss:$16 sps:$4 sm:$0xff]   ;;  %v15133_v40 = vld [vmem:[%s18141_s11 + $0x548] ss:$16 sps:$4 sm:$0xff]  }
 0x388   : > { %3592 = vmatprep.subr.bf16.mxu0 %v15048_v41  ;;  %3797 = vmatprep.subr.bf16.mxu1 %v15051_v42  ;;  %v15138_v41 = vld [vmem:[%s18141_s11 + $0x564] ss:$16 sps:$4 sm:$0xff]   ;;  %v15141_v42 = vld [vmem:[%s18141_s11 + $0x56c] ss:$16 sps:$4 sm:$0xff]  }
 0x38b   : > { %3593 = vmatpush1.bf16.msra.mxu0 %v15046_v43  ;;  %3798 = vmatpush1.bf16.msra.mxu1 %v15049_v44  ;;  %v15136_v43 = vld [vmem:[%s18141_s11 + $0x560] ss:$16 sps:$4 sm:$0xff]   ;;  %v15139_v44 = vld [vmem:[%s18141_s11 + $0x568] ss:$16 sps:$4 sm:$0xff]  }
 0x38c   : > { %3594 = vmatprep.subr.bf16.mxu0 %v15054_v45  ;;  %3799 = vmatprep.subr.bf16.mxu1 %v15057_v46  ;;  %v15144_v45 = vld [vmem:[%s18141_s11 + $0x584] ss:$16 sps:$4 sm:$0xff]   ;;  %v15147_v46 = vld [vmem:[%s18141_s11 + $0x58c] ss:$16 sps:$4 sm:$0xff]  }
 0x38f   : > { %3595 = vmatpush1.bf16.msra.mxu0 %v15052_v47  ;;  %3800 = vmatpush1.bf16.msra.mxu1 %v15055_v48  ;;  %v15142_v47 = vld [vmem:[%s18141_s11 + $0x580] ss:$16 sps:$4 sm:$0xff]   ;;  %v15145_v48 = vld [vmem:[%s18141_s11 + $0x588] ss:$16 sps:$4 sm:$0xff]  }
 0x390   : > { %3596 = vmatprep.subr.bf16.mxu0 %v15060_v49  ;;  %3801 = vmatprep.subr.bf16.mxu1 %v15063_v50  ;;  %v15150_v49 = vld [vmem:[%s18141_s11 + $0x5a4] ss:$16 sps:$4 sm:$0xff]   ;;  %v15153_v50 = vld [vmem:[%s18141_s11 + $0x5ac] ss:$16 sps:$4 sm:$0xff]  }
 0x393   : > { %3597 = vmatpush1.bf16.msra.mxu0 %v15058_v51  ;;  %3802 = vmatpush1.bf16.msra.mxu1 %v15061_v52  ;;  %v15148_v51 = vld [vmem:[%s18141_s11 + $0x5a0] ss:$16 sps:$4 sm:$0xff]   ;;  %v15151_v52 = vld [vmem:[%s18141_s11 + $0x5a8] ss:$16 sps:$4 sm:$0xff]  }
 0x394   : > { %3598 = vmatprep.subr.bf16.mxu0 %v15066_v53  ;;  %3803 = vmatprep.subr.bf16.mxu1 %v15069_v54  ;;  %v15156_v53 = vld [vmem:[%s18141_s11 + $0x5c4] ss:$16 sps:$4 sm:$0xff]   ;;  %v15159_v54 = vld [vmem:[%s18141_s11 + $0x5cc] ss:$16 sps:$4 sm:$0xff]  }
 0x397   : > { %3599 = vmatpush1.bf16.msra.mxu0 %v15064_v55  ;;  %3804 = vmatpush1.bf16.msra.mxu1 %v15067_v56  ;;  %v15154_v55 = vld [vmem:[%s18141_s11 + $0x5c0] ss:$16 sps:$4 sm:$0xff]   ;;  %v15157_v56 = vld [vmem:[%s18141_s11 + $0x5c8] ss:$16 sps:$4 sm:$0xff]  }
 0x398   : > { %3609 = vmatprep.subr.bf16.mxu0 %v15072_v57  ;;  %3814 = vmatprep.subr.bf16.mxu1 %v15075_v59  ;;  %v15162_v57 = vld [vmem:[%s18141_s11 + $0x5e4] ss:$16 sps:$4 sm:$0xff]   ;;  %v15160_v59 = vld [vmem:[%s18141_s11 + $0x5e0] ss:$16 sps:$4 sm:$0xff]  }
 0x39a   : > { %3601 = vmatmul.mubr.bf16.vlgmr.msra.gmra.mrb[0].mxu0 %v1577_v62  ;;  %3806 = vmatmul.mubr.bf16.vlgmr.msra.gmra.mrb[0].mxu1 %v1577_v62  ;;  %v1569_v62 = vld [vmem:[#allocation2 + $0x20] sm:$0xff] }
 0x39b   : > { %3610 = vmatpush1.bf16.msra.mxu0 %v15070_v60  ;;  %3815 = vmatpush1.bf16.msra.mxu1 %v15073_v61  ;;  %v15163_v60 = vld [vmem:[%s18141_s11 + $0x5e8] ss:$16 sps:$4 sm:$0xff]   ;;  %v15168_v61 = vld [vmem:[%s18141_s11 + $0x604] ss:$16 sps:$4 sm:$0xff]  }
 0x39c   : > { %3611 = vmatprep.subr.bf16.mxu0 %v15078_v63  ;;  %3816 = vmatprep.subr.bf16.mxu1 %v15081_v0  ;;  %v15171_v63 = vld [vmem:[%s18141_s11 + $0x60c] ss:$16 sps:$4 sm:$0xff]   ;;  %v15166_v0 = vld [vmem:[%s18141_s11 + $0x600] ss:$16 sps:$4 sm:$0xff]  }
 0x39d   : > { %3641 = vmatprep.mubr.bf16.mxu0 %v1580_v2  ;;  %3846 = vmatprep.mubr.bf16.mxu1 %v1580_v2  ;;  %v1579_v2 = vpack.c.bf16 %v1569_v62, %v1569_v62  ;;  %v15261_v62 = vld [vmem:[%s18141_s11 + $0x7ec] ss:$16 sps:$4 sm:$0xff]  }
 0x39f   : > { %3612 = vmatpush1.bf16.msra.mxu0 %v15076_v3  ;;  %3817 = vmatpush1.bf16.msra.mxu1 %v15079_v4  ;;  %v1572_v3 = vld [vmem:[#allocation2 + $0x38] sm:$0xff] }
 0x3a0   : > { %3613 = vmatprep.subr.bf16.mxu0 %v15084_v5  ;;  %3818 = vmatprep.subr.bf16.mxu1 %v15087_v6  ;;  %v15174_v4 = vld [vmem:[%s18141_s11 + $0x624] ss:$16 sps:$4 sm:$0xff]   ;;  %v15177_v5 = vld [vmem:[%s18141_s11 + $0x62c] ss:$16 sps:$4 sm:$0xff]   ;;  %v1582_v6 = vpack.c.bf16 %v1572_v3, %v1572_v3 }
 0x3a1   : > { %v15267_v3 = vld [vmem:[%s18141_s11 + $0x80c] ss:$16 sps:$4 sm:$0xff]  }
 0x3a3   : > { %3614 = vmatpush1.bf16.msra.mxu0 %v15082_v7  ;;  %3819 = vmatpush1.bf16.msra.mxu1 %v15085_v8  ;;  %v15172_v7 = vld [vmem:[%s18141_s11 + $0x620] ss:$16 sps:$4 sm:$0xff]   ;;  %v15175_v8 = vld [vmem:[%s18141_s11 + $0x628] ss:$16 sps:$4 sm:$0xff]  }
 0x3a4   : > { %3615 = vmatprep.subr.bf16.mxu0 %v15090_v9  ;;  %3820 = vmatprep.subr.bf16.mxu1 %v15093_v10  ;;  %v15180_v9 = vld [vmem:[%s18141_s11 + $0x644] ss:$16 sps:$4 sm:$0xff]   ;;  %v15183_v10 = vld [vmem:[%s18141_s11 + $0x64c] ss:$16 sps:$4 sm:$0xff]  }
 0x3a7   : > { %3616 = vmatpush1.bf16.msra.mxu0 %v15088_v11  ;;  %3821 = vmatpush1.bf16.msra.mxu1 %v15091_v12  ;;  %v15178_v11 = vld [vmem:[%s18141_s11 + $0x640] ss:$16 sps:$4 sm:$0xff]   ;;  %v15181_v12 = vld [vmem:[%s18141_s11 + $0x648] ss:$16 sps:$4 sm:$0xff]  }
 0x3a8   : > { %3617 = vmatprep.subr.bf16.mxu0 %v15096_v13  ;;  %3822 = vmatprep.subr.bf16.mxu1 %v15099_v14  ;;  %v15186_v13 = vld [vmem:[%s18141_s11 + $0x664] ss:$16 sps:$4 sm:$0xff]   ;;  %v15189_v14 = vld [vmem:[%s18141_s11 + $0x66c] ss:$16 sps:$4 sm:$0xff]  }
 0x3ab   : > { %3618 = vmatpush1.bf16.msra.mxu0 %v15094_v15  ;;  %3823 = vmatpush1.bf16.msra.mxu1 %v15097_v16  ;;  %v15184_v15 = vld [vmem:[%s18141_s11 + $0x660] ss:$16 sps:$4 sm:$0xff]   ;;  %v15187_v16 = vld [vmem:[%s18141_s11 + $0x668] ss:$16 sps:$4 sm:$0xff]  }
 0x3ac   : > { %3619 = vmatprep.subr.bf16.mxu0 %v15102_v17  ;;  %3824 = vmatprep.subr.bf16.mxu1 %v15105_v18  ;;  %v15192_v17 = vld [vmem:[%s18141_s11 + $0x684] ss:$16 sps:$4 sm:$0xff]   ;;  %v15195_v18 = vld [vmem:[%s18141_s11 + $0x68c] ss:$16 sps:$4 sm:$0xff]  }
 0x3af   : > { %3620 = vmatpush1.bf16.msra.mxu0 %v15100_v19  ;;  %3825 = vmatpush1.bf16.msra.mxu1 %v15103_v20  ;;  %v15190_v19 = vld [vmem:[%s18141_s11 + $0x680] ss:$16 sps:$4 sm:$0xff]   ;;  %v15193_v20 = vld [vmem:[%s18141_s11 + $0x688] ss:$16 sps:$4 sm:$0xff]  }
 0x3b0   : > { %3621 = vmatprep.subr.bf16.mxu0 %v15108_v21  ;;  %3826 = vmatprep.subr.bf16.mxu1 %v15111_v22  ;;  %v15198_v21 = vld [vmem:[%s18141_s11 + $0x6a4] ss:$16 sps:$4 sm:$0xff]   ;;  %v15201_v22 = vld [vmem:[%s18141_s11 + $0x6ac] ss:$16 sps:$4 sm:$0xff]  }
 0x3b3   : > { %3622 = vmatpush1.bf16.msra.mxu0 %v15106_v23  ;;  %3827 = vmatpush1.bf16.msra.mxu1 %v15109_v24  ;;  %v15196_v23 = vld [vmem:[%s18141_s11 + $0x6a0] ss:$16 sps:$4 sm:$0xff]   ;;  %v15199_v24 = vld [vmem:[%s18141_s11 + $0x6a8] ss:$16 sps:$4 sm:$0xff]  }
 0x3b4   : > { %3623 = vmatprep.subr.bf16.mxu0 %v15114_v25  ;;  %3828 = vmatprep.subr.bf16.mxu1 %v15117_v26  ;;  %v15204_v25 = vld [vmem:[%s18141_s11 + $0x6c4] ss:$16 sps:$4 sm:$0xff]   ;;  %v15207_v26 = vld [vmem:[%s18141_s11 + $0x6cc] ss:$16 sps:$4 sm:$0xff]  }
 0x3b7   : > { %3624 = vmatpush1.bf16.msra.mxu0 %v15112_v27  ;;  %3829 = vmatpush1.bf16.msra.mxu1 %v15115_v28  ;;  %v15202_v27 = vld [vmem:[%s18141_s11 + $0x6c0] ss:$16 sps:$4 sm:$0xff]   ;;  %v15205_v28 = vld [vmem:[%s18141_s11 + $0x6c8] ss:$16 sps:$4 sm:$0xff]  }
 0x3b8   : > { %3625 = vmatprep.subr.bf16.mxu0 %v15120_v29  ;;  %3830 = vmatprep.subr.bf16.mxu1 %v15123_v30  ;;  %v15210_v29 = vld [vmem:[%s18141_s11 + $0x6e4] ss:$16 sps:$4 sm:$0xff]   ;;  %v15213_v30 = vld [vmem:[%s18141_s11 + $0x6ec] ss:$16 sps:$4 sm:$0xff]  }
 0x3bb   : > { %3626 = vmatpush1.bf16.msra.mxu0 %v15118_v31  ;;  %3831 = vmatpush1.bf16.msra.mxu1 %v15121_v32  ;;  %v15208_v31 = vld [vmem:[%s18141_s11 + $0x6e0] ss:$16 sps:$4 sm:$0xff]   ;;  %v15211_v32 = vld [vmem:[%s18141_s11 + $0x6e8] ss:$16 sps:$4 sm:$0xff]  }
 0x3bc   : > { %3627 = vmatprep.subr.bf16.mxu0 %v15126_v33  ;;  %3832 = vmatprep.subr.bf16.mxu1 %v15129_v34  ;;  %v15216_v33 = vld [vmem:[%s18141_s11 + $0x704] ss:$16 sps:$4 sm:$0xff]   ;;  %v15219_v34 = vld [vmem:[%s18141_s11 + $0x70c] ss:$16 sps:$4 sm:$0xff]  }
 0x3bf   : > { %3628 = vmatpush1.bf16.msra.mxu0 %v15124_v35  ;;  %3833 = vmatpush1.bf16.msra.mxu1 %v15127_v36  ;;  %v15214_v35 = vld [vmem:[%s18141_s11 + $0x700] ss:$16 sps:$4 sm:$0xff]   ;;  %v15217_v36 = vld [vmem:[%s18141_s11 + $0x708] ss:$16 sps:$4 sm:$0xff]  }
 0x3c0   : > { %3629 = vmatprep.subr.bf16.mxu0 %v15132_v37  ;;  %3834 = vmatprep.subr.bf16.mxu1 %v15135_v38  ;;  %v15222_v37 = vld [vmem:[%s18141_s11 + $0x724] ss:$16 sps:$4 sm:$0xff]   ;;  %v15225_v38 = vld [vmem:[%s18141_s11 + $0x72c] ss:$16 sps:$4 sm:$0xff]  }
 0x3c3   : > { %3630 = vmatpush1.bf16.msra.mxu0 %v15130_v39  ;;  %3835 = vmatpush1.bf16.msra.mxu1 %v15133_v40  ;;  %v15220_v39 = vld [vmem:[%s18141_s11 + $0x720] ss:$16 sps:$4 sm:$0xff]   ;;  %v15223_v40 = vld [vmem:[%s18141_s11 + $0x728] ss:$16 sps:$4 sm:$0xff]  }
 0x3c4   : > { %3631 = vmatprep.subr.bf16.mxu0 %v15138_v41  ;;  %3836 = vmatprep.subr.bf16.mxu1 %v15141_v42  ;;  %v15228_v41 = vld [vmem:[%s18141_s11 + $0x744] ss:$16 sps:$4 sm:$0xff]   ;;  %v15231_v42 = vld [vmem:[%s18141_s11 + $0x74c] ss:$16 sps:$4 sm:$0xff]  }
 0x3c7   : > { %3632 = vmatpush1.bf16.msra.mxu0 %v15136_v43  ;;  %3837 = vmatpush1.bf16.msra.mxu1 %v15139_v44  ;;  %v15226_v43 = vld [vmem:[%s18141_s11 + $0x740] ss:$16 sps:$4 sm:$0xff]   ;;  %v15229_v44 = vld [vmem:[%s18141_s11 + $0x748] ss:$16 sps:$4 sm:$0xff]  }
 0x3c8   : > { %3633 = vmatprep.subr.bf16.mxu0 %v15144_v45  ;;  %3838 = vmatprep.subr.bf16.mxu1 %v15147_v46  ;;  %v15234_v45 = vld [vmem:[%s18141_s11 + $0x764] ss:$16 sps:$4 sm:$0xff]   ;;  %v15237_v46 = vld [vmem:[%s18141_s11 + $0x76c] ss:$16 sps:$4 sm:$0xff]  }
 0x3cb   : > { %3634 = vmatpush1.bf16.msra.mxu0 %v15142_v47  ;;  %3839 = vmatpush1.bf16.msra.mxu1 %v15145_v48  ;;  %v15232_v47 = vld [vmem:[%s18141_s11 + $0x760] ss:$16 sps:$4 sm:$0xff]   ;;  %v15235_v48 = vld [vmem:[%s18141_s11 + $0x768] ss:$16 sps:$4 sm:$0xff]  }
 0x3cc   : > { %3635 = vmatprep.subr.bf16.mxu0 %v15150_v49  ;;  %3840 = vmatprep.subr.bf16.mxu1 %v15153_v50  ;;  %v15240_v49 = vld [vmem:[%s18141_s11 + $0x784] ss:$16 sps:$4 sm:$0xff]   ;;  %v15243_v50 = vld [vmem:[%s18141_s11 + $0x78c] ss:$16 sps:$4 sm:$0xff]  }
 0x3cf   : > { %3636 = vmatpush1.bf16.msra.mxu0 %v15148_v51  ;;  %3841 = vmatpush1.bf16.msra.mxu1 %v15151_v52  ;;  %v15238_v51 = vld [vmem:[%s18141_s11 + $0x780] ss:$16 sps:$4 sm:$0xff]   ;;  %v15241_v52 = vld [vmem:[%s18141_s11 + $0x788] ss:$16 sps:$4 sm:$0xff]  }
 0x3d0   : > { %3637 = vmatprep.subr.bf16.mxu0 %v15156_v53  ;;  %3842 = vmatprep.subr.bf16.mxu1 %v15159_v54  ;;  %v15246_v53 = vld [vmem:[%s18141_s11 + $0x7a4] ss:$16 sps:$4 sm:$0xff]   ;;  %v15249_v54 = vld [vmem:[%s18141_s11 + $0x7ac] ss:$16 sps:$4 sm:$0xff]  }
 0x3d3   : > { %3638 = vmatpush1.bf16.msra.mxu0 %v15154_v55  ;;  %3843 = vmatpush1.bf16.msra.mxu1 %v15157_v56  ;;  %v15244_v55 = vld [vmem:[%s18141_s11 + $0x7a0] ss:$16 sps:$4 sm:$0xff]   ;;  %v15247_v56 = vld [vmem:[%s18141_s11 + $0x7a8] ss:$16 sps:$4 sm:$0xff]  }
 0x3d4   : > { %3639 = vmatprep.subr.bf16.mxu0 %v15162_v57  ;;  %3844 = vmatprep.subr.bf16.mxu1 %v15165_v58  ;;  %v15252_v57 = vld [vmem:[%s18141_s11 + $0x7c4] ss:$16 sps:$4 sm:$0xff]   ;;  %v15255_v58 = vld [vmem:[%s18141_s11 + $0x7cc] ss:$16 sps:$4 sm:$0xff]  }
 0x3d7   : > { %3640 = vmatpush1.bf16.msra.mxu0 %v15160_v59  ;;  %3845 = vmatpush1.bf16.msra.mxu1 %v15163_v60  ;;  %v15250_v59 = vld [vmem:[%s18141_s11 + $0x7c0] ss:$16 sps:$4 sm:$0xff]   ;;  %v15253_v60 = vld [vmem:[%s18141_s11 + $0x7c8] ss:$16 sps:$4 sm:$0xff]  }
 0x3d8   : > { %3650 = vmatprep.subr.bf16.mxu0 %v15168_v61  ;;  %3855 = vmatprep.subr.bf16.mxu1 %v15171_v63  ;;  %v15258_v61 = vld [vmem:[%s18141_s11 + $0x7e4] ss:$16 sps:$4 sm:$0xff]   ;;  %v15256_v63 = vld [vmem:[%s18141_s11 + $0x7e0] ss:$16 sps:$4 sm:$0xff]  }
 0x3da   : > { %3642 = vmatmul.mubr.bf16.vlgmr.msra.gmra.mrb[0].mxu0 %v1579_v2  ;;  %3847 = vmatmul.mubr.bf16.vlgmr.msra.gmra.mrb[0].mxu1 %v1579_v2  ;;  %v15264_v2 = vld [vmem:[%s18141_s11 + $0x804] ss:$16 sps:$4 sm:$0xff]  }
 0x3db   : > { %3651 = vmatpush1.bf16.msra.mxu0 %v15166_v0  ;;  %3856 = vmatpush1.bf16.msra.mxu1 %v15169_v1  ;;  %v15259_v0 = vld [vmem:[%s18141_s11 + $0x7e8] ss:$16 sps:$4 sm:$0xff]  }
 0x3dc   : > { %3652 = vmatprep.subr.bf16.mxu0 %v15174_v4  ;;  %3857 = vmatprep.subr.bf16.mxu1 %v15177_v5  ;;  %v1571_v1 = vld [vmem:[#allocation2 + $0x30] sm:$0xff]  ;;  %v1574_v5 = vld [vmem:[#allocation2 + $0x48] sm:$0xff] }
 0x3dd   : > { %3682 = vmatprep.mubr.bf16.mxu0 %v1582_v6  ;;  %3887 = vmatprep.mubr.bf16.mxu1 %v1582_v6  ;;  %v1581_v4 = vpack.c.bf16 %v1571_v1, %v1571_v1  ;;  %v15262_v6 = vld [vmem:[%s18141_s11 + $0x800] ss:$16 sps:$4 sm:$0xff]   ;;  %v15354_v1 = vld [vmem:[%s18141_s11 + $0x9e4] ss:$16 sps:$4 sm:$0xff]  }
 0x3df   : > { %3653 = vmatpush1.bf16.msra.mxu0 %v15172_v7  ;;  %3858 = vmatpush1.bf16.msra.mxu1 %v15175_v8  ;;  %v15265_v7 = vld [vmem:[%s18141_s11 + $0x808] ss:$16 sps:$4 sm:$0xff]   ;;  %v15270_v8 = vld [vmem:[%s18141_s11 + $0x824] ss:$16 sps:$4 sm:$0xff]  }
 0x3e0   : > { %3654 = vmatprep.subr.bf16.mxu0 %v15180_v9  ;;  %3859 = vmatprep.subr.bf16.mxu1 %v15183_v10  ;;  %v15273_v9 = vld [vmem:[%s18141_s11 + $0x82c] ss:$16 sps:$4 sm:$0xff]   ;;  %v1584_v10 = vpack.c.bf16 %v1574_v5, %v1574_v5 }
 0x3e1   : > { %v1573_v5 = vld [vmem:[#allocation2 + $0x40] sm:$0xff] }
 0x3e3   : > { %3655 = vmatpush1.bf16.msra.mxu0 %v15178_v11  ;;  %3860 = vmatpush1.bf16.msra.mxu1 %v15181_v12  ;;  %v15268_v11 = vld [vmem:[%s18141_s11 + $0x820] ss:$16 sps:$4 sm:$0xff]   ;;  %v15271_v12 = vld [vmem:[%s18141_s11 + $0x828] ss:$16 sps:$4 sm:$0xff]  }
 0x3e4   : > { %3656 = vmatprep.subr.bf16.mxu0 %v15186_v13  ;;  %3861 = vmatprep.subr.bf16.mxu1 %v15189_v14  ;;  %v15276_v13 = vld [vmem:[%s18141_s11 + $0x844] ss:$16 sps:$4 sm:$0xff]   ;;  %v15279_v14 = vld [vmem:[%s18141_s11 + $0x84c] ss:$16 sps:$4 sm:$0xff]  }
 0x3e7   : > { %3657 = vmatpush1.bf16.msra.mxu0 %v15184_v15  ;;  %3862 = vmatpush1.bf16.msra.mxu1 %v15187_v16  ;;  %v15274_v15 = vld [vmem:[%s18141_s11 + $0x840] ss:$16 sps:$4 sm:$0xff]   ;;  %v15277_v16 = vld [vmem:[%s18141_s11 + $0x848] ss:$16 sps:$4 sm:$0xff]  }
 0x3e8   : > { %3658 = vmatprep.subr.bf16.mxu0 %v15192_v17  ;;  %3863 = vmatprep.subr.bf16.mxu1 %v15195_v18  ;;  %v15282_v17 = vld [vmem:[%s18141_s11 + $0x864] ss:$16 sps:$4 sm:$0xff]   ;;  %v15285_v18 = vld [vmem:[%s18141_s11 + $0x86c] ss:$16 sps:$4 sm:$0xff]  }
 0x3eb   : > { %3659 = vmatpush1.bf16.msra.mxu0 %v15190_v19  ;;  %3864 = vmatpush1.bf16.msra.mxu1 %v15193_v20  ;;  %v15280_v19 = vld [vmem:[%s18141_s11 + $0x860] ss:$16 sps:$4 sm:$0xff]   ;;  %v15283_v20 = vld [vmem:[%s18141_s11 + $0x868] ss:$16 sps:$4 sm:$0xff]  }
 0x3ec   : > { %3660 = vmatprep.subr.bf16.mxu0 %v15198_v21  ;;  %3865 = vmatprep.subr.bf16.mxu1 %v15201_v22  ;;  %v15288_v21 = vld [vmem:[%s18141_s11 + $0x884] ss:$16 sps:$4 sm:$0xff]   ;;  %v15291_v22 = vld [vmem:[%s18141_s11 + $0x88c] ss:$16 sps:$4 sm:$0xff]  }
 0x3ef   : > { %3661 = vmatpush1.bf16.msra.mxu0 %v15196_v23  ;;  %3866 = vmatpush1.bf16.msra.mxu1 %v15199_v24  ;;  %v15286_v23 = vld [vmem:[%s18141_s11 + $0x880] ss:$16 sps:$4 sm:$0xff]   ;;  %v15289_v24 = vld [vmem:[%s18141_s11 + $0x888] ss:$16 sps:$4 sm:$0xff]  }
 0x3f0   : > { %3662 = vmatprep.subr.bf16.mxu0 %v15204_v25  ;;  %3867 = vmatprep.subr.bf16.mxu1 %v15207_v26  ;;  %v15294_v25 = vld [vmem:[%s18141_s11 + $0x8a4] ss:$16 sps:$4 sm:$0xff]   ;;  %v15297_v26 = vld [vmem:[%s18141_s11 + $0x8ac] ss:$16 sps:$4 sm:$0xff]  }
 0x3f3   : > { %3663 = vmatpush1.bf16.msra.mxu0 %v15202_v27  ;;  %3868 = vmatpush1.bf16.msra.mxu1 %v15205_v28  ;;  %v15292_v27 = vld [vmem:[%s18141_s11 + $0x8a0] ss:$16 sps:$4 sm:$0xff]   ;;  %v15295_v28 = vld [vmem:[%s18141_s11 + $0x8a8] ss:$16 sps:$4 sm:$0xff]  }
 0x3f4   : > { %3664 = vmatprep.subr.bf16.mxu0 %v15210_v29  ;;  %3869 = vmatprep.subr.bf16.mxu1 %v15213_v30  ;;  %v15300_v29 = vld [vmem:[%s18141_s11 + $0x8c4] ss:$16 sps:$4 sm:$0xff]   ;;  %v15303_v30 = vld [vmem:[%s18141_s11 + $0x8cc] ss:$16 sps:$4 sm:$0xff]  }
 0x3f7   : > { %3665 = vmatpush1.bf16.msra.mxu0 %v15208_v31  ;;  %3870 = vmatpush1.bf16.msra.mxu1 %v15211_v32  ;;  %v15298_v31 = vld [vmem:[%s18141_s11 + $0x8c0] ss:$16 sps:$4 sm:$0xff]   ;;  %v15301_v32 = vld [vmem:[%s18141_s11 + $0x8c8] ss:$16 sps:$4 sm:$0xff]  }
 0x3f8   : > { %3666 = vmatprep.subr.bf16.mxu0 %v15216_v33  ;;  %3871 = vmatprep.subr.bf16.mxu1 %v15219_v34  ;;  %v15306_v33 = vld [vmem:[%s18141_s11 + $0x8e4] ss:$16 sps:$4 sm:$0xff]   ;;  %v15309_v34 = vld [vmem:[%s18141_s11 + $0x8ec] ss:$16 sps:$4 sm:$0xff]  }
 0x3fb   : > { %3667 = vmatpush1.bf16.msra.mxu0 %v15214_v35  ;;  %3872 = vmatpush1.bf16.msra.mxu1 %v15217_v36  ;;  %v15304_v35 = vld [vmem:[%s18141_s11 + $0x8e0] ss:$16 sps:$4 sm:$0xff]   ;;  %v15307_v36 = vld [vmem:[%s18141_s11 + $0x8e8] ss:$16 sps:$4 sm:$0xff]  }
 0x3fc   : > { %3668 = vmatprep.subr.bf16.mxu0 %v15222_v37  ;;  %3873 = vmatprep.subr.bf16.mxu1 %v15225_v38  ;;  %v15312_v37 = vld [vmem:[%s18141_s11 + $0x904] ss:$16 sps:$4 sm:$0xff]   ;;  %v15315_v38 = vld [vmem:[%s18141_s11 + $0x90c] ss:$16 sps:$4 sm:$0xff]  }
 0x3ff   : > { %3669 = vmatpush1.bf16.msra.mxu0 %v15220_v39  ;;  %3874 = vmatpush1.bf16.msra.mxu1 %v15223_v40  ;;  %v15310_v39 = vld [vmem:[%s18141_s11 + $0x900] ss:$16 sps:$4 sm:$0xff]   ;;  %v15313_v40 = vld [vmem:[%s18141_s11 + $0x908] ss:$16 sps:$4 sm:$0xff]  }
 0x400   : > { %3670 = vmatprep.subr.bf16.mxu0 %v15228_v41  ;;  %3875 = vmatprep.subr.bf16.mxu1 %v15231_v42  ;;  %v15318_v41 = vld [vmem:[%s18141_s11 + $0x924] ss:$16 sps:$4 sm:$0xff]   ;;  %v15321_v42 = vld [vmem:[%s18141_s11 + $0x92c] ss:$16 sps:$4 sm:$0xff]  }
 0x403   : > { %3671 = vmatpush1.bf16.msra.mxu0 %v15226_v43  ;;  %3876 = vmatpush1.bf16.msra.mxu1 %v15229_v44  ;;  %v15316_v43 = vld [vmem:[%s18141_s11 + $0x920] ss:$16 sps:$4 sm:$0xff]   ;;  %v15319_v44 = vld [vmem:[%s18141_s11 + $0x928] ss:$16 sps:$4 sm:$0xff]  }
 0x404   : > { %3672 = vmatprep.subr.bf16.mxu0 %v15234_v45  ;;  %3877 = vmatprep.subr.bf16.mxu1 %v15237_v46  ;;  %v15324_v45 = vld [vmem:[%s18141_s11 + $0x944] ss:$16 sps:$4 sm:$0xff]   ;;  %v15327_v46 = vld [vmem:[%s18141_s11 + $0x94c] ss:$16 sps:$4 sm:$0xff]  }
 0x407   : > { %3673 = vmatpush1.bf16.msra.mxu0 %v15232_v47  ;;  %3878 = vmatpush1.bf16.msra.mxu1 %v15235_v48  ;;  %v15322_v47 = vld [vmem:[%s18141_s11 + $0x940] ss:$16 sps:$4 sm:$0xff]   ;;  %v15325_v48 = vld [vmem:[%s18141_s11 + $0x948] ss:$16 sps:$4 sm:$0xff]  }
 0x408   : > { %3674 = vmatprep.subr.bf16.mxu0 %v15240_v49  ;;  %3879 = vmatprep.subr.bf16.mxu1 %v15243_v50  ;;  %v15330_v49 = vld [vmem:[%s18141_s11 + $0x964] ss:$16 sps:$4 sm:$0xff]   ;;  %v15333_v50 = vld [vmem:[%s18141_s11 + $0x96c] ss:$16 sps:$4 sm:$0xff]  }
 0x40b   : > { %3675 = vmatpush1.bf16.msra.mxu0 %v15238_v51  ;;  %3880 = vmatpush1.bf16.msra.mxu1 %v15241_v52  ;;  %v15328_v51 = vld [vmem:[%s18141_s11 + $0x960] ss:$16 sps:$4 sm:$0xff]   ;;  %v15331_v52 = vld [vmem:[%s18141_s11 + $0x968] ss:$16 sps:$4 sm:$0xff]  }
 0x40c   : > { %3676 = vmatprep.subr.bf16.mxu0 %v15246_v53  ;;  %3881 = vmatprep.subr.bf16.mxu1 %v15249_v54  ;;  %v15336_v53 = vld [vmem:[%s18141_s11 + $0x984] ss:$16 sps:$4 sm:$0xff]   ;;  %v15339_v54 = vld [vmem:[%s18141_s11 + $0x98c] ss:$16 sps:$4 sm:$0xff]  }
 0x40f   : > { %3677 = vmatpush1.bf16.msra.mxu0 %v15244_v55  ;;  %3882 = vmatpush1.bf16.msra.mxu1 %v15247_v56  ;;  %v15334_v55 = vld [vmem:[%s18141_s11 + $0x980] ss:$16 sps:$4 sm:$0xff]   ;;  %v15337_v56 = vld [vmem:[%s18141_s11 + $0x988] ss:$16 sps:$4 sm:$0xff]  }
 0x410   : > { %3678 = vmatprep.subr.bf16.mxu0 %v15252_v57  ;;  %3883 = vmatprep.subr.bf16.mxu1 %v15255_v58  ;;  %v15342_v57 = vld [vmem:[%s18141_s11 + $0x9a4] ss:$16 sps:$4 sm:$0xff]   ;;  %v15345_v58 = vld [vmem:[%s18141_s11 + $0x9ac] ss:$16 sps:$4 sm:$0xff]  }
 0x413   : > { %3679 = vmatpush1.bf16.msra.mxu0 %v15250_v59  ;;  %3884 = vmatpush1.bf16.msra.mxu1 %v15253_v60  ;;  %v15340_v59 = vld [vmem:[%s18141_s11 + $0x9a0] ss:$16 sps:$4 sm:$0xff]   ;;  %v15343_v60 = vld [vmem:[%s18141_s11 + $0x9a8] ss:$16 sps:$4 sm:$0xff]  }
 0x414   : > { %3680 = vmatprep.subr.bf16.mxu0 %v15258_v61  ;;  %3885 = vmatprep.subr.bf16.mxu1 %v15261_v62  ;;  %v15348_v61 = vld [vmem:[%s18141_s11 + $0x9c4] ss:$16 sps:$4 sm:$0xff]   ;;  %v15351_v62 = vld [vmem:[%s18141_s11 + $0x9cc] ss:$16 sps:$4 sm:$0xff]  }
 0x417   : > { %3681 = vmatpush1.bf16.msra.mxu0 %v15256_v63  ;;  %3886 = vmatpush1.bf16.msra.mxu1 %v15259_v0  ;;  %v15346_v63 = vld [vmem:[%s18141_s11 + $0x9c0] ss:$16 sps:$4 sm:$0xff]   ;;  %v15349_v0 = vld [vmem:[%s18141_s11 + $0x9c8] ss:$16 sps:$4 sm:$0xff]  }
 0x418   : > { %3691 = vmatprep.subr.bf16.mxu0 %v15264_v2  ;;  %3896 = vmatprep.subr.bf16.mxu1 %v15267_v3  ;;  %v15357_v2 = vld [vmem:[%s18141_s11 + $0x9ec] ss:$16 sps:$4 sm:$0xff]   ;;  %v15352_v3 = vld [vmem:[%s18141_s11 + $0x9e0] ss:$16 sps:$4 sm:$0xff]  }
 0x41a   : > { %3683 = vmatmul.mubr.bf16.vlgmr.msra.gmra.mrb[0].mxu0 %v1581_v4  ;;  %3888 = vmatmul.mubr.bf16.vlgmr.msra.gmra.mrb[0].mxu1 %v1581_v4  ;;  %v15355_v4 = vld [vmem:[%s18141_s11 + $0x9e8] ss:$16 sps:$4 sm:$0xff]   ;;  %s13131_s11 = sshll.u32 %s3943_s20, 3 }
 0x41b   : > { %3692 = vmatpush1.bf16.msra.mxu0 %v15262_v6  ;;  %3897 = vmatpush1.bf16.msra.mxu1 %v15265_v7  ;;  %v1583_v6 = vpack.c.bf16 %v1573_v5, %v1573_v5  ;;  %v1907_v7 = vlaneseq  ;;  %s3946_s22 = scalar_lea.vmem [#allocation3], %s13131_s11 }
 0x41c   : > { %3693 = vmatprep.subr.bf16.mxu0 %v15270_v8  ;;  %3898 = vmatprep.subr.bf16.mxu1 %v15273_v9 }
 0x41d   : > { %3723 = vmatprep.mubr.bf16.mxu0 %v1584_v10  ;;  %3928 = vmatprep.mubr.bf16.mxu1 %v1584_v10  ;;  %v1908_v8 = vshrl.u32 %v1907_v7, 7 }
 0x41f   : > { %3694 = vmatpush1.bf16.msra.mxu0 %v15268_v11  ;;  %3899 = vmatpush1.bf16.msra.mxu1 %v15271_v12  ;;  %v1909_v9 = vsub.s32 0, %v1908_v8  ;;  %v1917_v10 = vsub.s32 2, %v1908_v8  ;;  %v1905_v11 = vld [vmem:[%s718_s12] sm:$0xf]  ;;  %v1913_v12 = vsub.s32 1, %v1908_v8 }
 0x420   : > { %3695 = vmatprep.subr.bf16.mxu0 %v15276_v13  ;;  %3900 = vmatprep.subr.bf16.mxu1 %v15279_v14  ;;  %v1921_v13 = vsub.s32 3, %v1908_v8 }
 0x421   : > { %v1910_v14 = vrot.slane %v1905_v11, %v1909_v9 }
 0x423   : > { %3696 = vmatpush1.bf16.msra.mxu0 %v15274_v15  ;;  %3901 = vmatpush1.bf16.msra.mxu1 %v15277_v16  ;;  %v1918_v15 = vrot.slane %v1905_v11, %v1917_v10  ;;  %v1914_v16 = vrot.slane %v1905_v11, %v1913_v12 }
 0x424   : > { %3697 = vmatprep.subr.bf16.mxu0 %v15282_v17  ;;  %3902 = vmatprep.subr.bf16.mxu1 %v15285_v18  ;;  %v1922_v17 = vrot.slane %v1905_v11, %v1921_v13 }
 0x427   : > { %3698 = vmatpush1.bf16.msra.mxu0 %v15280_v19  ;;  %3903 = vmatpush1.bf16.msra.mxu1 %v15283_v20 }
 0x428   : > { %3699 = vmatprep.subr.bf16.mxu0 %v15288_v21  ;;  %3904 = vmatprep.subr.bf16.mxu1 %v15291_v22 }
 0x42b   : > { %3700 = vmatpush1.bf16.msra.mxu0 %v15286_v23  ;;  %3905 = vmatpush1.bf16.msra.mxu1 %v15289_v24 }
 0x42c   : > { %3701 = vmatprep.subr.bf16.mxu0 %v15294_v25  ;;  %3906 = vmatprep.subr.bf16.mxu1 %v15297_v26 }
 0x42f   : > { %3702 = vmatpush1.bf16.msra.mxu0 %v15292_v27  ;;  %3907 = vmatpush1.bf16.msra.mxu1 %v15295_v28 }
 0x430   : > { %3703 = vmatprep.subr.bf16.mxu0 %v15300_v29  ;;  %3908 = vmatprep.subr.bf16.mxu1 %v15303_v30 }
 0x433   : > { %3704 = vmatpush1.bf16.msra.mxu0 %v15298_v31  ;;  %3909 = vmatpush1.bf16.msra.mxu1 %v15301_v32 }
 0x434   : > { %3705 = vmatprep.subr.bf16.mxu0 %v15306_v33  ;;  %3910 = vmatprep.subr.bf16.mxu1 %v15309_v34 }
 0x437   : > { %3706 = vmatpush1.bf16.msra.mxu0 %v15304_v35  ;;  %3911 = vmatpush1.bf16.msra.mxu1 %v15307_v36 }
 0x438   : > { %3707 = vmatprep.subr.bf16.mxu0 %v15312_v37  ;;  %3912 = vmatprep.subr.bf16.mxu1 %v15315_v38 }
 0x43b   : > { %3708 = vmatpush1.bf16.msra.mxu0 %v15310_v39  ;;  %3913 = vmatpush1.bf16.msra.mxu1 %v15313_v40 }
 0x43c   : > { %3709 = vmatprep.subr.bf16.mxu0 %v15318_v41  ;;  %3914 = vmatprep.subr.bf16.mxu1 %v15321_v42 }
 0x43f   : > { %3710 = vmatpush1.bf16.msra.mxu0 %v15316_v43  ;;  %3915 = vmatpush1.bf16.msra.mxu1 %v15319_v44 }
 0x440   : > { %3711 = vmatprep.subr.bf16.mxu0 %v15324_v45  ;;  %3916 = vmatprep.subr.bf16.mxu1 %v15327_v46 }
 0x443   : > { %3712 = vmatpush1.bf16.msra.mxu0 %v15322_v47  ;;  %3917 = vmatpush1.bf16.msra.mxu1 %v15325_v48 }
 0x444   : > { %3713 = vmatprep.subr.bf16.mxu0 %v15330_v49  ;;  %3918 = vmatprep.subr.bf16.mxu1 %v15333_v50 }
 0x447   : > { %3714 = vmatpush1.bf16.msra.mxu0 %v15328_v51  ;;  %3919 = vmatpush1.bf16.msra.mxu1 %v15331_v52 }
 0x448   : > { %3715 = vmatprep.subr.bf16.mxu0 %v15336_v53  ;;  %3920 = vmatprep.subr.bf16.mxu1 %v15339_v54 }
 0x44b   : > { %3716 = vmatpush1.bf16.msra.mxu0 %v15334_v55  ;;  %3921 = vmatpush1.bf16.msra.mxu1 %v15337_v56 }
 0x44c   : > { %3717 = vmatprep.subr.bf16.mxu0 %v15342_v57  ;;  %3922 = vmatprep.subr.bf16.mxu1 %v15345_v58 }
 0x44f   : > { %3718 = vmatpush1.bf16.msra.mxu0 %v15340_v59  ;;  %3923 = vmatpush1.bf16.msra.mxu1 %v15343_v60 }
 0x450   : > { %3719 = vmatprep.subr.bf16.mxu0 %v15348_v61  ;;  %3924 = vmatprep.subr.bf16.mxu1 %v15351_v62 }
 0x453   : > { %3720 = vmatpush1.bf16.msra.mxu0 %v15346_v63  ;;  %3925 = vmatpush1.bf16.msra.mxu1 %v15349_v0 }
 0x454   : > { %3721 = vmatprep.subr.bf16.mxu0 %v15354_v1  ;;  %3926 = vmatprep.subr.bf16.mxu1 %v15357_v2 }
 0x457   : > { %3722 = vmatpush1.bf16.msra.mxu0 %v15352_v3  ;;  %3927 = vmatpush1.bf16.msra.mxu1 %v15355_v4 }
 0x45a   : > { %3724 = vmatmul.mubr.bf16.vlgmr.msra.gmra.mrb[0].mxu0 %v1583_v6  ;;  %3929 = vmatmul.mubr.bf16.vlgmr.msra.gmra.mrb[0].mxu1 %v1583_v6 }
 0x52d   : > { %v3725_v18 = vpop.f32.mrb[0].mxu0  ;;  %v3930_v19 = vpop.f32.mrb[0].mxu1 }
 0x52e   : > { %v14404_v20 = vadd.f32 %v3725_v18, %v1910_v14  ;;  %v14406_v21 = vadd.f32 %v3930_v19, %v1918_v15  ;;  %v3727_v22 = vpop.f32.mrb[1].mxu0  ;;  %v3932_v23 = vpop.f32.mrb[1].mxu1 }
 0x52f   : > { %v14405_v24 = vadd.f32 %v3727_v22, %v1914_v16  ;;  %v14407_v25 = vadd.f32 %v3932_v23, %v1922_v17  ;;  %v3729_v26 = vpop.f32.mrb[2].mxu0  ;;  %v3934_v27 = vpop.f32.mrb[2].mxu1 }
 0x530   : > { %v3937_v28 = vmax.f32 %v14404_v20, 0.0  ;;  %v3939_v29 = vmax.f32 %v14406_v21, 0.0  ;;  %v3730_v30 = vpop.f32.mrb[3].mxu0  ;;  %v3935_v31 = vpop.f32.mrb[3].mxu1 }
 0x531   : > { %v3938_v32 = vmax.f32 %v14405_v24, 0.0  ;;  %v3940_v33 = vmax.f32 %v14407_v25, 0.0 }
 0x532   : > { %3947 = vst [vmem:[%s3946_s22] sm:$0xff] %v3937_v28  ;;  %3949 = vst [vmem:[%s3946_s22 + $0x10] sm:$0xff] %v3939_v29 }
 0x533   : > { %3948 = vst [vmem:[%s3946_s22 + $0x8] sm:$0xff] %v3938_v32  ;;  %3950 = vst [vmem:[%s3946_s22 + $0x18] sm:$0xff] %v3940_v33 }
 0x534 PF: > { %p3951_p8 = scmp.ge.s32.totalorder %s17635_s18, 6  ;;  %p3952_p11 = scmp.lt.s32.totalorder %s17635_s18, 10 }
 0x536   : > { %p3953_p4 = pnand %p3952_p11, %p3951_p8 }
 0x537   : > { %v15358_v34 = vld [vmem:[%s18152_s30 + $0x4] ss:$16 sps:$4 sm:$0xff] (!%p3953_p4)   ;;  %v15360_v35 = vld [vmem:[%s18152_s30 + $0xc] ss:$16 sps:$4 sm:$0xff] (!%p3953_p4)   ;;  %v15362_v36 = vld [vmem:[%s18152_s30] ss:$16 sps:$4 sm:$0xff] (!%p3953_p4)  }
 0x538   : > { %3956 = sbr.rel (%p3953_p4) target bundleno = 2066 (0x812), region = 120  ;;  %7083 = vmatprep.subr.bf16.mxu0 (!%p3953_p4), %v15358_v34  ;;  %v15363_v37 = vld [vmem:[%s18152_s30 + $0x8] ss:$16 sps:$4 sm:$0xff] (!%p3953_p4)   ;;  %7411 = vmatprep.subr.bf16.mxu1 (!%p3953_p4), %v15360_v35  ;;  %v15364_v38 = vld [vmem:[%s18152_s30 + $0x24] ss:$16 sps:$4 sm:$0xff] (!%p3953_p4)   ;;  %s13644_s12 = sadd.s32 (!%p3953_p4), 4294967290, %s17635_s18 }
 0x539   : > { %7084 = vmatpush1.bf16.msra.mxu0 (!%p3953_p4), %v15362_v36  ;;  %7412 = vmatpush1.bf16.msra.mxu1 (!%p3953_p4), %v15363_v37  ;;  %v15366_v39 = vld [vmem:[%s18152_s30 + $0x2c] ss:$16 sps:$4 sm:$0xff] (!%p3953_p4)   ;;  %v15368_v40 = vld [vmem:[%s18152_s30 + $0x20] ss:$16 sps:$4 sm:$0xff] (!%p3953_p4)   ;;  %v15369_v41 = vld [vmem:[%s18152_s30 + $0x28] ss:$16 sps:$4 sm:$0xff] (!%p3953_p4)  }
 0x53a   : > { %7085 = vmatprep.subr.bf16.mxu0 (!%p3953_p4), %v15364_v38  ;;  %7413 = vmatprep.subr.bf16.mxu1 (!%p3953_p4), %v15366_v39  ;;  %v15370_v42 = vld [vmem:[%s18152_s30 + $0x44] ss:$16 sps:$4 sm:$0xff] (!%p3953_p4)   ;;  %v15372_v43 = vld [vmem:[%s18152_s30 + $0x4c] ss:$16 sps:$4 sm:$0xff] (!%p3953_p4)   ;;  %v15374_v44 = vld [vmem:[%s18152_s30 + $0x40] ss:$16 sps:$4 sm:$0xff] (!%p3953_p4)  }
 0x53b   : > { %v15375_v45 = vld [vmem:[%s18152_s30 + $0x48] ss:$16 sps:$4 sm:$0xff] (!%p3953_p4)   ;;  %v15376_v46 = vld [vmem:[%s18152_s30 + $0x64] ss:$16 sps:$4 sm:$0xff] (!%p3953_p4)   ;;  %v15378_v47 = vld [vmem:[%s18152_s30 + $0x6c] ss:$16 sps:$4 sm:$0xff] (!%p3953_p4)  }
 0x53c   : > { %v15380_v48 = vld [vmem:[%s18152_s30 + $0x60] ss:$16 sps:$4 sm:$0xff] (!%p3953_p4)   ;;  %v15381_v49 = vld [vmem:[%s18152_s30 + $0x68] ss:$16 sps:$4 sm:$0xff] (!%p3953_p4)   ;;  %v15382_v50 = vld [vmem:[%s18152_s30 + $0x84] ss:$16 sps:$4 sm:$0xff] (!%p3953_p4)  }
 0x53d   : > { %7086 = vmatpush1.bf16.msra.mxu0 (!%p3953_p4), %v15368_v40  ;;  %7414 = vmatpush1.bf16.msra.mxu1 (!%p3953_p4), %v15369_v41  ;;  %v15384_v51 = vld [vmem:[%s18152_s30 + $0x8c] ss:$16 sps:$4 sm:$0xff] (!%p3953_p4)   ;;  %v15386_v52 = vld [vmem:[%s18152_s30 + $0x80] ss:$16 sps:$4 sm:$0xff] (!%p3953_p4)   ;;  %v15387_v53 = vld [vmem:[%s18152_s30 + $0x88] ss:$16 sps:$4 sm:$0xff] (!%p3953_p4)  }
 0x53e   : > { %7087 = vmatprep.subr.bf16.mxu0 (!%p3953_p4), %v15370_v42  ;;  %7415 = vmatprep.subr.bf16.mxu1 (!%p3953_p4), %v15372_v43  ;;  %v15388_v54 = vld [vmem:[%s18152_s30 + $0xa4] ss:$16 sps:$4 sm:$0xff] (!%p3953_p4)   ;;  %v15390_v55 = vld [vmem:[%s18152_s30 + $0xac] ss:$16 sps:$4 sm:$0xff] (!%p3953_p4)   ;;  %v15392_v56 = vld [vmem:[%s18152_s30 + $0xa0] ss:$16 sps:$4 sm:$0xff] (!%p3953_p4)  }
 0x53f   : > { %v15393_v57 = vld [vmem:[%s18152_s30 + $0xa8] ss:$16 sps:$4 sm:$0xff]   ;;  %v15394_v58 = vld [vmem:[%s18152_s30 + $0xc4] ss:$16 sps:$4 sm:$0xff]   ;;  %v15396_v59 = vld [vmem:[%s18152_s30 + $0xcc] ss:$16 sps:$4 sm:$0xff]  }
 0x540   : > { %v15398_v60 = vld [vmem:[%s18152_s30 + $0xc0] ss:$16 sps:$4 sm:$0xff]   ;;  %v15399_v61 = vld [vmem:[%s18152_s30 + $0xc8] ss:$16 sps:$4 sm:$0xff]   ;;  %v15400_v62 = vld [vmem:[%s18152_s30 + $0xe4] ss:$16 sps:$4 sm:$0xff]  }
 0x541   : > { %7088 = vmatpush1.bf16.msra.mxu0 %v15374_v44  ;;  %7416 = vmatpush1.bf16.msra.mxu1 %v15375_v45  ;;  %v15402_v63 = vld [vmem:[%s18152_s30 + $0xec] ss:$16 sps:$4 sm:$0xff]   ;;  %v15404_v0 = vld [vmem:[%s18152_s30 + $0xe0] ss:$16 sps:$4 sm:$0xff]   ;;  %v15405_v1 = vld [vmem:[%s18152_s30 + $0xe8] ss:$16 sps:$4 sm:$0xff]  }
 0x542   : > { %7089 = vmatprep.subr.bf16.mxu0 %v15376_v46  ;;  %7417 = vmatprep.subr.bf16.mxu1 %v15378_v47  ;;  %v15406_v2 = vld [vmem:[%s18152_s30 + $0x104] ss:$16 sps:$4 sm:$0xff]   ;;  %v15408_v3 = vld [vmem:[%s18152_s30 + $0x10c] ss:$16 sps:$4 sm:$0xff]   ;;  %v15410_v4 = vld [vmem:[%s18152_s30 + $0x100] ss:$16 sps:$4 sm:$0xff]  }
 0x543   : > { %v15411_v5 = vld [vmem:[%s18152_s30 + $0x108] ss:$16 sps:$4 sm:$0xff]   ;;  %v15412_v6 = vld [vmem:[%s18152_s30 + $0x124] ss:$16 sps:$4 sm:$0xff]   ;;  %v15414_v7 = vld [vmem:[%s18152_s30 + $0x12c] ss:$16 sps:$4 sm:$0xff]  }
 0x544   : > { %v15416_v8 = vld [vmem:[%s18152_s30 + $0x120] ss:$16 sps:$4 sm:$0xff]   ;;  %v15417_v9 = vld [vmem:[%s18152_s30 + $0x128] ss:$16 sps:$4 sm:$0xff]   ;;  %v15418_v10 = vld [vmem:[%s18152_s30 + $0x144] ss:$16 sps:$4 sm:$0xff]  }
 0x545   : > { %7090 = vmatpush1.bf16.msra.mxu0 %v15380_v48  ;;  %7418 = vmatpush1.bf16.msra.mxu1 %v15381_v49  ;;  %v15420_v11 = vld [vmem:[%s18152_s30 + $0x14c] ss:$16 sps:$4 sm:$0xff]   ;;  %v15422_v12 = vld [vmem:[%s18152_s30 + $0x140] ss:$16 sps:$4 sm:$0xff]   ;;  %v15423_v13 = vld [vmem:[%s18152_s30 + $0x148] ss:$16 sps:$4 sm:$0xff]  }
 0x546   : > { %7091 = vmatprep.subr.bf16.mxu0 %v15382_v50  ;;  %7419 = vmatprep.subr.bf16.mxu1 %v15384_v51  ;;  %v15424_v14 = vld [vmem:[%s18152_s30 + $0x164] ss:$16 sps:$4 sm:$0xff]   ;;  %v15426_v15 = vld [vmem:[%s18152_s30 + $0x16c] ss:$16 sps:$4 sm:$0xff]   ;;  %v15428_v17 = vld [vmem:[%s18152_s30 + $0x160] ss:$16 sps:$4 sm:$0xff]  }
 0x547   : > { %v3958_v16 = vld [vmem:[#allocation3 + $0x8] sm:$0xff]  ;;  %v15434_v22 = vld [vmem:[%s18152_s30 + $0x180] ss:$16 sps:$4 sm:$0xff]   ;;  %s13645_s21 = sshll.u32 %s13644_s12, 9 }
 0x548   : > { %v3974_v18 = vpack.c.bf16 %v3958_v16, %v3958_v16  ;;  %v15429_v19 = vld [vmem:[%s18152_s30 + $0x168] ss:$16 sps:$4 sm:$0xff]   ;;  %v15430_v20 = vld [vmem:[%s18152_s30 + $0x184] ss:$16 sps:$4 sm:$0xff]   ;;  %v15432_v21 = vld [vmem:[%s18152_s30 + $0x18c] ss:$16 sps:$4 sm:$0xff]  }
 0x549   : > { %7092 = vmatpush1.bf16.msra.mxu0 %v15386_v52  ;;  %7420 = vmatpush1.bf16.msra.mxu1 %v15387_v53  ;;  %v15435_v23 = vld [vmem:[%s18152_s30 + $0x188] ss:$16 sps:$4 sm:$0xff]   ;;  %v15436_v24 = vld [vmem:[%s18152_s30 + $0x1a4] ss:$16 sps:$4 sm:$0xff]   ;;  %v15438_v25 = vld [vmem:[%s18152_s30 + $0x1ac] ss:$16 sps:$4 sm:$0xff]  }
 0x54a   : > { %7093 = vmatprep.subr.bf16.mxu0 %v15388_v54  ;;  %7421 = vmatprep.subr.bf16.mxu1 %v15390_v55  ;;  %v15440_v26 = vld [vmem:[%s18152_s30 + $0x1a0] ss:$16 sps:$4 sm:$0xff]   ;;  %v15441_v27 = vld [vmem:[%s18152_s30 + $0x1a8] ss:$16 sps:$4 sm:$0xff]   ;;  %v15442_v28 = vld [vmem:[%s18152_s30 + $0x1c4] ss:$16 sps:$4 sm:$0xff]  }
 0x54b   : > { %7115 = vmatprep.mubr.bf16.mxu0 %v3974_v18  ;;  %7443 = vmatprep.mubr.bf16.mxu1 %v3974_v18  ;;  %v15444_v29 = vld [vmem:[%s18152_s30 + $0x1cc] ss:$16 sps:$4 sm:$0xff]   ;;  %v15446_v30 = vld [vmem:[%s18152_s30 + $0x1c0] ss:$16 sps:$4 sm:$0xff]   ;;  %v15447_v31 = vld [vmem:[%s18152_s30 + $0x1c8] ss:$16 sps:$4 sm:$0xff]  }
 0x54c   : > { %v15448_v32 = vld [vmem:[%s18152_s30 + $0x1e4] ss:$16 sps:$4 sm:$0xff]   ;;  %v15450_v33 = vld [vmem:[%s18152_s30 + $0x1ec] ss:$16 sps:$4 sm:$0xff]   ;;  %v15452_v34 = vld [vmem:[%s18152_s30 + $0x1e0] ss:$16 sps:$4 sm:$0xff]  }
 0x54d   : > { %7094 = vmatpush1.bf16.msra.mxu0 %v15392_v56  ;;  %7422 = vmatpush1.bf16.msra.mxu1 %v15393_v57  ;;  %v15453_v35 = vld [vmem:[%s18152_s30 + $0x1e8] ss:$16 sps:$4 sm:$0xff]   ;;  %v3957_v36 = vld [vmem:[#allocation3] sm:$0xff]  ;;  %s7745_s13 = sshra.s32 %s13645_s21, 7 }
 0x54e   : > { %7095 = vmatprep.subr.bf16.mxu0 %v15394_v58  ;;  %7423 = vmatprep.subr.bf16.mxu1 %v15396_v59  ;;  %v15456_v37 = vld [vmem:[%s18152_s30 + $0x204] ss:$16 sps:$4 sm:$0xff]   ;;  %v15459_v38 = vld [vmem:[%s18152_s30 + $0x20c] ss:$16 sps:$4 sm:$0xff]   ;;  %v3973_v39 = vpack.c.bf16 %v3957_v36, %v3957_v36  ;;  %v15454_v40 = vld [vmem:[%s18152_s30 + $0x200] ss:$16 sps:$4 sm:$0xff]  }
 0x54f   : > { %v15457_v41 = vld [vmem:[%s18152_s30 + $0x208] ss:$16 sps:$4 sm:$0xff]   ;;  %v15462_v42 = vld [vmem:[%s18152_s30 + $0x224] ss:$16 sps:$4 sm:$0xff]   ;;  %v15465_v43 = vld [vmem:[%s18152_s30 + $0x22c] ss:$16 sps:$4 sm:$0xff]  }
 0x550   : > { %v15460_v44 = vld [vmem:[%s18152_s30 + $0x220] ss:$16 sps:$4 sm:$0xff]   ;;  %v15463_v45 = vld [vmem:[%s18152_s30 + $0x228] ss:$16 sps:$4 sm:$0xff]   ;;  %v15468_v46 = vld [vmem:[%s18152_s30 + $0x244] ss:$16 sps:$4 sm:$0xff]  }
 0x551   : > { %7096 = vmatpush1.bf16.msra.mxu0 %v15398_v60  ;;  %7424 = vmatpush1.bf16.msra.mxu1 %v15399_v61  ;;  %v15471_v47 = vld [vmem:[%s18152_s30 + $0x24c] ss:$16 sps:$4 sm:$0xff]   ;;  %v15466_v48 = vld [vmem:[%s18152_s30 + $0x240] ss:$16 sps:$4 sm:$0xff]   ;;  %v15469_v49 = vld [vmem:[%s18152_s30 + $0x248] ss:$16 sps:$4 sm:$0xff]  }
 0x552   : > { %7097 = vmatprep.subr.bf16.mxu0 %v15400_v62  ;;  %7425 = vmatprep.subr.bf16.mxu1 %v15402_v63  ;;  %v15474_v50 = vld [vmem:[%s18152_s30 + $0x264] ss:$16 sps:$4 sm:$0xff]   ;;  %v15477_v51 = vld [vmem:[%s18152_s30 + $0x26c] ss:$16 sps:$4 sm:$0xff]   ;;  %v15472_v52 = vld [vmem:[%s18152_s30 + $0x260] ss:$16 sps:$4 sm:$0xff]  }
 0x553   : > { %v15475_v53 = vld [vmem:[%s18152_s30 + $0x268] ss:$16 sps:$4 sm:$0xff]   ;;  %v15480_v54 = vld [vmem:[%s18152_s30 + $0x284] ss:$16 sps:$4 sm:$0xff]   ;;  %v15483_v55 = vld [vmem:[%s18152_s30 + $0x28c] ss:$16 sps:$4 sm:$0xff]  }
 0x554   : > { %v15478_v56 = vld [vmem:[%s18152_s30 + $0x280] ss:$16 sps:$4 sm:$0xff]   ;;  %v15481_v57 = vld [vmem:[%s18152_s30 + $0x288] ss:$16 sps:$4 sm:$0xff]   ;;  %v15486_v58 = vld [vmem:[%s18152_s30 + $0x2a4] ss:$16 sps:$4 sm:$0xff]  }
 0x555   : > { %7098 = vmatpush1.bf16.msra.mxu0 %v15404_v0  ;;  %7426 = vmatpush1.bf16.msra.mxu1 %v15405_v1  ;;  %v15489_v59 = vld [vmem:[%s18152_s30 + $0x2ac] ss:$16 sps:$4 sm:$0xff]   ;;  %v15484_v60 = vld [vmem:[%s18152_s30 + $0x2a0] ss:$16 sps:$4 sm:$0xff]   ;;  %v15487_v61 = vld [vmem:[%s18152_s30 + $0x2a8] ss:$16 sps:$4 sm:$0xff]  }
 0x556   : > { %7099 = vmatprep.subr.bf16.mxu0 %v15406_v2  ;;  %7427 = vmatprep.subr.bf16.mxu1 %v15408_v3  ;;  %v15492_v62 = vld [vmem:[%s18152_s30 + $0x2c4] ss:$16 sps:$4 sm:$0xff]   ;;  %v15495_v63 = vld [vmem:[%s18152_s30 + $0x2cc] ss:$16 sps:$4 sm:$0xff]   ;;  %v15490_v1 = vld [vmem:[%s18152_s30 + $0x2c0] ss:$16 sps:$4 sm:$0xff]  }
 0x557   : > { %v3960_v0 = vld [vmem:[#allocation3 + $0x18] sm:$0xff]  ;;  %v15514_v18 = vld [vmem:[%s18152_s30 + $0x340] ss:$16 sps:$4 sm:$0xff]  }
 0x558   : > { %v3976_v2 = vpack.c.bf16 %v3960_v0, %v3960_v0  ;;  %v15493_v3 = vld [vmem:[%s18152_s30 + $0x2c8] ss:$16 sps:$4 sm:$0xff]   ;;  %v15516_v16 = vld [vmem:[%s18152_s30 + $0x344] ss:$16 sps:$4 sm:$0xff]  }
 0x559   : > { %7100 = vmatpush1.bf16.msra.mxu0 %v15410_v4  ;;  %7428 = vmatpush1.bf16.msra.mxu1 %v15411_v5  ;;  %v15498_v4 = vld [vmem:[%s18152_s30 + $0x2e4] ss:$16 sps:$4 sm:$0xff]   ;;  %v15501_v5 = vld [vmem:[%s18152_s30 + $0x2ec] ss:$16 sps:$4 sm:$0xff]  }
 0x55a   : > { %7101 = vmatprep.subr.bf16.mxu0 %v15412_v6  ;;  %7429 = vmatprep.subr.bf16.mxu1 %v15414_v7  ;;  %v15496_v6 = vld [vmem:[%s18152_s30 + $0x2e0] ss:$16 sps:$4 sm:$0xff]   ;;  %v15499_v7 = vld [vmem:[%s18152_s30 + $0x2e8] ss:$16 sps:$4 sm:$0xff]   ;;  %v15546_v36 = vld [vmem:[%s18152_s30 + $0x3e4] ss:$16 sps:$4 sm:$0xff]  }
 0x55b   : > { %v15582_v0 = vld [vmem:[%s18152_s30 + $0x4a4] ss:$16 sps:$4 sm:$0xff]  }
 0x55d   : > { %7102 = vmatpush1.bf16.msra.mxu0 %v15416_v8  ;;  %7430 = vmatpush1.bf16.msra.mxu1 %v15417_v9  ;;  %v15504_v8 = vld [vmem:[%s18152_s30 + $0x304] ss:$16 sps:$4 sm:$0xff]   ;;  %v15507_v9 = vld [vmem:[%s18152_s30 + $0x30c] ss:$16 sps:$4 sm:$0xff]  }
 0x55e   : > { %7103 = vmatprep.subr.bf16.mxu0 %v15418_v10  ;;  %7431 = vmatprep.subr.bf16.mxu1 %v15420_v11  ;;  %v15502_v10 = vld [vmem:[%s18152_s30 + $0x300] ss:$16 sps:$4 sm:$0xff]   ;;  %v15505_v11 = vld [vmem:[%s18152_s30 + $0x308] ss:$16 sps:$4 sm:$0xff]  }
 0x561   : > { %7104 = vmatpush1.bf16.msra.mxu0 %v15422_v12  ;;  %7432 = vmatpush1.bf16.msra.mxu1 %v15423_v13  ;;  %v15510_v12 = vld [vmem:[%s18152_s30 + $0x324] ss:$16 sps:$4 sm:$0xff]   ;;  %v15513_v13 = vld [vmem:[%s18152_s30 + $0x32c] ss:$16 sps:$4 sm:$0xff]  }
 0x562   : > { %7105 = vmatprep.subr.bf16.mxu0 %v15424_v14  ;;  %7433 = vmatprep.subr.bf16.mxu1 %v15426_v15  ;;  %v15508_v14 = vld [vmem:[%s18152_s30 + $0x320] ss:$16 sps:$4 sm:$0xff]   ;;  %v15511_v15 = vld [vmem:[%s18152_s30 + $0x328] ss:$16 sps:$4 sm:$0xff]  }
 0x565   : > { %7106 = vmatpush1.bf16.msra.mxu0 %v15428_v17  ;;  %7434 = vmatpush1.bf16.msra.mxu1 %v15429_v19  ;;  %v15519_v17 = vld [vmem:[%s18152_s30 + $0x34c] ss:$16 sps:$4 sm:$0xff]   ;;  %v15517_v19 = vld [vmem:[%s18152_s30 + $0x348] ss:$16 sps:$4 sm:$0xff]  }
 0x566   : > { %7107 = vmatprep.subr.bf16.mxu0 %v15430_v20  ;;  %7435 = vmatprep.subr.bf16.mxu1 %v15432_v21  ;;  %v15522_v20 = vld [vmem:[%s18152_s30 + $0x364] ss:$16 sps:$4 sm:$0xff]   ;;  %v15525_v21 = vld [vmem:[%s18152_s30 + $0x36c] ss:$16 sps:$4 sm:$0xff]  }
 0x569   : > { %7108 = vmatpush1.bf16.msra.mxu0 %v15434_v22  ;;  %7436 = vmatpush1.bf16.msra.mxu1 %v15435_v23  ;;  %v15520_v22 = vld [vmem:[%s18152_s30 + $0x360] ss:$16 sps:$4 sm:$0xff]   ;;  %v15523_v23 = vld [vmem:[%s18152_s30 + $0x368] ss:$16 sps:$4 sm:$0xff]  }
 0x56a   : > { %7109 = vmatprep.subr.bf16.mxu0 %v15436_v24  ;;  %7437 = vmatprep.subr.bf16.mxu1 %v15438_v25  ;;  %v15528_v24 = vld [vmem:[%s18152_s30 + $0x384] ss:$16 sps:$4 sm:$0xff]   ;;  %v15531_v25 = vld [vmem:[%s18152_s30 + $0x38c] ss:$16 sps:$4 sm:$0xff]  }
 0x56d   : > { %7110 = vmatpush1.bf16.msra.mxu0 %v15440_v26  ;;  %7438 = vmatpush1.bf16.msra.mxu1 %v15441_v27  ;;  %v15526_v26 = vld [vmem:[%s18152_s30 + $0x380] ss:$16 sps:$4 sm:$0xff]   ;;  %v15529_v27 = vld [vmem:[%s18152_s30 + $0x388] ss:$16 sps:$4 sm:$0xff]  }
 0x56e   : > { %7111 = vmatprep.subr.bf16.mxu0 %v15442_v28  ;;  %7439 = vmatprep.subr.bf16.mxu1 %v15444_v29  ;;  %v15534_v28 = vld [vmem:[%s18152_s30 + $0x3a4] ss:$16 sps:$4 sm:$0xff]   ;;  %v15537_v29 = vld [vmem:[%s18152_s30 + $0x3ac] ss:$16 sps:$4 sm:$0xff]  }
 0x571   : > { %7112 = vmatpush1.bf16.msra.mxu0 %v15446_v30  ;;  %7440 = vmatpush1.bf16.msra.mxu1 %v15447_v31  ;;  %v15532_v30 = vld [vmem:[%s18152_s30 + $0x3a0] ss:$16 sps:$4 sm:$0xff]   ;;  %v15535_v31 = vld [vmem:[%s18152_s30 + $0x3a8] ss:$16 sps:$4 sm:$0xff]  }
 0x572   : > { %7113 = vmatprep.subr.bf16.mxu0 %v15448_v32  ;;  %7441 = vmatprep.subr.bf16.mxu1 %v15450_v33  ;;  %v15540_v32 = vld [vmem:[%s18152_s30 + $0x3c4] ss:$16 sps:$4 sm:$0xff]   ;;  %v15543_v33 = vld [vmem:[%s18152_s30 + $0x3cc] ss:$16 sps:$4 sm:$0xff]  }
 0x575   : > { %7114 = vmatpush1.bf16.msra.mxu0 %v15452_v34  ;;  %7442 = vmatpush1.bf16.msra.mxu1 %v15453_v35  ;;  %v15538_v34 = vld [vmem:[%s18152_s30 + $0x3c0] ss:$16 sps:$4 sm:$0xff]   ;;  %v15541_v35 = vld [vmem:[%s18152_s30 + $0x3c8] ss:$16 sps:$4 sm:$0xff]  }
 0x576   : > { %7124 = vmatprep.subr.bf16.mxu0 %v15456_v37  ;;  %7452 = vmatprep.subr.bf16.mxu1 %v15459_v38  ;;  %v15549_v37 = vld [vmem:[%s18152_s30 + $0x3ec] ss:$16 sps:$4 sm:$0xff]   ;;  %v15544_v38 = vld [vmem:[%s18152_s30 + $0x3e0] ss:$16 sps:$4 sm:$0xff]  }
 0x578   : > { %7116 = vmatmul.mubr.bf16.vlgmr.msra.gmra.mrb[0].mxu0 %v3973_v39  ;;  %7444 = vmatmul.mubr.bf16.vlgmr.msra.gmra.mrb[0].mxu1 %v3973_v39  ;;  %v15547_v39 = vld [vmem:[%s18152_s30 + $0x3e8] ss:$16 sps:$4 sm:$0xff]  }
 0x579   : > { %7125 = vmatpush1.bf16.msra.mxu0 %v15454_v40  ;;  %7453 = vmatpush1.bf16.msra.mxu1 %v15457_v41  ;;  %v15552_v40 = vld [vmem:[%s18152_s30 + $0x404] ss:$16 sps:$4 sm:$0xff]  }
 0x57a   : > { %7126 = vmatprep.subr.bf16.mxu0 %v15462_v42  ;;  %7454 = vmatprep.subr.bf16.mxu1 %v15465_v43  ;;  %v3959_v41 = vld [vmem:[#allocation3 + $0x10] sm:$0xff] }
 0x57b   : > { %7156 = vmatprep.mubr.bf16.mxu0 %v3976_v2  ;;  %7484 = vmatprep.mubr.bf16.mxu1 %v3976_v2  ;;  %v15555_v42 = vld [vmem:[%s18152_s30 + $0x40c] ss:$16 sps:$4 sm:$0xff]   ;;  %v15550_v43 = vld [vmem:[%s18152_s30 + $0x400] ss:$16 sps:$4 sm:$0xff]  }
 0x57c   : > { %v15580_v2 = vld [vmem:[%s18152_s30 + $0x4a0] ss:$16 sps:$4 sm:$0xff]  }
 0x57d   : > { %7127 = vmatpush1.bf16.msra.mxu0 %v15460_v44  ;;  %7455 = vmatpush1.bf16.msra.mxu1 %v15463_v45  ;;  %v15553_v44 = vld [vmem:[%s18152_s30 + $0x408] ss:$16 sps:$4 sm:$0xff]   ;;  %v3975_v45 = vpack.c.bf16 %v3959_v41, %v3959_v41  ;;  %v15645_v41 = vld [vmem:[%s18152_s30 + $0x5ec] ss:$16 sps:$4 sm:$0xff]  }
 0x57e   : > { %7128 = vmatprep.subr.bf16.mxu0 %v15468_v46  ;;  %7456 = vmatprep.subr.bf16.mxu1 %v15471_v47  ;;  %v15558_v46 = vld [vmem:[%s18152_s30 + $0x424] ss:$16 sps:$4 sm:$0xff]   ;;  %v15561_v47 = vld [vmem:[%s18152_s30 + $0x42c] ss:$16 sps:$4 sm:$0xff]  }
 0x581   : > { %7129 = vmatpush1.bf16.msra.mxu0 %v15466_v48  ;;  %7457 = vmatpush1.bf16.msra.mxu1 %v15469_v49  ;;  %v3962_v48 = vld [vmem:[#allocation3 + $0x28] sm:$0xff] }
 0x582   : > { %7130 = vmatprep.subr.bf16.mxu0 %v15474_v50  ;;  %7458 = vmatprep.subr.bf16.mxu1 %v15477_v51  ;;  %v3978_v49 = vpack.c.bf16 %v3962_v48, %v3962_v48  ;;  %v15556_v50 = vld [vmem:[%s18152_s30 + $0x420] ss:$16 sps:$4 sm:$0xff]   ;;  %v15559_v51 = vld [vmem:[%s18152_s30 + $0x428] ss:$16 sps:$4 sm:$0xff]  }
 0x583   : > { %v15649_v48 = vld [vmem:[%s18152_s30 + $0x608] ss:$16 sps:$4 sm:$0xff]  }
 0x585   : > { %7131 = vmatpush1.bf16.msra.mxu0 %v15472_v52  ;;  %7459 = vmatpush1.bf16.msra.mxu1 %v15475_v53  ;;  %v15564_v52 = vld [vmem:[%s18152_s30 + $0x444] ss:$16 sps:$4 sm:$0xff]   ;;  %v15567_v53 = vld [vmem:[%s18152_s30 + $0x44c] ss:$16 sps:$4 sm:$0xff]  }
 0x586   : > { %7132 = vmatprep.subr.bf16.mxu0 %v15480_v54  ;;  %7460 = vmatprep.subr.bf16.mxu1 %v15483_v55  ;;  %v15562_v54 = vld [vmem:[%s18152_s30 + $0x440] ss:$16 sps:$4 sm:$0xff]   ;;  %v15565_v55 = vld [vmem:[%s18152_s30 + $0x448] ss:$16 sps:$4 sm:$0xff]  }
 0x589   : > { %7133 = vmatpush1.bf16.msra.mxu0 %v15478_v56  ;;  %7461 = vmatpush1.bf16.msra.mxu1 %v15481_v57  ;;  %v15570_v56 = vld [vmem:[%s18152_s30 + $0x464] ss:$16 sps:$4 sm:$0xff]   ;;  %v15573_v57 = vld [vmem:[%s18152_s30 + $0x46c] ss:$16 sps:$4 sm:$0xff]  }
 0x58a   : > { %7134 = vmatprep.subr.bf16.mxu0 %v15486_v58  ;;  %7462 = vmatprep.subr.bf16.mxu1 %v15489_v59  ;;  %v15568_v58 = vld [vmem:[%s18152_s30 + $0x460] ss:$16 sps:$4 sm:$0xff]   ;;  %v15571_v59 = vld [vmem:[%s18152_s30 + $0x468] ss:$16 sps:$4 sm:$0xff]  }
 0x58d   : > { %7135 = vmatpush1.bf16.msra.mxu0 %v15484_v60  ;;  %7463 = vmatpush1.bf16.msra.mxu1 %v15487_v61  ;;  %v15576_v60 = vld [vmem:[%s18152_s30 + $0x484] ss:$16 sps:$4 sm:$0xff]   ;;  %v15579_v61 = vld [vmem:[%s18152_s30 + $0x48c] ss:$16 sps:$4 sm:$0xff]  }
 0x58e   : > { %7136 = vmatprep.subr.bf16.mxu0 %v15492_v62  ;;  %7464 = vmatprep.subr.bf16.mxu1 %v15495_v63  ;;  %v15574_v62 = vld [vmem:[%s18152_s30 + $0x480] ss:$16 sps:$4 sm:$0xff]   ;;  %v15577_v63 = vld [vmem:[%s18152_s30 + $0x488] ss:$16 sps:$4 sm:$0xff]  }
 0x591   : > { %7137 = vmatpush1.bf16.msra.mxu0 %v15490_v1  ;;  %7465 = vmatpush1.bf16.msra.mxu1 %v15493_v3  ;;  %v15585_v1 = vld [vmem:[%s18152_s30 + $0x4ac] ss:$16 sps:$4 sm:$0xff]   ;;  %v15583_v3 = vld [vmem:[%s18152_s30 + $0x4a8] ss:$16 sps:$4 sm:$0xff]  }
 0x592   : > { %7138 = vmatprep.subr.bf16.mxu0 %v15498_v4  ;;  %7466 = vmatprep.subr.bf16.mxu1 %v15501_v5  ;;  %v15588_v4 = vld [vmem:[%s18152_s30 + $0x4c4] ss:$16 sps:$4 sm:$0xff]   ;;  %v15591_v5 = vld [vmem:[%s18152_s30 + $0x4cc] ss:$16 sps:$4 sm:$0xff]  }
 0x595   : > { %7139 = vmatpush1.bf16.msra.mxu0 %v15496_v6  ;;  %7467 = vmatpush1.bf16.msra.mxu1 %v15499_v7  ;;  %v15586_v6 = vld [vmem:[%s18152_s30 + $0x4c0] ss:$16 sps:$4 sm:$0xff]   ;;  %v15589_v7 = vld [vmem:[%s18152_s30 + $0x4c8] ss:$16 sps:$4 sm:$0xff]  }
 0x596   : > { %7140 = vmatprep.subr.bf16.mxu0 %v15504_v8  ;;  %7468 = vmatprep.subr.bf16.mxu1 %v15507_v9  ;;  %v15594_v8 = vld [vmem:[%s18152_s30 + $0x4e4] ss:$16 sps:$4 sm:$0xff]   ;;  %v15597_v9 = vld [vmem:[%s18152_s30 + $0x4ec] ss:$16 sps:$4 sm:$0xff]  }
 0x599   : > { %7141 = vmatpush1.bf16.msra.mxu0 %v15502_v10  ;;  %7469 = vmatpush1.bf16.msra.mxu1 %v15505_v11  ;;  %v15592_v10 = vld [vmem:[%s18152_s30 + $0x4e0] ss:$16 sps:$4 sm:$0xff]   ;;  %v15595_v11 = vld [vmem:[%s18152_s30 + $0x4e8] ss:$16 sps:$4 sm:$0xff]  }
 0x59a   : > { %7142 = vmatprep.subr.bf16.mxu0 %v15510_v12  ;;  %7470 = vmatprep.subr.bf16.mxu1 %v15513_v13  ;;  %v15600_v12 = vld [vmem:[%s18152_s30 + $0x504] ss:$16 sps:$4 sm:$0xff]   ;;  %v15603_v13 = vld [vmem:[%s18152_s30 + $0x50c] ss:$16 sps:$4 sm:$0xff]  }
 0x59d   : > { %7143 = vmatpush1.bf16.msra.mxu0 %v15508_v14  ;;  %7471 = vmatpush1.bf16.msra.mxu1 %v15511_v15  ;;  %v15598_v14 = vld [vmem:[%s18152_s30 + $0x500] ss:$16 sps:$4 sm:$0xff]   ;;  %v15601_v15 = vld [vmem:[%s18152_s30 + $0x508] ss:$16 sps:$4 sm:$0xff]  }
 0x59e   : > { %7144 = vmatprep.subr.bf16.mxu0 %v15516_v16  ;;  %7472 = vmatprep.subr.bf16.mxu1 %v15519_v17  ;;  %v15606_v16 = vld [vmem:[%s18152_s30 + $0x524] ss:$16 sps:$4 sm:$0xff]   ;;  %v15609_v17 = vld [vmem:[%s18152_s30 + $0x52c] ss:$16 sps:$4 sm:$0xff]  }
 0x5a1   : > { %7145 = vmatpush1.bf16.msra.mxu0 %v15514_v18  ;;  %7473 = vmatpush1.bf16.msra.mxu1 %v15517_v19  ;;  %v15604_v18 = vld [vmem:[%s18152_s30 + $0x520] ss:$16 sps:$4 sm:$0xff]   ;;  %v15607_v19 = vld [vmem:[%s18152_s30 + $0x528] ss:$16 sps:$4 sm:$0xff]  }
 0x5a2   : > { %7146 = vmatprep.subr.bf16.mxu0 %v15522_v20  ;;  %7474 = vmatprep.subr.bf16.mxu1 %v15525_v21  ;;  %v15612_v20 = vld [vmem:[%s18152_s30 + $0x544] ss:$16 sps:$4 sm:$0xff]   ;;  %v15615_v21 = vld [vmem:[%s18152_s30 + $0x54c] ss:$16 sps:$4 sm:$0xff]  }
 0x5a5   : > { %7147 = vmatpush1.bf16.msra.mxu0 %v15520_v22  ;;  %7475 = vmatpush1.bf16.msra.mxu1 %v15523_v23  ;;  %v15610_v22 = vld [vmem:[%s18152_s30 + $0x540] ss:$16 sps:$4 sm:$0xff]   ;;  %v15613_v23 = vld [vmem:[%s18152_s30 + $0x548] ss:$16 sps:$4 sm:$0xff]  }
 0x5a6   : > { %7148 = vmatprep.subr.bf16.mxu0 %v15528_v24  ;;  %7476 = vmatprep.subr.bf16.mxu1 %v15531_v25  ;;  %v15618_v24 = vld [vmem:[%s18152_s30 + $0x564] ss:$16 sps:$4 sm:$0xff]   ;;  %v15621_v25 = vld [vmem:[%s18152_s30 + $0x56c] ss:$16 sps:$4 sm:$0xff]  }
 0x5a9   : > { %7149 = vmatpush1.bf16.msra.mxu0 %v15526_v26  ;;  %7477 = vmatpush1.bf16.msra.mxu1 %v15529_v27  ;;  %v15616_v26 = vld [vmem:[%s18152_s30 + $0x560] ss:$16 sps:$4 sm:$0xff]   ;;  %v15619_v27 = vld [vmem:[%s18152_s30 + $0x568] ss:$16 sps:$4 sm:$0xff]  }
 0x5aa   : > { %7150 = vmatprep.subr.bf16.mxu0 %v15534_v28  ;;  %7478 = vmatprep.subr.bf16.mxu1 %v15537_v29  ;;  %v15624_v28 = vld [vmem:[%s18152_s30 + $0x584] ss:$16 sps:$4 sm:$0xff]   ;;  %v15627_v29 = vld [vmem:[%s18152_s30 + $0x58c] ss:$16 sps:$4 sm:$0xff]  }
 0x5ad   : > { %7151 = vmatpush1.bf16.msra.mxu0 %v15532_v30  ;;  %7479 = vmatpush1.bf16.msra.mxu1 %v15535_v31  ;;  %v15622_v30 = vld [vmem:[%s18152_s30 + $0x580] ss:$16 sps:$4 sm:$0xff]   ;;  %v15625_v31 = vld [vmem:[%s18152_s30 + $0x588] ss:$16 sps:$4 sm:$0xff]  }
 0x5ae   : > { %7152 = vmatprep.subr.bf16.mxu0 %v15540_v32  ;;  %7480 = vmatprep.subr.bf16.mxu1 %v15543_v33  ;;  %v15630_v32 = vld [vmem:[%s18152_s30 + $0x5a4] ss:$16 sps:$4 sm:$0xff]   ;;  %v15633_v33 = vld [vmem:[%s18152_s30 + $0x5ac] ss:$16 sps:$4 sm:$0xff]  }
 0x5b1   : > { %7153 = vmatpush1.bf16.msra.mxu0 %v15538_v34  ;;  %7481 = vmatpush1.bf16.msra.mxu1 %v15541_v35  ;;  %v15628_v34 = vld [vmem:[%s18152_s30 + $0x5a0] ss:$16 sps:$4 sm:$0xff]   ;;  %v15631_v35 = vld [vmem:[%s18152_s30 + $0x5a8] ss:$16 sps:$4 sm:$0xff]  }
 0x5b2   : > { %7154 = vmatprep.subr.bf16.mxu0 %v15546_v36  ;;  %7482 = vmatprep.subr.bf16.mxu1 %v15549_v37  ;;  %v15636_v36 = vld [vmem:[%s18152_s30 + $0x5c4] ss:$16 sps:$4 sm:$0xff]   ;;  %v15639_v37 = vld [vmem:[%s18152_s30 + $0x5cc] ss:$16 sps:$4 sm:$0xff]  }
 0x5b5   : > { %7155 = vmatpush1.bf16.msra.mxu0 %v15544_v38  ;;  %7483 = vmatpush1.bf16.msra.mxu1 %v15547_v39  ;;  %v15634_v38 = vld [vmem:[%s18152_s30 + $0x5c0] ss:$16 sps:$4 sm:$0xff]   ;;  %v15637_v39 = vld [vmem:[%s18152_s30 + $0x5c8] ss:$16 sps:$4 sm:$0xff]  }
 0x5b6   : > { %7165 = vmatprep.subr.bf16.mxu0 %v15552_v40  ;;  %7493 = vmatprep.subr.bf16.mxu1 %v15555_v42  ;;  %v15642_v40 = vld [vmem:[%s18152_s30 + $0x5e4] ss:$16 sps:$4 sm:$0xff]   ;;  %v15640_v42 = vld [vmem:[%s18152_s30 + $0x5e0] ss:$16 sps:$4 sm:$0xff]  }
 0x5b8   : > { %7157 = vmatmul.mubr.bf16.vlgmr.msra.gmra.mrb[0].mxu0 %v3975_v45  ;;  %7485 = vmatmul.mubr.bf16.vlgmr.msra.gmra.mrb[0].mxu1 %v3975_v45  ;;  %v3961_v45 = vld [vmem:[#allocation3 + $0x20] sm:$0xff] }
 0x5b9   : > { %7166 = vmatpush1.bf16.msra.mxu0 %v15550_v43  ;;  %7494 = vmatpush1.bf16.msra.mxu1 %v15553_v44  ;;  %v15643_v43 = vld [vmem:[%s18152_s30 + $0x5e8] ss:$16 sps:$4 sm:$0xff]   ;;  %v15648_v44 = vld [vmem:[%s18152_s30 + $0x604] ss:$16 sps:$4 sm:$0xff]  }
 0x5ba   : > { %7167 = vmatprep.subr.bf16.mxu0 %v15558_v46  ;;  %7495 = vmatprep.subr.bf16.mxu1 %v15561_v47  ;;  %v15651_v46 = vld [vmem:[%s18152_s30 + $0x60c] ss:$16 sps:$4 sm:$0xff]   ;;  %v15646_v47 = vld [vmem:[%s18152_s30 + $0x600] ss:$16 sps:$4 sm:$0xff]  }
 0x5bb   : > { %7197 = vmatprep.mubr.bf16.mxu0 %v3978_v49  ;;  %7525 = vmatprep.mubr.bf16.mxu1 %v3978_v49  ;;  %v3977_v49 = vpack.c.bf16 %v3961_v45, %v3961_v45  ;;  %v15741_v45 = vld [vmem:[%s18152_s30 + $0x7ec] ss:$16 sps:$4 sm:$0xff]  }
 0x5bd   : > { %7168 = vmatpush1.bf16.msra.mxu0 %v15556_v50  ;;  %7496 = vmatpush1.bf16.msra.mxu1 %v15559_v51  ;;  %v3964_v50 = vld [vmem:[#allocation3 + $0x38] sm:$0xff] }
 0x5be   : > { %7169 = vmatprep.subr.bf16.mxu0 %v15564_v52  ;;  %7497 = vmatprep.subr.bf16.mxu1 %v15567_v53  ;;  %v15654_v51 = vld [vmem:[%s18152_s30 + $0x624] ss:$16 sps:$4 sm:$0xff]   ;;  %v15657_v52 = vld [vmem:[%s18152_s30 + $0x62c] ss:$16 sps:$4 sm:$0xff]   ;;  %v3980_v53 = vpack.c.bf16 %v3964_v50, %v3964_v50 }
 0x5bf   : > { %v15747_v50 = vld [vmem:[%s18152_s30 + $0x80c] ss:$16 sps:$4 sm:$0xff]  }
 0x5c1   : > { %7170 = vmatpush1.bf16.msra.mxu0 %v15562_v54  ;;  %7498 = vmatpush1.bf16.msra.mxu1 %v15565_v55  ;;  %v15652_v54 = vld [vmem:[%s18152_s30 + $0x620] ss:$16 sps:$4 sm:$0xff]   ;;  %v15655_v55 = vld [vmem:[%s18152_s30 + $0x628] ss:$16 sps:$4 sm:$0xff]  }
 0x5c2   : > { %7171 = vmatprep.subr.bf16.mxu0 %v15570_v56  ;;  %7499 = vmatprep.subr.bf16.mxu1 %v15573_v57  ;;  %v15660_v56 = vld [vmem:[%s18152_s30 + $0x644] ss:$16 sps:$4 sm:$0xff]   ;;  %v15663_v57 = vld [vmem:[%s18152_s30 + $0x64c] ss:$16 sps:$4 sm:$0xff]  }
 0x5c5   : > { %7172 = vmatpush1.bf16.msra.mxu0 %v15568_v58  ;;  %7500 = vmatpush1.bf16.msra.mxu1 %v15571_v59  ;;  %v15658_v58 = vld [vmem:[%s18152_s30 + $0x640] ss:$16 sps:$4 sm:$0xff]   ;;  %v15661_v59 = vld [vmem:[%s18152_s30 + $0x648] ss:$16 sps:$4 sm:$0xff]  }
 0x5c6   : > { %7173 = vmatprep.subr.bf16.mxu0 %v15576_v60  ;;  %7501 = vmatprep.subr.bf16.mxu1 %v15579_v61  ;;  %v15666_v60 = vld [vmem:[%s18152_s30 + $0x664] ss:$16 sps:$4 sm:$0xff]   ;;  %v15669_v61 = vld [vmem:[%s18152_s30 + $0x66c] ss:$16 sps:$4 sm:$0xff]  }
 0x5c9   : > { %7174 = vmatpush1.bf16.msra.mxu0 %v15574_v62  ;;  %7502 = vmatpush1.bf16.msra.mxu1 %v15577_v63  ;;  %v15664_v62 = vld [vmem:[%s18152_s30 + $0x660] ss:$16 sps:$4 sm:$0xff]   ;;  %v15667_v63 = vld [vmem:[%s18152_s30 + $0x668] ss:$16 sps:$4 sm:$0xff]  }
 0x5ca   : > { %7175 = vmatprep.subr.bf16.mxu0 %v15582_v0  ;;  %7503 = vmatprep.subr.bf16.mxu1 %v15585_v1  ;;  %v15672_v0 = vld [vmem:[%s18152_s30 + $0x684] ss:$16 sps:$4 sm:$0xff]   ;;  %v15675_v1 = vld [vmem:[%s18152_s30 + $0x68c] ss:$16 sps:$4 sm:$0xff]  }
 0x5cd   : > { %7176 = vmatpush1.bf16.msra.mxu0 %v15580_v2  ;;  %7504 = vmatpush1.bf16.msra.mxu1 %v15583_v3  ;;  %v15670_v2 = vld [vmem:[%s18152_s30 + $0x680] ss:$16 sps:$4 sm:$0xff]   ;;  %v15673_v3 = vld [vmem:[%s18152_s30 + $0x688] ss:$16 sps:$4 sm:$0xff]  }
 0x5ce   : > { %7177 = vmatprep.subr.bf16.mxu0 %v15588_v4  ;;  %7505 = vmatprep.subr.bf16.mxu1 %v15591_v5  ;;  %v15678_v4 = vld [vmem:[%s18152_s30 + $0x6a4] ss:$16 sps:$4 sm:$0xff]   ;;  %v15681_v5 = vld [vmem:[%s18152_s30 + $0x6ac] ss:$16 sps:$4 sm:$0xff]  }
 0x5d1   : > { %7178 = vmatpush1.bf16.msra.mxu0 %v15586_v6  ;;  %7506 = vmatpush1.bf16.msra.mxu1 %v15589_v7  ;;  %v15676_v6 = vld [vmem:[%s18152_s30 + $0x6a0] ss:$16 sps:$4 sm:$0xff]   ;;  %v15679_v7 = vld [vmem:[%s18152_s30 + $0x6a8] ss:$16 sps:$4 sm:$0xff]  }
 0x5d2   : > { %7179 = vmatprep.subr.bf16.mxu0 %v15594_v8  ;;  %7507 = vmatprep.subr.bf16.mxu1 %v15597_v9  ;;  %v15684_v8 = vld [vmem:[%s18152_s30 + $0x6c4] ss:$16 sps:$4 sm:$0xff]   ;;  %v15687_v9 = vld [vmem:[%s18152_s30 + $0x6cc] ss:$16 sps:$4 sm:$0xff]  }
 0x5d5   : > { %7180 = vmatpush1.bf16.msra.mxu0 %v15592_v10  ;;  %7508 = vmatpush1.bf16.msra.mxu1 %v15595_v11  ;;  %v15682_v10 = vld [vmem:[%s18152_s30 + $0x6c0] ss:$16 sps:$4 sm:$0xff]   ;;  %v15685_v11 = vld [vmem:[%s18152_s30 + $0x6c8] ss:$16 sps:$4 sm:$0xff]  }
 0x5d6   : > { %7181 = vmatprep.subr.bf16.mxu0 %v15600_v12  ;;  %7509 = vmatprep.subr.bf16.mxu1 %v15603_v13  ;;  %v15690_v12 = vld [vmem:[%s18152_s30 + $0x6e4] ss:$16 sps:$4 sm:$0xff]   ;;  %v15693_v13 = vld [vmem:[%s18152_s30 + $0x6ec] ss:$16 sps:$4 sm:$0xff]  }
 0x5d9   : > { %7182 = vmatpush1.bf16.msra.mxu0 %v15598_v14  ;;  %7510 = vmatpush1.bf16.msra.mxu1 %v15601_v15  ;;  %v15688_v14 = vld [vmem:[%s18152_s30 + $0x6e0] ss:$16 sps:$4 sm:$0xff]   ;;  %v15691_v15 = vld [vmem:[%s18152_s30 + $0x6e8] ss:$16 sps:$4 sm:$0xff]  }
 0x5da   : > { %7183 = vmatprep.subr.bf16.mxu0 %v15606_v16  ;;  %7511 = vmatprep.subr.bf16.mxu1 %v15609_v17  ;;  %v15696_v16 = vld [vmem:[%s18152_s30 + $0x704] ss:$16 sps:$4 sm:$0xff]   ;;  %v15699_v17 = vld [vmem:[%s18152_s30 + $0x70c] ss:$16 sps:$4 sm:$0xff]  }
 0x5dd   : > { %7184 = vmatpush1.bf16.msra.mxu0 %v15604_v18  ;;  %7512 = vmatpush1.bf16.msra.mxu1 %v15607_v19  ;;  %v15694_v18 = vld [vmem:[%s18152_s30 + $0x700] ss:$16 sps:$4 sm:$0xff]   ;;  %v15697_v19 = vld [vmem:[%s18152_s30 + $0x708] ss:$16 sps:$4 sm:$0xff]  }
 0x5de   : > { %7185 = vmatprep.subr.bf16.mxu0 %v15612_v20  ;;  %7513 = vmatprep.subr.bf16.mxu1 %v15615_v21  ;;  %v15702_v20 = vld [vmem:[%s18152_s30 + $0x724] ss:$16 sps:$4 sm:$0xff]   ;;  %v15705_v21 = vld [vmem:[%s18152_s30 + $0x72c] ss:$16 sps:$4 sm:$0xff]  }
 0x5e1   : > { %7186 = vmatpush1.bf16.msra.mxu0 %v15610_v22  ;;  %7514 = vmatpush1.bf16.msra.mxu1 %v15613_v23  ;;  %v15700_v22 = vld [vmem:[%s18152_s30 + $0x720] ss:$16 sps:$4 sm:$0xff]   ;;  %v15703_v23 = vld [vmem:[%s18152_s30 + $0x728] ss:$16 sps:$4 sm:$0xff]  }
 0x5e2   : > { %7187 = vmatprep.subr.bf16.mxu0 %v15618_v24  ;;  %7515 = vmatprep.subr.bf16.mxu1 %v15621_v25  ;;  %v15708_v24 = vld [vmem:[%s18152_s30 + $0x744] ss:$16 sps:$4 sm:$0xff]   ;;  %v15711_v25 = vld [vmem:[%s18152_s30 + $0x74c] ss:$16 sps:$4 sm:$0xff]  }
 0x5e5   : > { %7188 = vmatpush1.bf16.msra.mxu0 %v15616_v26  ;;  %7516 = vmatpush1.bf16.msra.mxu1 %v15619_v27  ;;  %v15706_v26 = vld [vmem:[%s18152_s30 + $0x740] ss:$16 sps:$4 sm:$0xff]   ;;  %v15709_v27 = vld [vmem:[%s18152_s30 + $0x748] ss:$16 sps:$4 sm:$0xff]  }
 0x5e6   : > { %7189 = vmatprep.subr.bf16.mxu0 %v15624_v28  ;;  %7517 = vmatprep.subr.bf16.mxu1 %v15627_v29  ;;  %v15714_v28 = vld [vmem:[%s18152_s30 + $0x764] ss:$16 sps:$4 sm:$0xff]   ;;  %v15717_v29 = vld [vmem:[%s18152_s30 + $0x76c] ss:$16 sps:$4 sm:$0xff]  }
 0x5e9   : > { %7190 = vmatpush1.bf16.msra.mxu0 %v15622_v30  ;;  %7518 = vmatpush1.bf16.msra.mxu1 %v15625_v31  ;;  %v15712_v30 = vld [vmem:[%s18152_s30 + $0x760] ss:$16 sps:$4 sm:$0xff]   ;;  %v15715_v31 = vld [vmem:[%s18152_s30 + $0x768] ss:$16 sps:$4 sm:$0xff]  }
 0x5ea   : > { %7191 = vmatprep.subr.bf16.mxu0 %v15630_v32  ;;  %7519 = vmatprep.subr.bf16.mxu1 %v15633_v33  ;;  %v15720_v32 = vld [vmem:[%s18152_s30 + $0x784] ss:$16 sps:$4 sm:$0xff]   ;;  %v15723_v33 = vld [vmem:[%s18152_s30 + $0x78c] ss:$16 sps:$4 sm:$0xff]  }
 0x5ed   : > { %7192 = vmatpush1.bf16.msra.mxu0 %v15628_v34  ;;  %7520 = vmatpush1.bf16.msra.mxu1 %v15631_v35  ;;  %v15718_v34 = vld [vmem:[%s18152_s30 + $0x780] ss:$16 sps:$4 sm:$0xff]   ;;  %v15721_v35 = vld [vmem:[%s18152_s30 + $0x788] ss:$16 sps:$4 sm:$0xff]  }
 0x5ee   : > { %7193 = vmatprep.subr.bf16.mxu0 %v15636_v36  ;;  %7521 = vmatprep.subr.bf16.mxu1 %v15639_v37  ;;  %v15726_v36 = vld [vmem:[%s18152_s30 + $0x7a4] ss:$16 sps:$4 sm:$0xff]   ;;  %v15729_v37 = vld [vmem:[%s18152_s30 + $0x7ac] ss:$16 sps:$4 sm:$0xff]  }
 0x5f1   : > { %7194 = vmatpush1.bf16.msra.mxu0 %v15634_v38  ;;  %7522 = vmatpush1.bf16.msra.mxu1 %v15637_v39  ;;  %v15724_v38 = vld [vmem:[%s18152_s30 + $0x7a0] ss:$16 sps:$4 sm:$0xff]   ;;  %v15727_v39 = vld [vmem:[%s18152_s30 + $0x7a8] ss:$16 sps:$4 sm:$0xff]  }
 0x5f2   : > { %7195 = vmatprep.subr.bf16.mxu0 %v15642_v40  ;;  %7523 = vmatprep.subr.bf16.mxu1 %v15645_v41  ;;  %v15732_v40 = vld [vmem:[%s18152_s30 + $0x7c4] ss:$16 sps:$4 sm:$0xff]   ;;  %v15735_v41 = vld [vmem:[%s18152_s30 + $0x7cc] ss:$16 sps:$4 sm:$0xff]  }
 0x5f5   : > { %7196 = vmatpush1.bf16.msra.mxu0 %v15640_v42  ;;  %7524 = vmatpush1.bf16.msra.mxu1 %v15643_v43  ;;  %v15730_v42 = vld [vmem:[%s18152_s30 + $0x7c0] ss:$16 sps:$4 sm:$0xff]   ;;  %v15733_v43 = vld [vmem:[%s18152_s30 + $0x7c8] ss:$16 sps:$4 sm:$0xff]  }
 0x5f6   : > { %7206 = vmatprep.subr.bf16.mxu0 %v15648_v44  ;;  %7534 = vmatprep.subr.bf16.mxu1 %v15651_v46  ;;  %v15738_v44 = vld [vmem:[%s18152_s30 + $0x7e4] ss:$16 sps:$4 sm:$0xff]   ;;  %v15736_v46 = vld [vmem:[%s18152_s30 + $0x7e0] ss:$16 sps:$4 sm:$0xff]  }
 0x5f8   : > { %7198 = vmatmul.mubr.bf16.vlgmr.msra.gmra.mrb[0].mxu0 %v3977_v49  ;;  %7526 = vmatmul.mubr.bf16.vlgmr.msra.gmra.mrb[0].mxu1 %v3977_v49  ;;  %v15744_v49 = vld [vmem:[%s18152_s30 + $0x804] ss:$16 sps:$4 sm:$0xff]  }
 0x5f9   : > { %7207 = vmatpush1.bf16.msra.mxu0 %v15646_v47  ;;  %7535 = vmatpush1.bf16.msra.mxu1 %v15649_v48  ;;  %v15739_v47 = vld [vmem:[%s18152_s30 + $0x7e8] ss:$16 sps:$4 sm:$0xff]   ;;  %v3963_v48 = vld [vmem:[#allocation3 + $0x30] sm:$0xff] }
 0x5fa   : > { %7208 = vmatprep.subr.bf16.mxu0 %v15654_v51  ;;  %7536 = vmatprep.subr.bf16.mxu1 %v15657_v52  ;;  %v3979_v51 = vpack.c.bf16 %v3963_v48, %v3963_v48  ;;  %v3966_v52 = vld [vmem:[#allocation3 + $0x48] sm:$0xff] }
 0x5fb   : > { %7238 = vmatprep.mubr.bf16.mxu0 %v3980_v53  ;;  %7566 = vmatprep.mubr.bf16.mxu1 %v3980_v53  ;;  %v15742_v53 = vld [vmem:[%s18152_s30 + $0x800] ss:$16 sps:$4 sm:$0xff]   ;;  %v15834_v48 = vld [vmem:[%s18152_s30 + $0x9e4] ss:$16 sps:$4 sm:$0xff]  }
 0x5fd   : > { %7209 = vmatpush1.bf16.msra.mxu0 %v15652_v54  ;;  %7537 = vmatpush1.bf16.msra.mxu1 %v15655_v55  ;;  %v15745_v54 = vld [vmem:[%s18152_s30 + $0x808] ss:$16 sps:$4 sm:$0xff]   ;;  %v15750_v55 = vld [vmem:[%s18152_s30 + $0x824] ss:$16 sps:$4 sm:$0xff]  }
 0x5fe   : > { %7210 = vmatprep.subr.bf16.mxu0 %v15660_v56  ;;  %7538 = vmatprep.subr.bf16.mxu1 %v15663_v57  ;;  %v15753_v56 = vld [vmem:[%s18152_s30 + $0x82c] ss:$16 sps:$4 sm:$0xff]   ;;  %v3982_v57 = vpack.c.bf16 %v3966_v52, %v3966_v52  ;;  %v15840_v52 = vld [vmem:[%s18152_s30 + $0xa04] ss:$16 sps:$4 sm:$0xff]  }
 0x601   : > { %7211 = vmatpush1.bf16.msra.mxu0 %v15658_v58  ;;  %7539 = vmatpush1.bf16.msra.mxu1 %v15661_v59  ;;  %v15748_v58 = vld [vmem:[%s18152_s30 + $0x820] ss:$16 sps:$4 sm:$0xff]   ;;  %v15751_v59 = vld [vmem:[%s18152_s30 + $0x828] ss:$16 sps:$4 sm:$0xff]  }
 0x602   : > { %7212 = vmatprep.subr.bf16.mxu0 %v15666_v60  ;;  %7540 = vmatprep.subr.bf16.mxu1 %v15669_v61  ;;  %v15756_v60 = vld [vmem:[%s18152_s30 + $0x844] ss:$16 sps:$4 sm:$0xff]   ;;  %v15759_v61 = vld [vmem:[%s18152_s30 + $0x84c] ss:$16 sps:$4 sm:$0xff]  }
 0x605   : > { %7213 = vmatpush1.bf16.msra.mxu0 %v15664_v62  ;;  %7541 = vmatpush1.bf16.msra.mxu1 %v15667_v63  ;;  %v15754_v62 = vld [vmem:[%s18152_s30 + $0x840] ss:$16 sps:$4 sm:$0xff]   ;;  %v15757_v63 = vld [vmem:[%s18152_s30 + $0x848] ss:$16 sps:$4 sm:$0xff]  }
 0x606   : > { %7214 = vmatprep.subr.bf16.mxu0 %v15672_v0  ;;  %7542 = vmatprep.subr.bf16.mxu1 %v15675_v1  ;;  %v15762_v0 = vld [vmem:[%s18152_s30 + $0x864] ss:$16 sps:$4 sm:$0xff]   ;;  %v15765_v1 = vld [vmem:[%s18152_s30 + $0x86c] ss:$16 sps:$4 sm:$0xff]  }
 0x609   : > { %7215 = vmatpush1.bf16.msra.mxu0 %v15670_v2  ;;  %7543 = vmatpush1.bf16.msra.mxu1 %v15673_v3  ;;  %v15760_v2 = vld [vmem:[%s18152_s30 + $0x860] ss:$16 sps:$4 sm:$0xff]   ;;  %v15763_v3 = vld [vmem:[%s18152_s30 + $0x868] ss:$16 sps:$4 sm:$0xff]  }
 0x60a   : > { %7216 = vmatprep.subr.bf16.mxu0 %v15678_v4  ;;  %7544 = vmatprep.subr.bf16.mxu1 %v15681_v5  ;;  %v15768_v4 = vld [vmem:[%s18152_s30 + $0x884] ss:$16 sps:$4 sm:$0xff]   ;;  %v15771_v5 = vld [vmem:[%s18152_s30 + $0x88c] ss:$16 sps:$4 sm:$0xff]  }
 0x60d   : > { %7217 = vmatpush1.bf16.msra.mxu0 %v15676_v6  ;;  %7545 = vmatpush1.bf16.msra.mxu1 %v15679_v7  ;;  %v15766_v6 = vld [vmem:[%s18152_s30 + $0x880] ss:$16 sps:$4 sm:$0xff]   ;;  %v15769_v7 = vld [vmem:[%s18152_s30 + $0x888] ss:$16 sps:$4 sm:$0xff]  }
 0x60e   : > { %7218 = vmatprep.subr.bf16.mxu0 %v15684_v8  ;;  %7546 = vmatprep.subr.bf16.mxu1 %v15687_v9  ;;  %v15774_v8 = vld [vmem:[%s18152_s30 + $0x8a4] ss:$16 sps:$4 sm:$0xff]   ;;  %v15777_v9 = vld [vmem:[%s18152_s30 + $0x8ac] ss:$16 sps:$4 sm:$0xff]  }
 0x611   : > { %7219 = vmatpush1.bf16.msra.mxu0 %v15682_v10  ;;  %7547 = vmatpush1.bf16.msra.mxu1 %v15685_v11  ;;  %v15772_v10 = vld [vmem:[%s18152_s30 + $0x8a0] ss:$16 sps:$4 sm:$0xff]   ;;  %v15775_v11 = vld [vmem:[%s18152_s30 + $0x8a8] ss:$16 sps:$4 sm:$0xff]  }
 0x612   : > { %7220 = vmatprep.subr.bf16.mxu0 %v15690_v12  ;;  %7548 = vmatprep.subr.bf16.mxu1 %v15693_v13  ;;  %v15780_v12 = vld [vmem:[%s18152_s30 + $0x8c4] ss:$16 sps:$4 sm:$0xff]   ;;  %v15783_v13 = vld [vmem:[%s18152_s30 + $0x8cc] ss:$16 sps:$4 sm:$0xff]  }
 0x615   : > { %7221 = vmatpush1.bf16.msra.mxu0 %v15688_v14  ;;  %7549 = vmatpush1.bf16.msra.mxu1 %v15691_v15  ;;  %v15778_v14 = vld [vmem:[%s18152_s30 + $0x8c0] ss:$16 sps:$4 sm:$0xff]   ;;  %v15781_v15 = vld [vmem:[%s18152_s30 + $0x8c8] ss:$16 sps:$4 sm:$0xff]  }
 0x616   : > { %7222 = vmatprep.subr.bf16.mxu0 %v15696_v16  ;;  %7550 = vmatprep.subr.bf16.mxu1 %v15699_v17  ;;  %v15786_v16 = vld [vmem:[%s18152_s30 + $0x8e4] ss:$16 sps:$4 sm:$0xff]   ;;  %v15789_v17 = vld [vmem:[%s18152_s30 + $0x8ec] ss:$16 sps:$4 sm:$0xff]  }
 0x619   : > { %7223 = vmatpush1.bf16.msra.mxu0 %v15694_v18  ;;  %7551 = vmatpush1.bf16.msra.mxu1 %v15697_v19  ;;  %v15784_v18 = vld [vmem:[%s18152_s30 + $0x8e0] ss:$16 sps:$4 sm:$0xff]   ;;  %v15787_v19 = vld [vmem:[%s18152_s30 + $0x8e8] ss:$16 sps:$4 sm:$0xff]  }
 0x61a   : > { %7224 = vmatprep.subr.bf16.mxu0 %v15702_v20  ;;  %7552 = vmatprep.subr.bf16.mxu1 %v15705_v21  ;;  %v15792_v20 = vld [vmem:[%s18152_s30 + $0x904] ss:$16 sps:$4 sm:$0xff]   ;;  %v15795_v21 = vld [vmem:[%s18152_s30 + $0x90c] ss:$16 sps:$4 sm:$0xff]  }
 0x61d   : > { %7225 = vmatpush1.bf16.msra.mxu0 %v15700_v22  ;;  %7553 = vmatpush1.bf16.msra.mxu1 %v15703_v23  ;;  %v15790_v22 = vld [vmem:[%s18152_s30 + $0x900] ss:$16 sps:$4 sm:$0xff]   ;;  %v15793_v23 = vld [vmem:[%s18152_s30 + $0x908] ss:$16 sps:$4 sm:$0xff]  }
 0x61e   : > { %7226 = vmatprep.subr.bf16.mxu0 %v15708_v24  ;;  %7554 = vmatprep.subr.bf16.mxu1 %v15711_v25  ;;  %v15798_v24 = vld [vmem:[%s18152_s30 + $0x924] ss:$16 sps:$4 sm:$0xff]   ;;  %v15801_v25 = vld [vmem:[%s18152_s30 + $0x92c] ss:$16 sps:$4 sm:$0xff]  }
 0x621   : > { %7227 = vmatpush1.bf16.msra.mxu0 %v15706_v26  ;;  %7555 = vmatpush1.bf16.msra.mxu1 %v15709_v27  ;;  %v15796_v26 = vld [vmem:[%s18152_s30 + $0x920] ss:$16 sps:$4 sm:$0xff]   ;;  %v15799_v27 = vld [vmem:[%s18152_s30 + $0x928] ss:$16 sps:$4 sm:$0xff]  }
 0x622   : > { %7228 = vmatprep.subr.bf16.mxu0 %v15714_v28  ;;  %7556 = vmatprep.subr.bf16.mxu1 %v15717_v29  ;;  %v15804_v28 = vld [vmem:[%s18152_s30 + $0x944] ss:$16 sps:$4 sm:$0xff]   ;;  %v15807_v29 = vld [vmem:[%s18152_s30 + $0x94c] ss:$16 sps:$4 sm:$0xff]  }
 0x625   : > { %7229 = vmatpush1.bf16.msra.mxu0 %v15712_v30  ;;  %7557 = vmatpush1.bf16.msra.mxu1 %v15715_v31  ;;  %v15802_v30 = vld [vmem:[%s18152_s30 + $0x940] ss:$16 sps:$4 sm:$0xff]   ;;  %v15805_v31 = vld [vmem:[%s18152_s30 + $0x948] ss:$16 sps:$4 sm:$0xff]  }
 0x626   : > { %7230 = vmatprep.subr.bf16.mxu0 %v15720_v32  ;;  %7558 = vmatprep.subr.bf16.mxu1 %v15723_v33  ;;  %v15810_v32 = vld [vmem:[%s18152_s30 + $0x964] ss:$16 sps:$4 sm:$0xff]   ;;  %v15813_v33 = vld [vmem:[%s18152_s30 + $0x96c] ss:$16 sps:$4 sm:$0xff]  }
 0x629   : > { %7231 = vmatpush1.bf16.msra.mxu0 %v15718_v34  ;;  %7559 = vmatpush1.bf16.msra.mxu1 %v15721_v35  ;;  %v15808_v34 = vld [vmem:[%s18152_s30 + $0x960] ss:$16 sps:$4 sm:$0xff]   ;;  %v15811_v35 = vld [vmem:[%s18152_s30 + $0x968] ss:$16 sps:$4 sm:$0xff]  }
 0x62a   : > { %7232 = vmatprep.subr.bf16.mxu0 %v15726_v36  ;;  %7560 = vmatprep.subr.bf16.mxu1 %v15729_v37  ;;  %v15816_v36 = vld [vmem:[%s18152_s30 + $0x984] ss:$16 sps:$4 sm:$0xff]   ;;  %v15819_v37 = vld [vmem:[%s18152_s30 + $0x98c] ss:$16 sps:$4 sm:$0xff]  }
 0x62d   : > { %7233 = vmatpush1.bf16.msra.mxu0 %v15724_v38  ;;  %7561 = vmatpush1.bf16.msra.mxu1 %v15727_v39  ;;  %v15814_v38 = vld [vmem:[%s18152_s30 + $0x980] ss:$16 sps:$4 sm:$0xff]   ;;  %v15817_v39 = vld [vmem:[%s18152_s30 + $0x988] ss:$16 sps:$4 sm:$0xff]  }
 0x62e   : > { %7234 = vmatprep.subr.bf16.mxu0 %v15732_v40  ;;  %7562 = vmatprep.subr.bf16.mxu1 %v15735_v41  ;;  %v15822_v40 = vld [vmem:[%s18152_s30 + $0x9a4] ss:$16 sps:$4 sm:$0xff]   ;;  %v15825_v41 = vld [vmem:[%s18152_s30 + $0x9ac] ss:$16 sps:$4 sm:$0xff]  }
 0x631   : > { %7235 = vmatpush1.bf16.msra.mxu0 %v15730_v42  ;;  %7563 = vmatpush1.bf16.msra.mxu1 %v15733_v43  ;;  %v15820_v42 = vld [vmem:[%s18152_s30 + $0x9a0] ss:$16 sps:$4 sm:$0xff]   ;;  %v15823_v43 = vld [vmem:[%s18152_s30 + $0x9a8] ss:$16 sps:$4 sm:$0xff]  }
 0x632   : > { %7236 = vmatprep.subr.bf16.mxu0 %v15738_v44  ;;  %7564 = vmatprep.subr.bf16.mxu1 %v15741_v45  ;;  %v15828_v44 = vld [vmem:[%s18152_s30 + $0x9c4] ss:$16 sps:$4 sm:$0xff]   ;;  %v15831_v45 = vld [vmem:[%s18152_s30 + $0x9cc] ss:$16 sps:$4 sm:$0xff]  }
 0x635   : > { %7237 = vmatpush1.bf16.msra.mxu0 %v15736_v46  ;;  %7565 = vmatpush1.bf16.msra.mxu1 %v15739_v47  ;;  %v15826_v46 = vld [vmem:[%s18152_s30 + $0x9c0] ss:$16 sps:$4 sm:$0xff]   ;;  %v15829_v47 = vld [vmem:[%s18152_s30 + $0x9c8] ss:$16 sps:$4 sm:$0xff]  }
 0x636   : > { %7247 = vmatprep.subr.bf16.mxu0 %v15744_v49  ;;  %7575 = vmatprep.subr.bf16.mxu1 %v15747_v50  ;;  %v15837_v49 = vld [vmem:[%s18152_s30 + $0x9ec] ss:$16 sps:$4 sm:$0xff]   ;;  %v15832_v50 = vld [vmem:[%s18152_s30 + $0x9e0] ss:$16 sps:$4 sm:$0xff]  }
 0x638   : > { %7239 = vmatmul.mubr.bf16.vlgmr.msra.gmra.mrb[0].mxu0 %v3979_v51  ;;  %7567 = vmatmul.mubr.bf16.vlgmr.msra.gmra.mrb[0].mxu1 %v3979_v51  ;;  %v15835_v51 = vld [vmem:[%s18152_s30 + $0x9e8] ss:$16 sps:$4 sm:$0xff]  }
 0x639   : > { %7248 = vmatpush1.bf16.msra.mxu0 %v15742_v53  ;;  %7576 = vmatpush1.bf16.msra.mxu1 %v15745_v54  ;;  %v3965_v53 = vld [vmem:[#allocation3 + $0x40] sm:$0xff] }
 0x63a   : > { %7249 = vmatprep.subr.bf16.mxu0 %v15750_v55  ;;  %7577 = vmatprep.subr.bf16.mxu1 %v15753_v56  ;;  %v15843_v54 = vld [vmem:[%s18152_s30 + $0xa0c] ss:$16 sps:$4 sm:$0xff]   ;;  %v3981_v56 = vpack.c.bf16 %v3965_v53, %v3965_v53 }
 0x63b   : > { %7279 = vmatprep.mubr.bf16.mxu0 %v3982_v57  ;;  %7607 = vmatprep.mubr.bf16.mxu1 %v3982_v57  ;;  %v3968_v55 = vld [vmem:[#allocation3 + $0x58] sm:$0xff]  ;;  %v15838_v57 = vld [vmem:[%s18152_s30 + $0xa00] ss:$16 sps:$4 sm:$0xff]  }
 0x63c   : > { %v15933_v53 = vld [vmem:[%s18152_s30 + $0xbec] ss:$16 sps:$4 sm:$0xff]  }
 0x63d   : > { %7250 = vmatpush1.bf16.msra.mxu0 %v15748_v58  ;;  %7578 = vmatpush1.bf16.msra.mxu1 %v15751_v59  ;;  %v15841_v58 = vld [vmem:[%s18152_s30 + $0xa08] ss:$16 sps:$4 sm:$0xff]   ;;  %v15846_v59 = vld [vmem:[%s18152_s30 + $0xa24] ss:$16 sps:$4 sm:$0xff]  }
 0x63e   : > { %7251 = vmatprep.subr.bf16.mxu0 %v15756_v60  ;;  %7579 = vmatprep.subr.bf16.mxu1 %v15759_v61  ;;  %v15849_v60 = vld [vmem:[%s18152_s30 + $0xa2c] ss:$16 sps:$4 sm:$0xff]   ;;  %v3984_v61 = vpack.c.bf16 %v3968_v55, %v3968_v55  ;;  %v15931_v55 = vld [vmem:[%s18152_s30 + $0xbe8] ss:$16 sps:$4 sm:$0xff]  }
 0x641   : > { %7252 = vmatpush1.bf16.msra.mxu0 %v15754_v62  ;;  %7580 = vmatpush1.bf16.msra.mxu1 %v15757_v63  ;;  %v15844_v62 = vld [vmem:[%s18152_s30 + $0xa20] ss:$16 sps:$4 sm:$0xff]   ;;  %v15847_v63 = vld [vmem:[%s18152_s30 + $0xa28] ss:$16 sps:$4 sm:$0xff]  }
 0x642   : > { %7253 = vmatprep.subr.bf16.mxu0 %v15762_v0  ;;  %7581 = vmatprep.subr.bf16.mxu1 %v15765_v1  ;;  %v15852_v0 = vld [vmem:[%s18152_s30 + $0xa44] ss:$16 sps:$4 sm:$0xff]   ;;  %v15855_v1 = vld [vmem:[%s18152_s30 + $0xa4c] ss:$16 sps:$4 sm:$0xff]  }
 0x645   : > { %7254 = vmatpush1.bf16.msra.mxu0 %v15760_v2  ;;  %7582 = vmatpush1.bf16.msra.mxu1 %v15763_v3  ;;  %v15850_v2 = vld [vmem:[%s18152_s30 + $0xa40] ss:$16 sps:$4 sm:$0xff]   ;;  %v15853_v3 = vld [vmem:[%s18152_s30 + $0xa48] ss:$16 sps:$4 sm:$0xff]  }
 0x646   : > { %7255 = vmatprep.subr.bf16.mxu0 %v15768_v4  ;;  %7583 = vmatprep.subr.bf16.mxu1 %v15771_v5  ;;  %v15858_v4 = vld [vmem:[%s18152_s30 + $0xa64] ss:$16 sps:$4 sm:$0xff]   ;;  %v15861_v5 = vld [vmem:[%s18152_s30 + $0xa6c] ss:$16 sps:$4 sm:$0xff]  }
 0x649   : > { %7256 = vmatpush1.bf16.msra.mxu0 %v15766_v6  ;;  %7584 = vmatpush1.bf16.msra.mxu1 %v15769_v7  ;;  %v15856_v6 = vld [vmem:[%s18152_s30 + $0xa60] ss:$16 sps:$4 sm:$0xff]   ;;  %v15859_v7 = vld [vmem:[%s18152_s30 + $0xa68] ss:$16 sps:$4 sm:$0xff]  }
 0x64a   : > { %7257 = vmatprep.subr.bf16.mxu0 %v15774_v8  ;;  %7585 = vmatprep.subr.bf16.mxu1 %v15777_v9  ;;  %v15864_v8 = vld [vmem:[%s18152_s30 + $0xa84] ss:$16 sps:$4 sm:$0xff]   ;;  %v15867_v9 = vld [vmem:[%s18152_s30 + $0xa8c] ss:$16 sps:$4 sm:$0xff]  }
 0x64d   : > { %7258 = vmatpush1.bf16.msra.mxu0 %v15772_v10  ;;  %7586 = vmatpush1.bf16.msra.mxu1 %v15775_v11  ;;  %v15862_v10 = vld [vmem:[%s18152_s30 + $0xa80] ss:$16 sps:$4 sm:$0xff]   ;;  %v15865_v11 = vld [vmem:[%s18152_s30 + $0xa88] ss:$16 sps:$4 sm:$0xff]  }
 0x64e   : > { %7259 = vmatprep.subr.bf16.mxu0 %v15780_v12  ;;  %7587 = vmatprep.subr.bf16.mxu1 %v15783_v13  ;;  %v15870_v12 = vld [vmem:[%s18152_s30 + $0xaa4] ss:$16 sps:$4 sm:$0xff]   ;;  %v15873_v13 = vld [vmem:[%s18152_s30 + $0xaac] ss:$16 sps:$4 sm:$0xff]  }
 0x651   : > { %7260 = vmatpush1.bf16.msra.mxu0 %v15778_v14  ;;  %7588 = vmatpush1.bf16.msra.mxu1 %v15781_v15  ;;  %v15868_v14 = vld [vmem:[%s18152_s30 + $0xaa0] ss:$16 sps:$4 sm:$0xff]   ;;  %v15871_v15 = vld [vmem:[%s18152_s30 + $0xaa8] ss:$16 sps:$4 sm:$0xff]  }
 0x652   : > { %7261 = vmatprep.subr.bf16.mxu0 %v15786_v16  ;;  %7589 = vmatprep.subr.bf16.mxu1 %v15789_v17  ;;  %v15876_v16 = vld [vmem:[%s18152_s30 + $0xac4] ss:$16 sps:$4 sm:$0xff]   ;;  %v15879_v17 = vld [vmem:[%s18152_s30 + $0xacc] ss:$16 sps:$4 sm:$0xff]  }
 0x655   : > { %7262 = vmatpush1.bf16.msra.mxu0 %v15784_v18  ;;  %7590 = vmatpush1.bf16.msra.mxu1 %v15787_v19  ;;  %v15874_v18 = vld [vmem:[%s18152_s30 + $0xac0] ss:$16 sps:$4 sm:$0xff]   ;;  %v15877_v19 = vld [vmem:[%s18152_s30 + $0xac8] ss:$16 sps:$4 sm:$0xff]  }
 0x656   : > { %7263 = vmatprep.subr.bf16.mxu0 %v15792_v20  ;;  %7591 = vmatprep.subr.bf16.mxu1 %v15795_v21  ;;  %v15882_v20 = vld [vmem:[%s18152_s30 + $0xae4] ss:$16 sps:$4 sm:$0xff]   ;;  %v15885_v21 = vld [vmem:[%s18152_s30 + $0xaec] ss:$16 sps:$4 sm:$0xff]  }
 0x659   : > { %7264 = vmatpush1.bf16.msra.mxu0 %v15790_v22  ;;  %7592 = vmatpush1.bf16.msra.mxu1 %v15793_v23  ;;  %v15880_v22 = vld [vmem:[%s18152_s30 + $0xae0] ss:$16 sps:$4 sm:$0xff]   ;;  %v15883_v23 = vld [vmem:[%s18152_s30 + $0xae8] ss:$16 sps:$4 sm:$0xff]  }
 0x65a   : > { %7265 = vmatprep.subr.bf16.mxu0 %v15798_v24  ;;  %7593 = vmatprep.subr.bf16.mxu1 %v15801_v25  ;;  %v15888_v24 = vld [vmem:[%s18152_s30 + $0xb04] ss:$16 sps:$4 sm:$0xff]   ;;  %v15891_v25 = vld [vmem:[%s18152_s30 + $0xb0c] ss:$16 sps:$4 sm:$0xff]  }
 0x65d   : > { %7266 = vmatpush1.bf16.msra.mxu0 %v15796_v26  ;;  %7594 = vmatpush1.bf16.msra.mxu1 %v15799_v27  ;;  %v15886_v26 = vld [vmem:[%s18152_s30 + $0xb00] ss:$16 sps:$4 sm:$0xff]   ;;  %v15889_v27 = vld [vmem:[%s18152_s30 + $0xb08] ss:$16 sps:$4 sm:$0xff]  }
 0x65e   : > { %7267 = vmatprep.subr.bf16.mxu0 %v15804_v28  ;;  %7595 = vmatprep.subr.bf16.mxu1 %v15807_v29  ;;  %v15894_v28 = vld [vmem:[%s18152_s30 + $0xb24] ss:$16 sps:$4 sm:$0xff]   ;;  %v15897_v29 = vld [vmem:[%s18152_s30 + $0xb2c] ss:$16 sps:$4 sm:$0xff]  }
 0x661   : > { %7268 = vmatpush1.bf16.msra.mxu0 %v15802_v30  ;;  %7596 = vmatpush1.bf16.msra.mxu1 %v15805_v31  ;;  %v15892_v30 = vld [vmem:[%s18152_s30 + $0xb20] ss:$16 sps:$4 sm:$0xff]   ;;  %v15895_v31 = vld [vmem:[%s18152_s30 + $0xb28] ss:$16 sps:$4 sm:$0xff]  }
 0x662   : > { %7269 = vmatprep.subr.bf16.mxu0 %v15810_v32  ;;  %7597 = vmatprep.subr.bf16.mxu1 %v15813_v33  ;;  %v15900_v32 = vld [vmem:[%s18152_s30 + $0xb44] ss:$16 sps:$4 sm:$0xff]   ;;  %v15903_v33 = vld [vmem:[%s18152_s30 + $0xb4c] ss:$16 sps:$4 sm:$0xff]  }
 0x665   : > { %7270 = vmatpush1.bf16.msra.mxu0 %v15808_v34  ;;  %7598 = vmatpush1.bf16.msra.mxu1 %v15811_v35  ;;  %v15898_v34 = vld [vmem:[%s18152_s30 + $0xb40] ss:$16 sps:$4 sm:$0xff]   ;;  %v15901_v35 = vld [vmem:[%s18152_s30 + $0xb48] ss:$16 sps:$4 sm:$0xff]  }
 0x666   : > { %7271 = vmatprep.subr.bf16.mxu0 %v15816_v36  ;;  %7599 = vmatprep.subr.bf16.mxu1 %v15819_v37  ;;  %v15906_v36 = vld [vmem:[%s18152_s30 + $0xb64] ss:$16 sps:$4 sm:$0xff]   ;;  %v15909_v37 = vld [vmem:[%s18152_s30 + $0xb6c] ss:$16 sps:$4 sm:$0xff]  }
 0x669   : > { %7272 = vmatpush1.bf16.msra.mxu0 %v15814_v38  ;;  %7600 = vmatpush1.bf16.msra.mxu1 %v15817_v39  ;;  %v15904_v38 = vld [vmem:[%s18152_s30 + $0xb60] ss:$16 sps:$4 sm:$0xff]   ;;  %v15907_v39 = vld [vmem:[%s18152_s30 + $0xb68] ss:$16 sps:$4 sm:$0xff]  }
 0x66a   : > { %7273 = vmatprep.subr.bf16.mxu0 %v15822_v40  ;;  %7601 = vmatprep.subr.bf16.mxu1 %v15825_v41  ;;  %v15912_v40 = vld [vmem:[%s18152_s30 + $0xb84] ss:$16 sps:$4 sm:$0xff]   ;;  %v15915_v41 = vld [vmem:[%s18152_s30 + $0xb8c] ss:$16 sps:$4 sm:$0xff]  }
 0x66d   : > { %7274 = vmatpush1.bf16.msra.mxu0 %v15820_v42  ;;  %7602 = vmatpush1.bf16.msra.mxu1 %v15823_v43  ;;  %v15910_v42 = vld [vmem:[%s18152_s30 + $0xb80] ss:$16 sps:$4 sm:$0xff]   ;;  %v15913_v43 = vld [vmem:[%s18152_s30 + $0xb88] ss:$16 sps:$4 sm:$0xff]  }
 0x66e   : > { %7275 = vmatprep.subr.bf16.mxu0 %v15828_v44  ;;  %7603 = vmatprep.subr.bf16.mxu1 %v15831_v45  ;;  %v15918_v44 = vld [vmem:[%s18152_s30 + $0xba4] ss:$16 sps:$4 sm:$0xff]   ;;  %v15921_v45 = vld [vmem:[%s18152_s30 + $0xbac] ss:$16 sps:$4 sm:$0xff]  }
 0x671   : > { %7276 = vmatpush1.bf16.msra.mxu0 %v15826_v46  ;;  %7604 = vmatpush1.bf16.msra.mxu1 %v15829_v47  ;;  %v15916_v46 = vld [vmem:[%s18152_s30 + $0xba0] ss:$16 sps:$4 sm:$0xff]   ;;  %v15919_v47 = vld [vmem:[%s18152_s30 + $0xba8] ss:$16 sps:$4 sm:$0xff]  }
 0x672   : > { %7277 = vmatprep.subr.bf16.mxu0 %v15834_v48  ;;  %7605 = vmatprep.subr.bf16.mxu1 %v15837_v49  ;;  %v15924_v48 = vld [vmem:[%s18152_s30 + $0xbc4] ss:$16 sps:$4 sm:$0xff]   ;;  %v15927_v49 = vld [vmem:[%s18152_s30 + $0xbcc] ss:$16 sps:$4 sm:$0xff]  }
 0x675   : > { %7278 = vmatpush1.bf16.msra.mxu0 %v15832_v50  ;;  %7606 = vmatpush1.bf16.msra.mxu1 %v15835_v51  ;;  %v15922_v50 = vld [vmem:[%s18152_s30 + $0xbc0] ss:$16 sps:$4 sm:$0xff]   ;;  %v15925_v51 = vld [vmem:[%s18152_s30 + $0xbc8] ss:$16 sps:$4 sm:$0xff]  }
 0x676   : > { %7288 = vmatprep.subr.bf16.mxu0 %v15840_v52  ;;  %7616 = vmatprep.subr.bf16.mxu1 %v15843_v54  ;;  %v15930_v52 = vld [vmem:[%s18152_s30 + $0xbe4] ss:$16 sps:$4 sm:$0xff]   ;;  %v15928_v54 = vld [vmem:[%s18152_s30 + $0xbe0] ss:$16 sps:$4 sm:$0xff]  }
 0x678   : > { %7280 = vmatmul.mubr.bf16.vlgmr.msra.gmra.mrb[0].mxu0 %v3981_v56  ;;  %7608 = vmatmul.mubr.bf16.vlgmr.msra.gmra.mrb[0].mxu1 %v3981_v56  ;;  %v3967_v56 = vld [vmem:[#allocation3 + $0x50] sm:$0xff] }
 0x679   : > { %7289 = vmatpush1.bf16.msra.mxu0 %v15838_v57  ;;  %7617 = vmatpush1.bf16.msra.mxu1 %v15841_v58  ;;  %v15936_v57 = vld [vmem:[%s18152_s30 + $0xc04] ss:$16 sps:$4 sm:$0xff]   ;;  %v15939_v58 = vld [vmem:[%s18152_s30 + $0xc0c] ss:$16 sps:$4 sm:$0xff]  }
 0x67a   : > { %7290 = vmatprep.subr.bf16.mxu0 %v15846_v59  ;;  %7618 = vmatprep.subr.bf16.mxu1 %v15849_v60  ;;  %v3983_v59 = vpack.c.bf16 %v3967_v56, %v3967_v56  ;;  %v3970_v60 = vld [vmem:[#allocation3 + $0x68] sm:$0xff] }
 0x67b   : > { %7320 = vmatprep.mubr.bf16.mxu0 %v3984_v61  ;;  %7648 = vmatprep.mubr.bf16.mxu1 %v3984_v61  ;;  %v15934_v61 = vld [vmem:[%s18152_s30 + $0xc00] ss:$16 sps:$4 sm:$0xff]   ;;  %v16026_v56 = vld [vmem:[%s18152_s30 + $0xde4] ss:$16 sps:$4 sm:$0xff]  }
 0x67d   : > { %7291 = vmatpush1.bf16.msra.mxu0 %v15844_v62  ;;  %7619 = vmatpush1.bf16.msra.mxu1 %v15847_v63  ;;  %v15937_v62 = vld [vmem:[%s18152_s30 + $0xc08] ss:$16 sps:$4 sm:$0xff]   ;;  %v15942_v63 = vld [vmem:[%s18152_s30 + $0xc24] ss:$16 sps:$4 sm:$0xff]  }
 0x67e   : > { %7292 = vmatprep.subr.bf16.mxu0 %v15852_v0  ;;  %7620 = vmatprep.subr.bf16.mxu1 %v15855_v1  ;;  %v15945_v0 = vld [vmem:[%s18152_s30 + $0xc2c] ss:$16 sps:$4 sm:$0xff]   ;;  %v3986_v1 = vpack.c.bf16 %v3970_v60, %v3970_v60 }
 0x67f   : > { %v3969_v60 = vld [vmem:[#allocation3 + $0x60] sm:$0xff] }
 0x681   : > { %7293 = vmatpush1.bf16.msra.mxu0 %v15850_v2  ;;  %7621 = vmatpush1.bf16.msra.mxu1 %v15853_v3  ;;  %v15940_v2 = vld [vmem:[%s18152_s30 + $0xc20] ss:$16 sps:$4 sm:$0xff]   ;;  %v15943_v3 = vld [vmem:[%s18152_s30 + $0xc28] ss:$16 sps:$4 sm:$0xff]  }
 0x682   : > { %7294 = vmatprep.subr.bf16.mxu0 %v15858_v4  ;;  %7622 = vmatprep.subr.bf16.mxu1 %v15861_v5  ;;  %v15948_v4 = vld [vmem:[%s18152_s30 + $0xc44] ss:$16 sps:$4 sm:$0xff]   ;;  %v15951_v5 = vld [vmem:[%s18152_s30 + $0xc4c] ss:$16 sps:$4 sm:$0xff]  }
 0x685   : > { %7295 = vmatpush1.bf16.msra.mxu0 %v15856_v6  ;;  %7623 = vmatpush1.bf16.msra.mxu1 %v15859_v7  ;;  %v15946_v6 = vld [vmem:[%s18152_s30 + $0xc40] ss:$16 sps:$4 sm:$0xff]   ;;  %v15949_v7 = vld [vmem:[%s18152_s30 + $0xc48] ss:$16 sps:$4 sm:$0xff]  }
 0x686   : > { %7296 = vmatprep.subr.bf16.mxu0 %v15864_v8  ;;  %7624 = vmatprep.subr.bf16.mxu1 %v15867_v9  ;;  %v15954_v8 = vld [vmem:[%s18152_s30 + $0xc64] ss:$16 sps:$4 sm:$0xff]   ;;  %v15957_v9 = vld [vmem:[%s18152_s30 + $0xc6c] ss:$16 sps:$4 sm:$0xff]  }
 0x689   : > { %7297 = vmatpush1.bf16.msra.mxu0 %v15862_v10  ;;  %7625 = vmatpush1.bf16.msra.mxu1 %v15865_v11  ;;  %v15952_v10 = vld [vmem:[%s18152_s30 + $0xc60] ss:$16 sps:$4 sm:$0xff]   ;;  %v15955_v11 = vld [vmem:[%s18152_s30 + $0xc68] ss:$16 sps:$4 sm:$0xff]  }
 0x68a   : > { %7298 = vmatprep.subr.bf16.mxu0 %v15870_v12  ;;  %7626 = vmatprep.subr.bf16.mxu1 %v15873_v13  ;;  %v15960_v12 = vld [vmem:[%s18152_s30 + $0xc84] ss:$16 sps:$4 sm:$0xff]   ;;  %v15963_v13 = vld [vmem:[%s18152_s30 + $0xc8c] ss:$16 sps:$4 sm:$0xff]  }
 0x68d   : > { %7299 = vmatpush1.bf16.msra.mxu0 %v15868_v14  ;;  %7627 = vmatpush1.bf16.msra.mxu1 %v15871_v15  ;;  %v15958_v14 = vld [vmem:[%s18152_s30 + $0xc80] ss:$16 sps:$4 sm:$0xff]   ;;  %v15961_v15 = vld [vmem:[%s18152_s30 + $0xc88] ss:$16 sps:$4 sm:$0xff]  }
 0x68e   : > { %7300 = vmatprep.subr.bf16.mxu0 %v15876_v16  ;;  %7628 = vmatprep.subr.bf16.mxu1 %v15879_v17  ;;  %v15966_v16 = vld [vmem:[%s18152_s30 + $0xca4] ss:$16 sps:$4 sm:$0xff]   ;;  %v15969_v17 = vld [vmem:[%s18152_s30 + $0xcac] ss:$16 sps:$4 sm:$0xff]  }
 0x691   : > { %7301 = vmatpush1.bf16.msra.mxu0 %v15874_v18  ;;  %7629 = vmatpush1.bf16.msra.mxu1 %v15877_v19  ;;  %v15964_v18 = vld [vmem:[%s18152_s30 + $0xca0] ss:$16 sps:$4 sm:$0xff]   ;;  %v15967_v19 = vld [vmem:[%s18152_s30 + $0xca8] ss:$16 sps:$4 sm:$0xff]  }
 0x692   : > { %7302 = vmatprep.subr.bf16.mxu0 %v15882_v20  ;;  %7630 = vmatprep.subr.bf16.mxu1 %v15885_v21  ;;  %v15972_v20 = vld [vmem:[%s18152_s30 + $0xcc4] ss:$16 sps:$4 sm:$0xff]   ;;  %v15975_v21 = vld [vmem:[%s18152_s30 + $0xccc] ss:$16 sps:$4 sm:$0xff]  }
 0x695   : > { %7303 = vmatpush1.bf16.msra.mxu0 %v15880_v22  ;;  %7631 = vmatpush1.bf16.msra.mxu1 %v15883_v23  ;;  %v15970_v22 = vld [vmem:[%s18152_s30 + $0xcc0] ss:$16 sps:$4 sm:$0xff]   ;;  %v15973_v23 = vld [vmem:[%s18152_s30 + $0xcc8] ss:$16 sps:$4 sm:$0xff]  }
 0x696   : > { %7304 = vmatprep.subr.bf16.mxu0 %v15888_v24  ;;  %7632 = vmatprep.subr.bf16.mxu1 %v15891_v25  ;;  %v15978_v24 = vld [vmem:[%s18152_s30 + $0xce4] ss:$16 sps:$4 sm:$0xff]   ;;  %v15981_v25 = vld [vmem:[%s18152_s30 + $0xcec] ss:$16 sps:$4 sm:$0xff]  }
 0x699   : > { %7305 = vmatpush1.bf16.msra.mxu0 %v15886_v26  ;;  %7633 = vmatpush1.bf16.msra.mxu1 %v15889_v27  ;;  %v15976_v26 = vld [vmem:[%s18152_s30 + $0xce0] ss:$16 sps:$4 sm:$0xff]   ;;  %v15979_v27 = vld [vmem:[%s18152_s30 + $0xce8] ss:$16 sps:$4 sm:$0xff]  }
 0x69a   : > { %7306 = vmatprep.subr.bf16.mxu0 %v15894_v28  ;;  %7634 = vmatprep.subr.bf16.mxu1 %v15897_v29  ;;  %v15984_v28 = vld [vmem:[%s18152_s30 + $0xd04] ss:$16 sps:$4 sm:$0xff]   ;;  %v15987_v29 = vld [vmem:[%s18152_s30 + $0xd0c] ss:$16 sps:$4 sm:$0xff]  }
 0x69d   : > { %7307 = vmatpush1.bf16.msra.mxu0 %v15892_v30  ;;  %7635 = vmatpush1.bf16.msra.mxu1 %v15895_v31  ;;  %v15982_v30 = vld [vmem:[%s18152_s30 + $0xd00] ss:$16 sps:$4 sm:$0xff]   ;;  %v15985_v31 = vld [vmem:[%s18152_s30 + $0xd08] ss:$16 sps:$4 sm:$0xff]  }
 0x69e   : > { %7308 = vmatprep.subr.bf16.mxu0 %v15900_v32  ;;  %7636 = vmatprep.subr.bf16.mxu1 %v15903_v33  ;;  %v15990_v32 = vld [vmem:[%s18152_s30 + $0xd24] ss:$16 sps:$4 sm:$0xff]   ;;  %v15993_v33 = vld [vmem:[%s18152_s30 + $0xd2c] ss:$16 sps:$4 sm:$0xff]  }
 0x6a1   : > { %7309 = vmatpush1.bf16.msra.mxu0 %v15898_v34  ;;  %7637 = vmatpush1.bf16.msra.mxu1 %v15901_v35  ;;  %v15988_v34 = vld [vmem:[%s18152_s30 + $0xd20] ss:$16 sps:$4 sm:$0xff]   ;;  %v15991_v35 = vld [vmem:[%s18152_s30 + $0xd28] ss:$16 sps:$4 sm:$0xff]  }
 0x6a2   : > { %7310 = vmatprep.subr.bf16.mxu0 %v15906_v36  ;;  %7638 = vmatprep.subr.bf16.mxu1 %v15909_v37  ;;  %v15996_v36 = vld [vmem:[%s18152_s30 + $0xd44] ss:$16 sps:$4 sm:$0xff]   ;;  %v15999_v37 = vld [vmem:[%s18152_s30 + $0xd4c] ss:$16 sps:$4 sm:$0xff]  }
 0x6a5   : > { %7311 = vmatpush1.bf16.msra.mxu0 %v15904_v38  ;;  %7639 = vmatpush1.bf16.msra.mxu1 %v15907_v39  ;;  %v15994_v38 = vld [vmem:[%s18152_s30 + $0xd40] ss:$16 sps:$4 sm:$0xff]   ;;  %v15997_v39 = vld [vmem:[%s18152_s30 + $0xd48] ss:$16 sps:$4 sm:$0xff]  }
 0x6a6   : > { %7312 = vmatprep.subr.bf16.mxu0 %v15912_v40  ;;  %7640 = vmatprep.subr.bf16.mxu1 %v15915_v41  ;;  %v16002_v40 = vld [vmem:[%s18152_s30 + $0xd64] ss:$16 sps:$4 sm:$0xff]   ;;  %v16005_v41 = vld [vmem:[%s18152_s30 + $0xd6c] ss:$16 sps:$4 sm:$0xff]  }
 0x6a9   : > { %7313 = vmatpush1.bf16.msra.mxu0 %v15910_v42  ;;  %7641 = vmatpush1.bf16.msra.mxu1 %v15913_v43  ;;  %v16000_v42 = vld [vmem:[%s18152_s30 + $0xd60] ss:$16 sps:$4 sm:$0xff]   ;;  %v16003_v43 = vld [vmem:[%s18152_s30 + $0xd68] ss:$16 sps:$4 sm:$0xff]  }
 0x6aa   : > { %7314 = vmatprep.subr.bf16.mxu0 %v15918_v44  ;;  %7642 = vmatprep.subr.bf16.mxu1 %v15921_v45  ;;  %v16008_v44 = vld [vmem:[%s18152_s30 + $0xd84] ss:$16 sps:$4 sm:$0xff]   ;;  %v16011_v45 = vld [vmem:[%s18152_s30 + $0xd8c] ss:$16 sps:$4 sm:$0xff]  }
 0x6ad   : > { %7315 = vmatpush1.bf16.msra.mxu0 %v15916_v46  ;;  %7643 = vmatpush1.bf16.msra.mxu1 %v15919_v47  ;;  %v16006_v46 = vld [vmem:[%s18152_s30 + $0xd80] ss:$16 sps:$4 sm:$0xff]   ;;  %v16009_v47 = vld [vmem:[%s18152_s30 + $0xd88] ss:$16 sps:$4 sm:$0xff]  }
 0x6ae   : > { %7316 = vmatprep.subr.bf16.mxu0 %v15924_v48  ;;  %7644 = vmatprep.subr.bf16.mxu1 %v15927_v49  ;;  %v16014_v48 = vld [vmem:[%s18152_s30 + $0xda4] ss:$16 sps:$4 sm:$0xff]   ;;  %v16017_v49 = vld [vmem:[%s18152_s30 + $0xdac] ss:$16 sps:$4 sm:$0xff]  }
 0x6b1   : > { %7317 = vmatpush1.bf16.msra.mxu0 %v15922_v50  ;;  %7645 = vmatpush1.bf16.msra.mxu1 %v15925_v51  ;;  %v16012_v50 = vld [vmem:[%s18152_s30 + $0xda0] ss:$16 sps:$4 sm:$0xff]   ;;  %v16015_v51 = vld [vmem:[%s18152_s30 + $0xda8] ss:$16 sps:$4 sm:$0xff]  }
 0x6b2   : > { %7318 = vmatprep.subr.bf16.mxu0 %v15930_v52  ;;  %7646 = vmatprep.subr.bf16.mxu1 %v15933_v53  ;;  %v16020_v52 = vld [vmem:[%s18152_s30 + $0xdc4] ss:$16 sps:$4 sm:$0xff]   ;;  %v16023_v53 = vld [vmem:[%s18152_s30 + $0xdcc] ss:$16 sps:$4 sm:$0xff]  }
 0x6b5   : > { %7319 = vmatpush1.bf16.msra.mxu0 %v15928_v54  ;;  %7647 = vmatpush1.bf16.msra.mxu1 %v15931_v55  ;;  %v16018_v54 = vld [vmem:[%s18152_s30 + $0xdc0] ss:$16 sps:$4 sm:$0xff]   ;;  %v16021_v55 = vld [vmem:[%s18152_s30 + $0xdc8] ss:$16 sps:$4 sm:$0xff]  }
 0x6b6   : > { %7329 = vmatprep.subr.bf16.mxu0 %v15936_v57  ;;  %7657 = vmatprep.subr.bf16.mxu1 %v15939_v58  ;;  %v16029_v57 = vld [vmem:[%s18152_s30 + $0xdec] ss:$16 sps:$4 sm:$0xff]   ;;  %v16024_v58 = vld [vmem:[%s18152_s30 + $0xde0] ss:$16 sps:$4 sm:$0xff]  }
 0x6b8   : > { %7321 = vmatmul.mubr.bf16.vlgmr.msra.gmra.mrb[0].mxu0 %v3983_v59  ;;  %7649 = vmatmul.mubr.bf16.vlgmr.msra.gmra.mrb[0].mxu1 %v3983_v59  ;;  %v16027_v59 = vld [vmem:[%s18152_s30 + $0xde8] ss:$16 sps:$4 sm:$0xff]  }
 0x6b9   : > { %7330 = vmatpush1.bf16.msra.mxu0 %v15934_v61  ;;  %7658 = vmatpush1.bf16.msra.mxu1 %v15937_v62  ;;  %v16032_v61 = vld [vmem:[%s18152_s30 + $0xe04] ss:$16 sps:$4 sm:$0xff]   ;;  %v16035_v62 = vld [vmem:[%s18152_s30 + $0xe0c] ss:$16 sps:$4 sm:$0xff]  }
 0x6ba   : > { %7331 = vmatprep.subr.bf16.mxu0 %v15942_v63  ;;  %7659 = vmatprep.subr.bf16.mxu1 %v15945_v0  ;;  %v3985_v63 = vpack.c.bf16 %v3969_v60, %v3969_v60  ;;  %v3972_v0 = vld [vmem:[#allocation3 + $0x78] sm:$0xff] }
 0x6bb   : > { %7361 = vmatprep.mubr.bf16.mxu0 %v3986_v1  ;;  %7689 = vmatprep.mubr.bf16.mxu1 %v3986_v1  ;;  %v16030_v1 = vld [vmem:[%s18152_s30 + $0xe00] ss:$16 sps:$4 sm:$0xff]   ;;  %v16122_v60 = vld [vmem:[%s18152_s30 + $0xfe4] ss:$16 sps:$4 sm:$0xff]  }
 0x6bd   : > { %7332 = vmatpush1.bf16.msra.mxu0 %v15940_v2  ;;  %7660 = vmatpush1.bf16.msra.mxu1 %v15943_v3  ;;  %v16033_v2 = vld [vmem:[%s18152_s30 + $0xe08] ss:$16 sps:$4 sm:$0xff]   ;;  %v16038_v3 = vld [vmem:[%s18152_s30 + $0xe24] ss:$16 sps:$4 sm:$0xff]  }
 0x6be   : > { %7333 = vmatprep.subr.bf16.mxu0 %v15948_v4  ;;  %7661 = vmatprep.subr.bf16.mxu1 %v15951_v5  ;;  %v16041_v4 = vld [vmem:[%s18152_s30 + $0xe2c] ss:$16 sps:$4 sm:$0xff]   ;;  %v3988_v5 = vpack.c.bf16 %v3972_v0, %v3972_v0 }
 0x6bf   : > { %v3971_v0 = vld [vmem:[#allocation3 + $0x70] sm:$0xff] }
 0x6c1   : > { %7334 = vmatpush1.bf16.msra.mxu0 %v15946_v6  ;;  %7662 = vmatpush1.bf16.msra.mxu1 %v15949_v7  ;;  %v16036_v6 = vld [vmem:[%s18152_s30 + $0xe20] ss:$16 sps:$4 sm:$0xff]   ;;  %v16039_v7 = vld [vmem:[%s18152_s30 + $0xe28] ss:$16 sps:$4 sm:$0xff]  }
 0x6c2   : > { %7335 = vmatprep.subr.bf16.mxu0 %v15954_v8  ;;  %7663 = vmatprep.subr.bf16.mxu1 %v15957_v9  ;;  %v16044_v8 = vld [vmem:[%s18152_s30 + $0xe44] ss:$16 sps:$4 sm:$0xff]   ;;  %v16047_v9 = vld [vmem:[%s18152_s30 + $0xe4c] ss:$16 sps:$4 sm:$0xff]  }
 0x6c5   : > { %7336 = vmatpush1.bf16.msra.mxu0 %v15952_v10  ;;  %7664 = vmatpush1.bf16.msra.mxu1 %v15955_v11  ;;  %v16042_v10 = vld [vmem:[%s18152_s30 + $0xe40] ss:$16 sps:$4 sm:$0xff]   ;;  %v16045_v11 = vld [vmem:[%s18152_s30 + $0xe48] ss:$16 sps:$4 sm:$0xff]  }
 0x6c6   : > { %7337 = vmatprep.subr.bf16.mxu0 %v15960_v12  ;;  %7665 = vmatprep.subr.bf16.mxu1 %v15963_v13  ;;  %v16050_v12 = vld [vmem:[%s18152_s30 + $0xe64] ss:$16 sps:$4 sm:$0xff]   ;;  %v16053_v13 = vld [vmem:[%s18152_s30 + $0xe6c] ss:$16 sps:$4 sm:$0xff]  }
 0x6c9   : > { %7338 = vmatpush1.bf16.msra.mxu0 %v15958_v14  ;;  %7666 = vmatpush1.bf16.msra.mxu1 %v15961_v15  ;;  %v16048_v14 = vld [vmem:[%s18152_s30 + $0xe60] ss:$16 sps:$4 sm:$0xff]   ;;  %v16051_v15 = vld [vmem:[%s18152_s30 + $0xe68] ss:$16 sps:$4 sm:$0xff]  }
 0x6ca   : > { %7339 = vmatprep.subr.bf16.mxu0 %v15966_v16  ;;  %7667 = vmatprep.subr.bf16.mxu1 %v15969_v17  ;;  %v16056_v16 = vld [vmem:[%s18152_s30 + $0xe84] ss:$16 sps:$4 sm:$0xff]   ;;  %v16059_v17 = vld [vmem:[%s18152_s30 + $0xe8c] ss:$16 sps:$4 sm:$0xff]  }
 0x6cd   : > { %7340 = vmatpush1.bf16.msra.mxu0 %v15964_v18  ;;  %7668 = vmatpush1.bf16.msra.mxu1 %v15967_v19  ;;  %v16054_v18 = vld [vmem:[%s18152_s30 + $0xe80] ss:$16 sps:$4 sm:$0xff]   ;;  %v16057_v19 = vld [vmem:[%s18152_s30 + $0xe88] ss:$16 sps:$4 sm:$0xff]  }
 0x6ce   : > { %7341 = vmatprep.subr.bf16.mxu0 %v15972_v20  ;;  %7669 = vmatprep.subr.bf16.mxu1 %v15975_v21  ;;  %v16062_v20 = vld [vmem:[%s18152_s30 + $0xea4] ss:$16 sps:$4 sm:$0xff]   ;;  %v16065_v21 = vld [vmem:[%s18152_s30 + $0xeac] ss:$16 sps:$4 sm:$0xff]  }
 0x6d1   : > { %7342 = vmatpush1.bf16.msra.mxu0 %v15970_v22  ;;  %7670 = vmatpush1.bf16.msra.mxu1 %v15973_v23  ;;  %v16060_v22 = vld [vmem:[%s18152_s30 + $0xea0] ss:$16 sps:$4 sm:$0xff]   ;;  %v16063_v23 = vld [vmem:[%s18152_s30 + $0xea8] ss:$16 sps:$4 sm:$0xff]  }
 0x6d2   : > { %7343 = vmatprep.subr.bf16.mxu0 %v15978_v24  ;;  %7671 = vmatprep.subr.bf16.mxu1 %v15981_v25  ;;  %v16068_v24 = vld [vmem:[%s18152_s30 + $0xec4] ss:$16 sps:$4 sm:$0xff]   ;;  %v16071_v25 = vld [vmem:[%s18152_s30 + $0xecc] ss:$16 sps:$4 sm:$0xff]  }
 0x6d5   : > { %7344 = vmatpush1.bf16.msra.mxu0 %v15976_v26  ;;  %7672 = vmatpush1.bf16.msra.mxu1 %v15979_v27  ;;  %v16066_v26 = vld [vmem:[%s18152_s30 + $0xec0] ss:$16 sps:$4 sm:$0xff]   ;;  %v16069_v27 = vld [vmem:[%s18152_s30 + $0xec8] ss:$16 sps:$4 sm:$0xff]  }
 0x6d6   : > { %7345 = vmatprep.subr.bf16.mxu0 %v15984_v28  ;;  %7673 = vmatprep.subr.bf16.mxu1 %v15987_v29  ;;  %v16074_v28 = vld [vmem:[%s18152_s30 + $0xee4] ss:$16 sps:$4 sm:$0xff]   ;;  %v16077_v29 = vld [vmem:[%s18152_s30 + $0xeec] ss:$16 sps:$4 sm:$0xff]  }
 0x6d9   : > { %7346 = vmatpush1.bf16.msra.mxu0 %v15982_v30  ;;  %7674 = vmatpush1.bf16.msra.mxu1 %v15985_v31  ;;  %v16072_v30 = vld [vmem:[%s18152_s30 + $0xee0] ss:$16 sps:$4 sm:$0xff]   ;;  %v16075_v31 = vld [vmem:[%s18152_s30 + $0xee8] ss:$16 sps:$4 sm:$0xff]  }
 0x6da   : > { %7347 = vmatprep.subr.bf16.mxu0 %v15990_v32  ;;  %7675 = vmatprep.subr.bf16.mxu1 %v15993_v33  ;;  %v16080_v32 = vld [vmem:[%s18152_s30 + $0xf04] ss:$16 sps:$4 sm:$0xff]   ;;  %v16083_v33 = vld [vmem:[%s18152_s30 + $0xf0c] ss:$16 sps:$4 sm:$0xff]  }
 0x6dd   : > { %7348 = vmatpush1.bf16.msra.mxu0 %v15988_v34  ;;  %7676 = vmatpush1.bf16.msra.mxu1 %v15991_v35  ;;  %v16078_v34 = vld [vmem:[%s18152_s30 + $0xf00] ss:$16 sps:$4 sm:$0xff]   ;;  %v16081_v35 = vld [vmem:[%s18152_s30 + $0xf08] ss:$16 sps:$4 sm:$0xff]  }
 0x6de   : > { %7349 = vmatprep.subr.bf16.mxu0 %v15996_v36  ;;  %7677 = vmatprep.subr.bf16.mxu1 %v15999_v37  ;;  %v16086_v36 = vld [vmem:[%s18152_s30 + $0xf24] ss:$16 sps:$4 sm:$0xff]   ;;  %v16089_v37 = vld [vmem:[%s18152_s30 + $0xf2c] ss:$16 sps:$4 sm:$0xff]  }
 0x6e1   : > { %7350 = vmatpush1.bf16.msra.mxu0 %v15994_v38  ;;  %7678 = vmatpush1.bf16.msra.mxu1 %v15997_v39  ;;  %v16084_v38 = vld [vmem:[%s18152_s30 + $0xf20] ss:$16 sps:$4 sm:$0xff]   ;;  %v16087_v39 = vld [vmem:[%s18152_s30 + $0xf28] ss:$16 sps:$4 sm:$0xff]  }
 0x6e2   : > { %7351 = vmatprep.subr.bf16.mxu0 %v16002_v40  ;;  %7679 = vmatprep.subr.bf16.mxu1 %v16005_v41  ;;  %v16092_v40 = vld [vmem:[%s18152_s30 + $0xf44] ss:$16 sps:$4 sm:$0xff]   ;;  %v16095_v41 = vld [vmem:[%s18152_s30 + $0xf4c] ss:$16 sps:$4 sm:$0xff]  }
 0x6e5   : > { %7352 = vmatpush1.bf16.msra.mxu0 %v16000_v42  ;;  %7680 = vmatpush1.bf16.msra.mxu1 %v16003_v43  ;;  %v16090_v42 = vld [vmem:[%s18152_s30 + $0xf40] ss:$16 sps:$4 sm:$0xff]   ;;  %v16093_v43 = vld [vmem:[%s18152_s30 + $0xf48] ss:$16 sps:$4 sm:$0xff]  }
 0x6e6   : > { %7353 = vmatprep.subr.bf16.mxu0 %v16008_v44  ;;  %7681 = vmatprep.subr.bf16.mxu1 %v16011_v45  ;;  %v16098_v44 = vld [vmem:[%s18152_s30 + $0xf64] ss:$16 sps:$4 sm:$0xff]   ;;  %v16101_v45 = vld [vmem:[%s18152_s30 + $0xf6c] ss:$16 sps:$4 sm:$0xff]  }
 0x6e9   : > { %7354 = vmatpush1.bf16.msra.mxu0 %v16006_v46  ;;  %7682 = vmatpush1.bf16.msra.mxu1 %v16009_v47  ;;  %v16096_v46 = vld [vmem:[%s18152_s30 + $0xf60] ss:$16 sps:$4 sm:$0xff]   ;;  %v16099_v47 = vld [vmem:[%s18152_s30 + $0xf68] ss:$16 sps:$4 sm:$0xff]  }
 0x6ea   : > { %7355 = vmatprep.subr.bf16.mxu0 %v16014_v48  ;;  %7683 = vmatprep.subr.bf16.mxu1 %v16017_v49  ;;  %v16104_v48 = vld [vmem:[%s18152_s30 + $0xf84] ss:$16 sps:$4 sm:$0xff]   ;;  %v16107_v49 = vld [vmem:[%s18152_s30 + $0xf8c] ss:$16 sps:$4 sm:$0xff]  }
 0x6ed   : > { %7356 = vmatpush1.bf16.msra.mxu0 %v16012_v50  ;;  %7684 = vmatpush1.bf16.msra.mxu1 %v16015_v51  ;;  %v16102_v50 = vld [vmem:[%s18152_s30 + $0xf80] ss:$16 sps:$4 sm:$0xff]   ;;  %v16105_v51 = vld [vmem:[%s18152_s30 + $0xf88] ss:$16 sps:$4 sm:$0xff]  }
 0x6ee   : > { %7357 = vmatprep.subr.bf16.mxu0 %v16020_v52  ;;  %7685 = vmatprep.subr.bf16.mxu1 %v16023_v53  ;;  %v16110_v52 = vld [vmem:[%s18152_s30 + $0xfa4] ss:$16 sps:$4 sm:$0xff]   ;;  %v16113_v53 = vld [vmem:[%s18152_s30 + $0xfac] ss:$16 sps:$4 sm:$0xff]  }
 0x6f1   : > { %7358 = vmatpush1.bf16.msra.mxu0 %v16018_v54  ;;  %7686 = vmatpush1.bf16.msra.mxu1 %v16021_v55  ;;  %v16108_v54 = vld [vmem:[%s18152_s30 + $0xfa0] ss:$16 sps:$4 sm:$0xff]   ;;  %v16111_v55 = vld [vmem:[%s18152_s30 + $0xfa8] ss:$16 sps:$4 sm:$0xff]  }
 0x6f2   : > { %7359 = vmatprep.subr.bf16.mxu0 %v16026_v56  ;;  %7687 = vmatprep.subr.bf16.mxu1 %v16029_v57  ;;  %v16116_v56 = vld [vmem:[%s18152_s30 + $0xfc4] ss:$16 sps:$4 sm:$0xff]   ;;  %v16119_v57 = vld [vmem:[%s18152_s30 + $0xfcc] ss:$16 sps:$4 sm:$0xff]  }
 0x6f5   : > { %7360 = vmatpush1.bf16.msra.mxu0 %v16024_v58  ;;  %7688 = vmatpush1.bf16.msra.mxu1 %v16027_v59  ;;  %v16114_v58 = vld [vmem:[%s18152_s30 + $0xfc0] ss:$16 sps:$4 sm:$0xff]   ;;  %v16117_v59 = vld [vmem:[%s18152_s30 + $0xfc8] ss:$16 sps:$4 sm:$0xff]  }
 0x6f6   : > { %7370 = vmatprep.subr.bf16.mxu0 %v16032_v61  ;;  %7698 = vmatprep.subr.bf16.mxu1 %v16035_v62  ;;  %v16125_v61 = vld [vmem:[%s18152_s30 + $0xfec] ss:$16 sps:$4 sm:$0xff]   ;;  %v16120_v62 = vld [vmem:[%s18152_s30 + $0xfe0] ss:$16 sps:$4 sm:$0xff]  }
 0x6f8   : > { %7362 = vmatmul.mubr.bf16.vlgmr.msra.gmra.mrb[0].mxu0 %v3985_v63  ;;  %7690 = vmatmul.mubr.bf16.vlgmr.msra.gmra.mrb[0].mxu1 %v3985_v63  ;;  %v16123_v63 = vld [vmem:[%s18152_s30 + $0xfe8] ss:$16 sps:$4 sm:$0xff]   ;;  %s13646_s30 = sshll.u32 %s7745_s13, 3 }
 0x6f9   : > { %7371 = vmatpush1.bf16.msra.mxu0 %v16030_v1  ;;  %7699 = vmatpush1.bf16.msra.mxu1 %v16033_v2  ;;  %v3987_v1 = vpack.c.bf16 %v3971_v0, %v3971_v0  ;;  %v4503_v2 = vlaneseq  ;;  %s7748_s10 = scalar_lea.vmem [#allocation2], %s13646_s30 }
 0x6fa   : > { %7372 = vmatprep.subr.bf16.mxu0 %v16038_v3  ;;  %7700 = vmatprep.subr.bf16.mxu1 %v16041_v4 }
 0x6fb   : > { %7402 = vmatprep.mubr.bf16.mxu0 %v3988_v5  ;;  %7730 = vmatprep.mubr.bf16.mxu1 %v3988_v5  ;;  %v4504_v3 = vshrl.u32 %v4503_v2, 7 }
 0x6fd   : > { %7373 = vmatpush1.bf16.msra.mxu0 %v16036_v6  ;;  %7701 = vmatpush1.bf16.msra.mxu1 %v16039_v7  ;;  %v4505_v4 = vsub.s32 0, %v4504_v3  ;;  %v4513_v5 = vsub.s32 2, %v4504_v3  ;;  %v4501_v6 = vld [vmem:[%s736_s28] sm:$0xf]  ;;  %v4509_v7 = vsub.s32 1, %v4504_v3 }
 0x6fe   : > { %7374 = vmatprep.subr.bf16.mxu0 %v16044_v8  ;;  %7702 = vmatprep.subr.bf16.mxu1 %v16047_v9  ;;  %v4517_v8 = vsub.s32 3, %v4504_v3 }
 0x6ff   : > { %v4506_v9 = vrot.slane %v4501_v6, %v4505_v4 }
 0x701   : > { %7375 = vmatpush1.bf16.msra.mxu0 %v16042_v10  ;;  %7703 = vmatpush1.bf16.msra.mxu1 %v16045_v11  ;;  %v4514_v10 = vrot.slane %v4501_v6, %v4513_v5  ;;  %v4510_v11 = vrot.slane %v4501_v6, %v4509_v7 }
 0x702   : > { %7376 = vmatprep.subr.bf16.mxu0 %v16050_v12  ;;  %7704 = vmatprep.subr.bf16.mxu1 %v16053_v13  ;;  %v4518_v12 = vrot.slane %v4501_v6, %v4517_v8 }
 0x705   : > { %7377 = vmatpush1.bf16.msra.mxu0 %v16048_v14  ;;  %7705 = vmatpush1.bf16.msra.mxu1 %v16051_v15 }
 0x706   : > { %7378 = vmatprep.subr.bf16.mxu0 %v16056_v16  ;;  %7706 = vmatprep.subr.bf16.mxu1 %v16059_v17 }
 0x709   : > { %7379 = vmatpush1.bf16.msra.mxu0 %v16054_v18  ;;  %7707 = vmatpush1.bf16.msra.mxu1 %v16057_v19 }
 0x70a   : > { %7380 = vmatprep.subr.bf16.mxu0 %v16062_v20  ;;  %7708 = vmatprep.subr.bf16.mxu1 %v16065_v21 }
 0x70d   : > { %7381 = vmatpush1.bf16.msra.mxu0 %v16060_v22  ;;  %7709 = vmatpush1.bf16.msra.mxu1 %v16063_v23 }
 0x70e   : > { %7382 = vmatprep.subr.bf16.mxu0 %v16068_v24  ;;  %7710 = vmatprep.subr.bf16.mxu1 %v16071_v25 }
 0x711   : > { %7383 = vmatpush1.bf16.msra.mxu0 %v16066_v26  ;;  %7711 = vmatpush1.bf16.msra.mxu1 %v16069_v27 }
 0x712   : > { %7384 = vmatprep.subr.bf16.mxu0 %v16074_v28  ;;  %7712 = vmatprep.subr.bf16.mxu1 %v16077_v29 }
 0x715   : > { %7385 = vmatpush1.bf16.msra.mxu0 %v16072_v30  ;;  %7713 = vmatpush1.bf16.msra.mxu1 %v16075_v31 }
 0x716   : > { %7386 = vmatprep.subr.bf16.mxu0 %v16080_v32  ;;  %7714 = vmatprep.subr.bf16.mxu1 %v16083_v33 }
 0x719   : > { %7387 = vmatpush1.bf16.msra.mxu0 %v16078_v34  ;;  %7715 = vmatpush1.bf16.msra.mxu1 %v16081_v35 }
 0x71a   : > { %7388 = vmatprep.subr.bf16.mxu0 %v16086_v36  ;;  %7716 = vmatprep.subr.bf16.mxu1 %v16089_v37 }
 0x71d   : > { %7389 = vmatpush1.bf16.msra.mxu0 %v16084_v38  ;;  %7717 = vmatpush1.bf16.msra.mxu1 %v16087_v39 }
 0x71e   : > { %7390 = vmatprep.subr.bf16.mxu0 %v16092_v40  ;;  %7718 = vmatprep.subr.bf16.mxu1 %v16095_v41 }
 0x721   : > { %7391 = vmatpush1.bf16.msra.mxu0 %v16090_v42  ;;  %7719 = vmatpush1.bf16.msra.mxu1 %v16093_v43 }
 0x722   : > { %7392 = vmatprep.subr.bf16.mxu0 %v16098_v44  ;;  %7720 = vmatprep.subr.bf16.mxu1 %v16101_v45 }
 0x725   : > { %7393 = vmatpush1.bf16.msra.mxu0 %v16096_v46  ;;  %7721 = vmatpush1.bf16.msra.mxu1 %v16099_v47 }
 0x726   : > { %7394 = vmatprep.subr.bf16.mxu0 %v16104_v48  ;;  %7722 = vmatprep.subr.bf16.mxu1 %v16107_v49 }
 0x729   : > { %7395 = vmatpush1.bf16.msra.mxu0 %v16102_v50  ;;  %7723 = vmatpush1.bf16.msra.mxu1 %v16105_v51 }
 0x72a   : > { %7396 = vmatprep.subr.bf16.mxu0 %v16110_v52  ;;  %7724 = vmatprep.subr.bf16.mxu1 %v16113_v53 }
 0x72d   : > { %7397 = vmatpush1.bf16.msra.mxu0 %v16108_v54  ;;  %7725 = vmatpush1.bf16.msra.mxu1 %v16111_v55 }
 0x72e   : > { %7398 = vmatprep.subr.bf16.mxu0 %v16116_v56  ;;  %7726 = vmatprep.subr.bf16.mxu1 %v16119_v57 }
 0x731   : > { %7399 = vmatpush1.bf16.msra.mxu0 %v16114_v58  ;;  %7727 = vmatpush1.bf16.msra.mxu1 %v16117_v59 }
 0x732   : > { %7400 = vmatprep.subr.bf16.mxu0 %v16122_v60  ;;  %7728 = vmatprep.subr.bf16.mxu1 %v16125_v61 }
 0x735   : > { %7401 = vmatpush1.bf16.msra.mxu0 %v16120_v62  ;;  %7729 = vmatpush1.bf16.msra.mxu1 %v16123_v63 }
 0x738   : > { %7403 = vmatmul.mubr.bf16.vlgmr.msra.gmra.mrb[0].mxu0 %v3987_v1  ;;  %7731 = vmatmul.mubr.bf16.vlgmr.msra.gmra.mrb[0].mxu1 %v3987_v1 }
 0x80b   : > { %v7404_v13 = vpop.f32.mrb[0].mxu0  ;;  %v7732_v14 = vpop.f32.mrb[0].mxu1 }
 0x80c   : > { %v14440_v15 = vadd.f32 %v7404_v13, %v4506_v9  ;;  %v14442_v16 = vadd.f32 %v7732_v14, %v4514_v10  ;;  %v7406_v17 = vpop.f32.mrb[1].mxu0  ;;  %v7734_v18 = vpop.f32.mrb[1].mxu1 }
 0x80d   : > { %v14441_v19 = vadd.f32 %v7406_v17, %v4510_v11  ;;  %v14443_v20 = vadd.f32 %v7734_v18, %v4518_v12  ;;  %v7408_v21 = vpop.f32.mrb[2].mxu0  ;;  %v7736_v22 = vpop.f32.mrb[2].mxu1 }
 0x80e   : > { %v7739_v23 = vmax.f32 %v14440_v15, 0.0  ;;  %v7741_v24 = vmax.f32 %v14442_v16, 0.0  ;;  %v7409_v25 = vpop.f32.mrb[3].mxu0  ;;  %v7737_v26 = vpop.f32.mrb[3].mxu1 }
 0x80f   : > { %v7740_v27 = vmax.f32 %v14441_v19, 0.0  ;;  %v7742_v28 = vmax.f32 %v14443_v20, 0.0 }
 0x810   : > { %7749 = vst [vmem:[%s7748_s10] sm:$0xff] %v7739_v23  ;;  %7751 = vst [vmem:[%s7748_s10 + $0x10] sm:$0xff] %v7741_v24 }
 0x811   : > { %7750 = vst [vmem:[%s7748_s10 + $0x8] sm:$0xff] %v7740_v27  ;;  %7752 = vst [vmem:[%s7748_s10 + $0x18] sm:$0xff] %v7742_v28 }
 0x812 PF: > { %p7753_p6 = scmp.ge.s32.totalorder %s17635_s18, 10  ;;  %p7754_p13 = scmp.lt.s32.totalorder %s17635_s18, 12 }
 0x814   : > { %p7755_p9 = pnand %p7754_p13, %p7753_p6 }
 0x815   : > { %v16126_v29 = vld [vmem:[%s18163_s24 + $0x4] ss:$16 sps:$4 sm:$0xff] (!%p7755_p9)   ;;  %v16128_v30 = vld [vmem:[%s18163_s24 + $0xc] ss:$16 sps:$4 sm:$0xff] (!%p7755_p9)   ;;  %v16130_v31 = vld [vmem:[%s18163_s24] ss:$16 sps:$4 sm:$0xff] (!%p7755_p9)  }
 0x816   : > { %7758 = sbr.rel (%p7755_p9) target bundleno = 2820 (0xb04), region = 124  ;;  %10885 = vmatprep.subr.bf16.mxu0 (!%p7755_p9), %v16126_v29  ;;  %v16131_v32 = vld [vmem:[%s18163_s24 + $0x8] ss:$16 sps:$4 sm:$0xff] (!%p7755_p9)   ;;  %11213 = vmatprep.subr.bf16.mxu1 (!%p7755_p9), %v16128_v30  ;;  %v16132_v33 = vld [vmem:[%s18163_s24 + $0x24] ss:$16 sps:$4 sm:$0xff] (!%p7755_p9)   ;;  %s14163_s6 = sadd.s32 (!%p7755_p9), 4294967286, %s17635_s18 }
 0x817   : > { %10886 = vmatpush1.bf16.msra.mxu0 (!%p7755_p9), %v16130_v31  ;;  %11214 = vmatpush1.bf16.msra.mxu1 (!%p7755_p9), %v16131_v32  ;;  %v16134_v34 = vld [vmem:[%s18163_s24 + $0x2c] ss:$16 sps:$4 sm:$0xff] (!%p7755_p9)   ;;  %v16136_v35 = vld [vmem:[%s18163_s24 + $0x20] ss:$16 sps:$4 sm:$0xff] (!%p7755_p9)   ;;  %v16137_v36 = vld [vmem:[%s18163_s24 + $0x28] ss:$16 sps:$4 sm:$0xff] (!%p7755_p9)  }
 0x818   : > { %10887 = vmatprep.subr.bf16.mxu0 (!%p7755_p9), %v16132_v33  ;;  %11215 = vmatprep.subr.bf16.mxu1 (!%p7755_p9), %v16134_v34  ;;  %v16138_v37 = vld [vmem:[%s18163_s24 + $0x44] ss:$16 sps:$4 sm:$0xff] (!%p7755_p9)   ;;  %v16140_v38 = vld [vmem:[%s18163_s24 + $0x4c] ss:$16 sps:$4 sm:$0xff] (!%p7755_p9)   ;;  %v16142_v39 = vld [vmem:[%s18163_s24 + $0x40] ss:$16 sps:$4 sm:$0xff] (!%p7755_p9)  }
 0x819   : > { %v16143_v40 = vld [vmem:[%s18163_s24 + $0x48] ss:$16 sps:$4 sm:$0xff] (!%p7755_p9)   ;;  %v16144_v41 = vld [vmem:[%s18163_s24 + $0x64] ss:$16 sps:$4 sm:$0xff] (!%p7755_p9)   ;;  %v16146_v42 = vld [vmem:[%s18163_s24 + $0x6c] ss:$16 sps:$4 sm:$0xff] (!%p7755_p9)  }
 0x81a   : > { %v16148_v43 = vld [vmem:[%s18163_s24 + $0x60] ss:$16 sps:$4 sm:$0xff] (!%p7755_p9)   ;;  %v16149_v44 = vld [vmem:[%s18163_s24 + $0x68] ss:$16 sps:$4 sm:$0xff] (!%p7755_p9)   ;;  %v16150_v45 = vld [vmem:[%s18163_s24 + $0x84] ss:$16 sps:$4 sm:$0xff] (!%p7755_p9)  }
 0x81b   : > { %10888 = vmatpush1.bf16.msra.mxu0 (!%p7755_p9), %v16136_v35  ;;  %11216 = vmatpush1.bf16.msra.mxu1 (!%p7755_p9), %v16137_v36  ;;  %v16152_v46 = vld [vmem:[%s18163_s24 + $0x8c] ss:$16 sps:$4 sm:$0xff] (!%p7755_p9)   ;;  %v16154_v47 = vld [vmem:[%s18163_s24 + $0x80] ss:$16 sps:$4 sm:$0xff] (!%p7755_p9)   ;;  %v16155_v48 = vld [vmem:[%s18163_s24 + $0x88] ss:$16 sps:$4 sm:$0xff] (!%p7755_p9)  }
 0x81c   : > { %10889 = vmatprep.subr.bf16.mxu0 (!%p7755_p9), %v16138_v37  ;;  %11217 = vmatprep.subr.bf16.mxu1 (!%p7755_p9), %v16140_v38  ;;  %v16156_v49 = vld [vmem:[%s18163_s24 + $0xa4] ss:$16 sps:$4 sm:$0xff] (!%p7755_p9)   ;;  %v16158_v50 = vld [vmem:[%s18163_s24 + $0xac] ss:$16 sps:$4 sm:$0xff] (!%p7755_p9)   ;;  %v16160_v51 = vld [vmem:[%s18163_s24 + $0xa0] ss:$16 sps:$4 sm:$0xff] (!%p7755_p9)  }
 0x81d   : > { %v16161_v52 = vld [vmem:[%s18163_s24 + $0xa8] ss:$16 sps:$4 sm:$0xff]   ;;  %v16162_v53 = vld [vmem:[%s18163_s24 + $0xc4] ss:$16 sps:$4 sm:$0xff]   ;;  %v16164_v54 = vld [vmem:[%s18163_s24 + $0xcc] ss:$16 sps:$4 sm:$0xff]  }
 0x81e   : > { %v16166_v55 = vld [vmem:[%s18163_s24 + $0xc0] ss:$16 sps:$4 sm:$0xff]   ;;  %v16167_v56 = vld [vmem:[%s18163_s24 + $0xc8] ss:$16 sps:$4 sm:$0xff]   ;;  %v16168_v57 = vld [vmem:[%s18163_s24 + $0xe4] ss:$16 sps:$4 sm:$0xff]  }
 0x81f   : > { %10890 = vmatpush1.bf16.msra.mxu0 %v16142_v39  ;;  %11218 = vmatpush1.bf16.msra.mxu1 %v16143_v40  ;;  %v16170_v58 = vld [vmem:[%s18163_s24 + $0xec] ss:$16 sps:$4 sm:$0xff]   ;;  %v16172_v59 = vld [vmem:[%s18163_s24 + $0xe0] ss:$16 sps:$4 sm:$0xff]   ;;  %v16173_v60 = vld [vmem:[%s18163_s24 + $0xe8] ss:$16 sps:$4 sm:$0xff]  }
 0x820   : > { %10891 = vmatprep.subr.bf16.mxu0 %v16144_v41  ;;  %11219 = vmatprep.subr.bf16.mxu1 %v16146_v42  ;;  %v16174_v61 = vld [vmem:[%s18163_s24 + $0x104] ss:$16 sps:$4 sm:$0xff]   ;;  %v16176_v62 = vld [vmem:[%s18163_s24 + $0x10c] ss:$16 sps:$4 sm:$0xff]   ;;  %v16178_v63 = vld [vmem:[%s18163_s24 + $0x100] ss:$16 sps:$4 sm:$0xff]  }
 0x821   : > { %v16179_v0 = vld [vmem:[%s18163_s24 + $0x108] ss:$16 sps:$4 sm:$0xff]   ;;  %v16180_v1 = vld [vmem:[%s18163_s24 + $0x124] ss:$16 sps:$4 sm:$0xff]   ;;  %v16182_v2 = vld [vmem:[%s18163_s24 + $0x12c] ss:$16 sps:$4 sm:$0xff]  }
 0x822   : > { %v16184_v3 = vld [vmem:[%s18163_s24 + $0x120] ss:$16 sps:$4 sm:$0xff]   ;;  %v16185_v4 = vld [vmem:[%s18163_s24 + $0x128] ss:$16 sps:$4 sm:$0xff]   ;;  %v16186_v5 = vld [vmem:[%s18163_s24 + $0x144] ss:$16 sps:$4 sm:$0xff]  }
 0x823   : > { %10892 = vmatpush1.bf16.msra.mxu0 %v16148_v43  ;;  %11220 = vmatpush1.bf16.msra.mxu1 %v16149_v44  ;;  %v16188_v6 = vld [vmem:[%s18163_s24 + $0x14c] ss:$16 sps:$4 sm:$0xff]   ;;  %v16190_v7 = vld [vmem:[%s18163_s24 + $0x140] ss:$16 sps:$4 sm:$0xff]   ;;  %v16191_v8 = vld [vmem:[%s18163_s24 + $0x148] ss:$16 sps:$4 sm:$0xff]  }
 0x824   : > { %10893 = vmatprep.subr.bf16.mxu0 %v16150_v45  ;;  %11221 = vmatprep.subr.bf16.mxu1 %v16152_v46  ;;  %v16192_v9 = vld [vmem:[%s18163_s24 + $0x164] ss:$16 sps:$4 sm:$0xff]   ;;  %v16194_v10 = vld [vmem:[%s18163_s24 + $0x16c] ss:$16 sps:$4 sm:$0xff]   ;;  %v16196_v12 = vld [vmem:[%s18163_s24 + $0x160] ss:$16 sps:$4 sm:$0xff]  }
 0x825   : > { %v7760_v11 = vld [vmem:[#allocation2 + $0x8] sm:$0xff]  ;;  %v16197_v14 = vld [vmem:[%s18163_s24 + $0x168] ss:$16 sps:$4 sm:$0xff]   ;;  %s14164_s27 = sshll.u32 %s14163_s6, 9 }
 0x826   : > { %v7776_v13 = vpack.c.bf16 %v7760_v11, %v7760_v11  ;;  %v16198_v15 = vld [vmem:[%s18163_s24 + $0x184] ss:$16 sps:$4 sm:$0xff]   ;;  %v16200_v16 = vld [vmem:[%s18163_s24 + $0x18c] ss:$16 sps:$4 sm:$0xff]   ;;  %v16202_v17 = vld [vmem:[%s18163_s24 + $0x180] ss:$16 sps:$4 sm:$0xff]  }
 0x827   : > { %10894 = vmatpush1.bf16.msra.mxu0 %v16154_v47  ;;  %11222 = vmatpush1.bf16.msra.mxu1 %v16155_v48  ;;  %v16203_v18 = vld [vmem:[%s18163_s24 + $0x188] ss:$16 sps:$4 sm:$0xff]   ;;  %v16204_v19 = vld [vmem:[%s18163_s24 + $0x1a4] ss:$16 sps:$4 sm:$0xff]   ;;  %v16206_v20 = vld [vmem:[%s18163_s24 + $0x1ac] ss:$16 sps:$4 sm:$0xff]  }
 0x828   : > { %10895 = vmatprep.subr.bf16.mxu0 %v16156_v49  ;;  %11223 = vmatprep.subr.bf16.mxu1 %v16158_v50  ;;  %v16208_v21 = vld [vmem:[%s18163_s24 + $0x1a0] ss:$16 sps:$4 sm:$0xff]   ;;  %v16209_v22 = vld [vmem:[%s18163_s24 + $0x1a8] ss:$16 sps:$4 sm:$0xff]   ;;  %v16210_v23 = vld [vmem:[%s18163_s24 + $0x1c4] ss:$16 sps:$4 sm:$0xff]  }
 0x829   : > { %10917 = vmatprep.mubr.bf16.mxu0 %v7776_v13  ;;  %11245 = vmatprep.mubr.bf16.mxu1 %v7776_v13  ;;  %v16212_v24 = vld [vmem:[%s18163_s24 + $0x1cc] ss:$16 sps:$4 sm:$0xff]   ;;  %v16214_v25 = vld [vmem:[%s18163_s24 + $0x1c0] ss:$16 sps:$4 sm:$0xff]   ;;  %v16215_v26 = vld [vmem:[%s18163_s24 + $0x1c8] ss:$16 sps:$4 sm:$0xff]  }
 0x82a   : > { %v16216_v27 = vld [vmem:[%s18163_s24 + $0x1e4] ss:$16 sps:$4 sm:$0xff]   ;;  %v16218_v28 = vld [vmem:[%s18163_s24 + $0x1ec] ss:$16 sps:$4 sm:$0xff]   ;;  %v16220_v29 = vld [vmem:[%s18163_s24 + $0x1e0] ss:$16 sps:$4 sm:$0xff]  }
 0x82b   : > { %10896 = vmatpush1.bf16.msra.mxu0 %v16160_v51  ;;  %11224 = vmatpush1.bf16.msra.mxu1 %v16161_v52  ;;  %v16221_v30 = vld [vmem:[%s18163_s24 + $0x1e8] ss:$16 sps:$4 sm:$0xff]   ;;  %v16224_v32 = vld [vmem:[%s18163_s24 + $0x204] ss:$16 sps:$4 sm:$0xff]   ;;  %v16227_v33 = vld [vmem:[%s18163_s24 + $0x20c] ss:$16 sps:$4 sm:$0xff]  }
 0x82c   : > { %10897 = vmatprep.subr.bf16.mxu0 %v16162_v53  ;;  %11225 = vmatprep.subr.bf16.mxu1 %v16164_v54  ;;  %v7759_v31 = vld [vmem:[#allocation2] sm:$0xff]  ;;  %v16222_v35 = vld [vmem:[%s18163_s24 + $0x200] ss:$16 sps:$4 sm:$0xff]   ;;  %s11571_s28 = sshra.s32 %s14164_s27, 7 }
 0x82d   : > { %v7775_v34 = vpack.c.bf16 %v7759_v31, %v7759_v31  ;;  %v16225_v36 = vld [vmem:[%s18163_s24 + $0x208] ss:$16 sps:$4 sm:$0xff]   ;;  %v16230_v37 = vld [vmem:[%s18163_s24 + $0x224] ss:$16 sps:$4 sm:$0xff]   ;;  %v16233_v38 = vld [vmem:[%s18163_s24 + $0x22c] ss:$16 sps:$4 sm:$0xff]  }
 0x82e   : > { %v16228_v39 = vld [vmem:[%s18163_s24 + $0x220] ss:$16 sps:$4 sm:$0xff]   ;;  %v16231_v40 = vld [vmem:[%s18163_s24 + $0x228] ss:$16 sps:$4 sm:$0xff]   ;;  %v16236_v41 = vld [vmem:[%s18163_s24 + $0x244] ss:$16 sps:$4 sm:$0xff]  }
 0x82f   : > { %10898 = vmatpush1.bf16.msra.mxu0 %v16166_v55  ;;  %11226 = vmatpush1.bf16.msra.mxu1 %v16167_v56  ;;  %v16239_v42 = vld [vmem:[%s18163_s24 + $0x24c] ss:$16 sps:$4 sm:$0xff]   ;;  %v16234_v43 = vld [vmem:[%s18163_s24 + $0x240] ss:$16 sps:$4 sm:$0xff]   ;;  %v16237_v44 = vld [vmem:[%s18163_s24 + $0x248] ss:$16 sps:$4 sm:$0xff]  }
 0x830   : > { %10899 = vmatprep.subr.bf16.mxu0 %v16168_v57  ;;  %11227 = vmatprep.subr.bf16.mxu1 %v16170_v58  ;;  %v16242_v45 = vld [vmem:[%s18163_s24 + $0x264] ss:$16 sps:$4 sm:$0xff]   ;;  %v16245_v46 = vld [vmem:[%s18163_s24 + $0x26c] ss:$16 sps:$4 sm:$0xff]   ;;  %v16240_v47 = vld [vmem:[%s18163_s24 + $0x260] ss:$16 sps:$4 sm:$0xff]  }
 0x831   : > { %v16243_v48 = vld [vmem:[%s18163_s24 + $0x268] ss:$16 sps:$4 sm:$0xff]   ;;  %v16248_v49 = vld [vmem:[%s18163_s24 + $0x284] ss:$16 sps:$4 sm:$0xff]   ;;  %v16251_v50 = vld [vmem:[%s18163_s24 + $0x28c] ss:$16 sps:$4 sm:$0xff]  }
 0x832   : > { %v16246_v51 = vld [vmem:[%s18163_s24 + $0x280] ss:$16 sps:$4 sm:$0xff]   ;;  %v16249_v52 = vld [vmem:[%s18163_s24 + $0x288] ss:$16 sps:$4 sm:$0xff]   ;;  %v16254_v53 = vld [vmem:[%s18163_s24 + $0x2a4] ss:$16 sps:$4 sm:$0xff]  }
 0x833   : > { %10900 = vmatpush1.bf16.msra.mxu0 %v16172_v59  ;;  %11228 = vmatpush1.bf16.msra.mxu1 %v16173_v60  ;;  %v16257_v54 = vld [vmem:[%s18163_s24 + $0x2ac] ss:$16 sps:$4 sm:$0xff]   ;;  %v16252_v55 = vld [vmem:[%s18163_s24 + $0x2a0] ss:$16 sps:$4 sm:$0xff]   ;;  %v16255_v56 = vld [vmem:[%s18163_s24 + $0x2a8] ss:$16 sps:$4 sm:$0xff]  }
 0x834   : > { %10901 = vmatprep.subr.bf16.mxu0 %v16174_v61  ;;  %11229 = vmatprep.subr.bf16.mxu1 %v16176_v62  ;;  %v16260_v57 = vld [vmem:[%s18163_s24 + $0x2c4] ss:$16 sps:$4 sm:$0xff]   ;;  %v16263_v58 = vld [vmem:[%s18163_s24 + $0x2cc] ss:$16 sps:$4 sm:$0xff]   ;;  %v16258_v60 = vld [vmem:[%s18163_s24 + $0x2c0] ss:$16 sps:$4 sm:$0xff]  }
 0x835   : > { %v7762_v59 = vld [vmem:[#allocation2 + $0x18] sm:$0xff]  ;;  %v16261_v62 = vld [vmem:[%s18163_s24 + $0x2c8] ss:$16 sps:$4 sm:$0xff]   ;;  %s14165_s14 = sshll.u32 %s11571_s28, 3 }
 0x836   : > { %v7778_v61 = vpack.c.bf16 %v7762_v59, %v7762_v59  ;;  %v16284_v11 = vld [vmem:[%s18163_s24 + $0x344] ss:$16 sps:$4 sm:$0xff]   ;;  %v16282_v13 = vld [vmem:[%s18163_s24 + $0x340] ss:$16 sps:$4 sm:$0xff]  }
 0x837   : > { %10902 = vmatpush1.bf16.msra.mxu0 %v16178_v63  ;;  %11230 = vmatpush1.bf16.msra.mxu1 %v16179_v0  ;;  %v16266_v63 = vld [vmem:[%s18163_s24 + $0x2e4] ss:$16 sps:$4 sm:$0xff]   ;;  %v16269_v0 = vld [vmem:[%s18163_s24 + $0x2ec] ss:$16 sps:$4 sm:$0xff]  }
 0x838   : > { %10903 = vmatprep.subr.bf16.mxu0 %v16180_v1  ;;  %11231 = vmatprep.subr.bf16.mxu1 %v16182_v2  ;;  %v16264_v1 = vld [vmem:[%s18163_s24 + $0x2e0] ss:$16 sps:$4 sm:$0xff]   ;;  %v16267_v2 = vld [vmem:[%s18163_s24 + $0x2e8] ss:$16 sps:$4 sm:$0xff]   ;;  %v16314_v31 = vld [vmem:[%s18163_s24 + $0x3e4] ss:$16 sps:$4 sm:$0xff]  }
 0x839   : > { %v16350_v59 = vld [vmem:[%s18163_s24 + $0x4a4] ss:$16 sps:$4 sm:$0xff]  }
 0x83b   : > { %10904 = vmatpush1.bf16.msra.mxu0 %v16184_v3  ;;  %11232 = vmatpush1.bf16.msra.mxu1 %v16185_v4  ;;  %v16272_v3 = vld [vmem:[%s18163_s24 + $0x304] ss:$16 sps:$4 sm:$0xff]   ;;  %v16275_v4 = vld [vmem:[%s18163_s24 + $0x30c] ss:$16 sps:$4 sm:$0xff]  }
 0x83c   : > { %10905 = vmatprep.subr.bf16.mxu0 %v16186_v5  ;;  %11233 = vmatprep.subr.bf16.mxu1 %v16188_v6  ;;  %v16270_v5 = vld [vmem:[%s18163_s24 + $0x300] ss:$16 sps:$4 sm:$0xff]   ;;  %v16273_v6 = vld [vmem:[%s18163_s24 + $0x308] ss:$16 sps:$4 sm:$0xff]  }
 0x83f   : > { %10906 = vmatpush1.bf16.msra.mxu0 %v16190_v7  ;;  %11234 = vmatpush1.bf16.msra.mxu1 %v16191_v8  ;;  %v16278_v7 = vld [vmem:[%s18163_s24 + $0x324] ss:$16 sps:$4 sm:$0xff]   ;;  %v16281_v8 = vld [vmem:[%s18163_s24 + $0x32c] ss:$16 sps:$4 sm:$0xff]  }
 0x840   : > { %10907 = vmatprep.subr.bf16.mxu0 %v16192_v9  ;;  %11235 = vmatprep.subr.bf16.mxu1 %v16194_v10  ;;  %v16276_v9 = vld [vmem:[%s18163_s24 + $0x320] ss:$16 sps:$4 sm:$0xff]   ;;  %v16279_v10 = vld [vmem:[%s18163_s24 + $0x328] ss:$16 sps:$4 sm:$0xff]  }
 0x843   : > { %10908 = vmatpush1.bf16.msra.mxu0 %v16196_v12  ;;  %11236 = vmatpush1.bf16.msra.mxu1 %v16197_v14  ;;  %v16287_v12 = vld [vmem:[%s18163_s24 + $0x34c] ss:$16 sps:$4 sm:$0xff]   ;;  %v16285_v14 = vld [vmem:[%s18163_s24 + $0x348] ss:$16 sps:$4 sm:$0xff]  }
 0x844   : > { %10909 = vmatprep.subr.bf16.mxu0 %v16198_v15  ;;  %11237 = vmatprep.subr.bf16.mxu1 %v16200_v16  ;;  %v16290_v15 = vld [vmem:[%s18163_s24 + $0x364] ss:$16 sps:$4 sm:$0xff]   ;;  %v16293_v16 = vld [vmem:[%s18163_s24 + $0x36c] ss:$16 sps:$4 sm:$0xff]  }
 0x847   : > { %10910 = vmatpush1.bf16.msra.mxu0 %v16202_v17  ;;  %11238 = vmatpush1.bf16.msra.mxu1 %v16203_v18  ;;  %v16288_v17 = vld [vmem:[%s18163_s24 + $0x360] ss:$16 sps:$4 sm:$0xff]   ;;  %v16291_v18 = vld [vmem:[%s18163_s24 + $0x368] ss:$16 sps:$4 sm:$0xff]  }
 0x848   : > { %10911 = vmatprep.subr.bf16.mxu0 %v16204_v19  ;;  %11239 = vmatprep.subr.bf16.mxu1 %v16206_v20  ;;  %v16296_v19 = vld [vmem:[%s18163_s24 + $0x384] ss:$16 sps:$4 sm:$0xff]   ;;  %v16299_v20 = vld [vmem:[%s18163_s24 + $0x38c] ss:$16 sps:$4 sm:$0xff]  }
 0x84b   : > { %10912 = vmatpush1.bf16.msra.mxu0 %v16208_v21  ;;  %11240 = vmatpush1.bf16.msra.mxu1 %v16209_v22  ;;  %v16294_v21 = vld [vmem:[%s18163_s24 + $0x380] ss:$16 sps:$4 sm:$0xff]   ;;  %v16297_v22 = vld [vmem:[%s18163_s24 + $0x388] ss:$16 sps:$4 sm:$0xff]  }
 0x84c   : > { %10913 = vmatprep.subr.bf16.mxu0 %v16210_v23  ;;  %11241 = vmatprep.subr.bf16.mxu1 %v16212_v24  ;;  %v16302_v23 = vld [vmem:[%s18163_s24 + $0x3a4] ss:$16 sps:$4 sm:$0xff]   ;;  %v16305_v24 = vld [vmem:[%s18163_s24 + $0x3ac] ss:$16 sps:$4 sm:$0xff]  }
 0x84f   : > { %10914 = vmatpush1.bf16.msra.mxu0 %v16214_v25  ;;  %11242 = vmatpush1.bf16.msra.mxu1 %v16215_v26  ;;  %v16300_v25 = vld [vmem:[%s18163_s24 + $0x3a0] ss:$16 sps:$4 sm:$0xff]   ;;  %v16303_v26 = vld [vmem:[%s18163_s24 + $0x3a8] ss:$16 sps:$4 sm:$0xff]  }
 0x850   : > { %10915 = vmatprep.subr.bf16.mxu0 %v16216_v27  ;;  %11243 = vmatprep.subr.bf16.mxu1 %v16218_v28  ;;  %v16308_v27 = vld [vmem:[%s18163_s24 + $0x3c4] ss:$16 sps:$4 sm:$0xff]   ;;  %v16311_v28 = vld [vmem:[%s18163_s24 + $0x3cc] ss:$16 sps:$4 sm:$0xff]  }
 0x853   : > { %10916 = vmatpush1.bf16.msra.mxu0 %v16220_v29  ;;  %11244 = vmatpush1.bf16.msra.mxu1 %v16221_v30  ;;  %v16306_v29 = vld [vmem:[%s18163_s24 + $0x3c0] ss:$16 sps:$4 sm:$0xff]   ;;  %v16309_v30 = vld [vmem:[%s18163_s24 + $0x3c8] ss:$16 sps:$4 sm:$0xff]  }
 0x854   : > { %10926 = vmatprep.subr.bf16.mxu0 %v16224_v32  ;;  %11254 = vmatprep.subr.bf16.mxu1 %v16227_v33  ;;  %v16317_v32 = vld [vmem:[%s18163_s24 + $0x3ec] ss:$16 sps:$4 sm:$0xff]   ;;  %v16312_v33 = vld [vmem:[%s18163_s24 + $0x3e0] ss:$16 sps:$4 sm:$0xff]  }
 0x856   : > { %10918 = vmatmul.mubr.bf16.vlgmr.msra.gmra.mrb[0].mxu0 %v7775_v34  ;;  %11246 = vmatmul.mubr.bf16.vlgmr.msra.gmra.mrb[0].mxu1 %v7775_v34  ;;  %v16315_v34 = vld [vmem:[%s18163_s24 + $0x3e8] ss:$16 sps:$4 sm:$0xff]  }
 0x857   : > { %10927 = vmatpush1.bf16.msra.mxu0 %v16222_v35  ;;  %11255 = vmatpush1.bf16.msra.mxu1 %v16225_v36  ;;  %v16320_v35 = vld [vmem:[%s18163_s24 + $0x404] ss:$16 sps:$4 sm:$0xff]  }
 0x858   : > { %10928 = vmatprep.subr.bf16.mxu0 %v16230_v37  ;;  %11256 = vmatprep.subr.bf16.mxu1 %v16233_v38  ;;  %v7761_v36 = vld [vmem:[#allocation2 + $0x10] sm:$0xff]  ;;  %v16318_v38 = vld [vmem:[%s18163_s24 + $0x400] ss:$16 sps:$4 sm:$0xff]  }
 0x859   : > { %10958 = vmatprep.mubr.bf16.mxu0 %v7778_v61  ;;  %11286 = vmatprep.mubr.bf16.mxu1 %v7778_v61  ;;  %v16323_v37 = vld [vmem:[%s18163_s24 + $0x40c] ss:$16 sps:$4 sm:$0xff]   ;;  %v16348_v61 = vld [vmem:[%s18163_s24 + $0x4a0] ss:$16 sps:$4 sm:$0xff]  }
 0x85b   : > { %10929 = vmatpush1.bf16.msra.mxu0 %v16228_v39  ;;  %11257 = vmatpush1.bf16.msra.mxu1 %v16231_v40  ;;  %v16321_v39 = vld [vmem:[%s18163_s24 + $0x408] ss:$16 sps:$4 sm:$0xff]   ;;  %v7777_v40 = vpack.c.bf16 %v7761_v36, %v7761_v36  ;;  %v16413_v36 = vld [vmem:[%s18163_s24 + $0x5ec] ss:$16 sps:$4 sm:$0xff]  }
 0x85c   : > { %10930 = vmatprep.subr.bf16.mxu0 %v16236_v41  ;;  %11258 = vmatprep.subr.bf16.mxu1 %v16239_v42  ;;  %v16326_v41 = vld [vmem:[%s18163_s24 + $0x424] ss:$16 sps:$4 sm:$0xff]   ;;  %v16329_v42 = vld [vmem:[%s18163_s24 + $0x42c] ss:$16 sps:$4 sm:$0xff]  }
 0x85f   : > { %10931 = vmatpush1.bf16.msra.mxu0 %v16234_v43  ;;  %11259 = vmatpush1.bf16.msra.mxu1 %v16237_v44  ;;  %v7764_v43 = vld [vmem:[#allocation2 + $0x28] sm:$0xff] }
 0x860   : > { %10932 = vmatprep.subr.bf16.mxu0 %v16242_v45  ;;  %11260 = vmatprep.subr.bf16.mxu1 %v16245_v46  ;;  %v7780_v44 = vpack.c.bf16 %v7764_v43, %v7764_v43  ;;  %v16324_v45 = vld [vmem:[%s18163_s24 + $0x420] ss:$16 sps:$4 sm:$0xff]   ;;  %v16327_v46 = vld [vmem:[%s18163_s24 + $0x428] ss:$16 sps:$4 sm:$0xff]  }
 0x861   : > { %v16417_v43 = vld [vmem:[%s18163_s24 + $0x608] ss:$16 sps:$4 sm:$0xff]  }
 0x863   : > { %10933 = vmatpush1.bf16.msra.mxu0 %v16240_v47  ;;  %11261 = vmatpush1.bf16.msra.mxu1 %v16243_v48  ;;  %v16332_v47 = vld [vmem:[%s18163_s24 + $0x444] ss:$16 sps:$4 sm:$0xff]   ;;  %v16335_v48 = vld [vmem:[%s18163_s24 + $0x44c] ss:$16 sps:$4 sm:$0xff]  }
 0x864   : > { %10934 = vmatprep.subr.bf16.mxu0 %v16248_v49  ;;  %11262 = vmatprep.subr.bf16.mxu1 %v16251_v50  ;;  %v16330_v49 = vld [vmem:[%s18163_s24 + $0x440] ss:$16 sps:$4 sm:$0xff]   ;;  %v16333_v50 = vld [vmem:[%s18163_s24 + $0x448] ss:$16 sps:$4 sm:$0xff]  }
 0x867   : > { %10935 = vmatpush1.bf16.msra.mxu0 %v16246_v51  ;;  %11263 = vmatpush1.bf16.msra.mxu1 %v16249_v52  ;;  %v16338_v51 = vld [vmem:[%s18163_s24 + $0x464] ss:$16 sps:$4 sm:$0xff]   ;;  %v16341_v52 = vld [vmem:[%s18163_s24 + $0x46c] ss:$16 sps:$4 sm:$0xff]  }
 0x868   : > { %10936 = vmatprep.subr.bf16.mxu0 %v16254_v53  ;;  %11264 = vmatprep.subr.bf16.mxu1 %v16257_v54  ;;  %v16336_v53 = vld [vmem:[%s18163_s24 + $0x460] ss:$16 sps:$4 sm:$0xff]   ;;  %v16339_v54 = vld [vmem:[%s18163_s24 + $0x468] ss:$16 sps:$4 sm:$0xff]  }
 0x86b   : > { %10937 = vmatpush1.bf16.msra.mxu0 %v16252_v55  ;;  %11265 = vmatpush1.bf16.msra.mxu1 %v16255_v56  ;;  %v16344_v55 = vld [vmem:[%s18163_s24 + $0x484] ss:$16 sps:$4 sm:$0xff]   ;;  %v16347_v56 = vld [vmem:[%s18163_s24 + $0x48c] ss:$16 sps:$4 sm:$0xff]  }
 0x86c   : > { %10938 = vmatprep.subr.bf16.mxu0 %v16260_v57  ;;  %11266 = vmatprep.subr.bf16.mxu1 %v16263_v58  ;;  %v16342_v57 = vld [vmem:[%s18163_s24 + $0x480] ss:$16 sps:$4 sm:$0xff]   ;;  %v16345_v58 = vld [vmem:[%s18163_s24 + $0x488] ss:$16 sps:$4 sm:$0xff]  }
 0x86f   : > { %10939 = vmatpush1.bf16.msra.mxu0 %v16258_v60  ;;  %11267 = vmatpush1.bf16.msra.mxu1 %v16261_v62  ;;  %v16353_v60 = vld [vmem:[%s18163_s24 + $0x4ac] ss:$16 sps:$4 sm:$0xff]   ;;  %v16351_v62 = vld [vmem:[%s18163_s24 + $0x4a8] ss:$16 sps:$4 sm:$0xff]  }
 0x870   : > { %10940 = vmatprep.subr.bf16.mxu0 %v16266_v63  ;;  %11268 = vmatprep.subr.bf16.mxu1 %v16269_v0  ;;  %v16356_v63 = vld [vmem:[%s18163_s24 + $0x4c4] ss:$16 sps:$4 sm:$0xff]   ;;  %v16359_v0 = vld [vmem:[%s18163_s24 + $0x4cc] ss:$16 sps:$4 sm:$0xff]  }
 0x873   : > { %10941 = vmatpush1.bf16.msra.mxu0 %v16264_v1  ;;  %11269 = vmatpush1.bf16.msra.mxu1 %v16267_v2  ;;  %v16354_v1 = vld [vmem:[%s18163_s24 + $0x4c0] ss:$16 sps:$4 sm:$0xff]   ;;  %v16357_v2 = vld [vmem:[%s18163_s24 + $0x4c8] ss:$16 sps:$4 sm:$0xff]  }
 0x874   : > { %10942 = vmatprep.subr.bf16.mxu0 %v16272_v3  ;;  %11270 = vmatprep.subr.bf16.mxu1 %v16275_v4  ;;  %v16362_v3 = vld [vmem:[%s18163_s24 + $0x4e4] ss:$16 sps:$4 sm:$0xff]   ;;  %v16365_v4 = vld [vmem:[%s18163_s24 + $0x4ec] ss:$16 sps:$4 sm:$0xff]  }
 0x877   : > { %10943 = vmatpush1.bf16.msra.mxu0 %v16270_v5  ;;  %11271 = vmatpush1.bf16.msra.mxu1 %v16273_v6  ;;  %v16360_v5 = vld [vmem:[%s18163_s24 + $0x4e0] ss:$16 sps:$4 sm:$0xff]   ;;  %v16363_v6 = vld [vmem:[%s18163_s24 + $0x4e8] ss:$16 sps:$4 sm:$0xff]  }
 0x878   : > { %10944 = vmatprep.subr.bf16.mxu0 %v16278_v7  ;;  %11272 = vmatprep.subr.bf16.mxu1 %v16281_v8  ;;  %v16368_v7 = vld [vmem:[%s18163_s24 + $0x504] ss:$16 sps:$4 sm:$0xff]   ;;  %v16371_v8 = vld [vmem:[%s18163_s24 + $0x50c] ss:$16 sps:$4 sm:$0xff]  }
 0x87b   : > { %10945 = vmatpush1.bf16.msra.mxu0 %v16276_v9  ;;  %11273 = vmatpush1.bf16.msra.mxu1 %v16279_v10  ;;  %v16366_v9 = vld [vmem:[%s18163_s24 + $0x500] ss:$16 sps:$4 sm:$0xff]   ;;  %v16369_v10 = vld [vmem:[%s18163_s24 + $0x508] ss:$16 sps:$4 sm:$0xff]  }
 0x87c   : > { %10946 = vmatprep.subr.bf16.mxu0 %v16284_v11  ;;  %11274 = vmatprep.subr.bf16.mxu1 %v16287_v12  ;;  %v16374_v11 = vld [vmem:[%s18163_s24 + $0x524] ss:$16 sps:$4 sm:$0xff]   ;;  %v16377_v12 = vld [vmem:[%s18163_s24 + $0x52c] ss:$16 sps:$4 sm:$0xff]  }
 0x87f   : > { %10947 = vmatpush1.bf16.msra.mxu0 %v16282_v13  ;;  %11275 = vmatpush1.bf16.msra.mxu1 %v16285_v14  ;;  %v16372_v13 = vld [vmem:[%s18163_s24 + $0x520] ss:$16 sps:$4 sm:$0xff]   ;;  %v16375_v14 = vld [vmem:[%s18163_s24 + $0x528] ss:$16 sps:$4 sm:$0xff]  }
 0x880   : > { %10948 = vmatprep.subr.bf16.mxu0 %v16290_v15  ;;  %11276 = vmatprep.subr.bf16.mxu1 %v16293_v16  ;;  %v16380_v15 = vld [vmem:[%s18163_s24 + $0x544] ss:$16 sps:$4 sm:$0xff]   ;;  %v16383_v16 = vld [vmem:[%s18163_s24 + $0x54c] ss:$16 sps:$4 sm:$0xff]  }
 0x883   : > { %10949 = vmatpush1.bf16.msra.mxu0 %v16288_v17  ;;  %11277 = vmatpush1.bf16.msra.mxu1 %v16291_v18  ;;  %v16378_v17 = vld [vmem:[%s18163_s24 + $0x540] ss:$16 sps:$4 sm:$0xff]   ;;  %v16381_v18 = vld [vmem:[%s18163_s24 + $0x548] ss:$16 sps:$4 sm:$0xff]  }
 0x884   : > { %10950 = vmatprep.subr.bf16.mxu0 %v16296_v19  ;;  %11278 = vmatprep.subr.bf16.mxu1 %v16299_v20  ;;  %v16386_v19 = vld [vmem:[%s18163_s24 + $0x564] ss:$16 sps:$4 sm:$0xff]   ;;  %v16389_v20 = vld [vmem:[%s18163_s24 + $0x56c] ss:$16 sps:$4 sm:$0xff]  }
 0x887   : > { %10951 = vmatpush1.bf16.msra.mxu0 %v16294_v21  ;;  %11279 = vmatpush1.bf16.msra.mxu1 %v16297_v22  ;;  %v16384_v21 = vld [vmem:[%s18163_s24 + $0x560] ss:$16 sps:$4 sm:$0xff]   ;;  %v16387_v22 = vld [vmem:[%s18163_s24 + $0x568] ss:$16 sps:$4 sm:$0xff]  }
 0x888   : > { %10952 = vmatprep.subr.bf16.mxu0 %v16302_v23  ;;  %11280 = vmatprep.subr.bf16.mxu1 %v16305_v24  ;;  %v16392_v23 = vld [vmem:[%s18163_s24 + $0x584] ss:$16 sps:$4 sm:$0xff]   ;;  %v16395_v24 = vld [vmem:[%s18163_s24 + $0x58c] ss:$16 sps:$4 sm:$0xff]  }
 0x88b   : > { %10953 = vmatpush1.bf16.msra.mxu0 %v16300_v25  ;;  %11281 = vmatpush1.bf16.msra.mxu1 %v16303_v26  ;;  %v16390_v25 = vld [vmem:[%s18163_s24 + $0x580] ss:$16 sps:$4 sm:$0xff]   ;;  %v16393_v26 = vld [vmem:[%s18163_s24 + $0x588] ss:$16 sps:$4 sm:$0xff]  }
 0x88c   : > { %10954 = vmatprep.subr.bf16.mxu0 %v16308_v27  ;;  %11282 = vmatprep.subr.bf16.mxu1 %v16311_v28  ;;  %v16398_v27 = vld [vmem:[%s18163_s24 + $0x5a4] ss:$16 sps:$4 sm:$0xff]   ;;  %v16401_v28 = vld [vmem:[%s18163_s24 + $0x5ac] ss:$16 sps:$4 sm:$0xff]  }
 0x88f   : > { %10955 = vmatpush1.bf16.msra.mxu0 %v16306_v29  ;;  %11283 = vmatpush1.bf16.msra.mxu1 %v16309_v30  ;;  %v16396_v29 = vld [vmem:[%s18163_s24 + $0x5a0] ss:$16 sps:$4 sm:$0xff]   ;;  %v16399_v30 = vld [vmem:[%s18163_s24 + $0x5a8] ss:$16 sps:$4 sm:$0xff]  }
 0x890   : > { %10956 = vmatprep.subr.bf16.mxu0 %v16314_v31  ;;  %11284 = vmatprep.subr.bf16.mxu1 %v16317_v32  ;;  %v16404_v31 = vld [vmem:[%s18163_s24 + $0x5c4] ss:$16 sps:$4 sm:$0xff]   ;;  %v16407_v32 = vld [vmem:[%s18163_s24 + $0x5cc] ss:$16 sps:$4 sm:$0xff]  }
 0x893   : > { %10957 = vmatpush1.bf16.msra.mxu0 %v16312_v33  ;;  %11285 = vmatpush1.bf16.msra.mxu1 %v16315_v34  ;;  %v16402_v33 = vld [vmem:[%s18163_s24 + $0x5c0] ss:$16 sps:$4 sm:$0xff]   ;;  %v16405_v34 = vld [vmem:[%s18163_s24 + $0x5c8] ss:$16 sps:$4 sm:$0xff]  }
 0x894   : > { %10967 = vmatprep.subr.bf16.mxu0 %v16320_v35  ;;  %11295 = vmatprep.subr.bf16.mxu1 %v16323_v37  ;;  %v16410_v35 = vld [vmem:[%s18163_s24 + $0x5e4] ss:$16 sps:$4 sm:$0xff]   ;;  %v16408_v37 = vld [vmem:[%s18163_s24 + $0x5e0] ss:$16 sps:$4 sm:$0xff]  }
 0x896   : > { %10959 = vmatmul.mubr.bf16.vlgmr.msra.gmra.mrb[0].mxu0 %v7777_v40  ;;  %11287 = vmatmul.mubr.bf16.vlgmr.msra.gmra.mrb[0].mxu1 %v7777_v40  ;;  %v7763_v40 = vld [vmem:[#allocation2 + $0x20] sm:$0xff] }
 0x897   : > { %10968 = vmatpush1.bf16.msra.mxu0 %v16318_v38  ;;  %11296 = vmatpush1.bf16.msra.mxu1 %v16321_v39  ;;  %v16411_v38 = vld [vmem:[%s18163_s24 + $0x5e8] ss:$16 sps:$4 sm:$0xff]   ;;  %v16416_v39 = vld [vmem:[%s18163_s24 + $0x604] ss:$16 sps:$4 sm:$0xff]  }
 0x898   : > { %10969 = vmatprep.subr.bf16.mxu0 %v16326_v41  ;;  %11297 = vmatprep.subr.bf16.mxu1 %v16329_v42  ;;  %v16419_v41 = vld [vmem:[%s18163_s24 + $0x60c] ss:$16 sps:$4 sm:$0xff]   ;;  %v16414_v42 = vld [vmem:[%s18163_s24 + $0x600] ss:$16 sps:$4 sm:$0xff]  }
 0x899   : > { %10999 = vmatprep.mubr.bf16.mxu0 %v7780_v44  ;;  %11327 = vmatprep.mubr.bf16.mxu1 %v7780_v44  ;;  %v7779_v44 = vpack.c.bf16 %v7763_v40, %v7763_v40  ;;  %v16509_v40 = vld [vmem:[%s18163_s24 + $0x7ec] ss:$16 sps:$4 sm:$0xff]  }
 0x89b   : > { %10970 = vmatpush1.bf16.msra.mxu0 %v16324_v45  ;;  %11298 = vmatpush1.bf16.msra.mxu1 %v16327_v46  ;;  %v7766_v45 = vld [vmem:[#allocation2 + $0x38] sm:$0xff] }
 0x89c   : > { %10971 = vmatprep.subr.bf16.mxu0 %v16332_v47  ;;  %11299 = vmatprep.subr.bf16.mxu1 %v16335_v48  ;;  %v16422_v46 = vld [vmem:[%s18163_s24 + $0x624] ss:$16 sps:$4 sm:$0xff]   ;;  %v16425_v47 = vld [vmem:[%s18163_s24 + $0x62c] ss:$16 sps:$4 sm:$0xff]   ;;  %v7782_v48 = vpack.c.bf16 %v7766_v45, %v7766_v45 }
 0x89d   : > { %v16515_v45 = vld [vmem:[%s18163_s24 + $0x80c] ss:$16 sps:$4 sm:$0xff]  }
 0x89f   : > { %10972 = vmatpush1.bf16.msra.mxu0 %v16330_v49  ;;  %11300 = vmatpush1.bf16.msra.mxu1 %v16333_v50  ;;  %v16420_v49 = vld [vmem:[%s18163_s24 + $0x620] ss:$16 sps:$4 sm:$0xff]   ;;  %v16423_v50 = vld [vmem:[%s18163_s24 + $0x628] ss:$16 sps:$4 sm:$0xff]  }
 0x8a0   : > { %10973 = vmatprep.subr.bf16.mxu0 %v16338_v51  ;;  %11301 = vmatprep.subr.bf16.mxu1 %v16341_v52  ;;  %v16428_v51 = vld [vmem:[%s18163_s24 + $0x644] ss:$16 sps:$4 sm:$0xff]   ;;  %v16431_v52 = vld [vmem:[%s18163_s24 + $0x64c] ss:$16 sps:$4 sm:$0xff]  }
 0x8a3   : > { %10974 = vmatpush1.bf16.msra.mxu0 %v16336_v53  ;;  %11302 = vmatpush1.bf16.msra.mxu1 %v16339_v54  ;;  %v16426_v53 = vld [vmem:[%s18163_s24 + $0x640] ss:$16 sps:$4 sm:$0xff]   ;;  %v16429_v54 = vld [vmem:[%s18163_s24 + $0x648] ss:$16 sps:$4 sm:$0xff]  }
 0x8a4   : > { %10975 = vmatprep.subr.bf16.mxu0 %v16344_v55  ;;  %11303 = vmatprep.subr.bf16.mxu1 %v16347_v56  ;;  %v16434_v55 = vld [vmem:[%s18163_s24 + $0x664] ss:$16 sps:$4 sm:$0xff]   ;;  %v16437_v56 = vld [vmem:[%s18163_s24 + $0x66c] ss:$16 sps:$4 sm:$0xff]  }
 0x8a7   : > { %10976 = vmatpush1.bf16.msra.mxu0 %v16342_v57  ;;  %11304 = vmatpush1.bf16.msra.mxu1 %v16345_v58  ;;  %v16432_v57 = vld [vmem:[%s18163_s24 + $0x660] ss:$16 sps:$4 sm:$0xff]   ;;  %v16435_v58 = vld [vmem:[%s18163_s24 + $0x668] ss:$16 sps:$4 sm:$0xff]  }
 0x8a8   : > { %10977 = vmatprep.subr.bf16.mxu0 %v16350_v59  ;;  %11305 = vmatprep.subr.bf16.mxu1 %v16353_v60  ;;  %v16440_v59 = vld [vmem:[%s18163_s24 + $0x684] ss:$16 sps:$4 sm:$0xff]   ;;  %v16443_v60 = vld [vmem:[%s18163_s24 + $0x68c] ss:$16 sps:$4 sm:$0xff]  }
 0x8ab   : > { %10978 = vmatpush1.bf16.msra.mxu0 %v16348_v61  ;;  %11306 = vmatpush1.bf16.msra.mxu1 %v16351_v62  ;;  %v16438_v61 = vld [vmem:[%s18163_s24 + $0x680] ss:$16 sps:$4 sm:$0xff]   ;;  %v16441_v62 = vld [vmem:[%s18163_s24 + $0x688] ss:$16 sps:$4 sm:$0xff]  }
 0x8ac   : > { %10979 = vmatprep.subr.bf16.mxu0 %v16356_v63  ;;  %11307 = vmatprep.subr.bf16.mxu1 %v16359_v0  ;;  %v16446_v63 = vld [vmem:[%s18163_s24 + $0x6a4] ss:$16 sps:$4 sm:$0xff]   ;;  %v16449_v0 = vld [vmem:[%s18163_s24 + $0x6ac] ss:$16 sps:$4 sm:$0xff]  }
 0x8af   : > { %10980 = vmatpush1.bf16.msra.mxu0 %v16354_v1  ;;  %11308 = vmatpush1.bf16.msra.mxu1 %v16357_v2  ;;  %v16444_v1 = vld [vmem:[%s18163_s24 + $0x6a0] ss:$16 sps:$4 sm:$0xff]   ;;  %v16447_v2 = vld [vmem:[%s18163_s24 + $0x6a8] ss:$16 sps:$4 sm:$0xff]  }
 0x8b0   : > { %10981 = vmatprep.subr.bf16.mxu0 %v16362_v3  ;;  %11309 = vmatprep.subr.bf16.mxu1 %v16365_v4  ;;  %v16452_v3 = vld [vmem:[%s18163_s24 + $0x6c4] ss:$16 sps:$4 sm:$0xff]   ;;  %v16455_v4 = vld [vmem:[%s18163_s24 + $0x6cc] ss:$16 sps:$4 sm:$0xff]  }
 0x8b3   : > { %10982 = vmatpush1.bf16.msra.mxu0 %v16360_v5  ;;  %11310 = vmatpush1.bf16.msra.mxu1 %v16363_v6  ;;  %v16450_v5 = vld [vmem:[%s18163_s24 + $0x6c0] ss:$16 sps:$4 sm:$0xff]   ;;  %v16453_v6 = vld [vmem:[%s18163_s24 + $0x6c8] ss:$16 sps:$4 sm:$0xff]  }
 0x8b4   : > { %10983 = vmatprep.subr.bf16.mxu0 %v16368_v7  ;;  %11311 = vmatprep.subr.bf16.mxu1 %v16371_v8  ;;  %v16458_v7 = vld [vmem:[%s18163_s24 + $0x6e4] ss:$16 sps:$4 sm:$0xff]   ;;  %v16461_v8 = vld [vmem:[%s18163_s24 + $0x6ec] ss:$16 sps:$4 sm:$0xff]  }
 0x8b7   : > { %10984 = vmatpush1.bf16.msra.mxu0 %v16366_v9  ;;  %11312 = vmatpush1.bf16.msra.mxu1 %v16369_v10  ;;  %v16456_v9 = vld [vmem:[%s18163_s24 + $0x6e0] ss:$16 sps:$4 sm:$0xff]   ;;  %v16459_v10 = vld [vmem:[%s18163_s24 + $0x6e8] ss:$16 sps:$4 sm:$0xff]  }
 0x8b8   : > { %10985 = vmatprep.subr.bf16.mxu0 %v16374_v11  ;;  %11313 = vmatprep.subr.bf16.mxu1 %v16377_v12  ;;  %v16464_v11 = vld [vmem:[%s18163_s24 + $0x704] ss:$16 sps:$4 sm:$0xff]   ;;  %v16467_v12 = vld [vmem:[%s18163_s24 + $0x70c] ss:$16 sps:$4 sm:$0xff]  }
 0x8bb   : > { %10986 = vmatpush1.bf16.msra.mxu0 %v16372_v13  ;;  %11314 = vmatpush1.bf16.msra.mxu1 %v16375_v14  ;;  %v16462_v13 = vld [vmem:[%s18163_s24 + $0x700] ss:$16 sps:$4 sm:$0xff]   ;;  %v16465_v14 = vld [vmem:[%s18163_s24 + $0x708] ss:$16 sps:$4 sm:$0xff]  }
 0x8bc   : > { %10987 = vmatprep.subr.bf16.mxu0 %v16380_v15  ;;  %11315 = vmatprep.subr.bf16.mxu1 %v16383_v16  ;;  %v16470_v15 = vld [vmem:[%s18163_s24 + $0x724] ss:$16 sps:$4 sm:$0xff]   ;;  %v16473_v16 = vld [vmem:[%s18163_s24 + $0x72c] ss:$16 sps:$4 sm:$0xff]  }
 0x8bf   : > { %10988 = vmatpush1.bf16.msra.mxu0 %v16378_v17  ;;  %11316 = vmatpush1.bf16.msra.mxu1 %v16381_v18  ;;  %v16468_v17 = vld [vmem:[%s18163_s24 + $0x720] ss:$16 sps:$4 sm:$0xff]   ;;  %v16471_v18 = vld [vmem:[%s18163_s24 + $0x728] ss:$16 sps:$4 sm:$0xff]  }
 0x8c0   : > { %10989 = vmatprep.subr.bf16.mxu0 %v16386_v19  ;;  %11317 = vmatprep.subr.bf16.mxu1 %v16389_v20  ;;  %v16476_v19 = vld [vmem:[%s18163_s24 + $0x744] ss:$16 sps:$4 sm:$0xff]   ;;  %v16479_v20 = vld [vmem:[%s18163_s24 + $0x74c] ss:$16 sps:$4 sm:$0xff]  }
 0x8c3   : > { %10990 = vmatpush1.bf16.msra.mxu0 %v16384_v21  ;;  %11318 = vmatpush1.bf16.msra.mxu1 %v16387_v22  ;;  %v16474_v21 = vld [vmem:[%s18163_s24 + $0x740] ss:$16 sps:$4 sm:$0xff]   ;;  %v16477_v22 = vld [vmem:[%s18163_s24 + $0x748] ss:$16 sps:$4 sm:$0xff]  }
 0x8c4   : > { %10991 = vmatprep.subr.bf16.mxu0 %v16392_v23  ;;  %11319 = vmatprep.subr.bf16.mxu1 %v16395_v24  ;;  %v16482_v23 = vld [vmem:[%s18163_s24 + $0x764] ss:$16 sps:$4 sm:$0xff]   ;;  %v16485_v24 = vld [vmem:[%s18163_s24 + $0x76c] ss:$16 sps:$4 sm:$0xff]  }
 0x8c7   : > { %10992 = vmatpush1.bf16.msra.mxu0 %v16390_v25  ;;  %11320 = vmatpush1.bf16.msra.mxu1 %v16393_v26  ;;  %v16480_v25 = vld [vmem:[%s18163_s24 + $0x760] ss:$16 sps:$4 sm:$0xff]   ;;  %v16483_v26 = vld [vmem:[%s18163_s24 + $0x768] ss:$16 sps:$4 sm:$0xff]  }
 0x8c8   : > { %10993 = vmatprep.subr.bf16.mxu0 %v16398_v27  ;;  %11321 = vmatprep.subr.bf16.mxu1 %v16401_v28  ;;  %v16488_v27 = vld [vmem:[%s18163_s24 + $0x784] ss:$16 sps:$4 sm:$0xff]   ;;  %v16491_v28 = vld [vmem:[%s18163_s24 + $0x78c] ss:$16 sps:$4 sm:$0xff]  }
 0x8cb   : > { %10994 = vmatpush1.bf16.msra.mxu0 %v16396_v29  ;;  %11322 = vmatpush1.bf16.msra.mxu1 %v16399_v30  ;;  %v16486_v29 = vld [vmem:[%s18163_s24 + $0x780] ss:$16 sps:$4 sm:$0xff]   ;;  %v16489_v30 = vld [vmem:[%s18163_s24 + $0x788] ss:$16 sps:$4 sm:$0xff]  }
 0x8cc   : > { %10995 = vmatprep.subr.bf16.mxu0 %v16404_v31  ;;  %11323 = vmatprep.subr.bf16.mxu1 %v16407_v32  ;;  %v16494_v31 = vld [vmem:[%s18163_s24 + $0x7a4] ss:$16 sps:$4 sm:$0xff]   ;;  %v16497_v32 = vld [vmem:[%s18163_s24 + $0x7ac] ss:$16 sps:$4 sm:$0xff]  }
 0x8cf   : > { %10996 = vmatpush1.bf16.msra.mxu0 %v16402_v33  ;;  %11324 = vmatpush1.bf16.msra.mxu1 %v16405_v34  ;;  %v16492_v33 = vld [vmem:[%s18163_s24 + $0x7a0] ss:$16 sps:$4 sm:$0xff]   ;;  %v16495_v34 = vld [vmem:[%s18163_s24 + $0x7a8] ss:$16 sps:$4 sm:$0xff]  }
 0x8d0   : > { %10997 = vmatprep.subr.bf16.mxu0 %v16410_v35  ;;  %11325 = vmatprep.subr.bf16.mxu1 %v16413_v36  ;;  %v16500_v35 = vld [vmem:[%s18163_s24 + $0x7c4] ss:$16 sps:$4 sm:$0xff]   ;;  %v16503_v36 = vld [vmem:[%s18163_s24 + $0x7cc] ss:$16 sps:$4 sm:$0xff]  }
 0x8d3   : > { %10998 = vmatpush1.bf16.msra.mxu0 %v16408_v37  ;;  %11326 = vmatpush1.bf16.msra.mxu1 %v16411_v38  ;;  %v16498_v37 = vld [vmem:[%s18163_s24 + $0x7c0] ss:$16 sps:$4 sm:$0xff]   ;;  %v16501_v38 = vld [vmem:[%s18163_s24 + $0x7c8] ss:$16 sps:$4 sm:$0xff]  }
 0x8d4   : > { %11008 = vmatprep.subr.bf16.mxu0 %v16416_v39  ;;  %11336 = vmatprep.subr.bf16.mxu1 %v16419_v41  ;;  %v16506_v39 = vld [vmem:[%s18163_s24 + $0x7e4] ss:$16 sps:$4 sm:$0xff]   ;;  %v16504_v41 = vld [vmem:[%s18163_s24 + $0x7e0] ss:$16 sps:$4 sm:$0xff]  }
 0x8d6   : > { %11000 = vmatmul.mubr.bf16.vlgmr.msra.gmra.mrb[0].mxu0 %v7779_v44  ;;  %11328 = vmatmul.mubr.bf16.vlgmr.msra.gmra.mrb[0].mxu1 %v7779_v44  ;;  %v16512_v44 = vld [vmem:[%s18163_s24 + $0x804] ss:$16 sps:$4 sm:$0xff]  }
 0x8d7   : > { %11009 = vmatpush1.bf16.msra.mxu0 %v16414_v42  ;;  %11337 = vmatpush1.bf16.msra.mxu1 %v16417_v43  ;;  %v16507_v42 = vld [vmem:[%s18163_s24 + $0x7e8] ss:$16 sps:$4 sm:$0xff]  }
 0x8d8   : > { %11010 = vmatprep.subr.bf16.mxu0 %v16422_v46  ;;  %11338 = vmatprep.subr.bf16.mxu1 %v16425_v47  ;;  %v7765_v43 = vld [vmem:[#allocation2 + $0x30] sm:$0xff]  ;;  %v7768_v47 = vld [vmem:[#allocation2 + $0x48] sm:$0xff] }
 0x8d9   : > { %11040 = vmatprep.mubr.bf16.mxu0 %v7782_v48  ;;  %11368 = vmatprep.mubr.bf16.mxu1 %v7782_v48  ;;  %v7781_v46 = vpack.c.bf16 %v7765_v43, %v7765_v43  ;;  %v16510_v48 = vld [vmem:[%s18163_s24 + $0x800] ss:$16 sps:$4 sm:$0xff]   ;;  %v16602_v43 = vld [vmem:[%s18163_s24 + $0x9e4] ss:$16 sps:$4 sm:$0xff]  }
 0x8db   : > { %11011 = vmatpush1.bf16.msra.mxu0 %v16420_v49  ;;  %11339 = vmatpush1.bf16.msra.mxu1 %v16423_v50  ;;  %v16513_v49 = vld [vmem:[%s18163_s24 + $0x808] ss:$16 sps:$4 sm:$0xff]   ;;  %v16518_v50 = vld [vmem:[%s18163_s24 + $0x824] ss:$16 sps:$4 sm:$0xff]  }
 0x8dc   : > { %11012 = vmatprep.subr.bf16.mxu0 %v16428_v51  ;;  %11340 = vmatprep.subr.bf16.mxu1 %v16431_v52  ;;  %v16521_v51 = vld [vmem:[%s18163_s24 + $0x82c] ss:$16 sps:$4 sm:$0xff]   ;;  %v7784_v52 = vpack.c.bf16 %v7768_v47, %v7768_v47  ;;  %v16608_v47 = vld [vmem:[%s18163_s24 + $0xa04] ss:$16 sps:$4 sm:$0xff]  }
 0x8df   : > { %11013 = vmatpush1.bf16.msra.mxu0 %v16426_v53  ;;  %11341 = vmatpush1.bf16.msra.mxu1 %v16429_v54  ;;  %v16516_v53 = vld [vmem:[%s18163_s24 + $0x820] ss:$16 sps:$4 sm:$0xff]   ;;  %v16519_v54 = vld [vmem:[%s18163_s24 + $0x828] ss:$16 sps:$4 sm:$0xff]  }
 0x8e0   : > { %11014 = vmatprep.subr.bf16.mxu0 %v16434_v55  ;;  %11342 = vmatprep.subr.bf16.mxu1 %v16437_v56  ;;  %v16524_v55 = vld [vmem:[%s18163_s24 + $0x844] ss:$16 sps:$4 sm:$0xff]   ;;  %v16527_v56 = vld [vmem:[%s18163_s24 + $0x84c] ss:$16 sps:$4 sm:$0xff]  }
 0x8e3   : > { %11015 = vmatpush1.bf16.msra.mxu0 %v16432_v57  ;;  %11343 = vmatpush1.bf16.msra.mxu1 %v16435_v58  ;;  %v16522_v57 = vld [vmem:[%s18163_s24 + $0x840] ss:$16 sps:$4 sm:$0xff]   ;;  %v16525_v58 = vld [vmem:[%s18163_s24 + $0x848] ss:$16 sps:$4 sm:$0xff]  }
 0x8e4   : > { %11016 = vmatprep.subr.bf16.mxu0 %v16440_v59  ;;  %11344 = vmatprep.subr.bf16.mxu1 %v16443_v60  ;;  %v16530_v59 = vld [vmem:[%s18163_s24 + $0x864] ss:$16 sps:$4 sm:$0xff]   ;;  %v16533_v60 = vld [vmem:[%s18163_s24 + $0x86c] ss:$16 sps:$4 sm:$0xff]  }
 0x8e7   : > { %11017 = vmatpush1.bf16.msra.mxu0 %v16438_v61  ;;  %11345 = vmatpush1.bf16.msra.mxu1 %v16441_v62  ;;  %v16528_v61 = vld [vmem:[%s18163_s24 + $0x860] ss:$16 sps:$4 sm:$0xff]   ;;  %v16531_v62 = vld [vmem:[%s18163_s24 + $0x868] ss:$16 sps:$4 sm:$0xff]  }
 0x8e8   : > { %11018 = vmatprep.subr.bf16.mxu0 %v16446_v63  ;;  %11346 = vmatprep.subr.bf16.mxu1 %v16449_v0  ;;  %v16536_v63 = vld [vmem:[%s18163_s24 + $0x884] ss:$16 sps:$4 sm:$0xff]   ;;  %v16539_v0 = vld [vmem:[%s18163_s24 + $0x88c] ss:$16 sps:$4 sm:$0xff]  }
 0x8eb   : > { %11019 = vmatpush1.bf16.msra.mxu0 %v16444_v1  ;;  %11347 = vmatpush1.bf16.msra.mxu1 %v16447_v2  ;;  %v16534_v1 = vld [vmem:[%s18163_s24 + $0x880] ss:$16 sps:$4 sm:$0xff]   ;;  %v16537_v2 = vld [vmem:[%s18163_s24 + $0x888] ss:$16 sps:$4 sm:$0xff]  }
 0x8ec   : > { %11020 = vmatprep.subr.bf16.mxu0 %v16452_v3  ;;  %11348 = vmatprep.subr.bf16.mxu1 %v16455_v4  ;;  %v16542_v3 = vld [vmem:[%s18163_s24 + $0x8a4] ss:$16 sps:$4 sm:$0xff]   ;;  %v16545_v4 = vld [vmem:[%s18163_s24 + $0x8ac] ss:$16 sps:$4 sm:$0xff]  }
 0x8ef   : > { %11021 = vmatpush1.bf16.msra.mxu0 %v16450_v5  ;;  %11349 = vmatpush1.bf16.msra.mxu1 %v16453_v6  ;;  %v16540_v5 = vld [vmem:[%s18163_s24 + $0x8a0] ss:$16 sps:$4 sm:$0xff]   ;;  %v16543_v6 = vld [vmem:[%s18163_s24 + $0x8a8] ss:$16 sps:$4 sm:$0xff]  }
 0x8f0   : > { %11022 = vmatprep.subr.bf16.mxu0 %v16458_v7  ;;  %11350 = vmatprep.subr.bf16.mxu1 %v16461_v8  ;;  %v16548_v7 = vld [vmem:[%s18163_s24 + $0x8c4] ss:$16 sps:$4 sm:$0xff]   ;;  %v16551_v8 = vld [vmem:[%s18163_s24 + $0x8cc] ss:$16 sps:$4 sm:$0xff]  }
 0x8f3   : > { %11023 = vmatpush1.bf16.msra.mxu0 %v16456_v9  ;;  %11351 = vmatpush1.bf16.msra.mxu1 %v16459_v10  ;;  %v16546_v9 = vld [vmem:[%s18163_s24 + $0x8c0] ss:$16 sps:$4 sm:$0xff]   ;;  %v16549_v10 = vld [vmem:[%s18163_s24 + $0x8c8] ss:$16 sps:$4 sm:$0xff]  }
 0x8f4   : > { %11024 = vmatprep.subr.bf16.mxu0 %v16464_v11  ;;  %11352 = vmatprep.subr.bf16.mxu1 %v16467_v12  ;;  %v16554_v11 = vld [vmem:[%s18163_s24 + $0x8e4] ss:$16 sps:$4 sm:$0xff]   ;;  %v16557_v12 = vld [vmem:[%s18163_s24 + $0x8ec] ss:$16 sps:$4 sm:$0xff]  }
 0x8f7   : > { %11025 = vmatpush1.bf16.msra.mxu0 %v16462_v13  ;;  %11353 = vmatpush1.bf16.msra.mxu1 %v16465_v14  ;;  %v16552_v13 = vld [vmem:[%s18163_s24 + $0x8e0] ss:$16 sps:$4 sm:$0xff]   ;;  %v16555_v14 = vld [vmem:[%s18163_s24 + $0x8e8] ss:$16 sps:$4 sm:$0xff]  }
 0x8f8   : > { %11026 = vmatprep.subr.bf16.mxu0 %v16470_v15  ;;  %11354 = vmatprep.subr.bf16.mxu1 %v16473_v16  ;;  %v16560_v15 = vld [vmem:[%s18163_s24 + $0x904] ss:$16 sps:$4 sm:$0xff]   ;;  %v16563_v16 = vld [vmem:[%s18163_s24 + $0x90c] ss:$16 sps:$4 sm:$0xff]  }
 0x8fb   : > { %11027 = vmatpush1.bf16.msra.mxu0 %v16468_v17  ;;  %11355 = vmatpush1.bf16.msra.mxu1 %v16471_v18  ;;  %v16558_v17 = vld [vmem:[%s18163_s24 + $0x900] ss:$16 sps:$4 sm:$0xff]   ;;  %v16561_v18 = vld [vmem:[%s18163_s24 + $0x908] ss:$16 sps:$4 sm:$0xff]  }
 0x8fc   : > { %11028 = vmatprep.subr.bf16.mxu0 %v16476_v19  ;;  %11356 = vmatprep.subr.bf16.mxu1 %v16479_v20  ;;  %v16566_v19 = vld [vmem:[%s18163_s24 + $0x924] ss:$16 sps:$4 sm:$0xff]   ;;  %v16569_v20 = vld [vmem:[%s18163_s24 + $0x92c] ss:$16 sps:$4 sm:$0xff]  }
 0x8ff   : > { %11029 = vmatpush1.bf16.msra.mxu0 %v16474_v21  ;;  %11357 = vmatpush1.bf16.msra.mxu1 %v16477_v22  ;;  %v16564_v21 = vld [vmem:[%s18163_s24 + $0x920] ss:$16 sps:$4 sm:$0xff]   ;;  %v16567_v22 = vld [vmem:[%s18163_s24 + $0x928] ss:$16 sps:$4 sm:$0xff]  }
 0x900   : > { %11030 = vmatprep.subr.bf16.mxu0 %v16482_v23  ;;  %11358 = vmatprep.subr.bf16.mxu1 %v16485_v24  ;;  %v16572_v23 = vld [vmem:[%s18163_s24 + $0x944] ss:$16 sps:$4 sm:$0xff]   ;;  %v16575_v24 = vld [vmem:[%s18163_s24 + $0x94c] ss:$16 sps:$4 sm:$0xff]  }
 0x903   : > { %11031 = vmatpush1.bf16.msra.mxu0 %v16480_v25  ;;  %11359 = vmatpush1.bf16.msra.mxu1 %v16483_v26  ;;  %v16570_v25 = vld [vmem:[%s18163_s24 + $0x940] ss:$16 sps:$4 sm:$0xff]   ;;  %v16573_v26 = vld [vmem:[%s18163_s24 + $0x948] ss:$16 sps:$4 sm:$0xff]  }
 0x904   : > { %11032 = vmatprep.subr.bf16.mxu0 %v16488_v27  ;;  %11360 = vmatprep.subr.bf16.mxu1 %v16491_v28  ;;  %v16578_v27 = vld [vmem:[%s18163_s24 + $0x964] ss:$16 sps:$4 sm:$0xff]   ;;  %v16581_v28 = vld [vmem:[%s18163_s24 + $0x96c] ss:$16 sps:$4 sm:$0xff]  }
 0x907   : > { %11033 = vmatpush1.bf16.msra.mxu0 %v16486_v29  ;;  %11361 = vmatpush1.bf16.msra.mxu1 %v16489_v30  ;;  %v16576_v29 = vld [vmem:[%s18163_s24 + $0x960] ss:$16 sps:$4 sm:$0xff]   ;;  %v16579_v30 = vld [vmem:[%s18163_s24 + $0x968] ss:$16 sps:$4 sm:$0xff]  }
 0x908   : > { %11034 = vmatprep.subr.bf16.mxu0 %v16494_v31  ;;  %11362 = vmatprep.subr.bf16.mxu1 %v16497_v32  ;;  %v16584_v31 = vld [vmem:[%s18163_s24 + $0x984] ss:$16 sps:$4 sm:$0xff]   ;;  %v16587_v32 = vld [vmem:[%s18163_s24 + $0x98c] ss:$16 sps:$4 sm:$0xff]  }
 0x90b   : > { %11035 = vmatpush1.bf16.msra.mxu0 %v16492_v33  ;;  %11363 = vmatpush1.bf16.msra.mxu1 %v16495_v34  ;;  %v16582_v33 = vld [vmem:[%s18163_s24 + $0x980] ss:$16 sps:$4 sm:$0xff]   ;;  %v16585_v34 = vld [vmem:[%s18163_s24 + $0x988] ss:$16 sps:$4 sm:$0xff]  }
 0x90c   : > { %11036 = vmatprep.subr.bf16.mxu0 %v16500_v35  ;;  %11364 = vmatprep.subr.bf16.mxu1 %v16503_v36  ;;  %v16590_v35 = vld [vmem:[%s18163_s24 + $0x9a4] ss:$16 sps:$4 sm:$0xff]   ;;  %v16593_v36 = vld [vmem:[%s18163_s24 + $0x9ac] ss:$16 sps:$4 sm:$0xff]  }
 0x90f   : > { %11037 = vmatpush1.bf16.msra.mxu0 %v16498_v37  ;;  %11365 = vmatpush1.bf16.msra.mxu1 %v16501_v38  ;;  %v16588_v37 = vld [vmem:[%s18163_s24 + $0x9a0] ss:$16 sps:$4 sm:$0xff]   ;;  %v16591_v38 = vld [vmem:[%s18163_s24 + $0x9a8] ss:$16 sps:$4 sm:$0xff]  }
 0x910   : > { %11038 = vmatprep.subr.bf16.mxu0 %v16506_v39  ;;  %11366 = vmatprep.subr.bf16.mxu1 %v16509_v40  ;;  %v16596_v39 = vld [vmem:[%s18163_s24 + $0x9c4] ss:$16 sps:$4 sm:$0xff]   ;;  %v16599_v40 = vld [vmem:[%s18163_s24 + $0x9cc] ss:$16 sps:$4 sm:$0xff]  }
 0x913   : > { %11039 = vmatpush1.bf16.msra.mxu0 %v16504_v41  ;;  %11367 = vmatpush1.bf16.msra.mxu1 %v16507_v42  ;;  %v16594_v41 = vld [vmem:[%s18163_s24 + $0x9c0] ss:$16 sps:$4 sm:$0xff]   ;;  %v16597_v42 = vld [vmem:[%s18163_s24 + $0x9c8] ss:$16 sps:$4 sm:$0xff]  }
 0x914   : > { %11049 = vmatprep.subr.bf16.mxu0 %v16512_v44  ;;  %11377 = vmatprep.subr.bf16.mxu1 %v16515_v45  ;;  %v16605_v44 = vld [vmem:[%s18163_s24 + $0x9ec] ss:$16 sps:$4 sm:$0xff]   ;;  %v16600_v45 = vld [vmem:[%s18163_s24 + $0x9e0] ss:$16 sps:$4 sm:$0xff]  }
 0x916   : > { %11041 = vmatmul.mubr.bf16.vlgmr.msra.gmra.mrb[0].mxu0 %v7781_v46  ;;  %11369 = vmatmul.mubr.bf16.vlgmr.msra.gmra.mrb[0].mxu1 %v7781_v46  ;;  %v16603_v46 = vld [vmem:[%s18163_s24 + $0x9e8] ss:$16 sps:$4 sm:$0xff]  }
 0x917   : > { %11050 = vmatpush1.bf16.msra.mxu0 %v16510_v48  ;;  %11378 = vmatpush1.bf16.msra.mxu1 %v16513_v49  ;;  %v7767_v48 = vld [vmem:[#allocation2 + $0x40] sm:$0xff] }
 0x918   : > { %11051 = vmatprep.subr.bf16.mxu0 %v16518_v50  ;;  %11379 = vmatprep.subr.bf16.mxu1 %v16521_v51  ;;  %v16611_v49 = vld [vmem:[%s18163_s24 + $0xa0c] ss:$16 sps:$4 sm:$0xff]   ;;  %v7783_v51 = vpack.c.bf16 %v7767_v48, %v7767_v48 }
 0x919   : > { %11081 = vmatprep.mubr.bf16.mxu0 %v7784_v52  ;;  %11409 = vmatprep.mubr.bf16.mxu1 %v7784_v52  ;;  %v7770_v50 = vld [vmem:[#allocation2 + $0x58] sm:$0xff] }
 0x91a   : > { %v16606_v52 = vld [vmem:[%s18163_s24 + $0xa00] ss:$16 sps:$4 sm:$0xff]   ;;  %v16701_v48 = vld [vmem:[%s18163_s24 + $0xbec] ss:$16 sps:$4 sm:$0xff]  }
 0x91b   : > { %11052 = vmatpush1.bf16.msra.mxu0 %v16516_v53  ;;  %11380 = vmatpush1.bf16.msra.mxu1 %v16519_v54  ;;  %v16609_v53 = vld [vmem:[%s18163_s24 + $0xa08] ss:$16 sps:$4 sm:$0xff]   ;;  %v16614_v54 = vld [vmem:[%s18163_s24 + $0xa24] ss:$16 sps:$4 sm:$0xff]  }
 0x91c   : > { %11053 = vmatprep.subr.bf16.mxu0 %v16524_v55  ;;  %11381 = vmatprep.subr.bf16.mxu1 %v16527_v56  ;;  %v16617_v55 = vld [vmem:[%s18163_s24 + $0xa2c] ss:$16 sps:$4 sm:$0xff]   ;;  %v7786_v56 = vpack.c.bf16 %v7770_v50, %v7770_v50  ;;  %v16699_v50 = vld [vmem:[%s18163_s24 + $0xbe8] ss:$16 sps:$4 sm:$0xff]  }
 0x91f   : > { %11054 = vmatpush1.bf16.msra.mxu0 %v16522_v57  ;;  %11382 = vmatpush1.bf16.msra.mxu1 %v16525_v58  ;;  %v16612_v57 = vld [vmem:[%s18163_s24 + $0xa20] ss:$16 sps:$4 sm:$0xff]   ;;  %v16615_v58 = vld [vmem:[%s18163_s24 + $0xa28] ss:$16 sps:$4 sm:$0xff]  }
 0x920   : > { %11055 = vmatprep.subr.bf16.mxu0 %v16530_v59  ;;  %11383 = vmatprep.subr.bf16.mxu1 %v16533_v60  ;;  %v16620_v59 = vld [vmem:[%s18163_s24 + $0xa44] ss:$16 sps:$4 sm:$0xff]   ;;  %v16623_v60 = vld [vmem:[%s18163_s24 + $0xa4c] ss:$16 sps:$4 sm:$0xff]  }
 0x923   : > { %11056 = vmatpush1.bf16.msra.mxu0 %v16528_v61  ;;  %11384 = vmatpush1.bf16.msra.mxu1 %v16531_v62  ;;  %v16618_v61 = vld [vmem:[%s18163_s24 + $0xa40] ss:$16 sps:$4 sm:$0xff]   ;;  %v16621_v62 = vld [vmem:[%s18163_s24 + $0xa48] ss:$16 sps:$4 sm:$0xff]  }
 0x924   : > { %11057 = vmatprep.subr.bf16.mxu0 %v16536_v63  ;;  %11385 = vmatprep.subr.bf16.mxu1 %v16539_v0  ;;  %v16626_v63 = vld [vmem:[%s18163_s24 + $0xa64] ss:$16 sps:$4 sm:$0xff]   ;;  %v16629_v0 = vld [vmem:[%s18163_s24 + $0xa6c] ss:$16 sps:$4 sm:$0xff]  }
 0x927   : > { %11058 = vmatpush1.bf16.msra.mxu0 %v16534_v1  ;;  %11386 = vmatpush1.bf16.msra.mxu1 %v16537_v2  ;;  %v16624_v1 = vld [vmem:[%s18163_s24 + $0xa60] ss:$16 sps:$4 sm:$0xff]   ;;  %v16627_v2 = vld [vmem:[%s18163_s24 + $0xa68] ss:$16 sps:$4 sm:$0xff]  }
 0x928   : > { %11059 = vmatprep.subr.bf16.mxu0 %v16542_v3  ;;  %11387 = vmatprep.subr.bf16.mxu1 %v16545_v4  ;;  %v16632_v3 = vld [vmem:[%s18163_s24 + $0xa84] ss:$16 sps:$4 sm:$0xff]   ;;  %v16635_v4 = vld [vmem:[%s18163_s24 + $0xa8c] ss:$16 sps:$4 sm:$0xff]  }
 0x92b   : > { %11060 = vmatpush1.bf16.msra.mxu0 %v16540_v5  ;;  %11388 = vmatpush1.bf16.msra.mxu1 %v16543_v6  ;;  %v16630_v5 = vld [vmem:[%s18163_s24 + $0xa80] ss:$16 sps:$4 sm:$0xff]   ;;  %v16633_v6 = vld [vmem:[%s18163_s24 + $0xa88] ss:$16 sps:$4 sm:$0xff]  }
 0x92c   : > { %11061 = vmatprep.subr.bf16.mxu0 %v16548_v7  ;;  %11389 = vmatprep.subr.bf16.mxu1 %v16551_v8  ;;  %v16638_v7 = vld [vmem:[%s18163_s24 + $0xaa4] ss:$16 sps:$4 sm:$0xff]   ;;  %v16641_v8 = vld [vmem:[%s18163_s24 + $0xaac] ss:$16 sps:$4 sm:$0xff]  }
 0x92f   : > { %11062 = vmatpush1.bf16.msra.mxu0 %v16546_v9  ;;  %11390 = vmatpush1.bf16.msra.mxu1 %v16549_v10  ;;  %v16636_v9 = vld [vmem:[%s18163_s24 + $0xaa0] ss:$16 sps:$4 sm:$0xff]   ;;  %v16639_v10 = vld [vmem:[%s18163_s24 + $0xaa8] ss:$16 sps:$4 sm:$0xff]  }
 0x930   : > { %11063 = vmatprep.subr.bf16.mxu0 %v16554_v11  ;;  %11391 = vmatprep.subr.bf16.mxu1 %v16557_v12  ;;  %v16644_v11 = vld [vmem:[%s18163_s24 + $0xac4] ss:$16 sps:$4 sm:$0xff]   ;;  %v16647_v12 = vld [vmem:[%s18163_s24 + $0xacc] ss:$16 sps:$4 sm:$0xff]  }
 0x933   : > { %11064 = vmatpush1.bf16.msra.mxu0 %v16552_v13  ;;  %11392 = vmatpush1.bf16.msra.mxu1 %v16555_v14  ;;  %v16642_v13 = vld [vmem:[%s18163_s24 + $0xac0] ss:$16 sps:$4 sm:$0xff]   ;;  %v16645_v14 = vld [vmem:[%s18163_s24 + $0xac8] ss:$16 sps:$4 sm:$0xff]  }
 0x934   : > { %11065 = vmatprep.subr.bf16.mxu0 %v16560_v15  ;;  %11393 = vmatprep.subr.bf16.mxu1 %v16563_v16  ;;  %v16650_v15 = vld [vmem:[%s18163_s24 + $0xae4] ss:$16 sps:$4 sm:$0xff]   ;;  %v16653_v16 = vld [vmem:[%s18163_s24 + $0xaec] ss:$16 sps:$4 sm:$0xff]  }
 0x937   : > { %11066 = vmatpush1.bf16.msra.mxu0 %v16558_v17  ;;  %11394 = vmatpush1.bf16.msra.mxu1 %v16561_v18  ;;  %v16648_v17 = vld [vmem:[%s18163_s24 + $0xae0] ss:$16 sps:$4 sm:$0xff]   ;;  %v16651_v18 = vld [vmem:[%s18163_s24 + $0xae8] ss:$16 sps:$4 sm:$0xff]  }
 0x938   : > { %11067 = vmatprep.subr.bf16.mxu0 %v16566_v19  ;;  %11395 = vmatprep.subr.bf16.mxu1 %v16569_v20  ;;  %v16656_v19 = vld [vmem:[%s18163_s24 + $0xb04] ss:$16 sps:$4 sm:$0xff]   ;;  %v16659_v20 = vld [vmem:[%s18163_s24 + $0xb0c] ss:$16 sps:$4 sm:$0xff]  }
 0x93b   : > { %11068 = vmatpush1.bf16.msra.mxu0 %v16564_v21  ;;  %11396 = vmatpush1.bf16.msra.mxu1 %v16567_v22  ;;  %v16654_v21 = vld [vmem:[%s18163_s24 + $0xb00] ss:$16 sps:$4 sm:$0xff]   ;;  %v16657_v22 = vld [vmem:[%s18163_s24 + $0xb08] ss:$16 sps:$4 sm:$0xff]  }
 0x93c   : > { %11069 = vmatprep.subr.bf16.mxu0 %v16572_v23  ;;  %11397 = vmatprep.subr.bf16.mxu1 %v16575_v24  ;;  %v16662_v23 = vld [vmem:[%s18163_s24 + $0xb24] ss:$16 sps:$4 sm:$0xff]   ;;  %v16665_v24 = vld [vmem:[%s18163_s24 + $0xb2c] ss:$16 sps:$4 sm:$0xff]  }
 0x93f   : > { %11070 = vmatpush1.bf16.msra.mxu0 %v16570_v25  ;;  %11398 = vmatpush1.bf16.msra.mxu1 %v16573_v26  ;;  %v16660_v25 = vld [vmem:[%s18163_s24 + $0xb20] ss:$16 sps:$4 sm:$0xff]   ;;  %v16663_v26 = vld [vmem:[%s18163_s24 + $0xb28] ss:$16 sps:$4 sm:$0xff]  }
 0x940   : > { %11071 = vmatprep.subr.bf16.mxu0 %v16578_v27  ;;  %11399 = vmatprep.subr.bf16.mxu1 %v16581_v28  ;;  %v16668_v27 = vld [vmem:[%s18163_s24 + $0xb44] ss:$16 sps:$4 sm:$0xff]   ;;  %v16671_v28 = vld [vmem:[%s18163_s24 + $0xb4c] ss:$16 sps:$4 sm:$0xff]  }
 0x943   : > { %11072 = vmatpush1.bf16.msra.mxu0 %v16576_v29  ;;  %11400 = vmatpush1.bf16.msra.mxu1 %v16579_v30  ;;  %v16666_v29 = vld [vmem:[%s18163_s24 + $0xb40] ss:$16 sps:$4 sm:$0xff]   ;;  %v16669_v30 = vld [vmem:[%s18163_s24 + $0xb48] ss:$16 sps:$4 sm:$0xff]  }
 0x944   : > { %11073 = vmatprep.subr.bf16.mxu0 %v16584_v31  ;;  %11401 = vmatprep.subr.bf16.mxu1 %v16587_v32  ;;  %v16674_v31 = vld [vmem:[%s18163_s24 + $0xb64] ss:$16 sps:$4 sm:$0xff]   ;;  %v16677_v32 = vld [vmem:[%s18163_s24 + $0xb6c] ss:$16 sps:$4 sm:$0xff]  }
 0x947   : > { %11074 = vmatpush1.bf16.msra.mxu0 %v16582_v33  ;;  %11402 = vmatpush1.bf16.msra.mxu1 %v16585_v34  ;;  %v16672_v33 = vld [vmem:[%s18163_s24 + $0xb60] ss:$16 sps:$4 sm:$0xff]   ;;  %v16675_v34 = vld [vmem:[%s18163_s24 + $0xb68] ss:$16 sps:$4 sm:$0xff]  }
 0x948   : > { %11075 = vmatprep.subr.bf16.mxu0 %v16590_v35  ;;  %11403 = vmatprep.subr.bf16.mxu1 %v16593_v36  ;;  %v16680_v35 = vld [vmem:[%s18163_s24 + $0xb84] ss:$16 sps:$4 sm:$0xff]   ;;  %v16683_v36 = vld [vmem:[%s18163_s24 + $0xb8c] ss:$16 sps:$4 sm:$0xff]  }
 0x94b   : > { %11076 = vmatpush1.bf16.msra.mxu0 %v16588_v37  ;;  %11404 = vmatpush1.bf16.msra.mxu1 %v16591_v38  ;;  %v16678_v37 = vld [vmem:[%s18163_s24 + $0xb80] ss:$16 sps:$4 sm:$0xff]   ;;  %v16681_v38 = vld [vmem:[%s18163_s24 + $0xb88] ss:$16 sps:$4 sm:$0xff]  }
 0x94c   : > { %11077 = vmatprep.subr.bf16.mxu0 %v16596_v39  ;;  %11405 = vmatprep.subr.bf16.mxu1 %v16599_v40  ;;  %v16686_v39 = vld [vmem:[%s18163_s24 + $0xba4] ss:$16 sps:$4 sm:$0xff]   ;;  %v16689_v40 = vld [vmem:[%s18163_s24 + $0xbac] ss:$16 sps:$4 sm:$0xff]  }
 0x94f   : > { %11078 = vmatpush1.bf16.msra.mxu0 %v16594_v41  ;;  %11406 = vmatpush1.bf16.msra.mxu1 %v16597_v42  ;;  %v16684_v41 = vld [vmem:[%s18163_s24 + $0xba0] ss:$16 sps:$4 sm:$0xff]   ;;  %v16687_v42 = vld [vmem:[%s18163_s24 + $0xba8] ss:$16 sps:$4 sm:$0xff]  }
 0x950   : > { %11079 = vmatprep.subr.bf16.mxu0 %v16602_v43  ;;  %11407 = vmatprep.subr.bf16.mxu1 %v16605_v44  ;;  %v16692_v43 = vld [vmem:[%s18163_s24 + $0xbc4] ss:$16 sps:$4 sm:$0xff]   ;;  %v16695_v44 = vld [vmem:[%s18163_s24 + $0xbcc] ss:$16 sps:$4 sm:$0xff]  }
 0x953   : > { %11080 = vmatpush1.bf16.msra.mxu0 %v16600_v45  ;;  %11408 = vmatpush1.bf16.msra.mxu1 %v16603_v46  ;;  %v16690_v45 = vld [vmem:[%s18163_s24 + $0xbc0] ss:$16 sps:$4 sm:$0xff]   ;;  %v16693_v46 = vld [vmem:[%s18163_s24 + $0xbc8] ss:$16 sps:$4 sm:$0xff]  }
 0x954   : > { %11090 = vmatprep.subr.bf16.mxu0 %v16608_v47  ;;  %11418 = vmatprep.subr.bf16.mxu1 %v16611_v49  ;;  %v16698_v47 = vld [vmem:[%s18163_s24 + $0xbe4] ss:$16 sps:$4 sm:$0xff]   ;;  %v16696_v49 = vld [vmem:[%s18163_s24 + $0xbe0] ss:$16 sps:$4 sm:$0xff]  }
 0x956   : > { %11082 = vmatmul.mubr.bf16.vlgmr.msra.gmra.mrb[0].mxu0 %v7783_v51  ;;  %11410 = vmatmul.mubr.bf16.vlgmr.msra.gmra.mrb[0].mxu1 %v7783_v51  ;;  %v7769_v51 = vld [vmem:[#allocation2 + $0x50] sm:$0xff] }
 0x957   : > { %11091 = vmatpush1.bf16.msra.mxu0 %v16606_v52  ;;  %11419 = vmatpush1.bf16.msra.mxu1 %v16609_v53  ;;  %v16704_v52 = vld [vmem:[%s18163_s24 + $0xc04] ss:$16 sps:$4 sm:$0xff]   ;;  %v16707_v53 = vld [vmem:[%s18163_s24 + $0xc0c] ss:$16 sps:$4 sm:$0xff]  }
 0x958   : > { %11092 = vmatprep.subr.bf16.mxu0 %v16614_v54  ;;  %11420 = vmatprep.subr.bf16.mxu1 %v16617_v55  ;;  %v7785_v54 = vpack.c.bf16 %v7769_v51, %v7769_v51  ;;  %v7772_v55 = vld [vmem:[#allocation2 + $0x68] sm:$0xff] }
 0x959   : > { %11122 = vmatprep.mubr.bf16.mxu0 %v7786_v56  ;;  %11450 = vmatprep.mubr.bf16.mxu1 %v7786_v56  ;;  %v16702_v56 = vld [vmem:[%s18163_s24 + $0xc00] ss:$16 sps:$4 sm:$0xff]   ;;  %v16794_v51 = vld [vmem:[%s18163_s24 + $0xde4] ss:$16 sps:$4 sm:$0xff]  }
 0x95b   : > { %11093 = vmatpush1.bf16.msra.mxu0 %v16612_v57  ;;  %11421 = vmatpush1.bf16.msra.mxu1 %v16615_v58  ;;  %v16705_v57 = vld [vmem:[%s18163_s24 + $0xc08] ss:$16 sps:$4 sm:$0xff]   ;;  %v16710_v58 = vld [vmem:[%s18163_s24 + $0xc24] ss:$16 sps:$4 sm:$0xff]  }
 0x95c   : > { %11094 = vmatprep.subr.bf16.mxu0 %v16620_v59  ;;  %11422 = vmatprep.subr.bf16.mxu1 %v16623_v60  ;;  %v16713_v59 = vld [vmem:[%s18163_s24 + $0xc2c] ss:$16 sps:$4 sm:$0xff]   ;;  %v7788_v60 = vpack.c.bf16 %v7772_v55, %v7772_v55 }
 0x95d   : > { %v7771_v55 = vld [vmem:[#allocation2 + $0x60] sm:$0xff] }
 0x95f   : > { %11095 = vmatpush1.bf16.msra.mxu0 %v16618_v61  ;;  %11423 = vmatpush1.bf16.msra.mxu1 %v16621_v62  ;;  %v16708_v61 = vld [vmem:[%s18163_s24 + $0xc20] ss:$16 sps:$4 sm:$0xff]   ;;  %v16711_v62 = vld [vmem:[%s18163_s24 + $0xc28] ss:$16 sps:$4 sm:$0xff]  }
 0x960   : > { %11096 = vmatprep.subr.bf16.mxu0 %v16626_v63  ;;  %11424 = vmatprep.subr.bf16.mxu1 %v16629_v0  ;;  %v16716_v63 = vld [vmem:[%s18163_s24 + $0xc44] ss:$16 sps:$4 sm:$0xff]   ;;  %v16719_v0 = vld [vmem:[%s18163_s24 + $0xc4c] ss:$16 sps:$4 sm:$0xff]  }
 0x963   : > { %11097 = vmatpush1.bf16.msra.mxu0 %v16624_v1  ;;  %11425 = vmatpush1.bf16.msra.mxu1 %v16627_v2  ;;  %v16714_v1 = vld [vmem:[%s18163_s24 + $0xc40] ss:$16 sps:$4 sm:$0xff]   ;;  %v16717_v2 = vld [vmem:[%s18163_s24 + $0xc48] ss:$16 sps:$4 sm:$0xff]  }
 0x964   : > { %11098 = vmatprep.subr.bf16.mxu0 %v16632_v3  ;;  %11426 = vmatprep.subr.bf16.mxu1 %v16635_v4  ;;  %v16722_v3 = vld [vmem:[%s18163_s24 + $0xc64] ss:$16 sps:$4 sm:$0xff]   ;;  %v16725_v4 = vld [vmem:[%s18163_s24 + $0xc6c] ss:$16 sps:$4 sm:$0xff]  }
 0x967   : > { %11099 = vmatpush1.bf16.msra.mxu0 %v16630_v5  ;;  %11427 = vmatpush1.bf16.msra.mxu1 %v16633_v6  ;;  %v16720_v5 = vld [vmem:[%s18163_s24 + $0xc60] ss:$16 sps:$4 sm:$0xff]   ;;  %v16723_v6 = vld [vmem:[%s18163_s24 + $0xc68] ss:$16 sps:$4 sm:$0xff]  }
 0x968   : > { %11100 = vmatprep.subr.bf16.mxu0 %v16638_v7  ;;  %11428 = vmatprep.subr.bf16.mxu1 %v16641_v8  ;;  %v16728_v7 = vld [vmem:[%s18163_s24 + $0xc84] ss:$16 sps:$4 sm:$0xff]   ;;  %v16731_v8 = vld [vmem:[%s18163_s24 + $0xc8c] ss:$16 sps:$4 sm:$0xff]  }
 0x96b   : > { %11101 = vmatpush1.bf16.msra.mxu0 %v16636_v9  ;;  %11429 = vmatpush1.bf16.msra.mxu1 %v16639_v10  ;;  %v16726_v9 = vld [vmem:[%s18163_s24 + $0xc80] ss:$16 sps:$4 sm:$0xff]   ;;  %v16729_v10 = vld [vmem:[%s18163_s24 + $0xc88] ss:$16 sps:$4 sm:$0xff]  }
 0x96c   : > { %11102 = vmatprep.subr.bf16.mxu0 %v16644_v11  ;;  %11430 = vmatprep.subr.bf16.mxu1 %v16647_v12  ;;  %v16734_v11 = vld [vmem:[%s18163_s24 + $0xca4] ss:$16 sps:$4 sm:$0xff]   ;;  %v16737_v12 = vld [vmem:[%s18163_s24 + $0xcac] ss:$16 sps:$4 sm:$0xff]  }
 0x96f   : > { %11103 = vmatpush1.bf16.msra.mxu0 %v16642_v13  ;;  %11431 = vmatpush1.bf16.msra.mxu1 %v16645_v14  ;;  %v16732_v13 = vld [vmem:[%s18163_s24 + $0xca0] ss:$16 sps:$4 sm:$0xff]   ;;  %v16735_v14 = vld [vmem:[%s18163_s24 + $0xca8] ss:$16 sps:$4 sm:$0xff]  }
 0x970   : > { %11104 = vmatprep.subr.bf16.mxu0 %v16650_v15  ;;  %11432 = vmatprep.subr.bf16.mxu1 %v16653_v16  ;;  %v16740_v15 = vld [vmem:[%s18163_s24 + $0xcc4] ss:$16 sps:$4 sm:$0xff]   ;;  %v16743_v16 = vld [vmem:[%s18163_s24 + $0xccc] ss:$16 sps:$4 sm:$0xff]  }
 0x973   : > { %11105 = vmatpush1.bf16.msra.mxu0 %v16648_v17  ;;  %11433 = vmatpush1.bf16.msra.mxu1 %v16651_v18  ;;  %v16738_v17 = vld [vmem:[%s18163_s24 + $0xcc0] ss:$16 sps:$4 sm:$0xff]   ;;  %v16741_v18 = vld [vmem:[%s18163_s24 + $0xcc8] ss:$16 sps:$4 sm:$0xff]  }
 0x974   : > { %11106 = vmatprep.subr.bf16.mxu0 %v16656_v19  ;;  %11434 = vmatprep.subr.bf16.mxu1 %v16659_v20  ;;  %v16746_v19 = vld [vmem:[%s18163_s24 + $0xce4] ss:$16 sps:$4 sm:$0xff]   ;;  %v16749_v20 = vld [vmem:[%s18163_s24 + $0xcec] ss:$16 sps:$4 sm:$0xff]  }
 0x977   : > { %11107 = vmatpush1.bf16.msra.mxu0 %v16654_v21  ;;  %11435 = vmatpush1.bf16.msra.mxu1 %v16657_v22  ;;  %v16744_v21 = vld [vmem:[%s18163_s24 + $0xce0] ss:$16 sps:$4 sm:$0xff]   ;;  %v16747_v22 = vld [vmem:[%s18163_s24 + $0xce8] ss:$16 sps:$4 sm:$0xff]  }
 0x978   : > { %11108 = vmatprep.subr.bf16.mxu0 %v16662_v23  ;;  %11436 = vmatprep.subr.bf16.mxu1 %v16665_v24  ;;  %v16752_v23 = vld [vmem:[%s18163_s24 + $0xd04] ss:$16 sps:$4 sm:$0xff]   ;;  %v16755_v24 = vld [vmem:[%s18163_s24 + $0xd0c] ss:$16 sps:$4 sm:$0xff]  }
 0x97b   : > { %11109 = vmatpush1.bf16.msra.mxu0 %v16660_v25  ;;  %11437 = vmatpush1.bf16.msra.mxu1 %v16663_v26  ;;  %v16750_v25 = vld [vmem:[%s18163_s24 + $0xd00] ss:$16 sps:$4 sm:$0xff]   ;;  %v16753_v26 = vld [vmem:[%s18163_s24 + $0xd08] ss:$16 sps:$4 sm:$0xff]  }
 0x97c   : > { %11110 = vmatprep.subr.bf16.mxu0 %v16668_v27  ;;  %11438 = vmatprep.subr.bf16.mxu1 %v16671_v28  ;;  %v16758_v27 = vld [vmem:[%s18163_s24 + $0xd24] ss:$16 sps:$4 sm:$0xff]   ;;  %v16761_v28 = vld [vmem:[%s18163_s24 + $0xd2c] ss:$16 sps:$4 sm:$0xff]  }
 0x97f   : > { %11111 = vmatpush1.bf16.msra.mxu0 %v16666_v29  ;;  %11439 = vmatpush1.bf16.msra.mxu1 %v16669_v30  ;;  %v16756_v29 = vld [vmem:[%s18163_s24 + $0xd20] ss:$16 sps:$4 sm:$0xff]   ;;  %v16759_v30 = vld [vmem:[%s18163_s24 + $0xd28] ss:$16 sps:$4 sm:$0xff]  }
 0x980   : > { %11112 = vmatprep.subr.bf16.mxu0 %v16674_v31  ;;  %11440 = vmatprep.subr.bf16.mxu1 %v16677_v32  ;;  %v16764_v31 = vld [vmem:[%s18163_s24 + $0xd44] ss:$16 sps:$4 sm:$0xff]   ;;  %v16767_v32 = vld [vmem:[%s18163_s24 + $0xd4c] ss:$16 sps:$4 sm:$0xff]  }
 0x983   : > { %11113 = vmatpush1.bf16.msra.mxu0 %v16672_v33  ;;  %11441 = vmatpush1.bf16.msra.mxu1 %v16675_v34  ;;  %v16762_v33 = vld [vmem:[%s18163_s24 + $0xd40] ss:$16 sps:$4 sm:$0xff]   ;;  %v16765_v34 = vld [vmem:[%s18163_s24 + $0xd48] ss:$16 sps:$4 sm:$0xff]  }
 0x984   : > { %11114 = vmatprep.subr.bf16.mxu0 %v16680_v35  ;;  %11442 = vmatprep.subr.bf16.mxu1 %v16683_v36  ;;  %v16770_v35 = vld [vmem:[%s18163_s24 + $0xd64] ss:$16 sps:$4 sm:$0xff]   ;;  %v16773_v36 = vld [vmem:[%s18163_s24 + $0xd6c] ss:$16 sps:$4 sm:$0xff]  }
 0x987   : > { %11115 = vmatpush1.bf16.msra.mxu0 %v16678_v37  ;;  %11443 = vmatpush1.bf16.msra.mxu1 %v16681_v38  ;;  %v16768_v37 = vld [vmem:[%s18163_s24 + $0xd60] ss:$16 sps:$4 sm:$0xff]   ;;  %v16771_v38 = vld [vmem:[%s18163_s24 + $0xd68] ss:$16 sps:$4 sm:$0xff]  }
 0x988   : > { %11116 = vmatprep.subr.bf16.mxu0 %v16686_v39  ;;  %11444 = vmatprep.subr.bf16.mxu1 %v16689_v40  ;;  %v16776_v39 = vld [vmem:[%s18163_s24 + $0xd84] ss:$16 sps:$4 sm:$0xff]   ;;  %v16779_v40 = vld [vmem:[%s18163_s24 + $0xd8c] ss:$16 sps:$4 sm:$0xff]  }
 0x98b   : > { %11117 = vmatpush1.bf16.msra.mxu0 %v16684_v41  ;;  %11445 = vmatpush1.bf16.msra.mxu1 %v16687_v42  ;;  %v16774_v41 = vld [vmem:[%s18163_s24 + $0xd80] ss:$16 sps:$4 sm:$0xff]   ;;  %v16777_v42 = vld [vmem:[%s18163_s24 + $0xd88] ss:$16 sps:$4 sm:$0xff]  }
 0x98c   : > { %11118 = vmatprep.subr.bf16.mxu0 %v16692_v43  ;;  %11446 = vmatprep.subr.bf16.mxu1 %v16695_v44  ;;  %v16782_v43 = vld [vmem:[%s18163_s24 + $0xda4] ss:$16 sps:$4 sm:$0xff]   ;;  %v16785_v44 = vld [vmem:[%s18163_s24 + $0xdac] ss:$16 sps:$4 sm:$0xff]  }
 0x98f   : > { %11119 = vmatpush1.bf16.msra.mxu0 %v16690_v45  ;;  %11447 = vmatpush1.bf16.msra.mxu1 %v16693_v46  ;;  %v16780_v45 = vld [vmem:[%s18163_s24 + $0xda0] ss:$16 sps:$4 sm:$0xff]   ;;  %v16783_v46 = vld [vmem:[%s18163_s24 + $0xda8] ss:$16 sps:$4 sm:$0xff]  }
 0x990   : > { %11120 = vmatprep.subr.bf16.mxu0 %v16698_v47  ;;  %11448 = vmatprep.subr.bf16.mxu1 %v16701_v48  ;;  %v16788_v47 = vld [vmem:[%s18163_s24 + $0xdc4] ss:$16 sps:$4 sm:$0xff]   ;;  %v16791_v48 = vld [vmem:[%s18163_s24 + $0xdcc] ss:$16 sps:$4 sm:$0xff]  }
 0x993   : > { %11121 = vmatpush1.bf16.msra.mxu0 %v16696_v49  ;;  %11449 = vmatpush1.bf16.msra.mxu1 %v16699_v50  ;;  %v16786_v49 = vld [vmem:[%s18163_s24 + $0xdc0] ss:$16 sps:$4 sm:$0xff]   ;;  %v16789_v50 = vld [vmem:[%s18163_s24 + $0xdc8] ss:$16 sps:$4 sm:$0xff]  }
 0x994   : > { %11131 = vmatprep.subr.bf16.mxu0 %v16704_v52  ;;  %11459 = vmatprep.subr.bf16.mxu1 %v16707_v53  ;;  %v16797_v52 = vld [vmem:[%s18163_s24 + $0xdec] ss:$16 sps:$4 sm:$0xff]   ;;  %v16792_v53 = vld [vmem:[%s18163_s24 + $0xde0] ss:$16 sps:$4 sm:$0xff]  }
 0x996   : > { %11123 = vmatmul.mubr.bf16.vlgmr.msra.gmra.mrb[0].mxu0 %v7785_v54  ;;  %11451 = vmatmul.mubr.bf16.vlgmr.msra.gmra.mrb[0].mxu1 %v7785_v54  ;;  %v16795_v54 = vld [vmem:[%s18163_s24 + $0xde8] ss:$16 sps:$4 sm:$0xff]  }
 0x997   : > { %11132 = vmatpush1.bf16.msra.mxu0 %v16702_v56  ;;  %11460 = vmatpush1.bf16.msra.mxu1 %v16705_v57  ;;  %v16800_v56 = vld [vmem:[%s18163_s24 + $0xe04] ss:$16 sps:$4 sm:$0xff]   ;;  %v16803_v57 = vld [vmem:[%s18163_s24 + $0xe0c] ss:$16 sps:$4 sm:$0xff]  }
 0x998   : > { %11133 = vmatprep.subr.bf16.mxu0 %v16710_v58  ;;  %11461 = vmatprep.subr.bf16.mxu1 %v16713_v59  ;;  %v7787_v58 = vpack.c.bf16 %v7771_v55, %v7771_v55  ;;  %v7774_v59 = vld [vmem:[#allocation2 + $0x78] sm:$0xff] }
 0x999   : > { %11163 = vmatprep.mubr.bf16.mxu0 %v7788_v60  ;;  %11491 = vmatprep.mubr.bf16.mxu1 %v7788_v60  ;;  %v16798_v60 = vld [vmem:[%s18163_s24 + $0xe00] ss:$16 sps:$4 sm:$0xff]   ;;  %v16890_v55 = vld [vmem:[%s18163_s24 + $0xfe4] ss:$16 sps:$4 sm:$0xff]  }
 0x99b   : > { %11134 = vmatpush1.bf16.msra.mxu0 %v16708_v61  ;;  %11462 = vmatpush1.bf16.msra.mxu1 %v16711_v62  ;;  %v16801_v61 = vld [vmem:[%s18163_s24 + $0xe08] ss:$16 sps:$4 sm:$0xff]   ;;  %v16806_v62 = vld [vmem:[%s18163_s24 + $0xe24] ss:$16 sps:$4 sm:$0xff]  }
 0x99c   : > { %11135 = vmatprep.subr.bf16.mxu0 %v16716_v63  ;;  %11463 = vmatprep.subr.bf16.mxu1 %v16719_v0  ;;  %v16809_v63 = vld [vmem:[%s18163_s24 + $0xe2c] ss:$16 sps:$4 sm:$0xff]   ;;  %v7790_v0 = vpack.c.bf16 %v7774_v59, %v7774_v59 }
 0x99d   : > { %v7773_v59 = vld [vmem:[#allocation2 + $0x70] sm:$0xff] }
 0x99f   : > { %11136 = vmatpush1.bf16.msra.mxu0 %v16714_v1  ;;  %11464 = vmatpush1.bf16.msra.mxu1 %v16717_v2  ;;  %v16804_v1 = vld [vmem:[%s18163_s24 + $0xe20] ss:$16 sps:$4 sm:$0xff]   ;;  %v16807_v2 = vld [vmem:[%s18163_s24 + $0xe28] ss:$16 sps:$4 sm:$0xff]  }
 0x9a0   : > { %11137 = vmatprep.subr.bf16.mxu0 %v16722_v3  ;;  %11465 = vmatprep.subr.bf16.mxu1 %v16725_v4  ;;  %v16812_v3 = vld [vmem:[%s18163_s24 + $0xe44] ss:$16 sps:$4 sm:$0xff]   ;;  %v16815_v4 = vld [vmem:[%s18163_s24 + $0xe4c] ss:$16 sps:$4 sm:$0xff]  }
 0x9a3   : > { %11138 = vmatpush1.bf16.msra.mxu0 %v16720_v5  ;;  %11466 = vmatpush1.bf16.msra.mxu1 %v16723_v6  ;;  %v16810_v5 = vld [vmem:[%s18163_s24 + $0xe40] ss:$16 sps:$4 sm:$0xff]   ;;  %v16813_v6 = vld [vmem:[%s18163_s24 + $0xe48] ss:$16 sps:$4 sm:$0xff]  }
 0x9a4   : > { %11139 = vmatprep.subr.bf16.mxu0 %v16728_v7  ;;  %11467 = vmatprep.subr.bf16.mxu1 %v16731_v8  ;;  %v16818_v7 = vld [vmem:[%s18163_s24 + $0xe64] ss:$16 sps:$4 sm:$0xff]   ;;  %v16821_v8 = vld [vmem:[%s18163_s24 + $0xe6c] ss:$16 sps:$4 sm:$0xff]  }
 0x9a7   : > { %11140 = vmatpush1.bf16.msra.mxu0 %v16726_v9  ;;  %11468 = vmatpush1.bf16.msra.mxu1 %v16729_v10  ;;  %v16816_v9 = vld [vmem:[%s18163_s24 + $0xe60] ss:$16 sps:$4 sm:$0xff]   ;;  %v16819_v10 = vld [vmem:[%s18163_s24 + $0xe68] ss:$16 sps:$4 sm:$0xff]  }
 0x9a8   : > { %11141 = vmatprep.subr.bf16.mxu0 %v16734_v11  ;;  %11469 = vmatprep.subr.bf16.mxu1 %v16737_v12  ;;  %v16824_v11 = vld [vmem:[%s18163_s24 + $0xe84] ss:$16 sps:$4 sm:$0xff]   ;;  %v16827_v12 = vld [vmem:[%s18163_s24 + $0xe8c] ss:$16 sps:$4 sm:$0xff]  }
 0x9ab   : > { %11142 = vmatpush1.bf16.msra.mxu0 %v16732_v13  ;;  %11470 = vmatpush1.bf16.msra.mxu1 %v16735_v14  ;;  %v16822_v13 = vld [vmem:[%s18163_s24 + $0xe80] ss:$16 sps:$4 sm:$0xff]   ;;  %v16825_v14 = vld [vmem:[%s18163_s24 + $0xe88] ss:$16 sps:$4 sm:$0xff]  }
 0x9ac   : > { %11143 = vmatprep.subr.bf16.mxu0 %v16740_v15  ;;  %11471 = vmatprep.subr.bf16.mxu1 %v16743_v16  ;;  %v16830_v15 = vld [vmem:[%s18163_s24 + $0xea4] ss:$16 sps:$4 sm:$0xff]   ;;  %v16833_v16 = vld [vmem:[%s18163_s24 + $0xeac] ss:$16 sps:$4 sm:$0xff]  }
 0x9af   : > { %11144 = vmatpush1.bf16.msra.mxu0 %v16738_v17  ;;  %11472 = vmatpush1.bf16.msra.mxu1 %v16741_v18  ;;  %v16828_v17 = vld [vmem:[%s18163_s24 + $0xea0] ss:$16 sps:$4 sm:$0xff]   ;;  %v16831_v18 = vld [vmem:[%s18163_s24 + $0xea8] ss:$16 sps:$4 sm:$0xff]  }
 0x9b0   : > { %11145 = vmatprep.subr.bf16.mxu0 %v16746_v19  ;;  %11473 = vmatprep.subr.bf16.mxu1 %v16749_v20  ;;  %v16836_v19 = vld [vmem:[%s18163_s24 + $0xec4] ss:$16 sps:$4 sm:$0xff]   ;;  %v16839_v20 = vld [vmem:[%s18163_s24 + $0xecc] ss:$16 sps:$4 sm:$0xff]  }
 0x9b3   : > { %11146 = vmatpush1.bf16.msra.mxu0 %v16744_v21  ;;  %11474 = vmatpush1.bf16.msra.mxu1 %v16747_v22  ;;  %v16834_v21 = vld [vmem:[%s18163_s24 + $0xec0] ss:$16 sps:$4 sm:$0xff]   ;;  %v16837_v22 = vld [vmem:[%s18163_s24 + $0xec8] ss:$16 sps:$4 sm:$0xff]  }
 0x9b4   : > { %11147 = vmatprep.subr.bf16.mxu0 %v16752_v23  ;;  %11475 = vmatprep.subr.bf16.mxu1 %v16755_v24  ;;  %v16842_v23 = vld [vmem:[%s18163_s24 + $0xee4] ss:$16 sps:$4 sm:$0xff]   ;;  %v16845_v24 = vld [vmem:[%s18163_s24 + $0xeec] ss:$16 sps:$4 sm:$0xff]  }
 0x9b7   : > { %11148 = vmatpush1.bf16.msra.mxu0 %v16750_v25  ;;  %11476 = vmatpush1.bf16.msra.mxu1 %v16753_v26  ;;  %v16840_v25 = vld [vmem:[%s18163_s24 + $0xee0] ss:$16 sps:$4 sm:$0xff]   ;;  %v16843_v26 = vld [vmem:[%s18163_s24 + $0xee8] ss:$16 sps:$4 sm:$0xff]  }
 0x9b8   : > { %11149 = vmatprep.subr.bf16.mxu0 %v16758_v27  ;;  %11477 = vmatprep.subr.bf16.mxu1 %v16761_v28  ;;  %v16848_v27 = vld [vmem:[%s18163_s24 + $0xf04] ss:$16 sps:$4 sm:$0xff]   ;;  %v16851_v28 = vld [vmem:[%s18163_s24 + $0xf0c] ss:$16 sps:$4 sm:$0xff]  }
 0x9bb   : > { %11150 = vmatpush1.bf16.msra.mxu0 %v16756_v29  ;;  %11478 = vmatpush1.bf16.msra.mxu1 %v16759_v30  ;;  %v16846_v29 = vld [vmem:[%s18163_s24 + $0xf00] ss:$16 sps:$4 sm:$0xff]   ;;  %v16849_v30 = vld [vmem:[%s18163_s24 + $0xf08] ss:$16 sps:$4 sm:$0xff]  }
 0x9bc   : > { %11151 = vmatprep.subr.bf16.mxu0 %v16764_v31  ;;  %11479 = vmatprep.subr.bf16.mxu1 %v16767_v32  ;;  %v16854_v31 = vld [vmem:[%s18163_s24 + $0xf24] ss:$16 sps:$4 sm:$0xff]   ;;  %v16857_v32 = vld [vmem:[%s18163_s24 + $0xf2c] ss:$16 sps:$4 sm:$0xff]  }
 0x9bf   : > { %11152 = vmatpush1.bf16.msra.mxu0 %v16762_v33  ;;  %11480 = vmatpush1.bf16.msra.mxu1 %v16765_v34  ;;  %v16852_v33 = vld [vmem:[%s18163_s24 + $0xf20] ss:$16 sps:$4 sm:$0xff]   ;;  %v16855_v34 = vld [vmem:[%s18163_s24 + $0xf28] ss:$16 sps:$4 sm:$0xff]  }
 0x9c0   : > { %11153 = vmatprep.subr.bf16.mxu0 %v16770_v35  ;;  %11481 = vmatprep.subr.bf16.mxu1 %v16773_v36  ;;  %v16860_v35 = vld [vmem:[%s18163_s24 + $0xf44] ss:$16 sps:$4 sm:$0xff]   ;;  %v16863_v36 = vld [vmem:[%s18163_s24 + $0xf4c] ss:$16 sps:$4 sm:$0xff]  }
 0x9c3   : > { %11154 = vmatpush1.bf16.msra.mxu0 %v16768_v37  ;;  %11482 = vmatpush1.bf16.msra.mxu1 %v16771_v38  ;;  %v16858_v37 = vld [vmem:[%s18163_s24 + $0xf40] ss:$16 sps:$4 sm:$0xff]   ;;  %v16861_v38 = vld [vmem:[%s18163_s24 + $0xf48] ss:$16 sps:$4 sm:$0xff]  }
 0x9c4   : > { %11155 = vmatprep.subr.bf16.mxu0 %v16776_v39  ;;  %11483 = vmatprep.subr.bf16.mxu1 %v16779_v40  ;;  %v16866_v39 = vld [vmem:[%s18163_s24 + $0xf64] ss:$16 sps:$4 sm:$0xff]   ;;  %v16869_v40 = vld [vmem:[%s18163_s24 + $0xf6c] ss:$16 sps:$4 sm:$0xff]  }
 0x9c7   : > { %11156 = vmatpush1.bf16.msra.mxu0 %v16774_v41  ;;  %11484 = vmatpush1.bf16.msra.mxu1 %v16777_v42  ;;  %v16864_v41 = vld [vmem:[%s18163_s24 + $0xf60] ss:$16 sps:$4 sm:$0xff]   ;;  %v16867_v42 = vld [vmem:[%s18163_s24 + $0xf68] ss:$16 sps:$4 sm:$0xff]  }
 0x9c8   : > { %11157 = vmatprep.subr.bf16.mxu0 %v16782_v43  ;;  %11485 = vmatprep.subr.bf16.mxu1 %v16785_v44  ;;  %v16872_v43 = vld [vmem:[%s18163_s24 + $0xf84] ss:$16 sps:$4 sm:$0xff]   ;;  %v16875_v44 = vld [vmem:[%s18163_s24 + $0xf8c] ss:$16 sps:$4 sm:$0xff]  }
 0x9cb   : > { %11158 = vmatpush1.bf16.msra.mxu0 %v16780_v45  ;;  %11486 = vmatpush1.bf16.msra.mxu1 %v16783_v46  ;;  %v16870_v45 = vld [vmem:[%s18163_s24 + $0xf80] ss:$16 sps:$4 sm:$0xff]   ;;  %v16873_v46 = vld [vmem:[%s18163_s24 + $0xf88] ss:$16 sps:$4 sm:$0xff]  }
 0x9cc   : > { %11159 = vmatprep.subr.bf16.mxu0 %v16788_v47  ;;  %11487 = vmatprep.subr.bf16.mxu1 %v16791_v48  ;;  %v16878_v47 = vld [vmem:[%s18163_s24 + $0xfa4] ss:$16 sps:$4 sm:$0xff]   ;;  %v16881_v48 = vld [vmem:[%s18163_s24 + $0xfac] ss:$16 sps:$4 sm:$0xff]  }
 0x9cf   : > { %11160 = vmatpush1.bf16.msra.mxu0 %v16786_v49  ;;  %11488 = vmatpush1.bf16.msra.mxu1 %v16789_v50  ;;  %v16876_v49 = vld [vmem:[%s18163_s24 + $0xfa0] ss:$16 sps:$4 sm:$0xff]   ;;  %v16879_v50 = vld [vmem:[%s18163_s24 + $0xfa8] ss:$16 sps:$4 sm:$0xff]  }
 0x9d0   : > { %11161 = vmatprep.subr.bf16.mxu0 %v16794_v51  ;;  %11489 = vmatprep.subr.bf16.mxu1 %v16797_v52  ;;  %v16884_v51 = vld [vmem:[%s18163_s24 + $0xfc4] ss:$16 sps:$4 sm:$0xff]   ;;  %v16887_v52 = vld [vmem:[%s18163_s24 + $0xfcc] ss:$16 sps:$4 sm:$0xff]  }
 0x9d3   : > { %11162 = vmatpush1.bf16.msra.mxu0 %v16792_v53  ;;  %11490 = vmatpush1.bf16.msra.mxu1 %v16795_v54  ;;  %v16882_v53 = vld [vmem:[%s18163_s24 + $0xfc0] ss:$16 sps:$4 sm:$0xff]   ;;  %v16885_v54 = vld [vmem:[%s18163_s24 + $0xfc8] ss:$16 sps:$4 sm:$0xff]  }
 0x9d4   : > { %11172 = vmatprep.subr.bf16.mxu0 %v16800_v56  ;;  %11500 = vmatprep.subr.bf16.mxu1 %v16803_v57  ;;  %v16893_v56 = vld [vmem:[%s18163_s24 + $0xfec] ss:$16 sps:$4 sm:$0xff]   ;;  %v16888_v57 = vld [vmem:[%s18163_s24 + $0xfe0] ss:$16 sps:$4 sm:$0xff]  }
 0x9d6   : > { %11164 = vmatmul.mubr.bf16.vlgmr.msra.gmra.mrb[0].mxu0 %v7787_v58  ;;  %11492 = vmatmul.mubr.bf16.vlgmr.msra.gmra.mrb[0].mxu1 %v7787_v58  ;;  %v16891_v58 = vld [vmem:[%s18163_s24 + $0xfe8] ss:$16 sps:$4 sm:$0xff]   ;;  %s11574_s24 = scalar_lea.vmem [#allocation22], %s14165_s14 }
 0x9d7   : > { %11173 = vmatpush1.bf16.msra.mxu0 %v16798_v60  ;;  %11501 = vmatpush1.bf16.msra.mxu1 %v16801_v61  ;;  %v7789_v60 = vpack.c.bf16 %v7773_v59, %v7773_v59  ;;  %v8305_v61 = vlaneseq }
 0x9d8   : > { %11174 = vmatprep.subr.bf16.mxu0 %v16806_v62  ;;  %11502 = vmatprep.subr.bf16.mxu1 %v16809_v63 }
 0x9d9   : > { %11204 = vmatprep.mubr.bf16.mxu0 %v7790_v0  ;;  %11532 = vmatprep.mubr.bf16.mxu1 %v7790_v0  ;;  %v8306_v62 = vshrl.u32 %v8305_v61, 7 }
 0x9db   : > { %11175 = vmatpush1.bf16.msra.mxu0 %v16804_v1  ;;  %11503 = vmatpush1.bf16.msra.mxu1 %v16807_v2  ;;  %v8307_v63 = vsub.s32 0, %v8306_v62  ;;  %v8315_v0 = vsub.s32 2, %v8306_v62  ;;  %v8303_v1 = vld [vmem:[%s754_s15] sm:$0xf]  ;;  %v8311_v2 = vsub.s32 1, %v8306_v62 }
 0x9dc   : > { %11176 = vmatprep.subr.bf16.mxu0 %v16812_v3  ;;  %11504 = vmatprep.subr.bf16.mxu1 %v16815_v4  ;;  %v8319_v3 = vsub.s32 3, %v8306_v62 }
 0x9dd   : > { %v8308_v4 = vrot.slane %v8303_v1, %v8307_v63 }
 0x9df   : > { %11177 = vmatpush1.bf16.msra.mxu0 %v16810_v5  ;;  %11505 = vmatpush1.bf16.msra.mxu1 %v16813_v6  ;;  %v8316_v5 = vrot.slane %v8303_v1, %v8315_v0  ;;  %v8312_v6 = vrot.slane %v8303_v1, %v8311_v2 }
 0x9e0   : > { %11178 = vmatprep.subr.bf16.mxu0 %v16818_v7  ;;  %11506 = vmatprep.subr.bf16.mxu1 %v16821_v8  ;;  %v8320_v7 = vrot.slane %v8303_v1, %v8319_v3 }
 0x9e3   : > { %11179 = vmatpush1.bf16.msra.mxu0 %v16816_v9  ;;  %11507 = vmatpush1.bf16.msra.mxu1 %v16819_v10 }
 0x9e4   : > { %11180 = vmatprep.subr.bf16.mxu0 %v16824_v11  ;;  %11508 = vmatprep.subr.bf16.mxu1 %v16827_v12 }
 0x9e7   : > { %11181 = vmatpush1.bf16.msra.mxu0 %v16822_v13  ;;  %11509 = vmatpush1.bf16.msra.mxu1 %v16825_v14 }
 0x9e8   : > { %11182 = vmatprep.subr.bf16.mxu0 %v16830_v15  ;;  %11510 = vmatprep.subr.bf16.mxu1 %v16833_v16 }
 0x9eb   : > { %11183 = vmatpush1.bf16.msra.mxu0 %v16828_v17  ;;  %11511 = vmatpush1.bf16.msra.mxu1 %v16831_v18 }
 0x9ec   : > { %11184 = vmatprep.subr.bf16.mxu0 %v16836_v19  ;;  %11512 = vmatprep.subr.bf16.mxu1 %v16839_v20 }
 0x9ef   : > { %11185 = vmatpush1.bf16.msra.mxu0 %v16834_v21  ;;  %11513 = vmatpush1.bf16.msra.mxu1 %v16837_v22 }
 0x9f0   : > { %11186 = vmatprep.subr.bf16.mxu0 %v16842_v23  ;;  %11514 = vmatprep.subr.bf16.mxu1 %v16845_v24 }
 0x9f3   : > { %11187 = vmatpush1.bf16.msra.mxu0 %v16840_v25  ;;  %11515 = vmatpush1.bf16.msra.mxu1 %v16843_v26 }
 0x9f4   : > { %11188 = vmatprep.subr.bf16.mxu0 %v16848_v27  ;;  %11516 = vmatprep.subr.bf16.mxu1 %v16851_v28 }
 0x9f7   : > { %11189 = vmatpush1.bf16.msra.mxu0 %v16846_v29  ;;  %11517 = vmatpush1.bf16.msra.mxu1 %v16849_v30 }
 0x9f8   : > { %11190 = vmatprep.subr.bf16.mxu0 %v16854_v31  ;;  %11518 = vmatprep.subr.bf16.mxu1 %v16857_v32 }
 0x9fb   : > { %11191 = vmatpush1.bf16.msra.mxu0 %v16852_v33  ;;  %11519 = vmatpush1.bf16.msra.mxu1 %v16855_v34 }
 0x9fc   : > { %11192 = vmatprep.subr.bf16.mxu0 %v16860_v35  ;;  %11520 = vmatprep.subr.bf16.mxu1 %v16863_v36 }
 0x9ff   : > { %11193 = vmatpush1.bf16.msra.mxu0 %v16858_v37  ;;  %11521 = vmatpush1.bf16.msra.mxu1 %v16861_v38 }
 0xa00   : > { %11194 = vmatprep.subr.bf16.mxu0 %v16866_v39  ;;  %11522 = vmatprep.subr.bf16.mxu1 %v16869_v40 }
 0xa03   : > { %11195 = vmatpush1.bf16.msra.mxu0 %v16864_v41  ;;  %11523 = vmatpush1.bf16.msra.mxu1 %v16867_v42 }
 0xa04   : > { %11196 = vmatprep.subr.bf16.mxu0 %v16872_v43  ;;  %11524 = vmatprep.subr.bf16.mxu1 %v16875_v44 }
 0xa07   : > { %11197 = vmatpush1.bf16.msra.mxu0 %v16870_v45  ;;  %11525 = vmatpush1.bf16.msra.mxu1 %v16873_v46 }
 0xa08   : > { %11198 = vmatprep.subr.bf16.mxu0 %v16878_v47  ;;  %11526 = vmatprep.subr.bf16.mxu1 %v16881_v48 }
 0xa0b   : > { %11199 = vmatpush1.bf16.msra.mxu0 %v16876_v49  ;;  %11527 = vmatpush1.bf16.msra.mxu1 %v16879_v50 }
 0xa0c   : > { %11200 = vmatprep.subr.bf16.mxu0 %v16884_v51  ;;  %11528 = vmatprep.subr.bf16.mxu1 %v16887_v52 }
 0xa0f   : > { %11201 = vmatpush1.bf16.msra.mxu0 %v16882_v53  ;;  %11529 = vmatpush1.bf16.msra.mxu1 %v16885_v54 }
 0xa10   : > { %11202 = vmatprep.subr.bf16.mxu0 %v16890_v55  ;;  %11530 = vmatprep.subr.bf16.mxu1 %v16893_v56 }
 0xa13   : > { %11203 = vmatpush1.bf16.msra.mxu0 %v16888_v57  ;;  %11531 = vmatpush1.bf16.msra.mxu1 %v16891_v58 }
 0xa16   : > { %11205 = vmatmul.mubr.bf16.vlgmr.msra.gmra.mrb[0].mxu0 %v7789_v60  ;;  %11533 = vmatmul.mubr.bf16.vlgmr.msra.gmra.mrb[0].mxu1 %v7789_v60 }
 0xae9   : > { %v11206_v8 = vpop.f32.mrb[0].mxu0  ;;  %v11534_v9 = vpop.f32.mrb[0].mxu1 }
 0xaea   : > { %v14500_v10 = vadd.f32 %v11206_v8, %v8308_v4  ;;  %v14502_v11 = vadd.f32 %v11534_v9, %v8316_v5  ;;  %v11208_v12 = vpop.f32.mrb[1].mxu0  ;;  %v11536_v13 = vpop.f32.mrb[1].mxu1 }
 0xaeb   : > { %v14501_v14 = vadd.f32 %v11208_v12, %v8312_v6  ;;  %v14503_v15 = vadd.f32 %v11536_v13, %v8320_v7  ;;  %v11210_v16 = vpop.f32.mrb[2].mxu0  ;;  %v11538_v17 = vpop.f32.mrb[2].mxu1 }
 0xaec   : > { %v11545_v18 = vmul.f32 1.442695, %v14500_v10  ;;  %v11549_v19 = vmul.f32 1.442695, %v14502_v11  ;;  %v11211_v22 = vpop.f32.mrb[3].mxu0  ;;  %v11539_v23 = vpop.f32.mrb[3].mxu1 }
 0xaed   : > { %v11547_v20 = vmul.f32 1.442695, %v14501_v14  ;;  %v11551_v21 = vmul.f32 1.442695, %v14503_v15  ;;  %vm11541_vm0 = vcmp.gt.f32.partialorder %v14500_v10, 0.0  ;;  %vm11543_vm1 = vcmp.gt.f32.partialorder %v14502_v11, 0.0 }
 0xaee   : > { %16894 = vpow2.f32 %v11545_v18  ;;  %vm11542_vm2 = vcmp.gt.f32.partialorder %v14501_v14, 0.0  ;;  %vm11544_vm3 = vcmp.gt.f32.partialorder %v14503_v15, 0.0 }
 0xaef   : > { %16896 = vpow2.f32 %v11549_v19 }
 0xaf0   : > { %16898 = vpow2.f32 %v11547_v20 }
 0xaf1   : > { %16900 = vpow2.f32 %v11551_v21 }
 0xaf8   : > { %v16895_v24 = vpop.eup %16894 }
 0xaf9   : > { %v16897_v25 = vpop.eup %16896  ;;  %v14159_v26 = vadd.f32 -1.0, %v16895_v24 }
 0xafa   : > { %v16899_v27 = vpop.eup %16898  ;;  %v14161_v28 = vadd.f32 -1.0, %v16897_v25 }
 0xafb   : > { %v16901_v29 = vpop.eup %16900  ;;  %v11557_v30 = vmul.f32 1.6732632, %v14159_v26  ;;  %v14160_v31 = vadd.f32 -1.0, %v16899_v27 }
 0xafc   : > { %v11559_v32 = vmul.f32 1.6732632, %v14161_v28  ;;  %v14162_v33 = vadd.f32 -1.0, %v16901_v29 }
 0xafd   : > { %v11561_v34 = vsel %vm11541_vm0, %v14500_v10, %v11557_v30  ;;  %v11558_v35 = vmul.f32 1.6732632, %v14160_v31 }
 0xafe   : > { %v11565_v36 = vmul.f32 1.050701, %v11561_v34  ;;  %v11563_v37 = vsel %vm11543_vm1, %v14502_v11, %v11559_v32  ;;  %v11560_v38 = vmul.f32 1.6732632, %v14162_v33 }
 0xaff   : > { %v11567_v39 = vmul.f32 1.050701, %v11563_v37  ;;  %v11562_v40 = vsel %vm11542_vm2, %v14501_v14, %v11558_v35 }
 0xb00   : > { %11575 = vst [vmem:[%s11574_s24] sm:$0xff] %v11565_v36  ;;  %v11566_v41 = vmul.f32 1.050701, %v11562_v40  ;;  %v11564_v42 = vsel %vm11544_vm3, %v14503_v15, %v11560_v38 }
 0xb01   : > { %11577 = vst [vmem:[%s11574_s24 + $0x10] sm:$0xff] %v11567_v39  ;;  %v11568_v43 = vmul.f32 1.050701, %v11564_v42 }
 0xb02   : > { %11576 = vst [vmem:[%s11574_s24 + $0x8] sm:$0xff] %v11566_v41 }
 0xb03   : > { %11578 = vst [vmem:[%s11574_s24 + $0x18] sm:$0xff] %v11568_v43 }
 0xb04 PF: > { %p14166_p12 = scmp.ne.s32.totalorder %s17635_s18, 12 }
 0xb05   : > { %v16902_v44 = vld [vmem:[#allocation19 + $0x40] sm:$0xff] (!%p14166_p12)   ;;  %v16906_v48 = vld [vmem:[#allocation19 + $0x48] sm:$0xff] (!%p14166_p12)   ;;  %v16910_v52 = vld [vmem:[#allocation19 + $0x50] sm:$0xff] (!%p14166_p12)  }
 0xb06   : > { %11582 = sbr.rel (%p14166_p12) target bundleno = 3419 (0xd5b), region = 128  ;;  %v16903_v45 = vld [vmem:[#allocation19 + $0xc0] sm:$0xff] (!%p14166_p12)   ;;  %14316 = vmatprep.subr.bf16.mxu0 (!%p14166_p12), %v16902_v44  ;;  %v16907_v49 = vld [vmem:[#allocation19 + $0xc8] sm:$0xff] (!%p14166_p12)   ;;  %v16911_v53 = vld [vmem:[#allocation19 + $0xd0] sm:$0xff] (!%p14166_p12)  }
 0xb07   : > { %v16904_v46 = vld [vmem:[#allocation19] sm:$0xff] (!%p14166_p12)   ;;  %14338 = vmatprep.subr.bf16.mxu1 (!%p14166_p12), %v16903_v45  ;;  %v16908_v50 = vld [vmem:[#allocation19 + $0x8] sm:$0xff] (!%p14166_p12)   ;;  %v16912_v54 = vld [vmem:[#allocation19 + $0x10] sm:$0xff] (!%p14166_p12)  }
 0xb08   : > { %v16905_v47 = vld [vmem:[#allocation19 + $0x80] sm:$0xff] (!%p14166_p12)   ;;  %14317 = vmatpush3.bf16.msra.mxu0 (!%p14166_p12), %v16904_v46  ;;  %v16909_v51 = vld [vmem:[#allocation19 + $0x88] sm:$0xff] (!%p14166_p12)   ;;  %v16913_v55 = vld [vmem:[#allocation19 + $0x90] sm:$0xff] (!%p14166_p12)  }
 0xb09   : > { %14339 = vmatpush3.bf16.msra.mxu1 (!%p14166_p12), %v16905_v47  ;;  %14318 = vmatprep.subr.bf16.mxu0 (!%p14166_p12), %v16906_v48  ;;  %v16914_v56 = vld [vmem:[#allocation19 + $0x58] sm:$0xff] (!%p14166_p12)   ;;  %v16918_v60 = vld [vmem:[#allocation19 + $0x60] sm:$0xff] (!%p14166_p12)   ;;  %v16922_v0 = vld [vmem:[#allocation19 + $0x68] sm:$0xff] (!%p14166_p12)  }
 0xb0a   : > { %14340 = vmatprep.subr.bf16.mxu1 (!%p14166_p12), %v16907_v49  ;;  %v16915_v57 = vld [vmem:[#allocation19 + $0xd8] sm:$0xff] (!%p14166_p12)   ;;  %v16919_v61 = vld [vmem:[#allocation19 + $0xe0] sm:$0xff] (!%p14166_p12)   ;;  %v16923_v1 = vld [vmem:[#allocation19 + $0xe8] sm:$0xff] (!%p14166_p12)  }
 0xb0b   : > { %v16916_v58 = vld [vmem:[#allocation19 + $0x18] sm:$0xff] (!%p14166_p12)   ;;  %v16920_v62 = vld [vmem:[#allocation19 + $0x20] sm:$0xff] (!%p14166_p12)   ;;  %v16924_v2 = vld [vmem:[#allocation19 + $0x28] sm:$0xff] (!%p14166_p12)  }
 0xb0c   : > { %14319 = vmatpush3.bf16.msra.mxu0 (!%p14166_p12), %v16908_v50  ;;  %v16917_v59 = vld [vmem:[#allocation19 + $0x98] sm:$0xff] (!%p14166_p12)   ;;  %v16921_v63 = vld [vmem:[#allocation19 + $0xa0] sm:$0xff] (!%p14166_p12)   ;;  %v16925_v3 = vld [vmem:[#allocation19 + $0xa8] sm:$0xff] (!%p14166_p12)  }
 0xb0d   : > { %14341 = vmatpush3.bf16.msra.mxu1 %v16909_v51  ;;  %14320 = vmatprep.subr.bf16.mxu0 %v16910_v52  ;;  %v16926_v4 = vld [vmem:[#allocation19 + $0x70] sm:$0xff]   ;;  %v16930_v8 = vld [vmem:[#allocation19 + $0x78] sm:$0xff]   ;;  %v11583_v14 = vld [vmem:[#allocation22] sm:$0xff] }
 0xb0e   : > { %14342 = vmatprep.subr.bf16.mxu1 %v16911_v53  ;;  %v16927_v5 = vld [vmem:[#allocation19 + $0xf0] sm:$0xff]   ;;  %v16931_v9 = vld [vmem:[#allocation19 + $0xf8] sm:$0xff]   ;;  %v11591_v17 = vpack.c.bf16 %v11583_v14, %v11583_v14  ;;  %v16934_v20 = vld [vmem:[#allocation19 + $0x140] sm:$0xff]  }
 0xb0f   : > { %v16928_v6 = vld [vmem:[#allocation19 + $0x30] sm:$0xff]   ;;  %v16932_v10 = vld [vmem:[#allocation19 + $0x38] sm:$0xff]   ;;  %v16935_v21 = vld [vmem:[#allocation19 + $0x1c0] sm:$0xff]  }
 0xb10   : > { %14321 = vmatpush3.bf16.msra.mxu0 %v16912_v54  ;;  %v16929_v7 = vld [vmem:[#allocation19 + $0xb0] sm:$0xff]   ;;  %v16933_v11 = vld [vmem:[#allocation19 + $0xb8] sm:$0xff]   ;;  %v16936_v22 = vld [vmem:[#allocation19 + $0x100] sm:$0xff]  }
 0xb11   : > { %14343 = vmatpush3.bf16.msra.mxu1 %v16913_v55  ;;  %14322 = vmatprep.subr.bf16.mxu0 %v16914_v56  ;;  %v11584_v12 = vld [vmem:[#allocation22 + $0x8] sm:$0xff]  ;;  %v11586_v13 = vld [vmem:[#allocation22 + $0x18] sm:$0xff]  ;;  %v11585_v18 = vld [vmem:[#allocation22 + $0x10] sm:$0xff] }
 0xb12   : > { %14344 = vmatprep.subr.bf16.mxu1 %v16915_v57  ;;  %v11592_v15 = vpack.c.bf16 %v11584_v12, %v11584_v12  ;;  %v11594_v16 = vpack.c.bf16 %v11586_v13, %v11586_v13  ;;  %v11593_v19 = vpack.c.bf16 %v11585_v18, %v11585_v18  ;;  %v16937_v23 = vld [vmem:[#allocation19 + $0x180] sm:$0xff]   ;;  %v16938_v24 = vld [vmem:[#allocation19 + $0x148] sm:$0xff]   ;;  %v16942_v28 = vld [vmem:[#allocation19 + $0x150] sm:$0xff]  }
 0xb13   : > { %v16939_v25 = vld [vmem:[#allocation19 + $0x1c8] sm:$0xff]   ;;  %v16943_v29 = vld [vmem:[#allocation19 + $0x1d0] sm:$0xff]   ;;  %v16946_v32 = vld [vmem:[#allocation19 + $0x158] sm:$0xff]  }
 0xb14   : > { %14323 = vmatpush3.bf16.msra.mxu0 %v16916_v58  ;;  %12150 = vmatprep.mubr.bf16.mxu0 %v11592_v15  ;;  %v16940_v26 = vld [vmem:[#allocation19 + $0x108] sm:$0xff]   ;;  %v16944_v30 = vld [vmem:[#allocation19 + $0x110] sm:$0xff]   ;;  %v16947_v33 = vld [vmem:[#allocation19 + $0x1d8] sm:$0xff]  }
 0xb15   : > { %14345 = vmatpush3.bf16.msra.mxu1 %v16917_v59  ;;  %14324 = vmatprep.subr.bf16.mxu0 %v16918_v60  ;;  %v16941_v27 = vld [vmem:[#allocation19 + $0x188] sm:$0xff]   ;;  %v16945_v31 = vld [vmem:[#allocation19 + $0x190] sm:$0xff]   ;;  %v16948_v34 = vld [vmem:[#allocation19 + $0x118] sm:$0xff]  }
 0xb16   : > { %14346 = vmatprep.subr.bf16.mxu1 %v16919_v61  ;;  %12190 = vmatprep.mubr.bf16.mxu1 %v11594_v16  ;;  %v16949_v35 = vld [vmem:[#allocation19 + $0x198] sm:$0xff]   ;;  %v16950_v36 = vld [vmem:[#allocation19 + $0x160] sm:$0xff]   ;;  %v16954_v40 = vld [vmem:[#allocation19 + $0x168] sm:$0xff]  }
 0xb17   : > { %v16951_v37 = vld [vmem:[#allocation19 + $0x1e0] sm:$0xff]   ;;  %v16955_v41 = vld [vmem:[#allocation19 + $0x1e8] sm:$0xff]   ;;  %v16958_v44 = vld [vmem:[#allocation19 + $0x170] sm:$0xff]  }
 0xb18   : > { %14325 = vmatpush3.bf16.msra.mxu0 %v16920_v62  ;;  %v16952_v38 = vld [vmem:[#allocation19 + $0x120] sm:$0xff]   ;;  %v16956_v42 = vld [vmem:[#allocation19 + $0x128] sm:$0xff]   ;;  %v16959_v45 = vld [vmem:[#allocation19 + $0x1f0] sm:$0xff]  }
 0xb19   : > { %14347 = vmatpush3.bf16.msra.mxu1 %v16921_v63  ;;  %14326 = vmatprep.subr.bf16.mxu0 %v16922_v0  ;;  %v16953_v39 = vld [vmem:[#allocation19 + $0x1a0] sm:$0xff]   ;;  %v16957_v43 = vld [vmem:[#allocation19 + $0x1a8] sm:$0xff]   ;;  %v16960_v46 = vld [vmem:[#allocation19 + $0x130] sm:$0xff]  }
 0xb1a   : > { %14348 = vmatprep.subr.bf16.mxu1 %v16923_v1  ;;  %v16961_v47 = vld [vmem:[#allocation19 + $0x1b0] sm:$0xff]   ;;  %v16962_v48 = vld [vmem:[#allocation19 + $0x178] sm:$0xff]   ;;  %v11587_v56 = vld [vmem:[#allocation22 + $0x20] sm:$0xff] }
 0xb1b   : > { %v16963_v49 = vld [vmem:[#allocation19 + $0x1f8] sm:$0xff]   ;;  %v11588_v52 = vld [vmem:[#allocation22 + $0x28] sm:$0xff]  ;;  %v11595_v58 = vpack.c.bf16 %v11587_v56, %v11587_v56  ;;  %v14167_v62 = vld [vmem:[#allocation21] ss:$0 sm:$0xff] }
 0xb1c   : > { %14327 = vmatpush3.bf16.msra.mxu0 %v16924_v2  ;;  %v16964_v50 = vld [vmem:[#allocation19 + $0x138] sm:$0xff]   ;;  %v11596_v54 = vpack.c.bf16 %v11588_v52, %v11588_v52 }
 0xb1d   : > { %14349 = vmatpush3.bf16.msra.mxu1 %v16925_v3  ;;  %14328 = vmatprep.subr.bf16.mxu0 %v16926_v4  ;;  %v16965_v51 = vld [vmem:[#allocation19 + $0x1b8] sm:$0xff]  }
 0xb1e   : > { %14350 = vmatprep.subr.bf16.mxu1 %v16927_v5  ;;  %v11590_v53 = vld [vmem:[#allocation22 + $0x38] sm:$0xff]  ;;  %v11589_v57 = vld [vmem:[#allocation22 + $0x30] sm:$0xff] }
 0xb1f   : > { %v11598_v55 = vpack.c.bf16 %v11590_v53, %v11590_v53  ;;  %v11597_v59 = vpack.c.bf16 %v11589_v57, %v11589_v57 }
 0xb20   : > { %14329 = vmatpush3.bf16.msra.mxu0 %v16928_v6 }
 0xb21   : > { %14351 = vmatpush3.bf16.msra.mxu1 %v16929_v7  ;;  %14330 = vmatprep.subr.bf16.mxu0 %v16930_v8 }
 0xb22   : > { %14352 = vmatprep.subr.bf16.mxu1 %v16931_v9 }
 0xb24   : > { %14331 = vmatpush3.bf16.msra.mxu0 %v16932_v10 }
 0xb25   : > { %14353 = vmatpush3.bf16.msra.mxu1 %v16933_v11  ;;  %14360 = vmatprep.subr.bf16.mxu0 %v16934_v20 }
 0xb26   : > { %14382 = vmatprep.subr.bf16.mxu1 %v16935_v21 }
 0xb27   : > { %12151 = vmatmul.mubr.bf16.vlgmr.msra.gmra.mrb[0].mxu0 %v11591_v17 }
 0xb28   : > { %12191 = vmatmul.mubr.bf16.vlgmr.msra.gmra.mrb[0].mxu1 %v11593_v19  ;;  %14361 = vmatpush3.bf16.msra.mxu0 %v16936_v22 }
 0xb29   : > { %14383 = vmatpush3.bf16.msra.mxu1 %v16937_v23  ;;  %14362 = vmatprep.subr.bf16.mxu0 %v16938_v24 }
 0xb2a   : > { %14384 = vmatprep.subr.bf16.mxu1 %v16939_v25  ;;  %12230 = vmatprep.mubr.bf16.mxu0 %v11596_v54 }
 0xb2b   : > { %12270 = vmatprep.mubr.bf16.mxu1 %v11598_v55 }
 0xb2c   : > { %14363 = vmatpush3.bf16.msra.mxu0 %v16940_v26 }
 0xb2d   : > { %14385 = vmatpush3.bf16.msra.mxu1 %v16941_v27  ;;  %14364 = vmatprep.subr.bf16.mxu0 %v16942_v28 }
 0xb2e   : > { %14386 = vmatprep.subr.bf16.mxu1 %v16943_v29 }
 0xb30   : > { %14365 = vmatpush3.bf16.msra.mxu0 %v16944_v30 }
 0xb31   : > { %14387 = vmatpush3.bf16.msra.mxu1 %v16945_v31  ;;  %14366 = vmatprep.subr.bf16.mxu0 %v16946_v32 }
 0xb32   : > { %14388 = vmatprep.subr.bf16.mxu1 %v16947_v33 }
 0xb34   : > { %14367 = vmatpush3.bf16.msra.mxu0 %v16948_v34 }
 0xb35   : > { %14389 = vmatpush3.bf16.msra.mxu1 %v16949_v35  ;;  %14368 = vmatprep.subr.bf16.mxu0 %v16950_v36 }
 0xb36   : > { %14390 = vmatprep.subr.bf16.mxu1 %v16951_v37 }
 0xb38   : > { %14369 = vmatpush3.bf16.msra.mxu0 %v16952_v38 }
 0xb39   : > { %14391 = vmatpush3.bf16.msra.mxu1 %v16953_v39  ;;  %14370 = vmatprep.subr.bf16.mxu0 %v16954_v40 }
 0xb3a   : > { %14392 = vmatprep.subr.bf16.mxu1 %v16955_v41 }
 0xb3c   : > { %14371 = vmatpush3.bf16.msra.mxu0 %v16956_v42 }
 0xb3d   : > { %14393 = vmatpush3.bf16.msra.mxu1 %v16957_v43  ;;  %14372 = vmatprep.subr.bf16.mxu0 %v16958_v44 }
 0xb3e   : > { %14394 = vmatprep.subr.bf16.mxu1 %v16959_v45 }
 0xb40   : > { %14373 = vmatpush3.bf16.msra.mxu0 %v16960_v46 }
 0xb41   : > { %14395 = vmatpush3.bf16.msra.mxu1 %v16961_v47  ;;  %14374 = vmatprep.subr.bf16.mxu0 %v16962_v48 }
 0xb42   : > { %14396 = vmatprep.subr.bf16.mxu1 %v16963_v49 }
 0xb44   : > { %14375 = vmatpush3.bf16.msra.mxu0 %v16964_v50 }
 0xb45   : > { %14397 = vmatpush3.bf16.msra.mxu1 %v16965_v51 }
 0xb47   : > { %12231 = vmatmul.mubr.bf16.vlgmr.msra.gmra.mrb[4].mxu0 %v11595_v58 }
 0xb48   : > { %12271 = vmatmul.mubr.bf16.vlgmr.msra.gmra.mrb[4].mxu1 %v11597_v59 }
 0xbfa   : > { %v14332_v60 = vpop.f32.mrb[0].mxu0 }
 0xbfb   : > { %v14354_v61 = vpop.f32.mrb[0].mxu1  ;;  %v14333_v63 = vpop.f32.mrb[1].mxu0 }
 0xbfc   : > { %v14355_v0 = vpop.f32.mrb[1].mxu1  ;;  %v14334_v1 = vadd.f32 %v14333_v63, %v14332_v60  ;;  %v14335_v3 = vpop.f32.mrb[2].mxu0 }
 0xbfd   : > { %v14356_v2 = vadd.f32 %v14355_v0, %v14354_v61  ;;  %v14357_v4 = vpop.f32.mrb[2].mxu1  ;;  %v14336_v5 = vpop.f32.mrb[3].mxu0 }
 0xbfe   : > { %v14358_v6 = vpop.f32.mrb[3].mxu1  ;;  %v12153_v7 = vadd.f32 %v14334_v1, %v14167_v62 }
 0xc00   : > { %v12193_v8 = vadd.f32 %v14356_v2, %v12153_v7 }
 0xc1a   : > { %v14376_v9 = vpop.f32.mrb[4].mxu0 }
 0xc1b   : > { %v14398_v10 = vpop.f32.mrb[4].mxu1  ;;  %v14377_v11 = vpop.f32.mrb[5].mxu0 }
 0xc1c   : > { %v14378_v12 = vadd.f32 %v14377_v11, %v14376_v9  ;;  %v14399_v13 = vpop.f32.mrb[5].mxu1  ;;  %v14379_v14 = vpop.f32.mrb[6].mxu0 }
 0xc1d   : > { %v14400_v15 = vadd.f32 %v14399_v13, %v14398_v10  ;;  %v14401_v16 = vpop.f32.mrb[6].mxu1  ;;  %v14380_v17 = vpop.f32.mrb[7].mxu0 }
 0xc1e   : > { %v12233_v18 = vadd.f32 %v14378_v12, %v12193_v8  ;;  %v14402_v19 = vpop.f32.mrb[7].mxu1 }
 0xc20   : > { %v12273_v20 = vadd.f32 %v14400_v15, %v12233_v18 }
 0xc22   : > { %12278 = vmax.xlane.f32.xlu0 %v12273_v20 }
 0xcaf   : > { %v12279_v21 = vpop.xlane.xlu0 %12278 }
 0xcb0   : > { %v12280_v22 = vsub.f32 %v12273_v20, %v12279_v21 }
 0xcb2   : > { %v12281_v23 = vmul.f32 1.442695, %v12280_v22 }
 0xcb4   : > { %16966 = vpow2.f32 %v12281_v23 }
 0xcbe   : > { %v16967_v24 = vpop.eup %16966 }
 0xcbf   : > { %12283 = vadd.xlane.f32.xlu0 %v16967_v24 }
 0xd4c   : > { %v12284_v25 = vpop.xlane.xlu0 %12283 }
 0xd4d   : > { %16968 = vrcp.f32 %v12284_v25 }
 0xd57   : > { %v16969_v26 = vpop.eup %16968 }
 0xd58   : > { %v12286_v27 = vmul.f32 %v16969_v26, %v16967_v24 }
 0xd5a   : > { %12287 = vst [vmem:[#allocation23] sm:$0xff] %v12286_v27 }
 0xd5b PF: > { %p14644_p2 = scmp.eq.s32.totalorder %s17635_s18, 12  ;;  %s17502_s17 = smov [#allocation22]  }
 0xd5c   : > { %s12295_s15 = sshll.u32 %s17502_s17, 4  ;;  %s17503_s5 = smov [#allocation23]   ;;  %s12296_s15 = int_to_ptr.vmem [resolvable:$true] %s12295_s15 }
 0xd5d   : > { %s12306_s1 = sshll.u32 %s17503_s5, 4  ;;  %s17294_s25 = scalar_lea.vmem %s12296_s15, 1024  ;;  %s12307_s1 = int_to_ptr.vmem [resolvable:$true] %s12306_s1 }
 0xd5e   : > { %p17295_p7 = scmp.ne.s32.totalorder %s12296_s15, %s17294_s25  ;;  %p17301_p3 = scmp.lt.s32.totalorder %s12296_s15, %s12296_s15 }
 0xd5f   : > { %p17302_p10 = scmp.lt.s32.totalorder %s17294_s25, %s17294_s25 }
 0xd60   : > { %p17296_p1 = pnand %p17295_p7, %p14644_p2 }
 0xd61   : > { %p17303_p0 = por %p17302_p10, %p17301_p3 }
 0xd62   : > { %p17297_p5 = pneg %p17296_p1 }
 0xd64   : > { %p17304_p8 = pnand %p17303_p0, %p17297_p5 }
 0xd66   : > { %17307 = shalt.err (!%p17304_p8)
}
 0xd67   : > { %s19892_s2 = sld [smem:[#allocation59_spill]] }
 0xd6d   : > { %s17308_s20 = scalar_lea.hbm %s19892_s2, 1024 }
 0xd6e   : > { %p17309_p11 = scmp.ne.s32.totalorder %s19892_s2, %s17308_s20  ;;  %p17314_p13 = scmp.lt.u32.totalorder %s17308_s20, %s19892_s2 }
 0xd70   : > { %p17310_p4 = pnand %p17309_p11, %p14644_p2 }
 0xd72   : > { %p17311_p6 = pneg %p17310_p4 }
 0xd74   : > { %p17316_p9 = pnand %p17314_p13, %p17311_p6 }
 0xd76   : > { %17319 = shalt.err (!%p17316_p9)
}
 0xd77   : > { %14595 = dma.vmem_to_hbm [thread:$0]  (%p14644_p2), %s12296_s15, 1024, %s19892_s2, [#allocation6]  }
 0xd78   : > { %s17320_s10 = scalar_lea.vmem %s12307_s1, 128  ;;  %p17327_p5 = scmp.lt.s32.totalorder %s12307_s1, %s12307_s1 }
 0xd79   : > { %p17321_p12 = scmp.ne.s32.totalorder %s12307_s1, %s17320_s10  ;;  %p17328_p3 = scmp.lt.s32.totalorder %s17320_s10, %s17320_s10 }
 0xd7b   : > { %p17322_p7 = pnand %p17321_p12, %p14644_p2  ;;  %p17329_p10 = por %p17328_p3, %p17327_p5 }
 0xd7d   : > { %p17323_p1 = pneg %p17322_p7 }
 0xd7f   : > { %p17330_p0 = pnand %p17329_p10, %p17323_p1 }
 0xd81   : > { %17333 = shalt.err (!%p17330_p0)
}
 0xd82   : > { %s19893_s28 = sld [smem:[#allocation60_spill]] }
 0xd88   : > { %s19894_s17 = smov %s19893_s28  ;;  %s17334_s14 = scalar_lea.hbm %s19893_s28, 128 }
 0xd89   : > { %p17335_p8 = scmp.ne.s32.totalorder %s19894_s17, %s17334_s14  ;;  %p17340_p6 = scmp.lt.u32.totalorder %s17334_s14, %s19894_s17 }
 0xd8b   : > { %p17336_p11 = pnand %p17335_p8, %p14644_p2 }
 0xd8d   : > { %p17337_p4 = pneg %p17336_p11 }
 0xd8f   : > { %p17342_p13 = pnand %p17340_p6, %p17337_p4 }
 0xd91   : > { %17345 = shalt.err (!%p17342_p13)
}
 0xd92   : > { %14597 = dma.vmem_to_hbm [thread:$0]  (%p14644_p2), %s12307_s1, 128, %s19894_s17, [#allocation24]  }
 0xd93   : > { %17423 = dma.done.wait (%p14644_p2), [#allocation6], 1024  }
 0xd94   : > { %17425 = vsyncadd (%p14644_p2), [#allocation6], 4294966272 }
 0xd95   : > { %17427 = dma.done.wait (%p14644_p2), [#allocation24], 128  }
 0xd96   : > { %17429 = vsyncadd (%p14644_p2), [#allocation24], 4294967168 }
 0xd97 PF: > { %s19895_s15 = sld [smem:[#allocation40_spill]]  ;;  %s19896_s21 = sld [smem:[#allocation33_spill]] }
 0xd98   : > { %s19897_s20 = sld [smem:[#allocation48_spill]]  ;;  %s19899_s11 = sld [smem:[#allocation46_spill]] }
 0xd99   : > { %s19898_s24 = sld [smem:[#allocation34_spill]]  ;;  %s19900_s27 = sld [smem:[#allocation35_spill]] }
 0xd9a   : > { %s19901_s1 = sld [smem:[#allocation44_spill]]  ;;  %s19902_s30 = sld [smem:[#allocation36_spill]] }
 0xd9b   : > { %s19903_s13 = sld [smem:[#allocation37_spill]]  ;;  %s19904_s14 = sld [smem:[#allocation42_spill]] }
 0xd9c   : > { %s19906_s22 = smov %s17440_s23  ;;  %s19908_s25 = smov %s17452_s26 }
 0xd9d   : > { %p36_p9 = scmp.ge.s32.totalorder %s19895_s15, 15   ;;  %s19910_s28 = smov %s17464_s29 }
 0xd9e   : > { %s19907_s23 = smov %s19897_s20  ;;  %s19909_s26 = smov %s19899_s11 }
 0xd9f   :  { %38 = sbr.rel (!%p36_p9) target bundleno = 31 (0x1f), region = 229 }
 0xda0   : > { %s19911_s29 = smov %s19901_s1 }
 0xda6   :  { %12323 = vsyncpa [#allocation5], 1 }
 0xda7   :  { %12325 = vsyncpa [#allocation5 + $0x1], 1 }
 0xda8   :  { %12326 = vsyncpa [#allocation8], 1 }
 0xda9   :  { %12328 = vsyncpa [#allocation8 + $0x1], 1 }
 0xdaa   :  { %12329 = vsyncpa [#allocation11], 1 }
 0xdab   :  { %12331 = vsyncpa [#allocation11 + $0x1], 1 }
 0xdac   :  { %12332 = vsyncpa [#allocation14], 1 }
 0xdad   :  { %12334 = vsyncpa [#allocation14 + $0x1], 1 }
 0xdae   :  { %12335 = vsyncpa [#allocation17], 1 }
 0xdaf   :  { %12337 = vsyncpa [#allocation17 + $0x1], 1 }
 0xdb0   :  { %12338 = vsyncpa [#allocation20], 1 }
 0xdb1   :  { %12339 = vsyncpa [#allocation6], 1 }
 0xdb2   :  { %12341 = vsyncpa [#allocation6 + $0x1], 1 }
 0xdb3   :  { %12342 = vsyncpa [#allocation24], 1 }

</bundles_post_ra>
